<compile_context>
chip_gen: v6e
topology: v6e:2x2x1
jax: 0.10.0
libtpu: 0.0.40
codegen_flags: <defaults>
</compile_context>

<pallas_src>
import jax
import jax.numpy as jnp
from jax import lax
from jax.experimental import pallas as pl
from jax.experimental.pallas import tpu as pltpu


# ------------------------------ in-kernel helpers ----------------------------

def _conv_taps(pad_ref, w_ref, H, W, K, acc0=None):
    """Sum of K*K shifted-slice matmuls from a zero-padded VMEM scratch.

    pad_ref : (H+K-1, W+K-1, Cin) f32 scratch (zero border, interior filled).
    w_ref   : (K*K, Cin, Cout) bf16 weights.
    acc0    : optional f32 value broadcastable to (H*W, Cout) seeding the
              accumulator (bias and/or residual) -- avoids zero-fill + re-add.
    """
    HW = H * W
    Cin = pad_ref.shape[-1]
    acc = acc0
    for t in range(K * K):                       # static unroll over taps
        kh, kw = divmod(t, K)
        patch = (pad_ref[kh:kh + H, kw:kw + W, :]
                 .reshape(HW, Cin).astype(jnp.bfloat16))
        d = jnp.dot(patch, w_ref[t], preferred_element_type=jnp.float32)
        acc = d if acc is None else acc + d
    return acc


# --------------------------------- kernels -----------------------------------

def _make_input_kernel(H, W, K, P, Cin, Cmid):
    HW = H * W

    def kernel(x_ref, s_ref, b_ref, wpos_ref, wneg_ref, bin_ref,
               wsk_ref, bsk_ref, y_ref, xs_ref, pad_pos, pad_neg):
        x = x_ref[...].reshape(HW, Cin)
        a = x * s_ref[...] + b_ref[...]          # folded BN (+ optional *2)
        # relu(concat([a, -a], C)) handled by splitting the conv weights into
        # a "pos" half and a "neg" half -> no lane-axis concatenation needed.
        pad_pos[...] = jnp.zeros_like(pad_pos)
        pad_neg[...] = jnp.zeros_like(pad_neg)
        pad_pos[P:P + H, P:P + W, :] = jnp.maximum(a, 0.0).reshape(H, W, Cin)
        pad_neg[P:P + H, P:P + W, :] = jnp.maximum(-a, 0.0).reshape(H, W, Cin)

        y = _conv_taps(pad_pos, wpos_ref, H, W, K, acc0=bin_ref[...])
        y = _conv_taps(pad_neg, wneg_ref, H, W, K, acc0=y)
        y_ref[...] = y.reshape(1, H, W, Cmid).astype(y_ref.dtype)

        # fused 1x1 in_skip conv on y
        xs = jnp.dot(y.astype(jnp.bfloat16), wsk_ref[...],
                     preferred_element_type=jnp.float32) + bsk_ref[...]
        xs_ref[...] = xs.reshape(1, H, W, Cmid).astype(xs_ref.dtype)

    return kernel


def _make_block_kernel(H, W, C):
    HW, K, P = H * W, 3, 1

    def kernel(y_ref, xs_ref, s1_ref, b1_ref, w1_ref, s2_ref, b2_ref, w2_ref,
               bias2_ref, wsk_ref, bsk_ref, yo_ref, xso_ref, pad_ref):
        y = y_ref[...].reshape(HW, C)

        pad_ref[...] = jnp.zeros_like(pad_ref)   # border stays zero for both convs
        a1 = jnp.maximum(y * s1_ref[...] + b1_ref[...], 0.0)
        pad_ref[P:P + H, P:P + W, :] = a1.reshape(H, W, C)
        t = _conv_taps(pad_ref, w1_ref, H, W, K)            # 3x3, no bias

        a2 = jnp.maximum(t * s2_ref[...] + b2_ref[...], 0.0)
        pad_ref[P:P + H, P:P + W, :] = a2.reshape(H, W, C)
        y_new = _conv_taps(pad_ref, w2_ref, H, W, K,
                           acc0=y + bias2_ref[...])          # bias + residual
        yo_ref[...] = y_new.reshape(1, H, W, C).astype(yo_ref.dtype)

        # fused 1x1 skip conv, accumulated into x_skip
        xs = xs_ref[...].reshape(HW, C) + bsk_ref[...] + jnp.dot(
            y_new.astype(jnp.bfloat16), wsk_ref[...],
            preferred_element_type=jnp.float32)
        xso_ref[...] = xs.reshape(1, H, W, C).astype(xso_ref.dtype)

    return kernel


def _make_out_kernel(H, W, Cmid, Cout):
    HW = H * W

    def kernel(xs_ref, s_ref, b_ref, w_ref, bias_ref, o_ref):
        a = jnp.maximum(xs_ref[...].reshape(HW, Cmid) * s_ref[...] + b_ref[...],
                        0.0)
        out = jnp.dot(a.astype(jnp.bfloat16), w_ref[...],
                      preferred_element_type=jnp.float32) + bias_ref[...]
        o_ref[...] = out.reshape(1, H, W, Cout).astype(o_ref.dtype)

    return kernel


# ------------------------------ pallas wrappers -------------------------------

def _cparams():
    return pltpu.CompilerParams(dimension_semantics=("parallel",),
                                vmem_limit_bytes=32 * 1024 * 1024)


def _act_spec(H, W, C):
    return pl.BlockSpec((1, H, W, C), lambda n: (n, 0, 0, 0))


def _rep_spec(shape):
    zeros = (0,) * len(shape)
    return pl.BlockSpec(tuple(shape), lambda n: zeros)


def input_stage(x, scale, shift, w_pos, w_neg, b_in, w_sk, b_sk, K, P):
    N, H, W, Cin = x.shape
    Cmid = w_pos.shape[-1]
    Hp, Wp = H + 2 * P, W + 2 * P
    sds = jax.ShapeDtypeStruct((N, H, W, Cmid), jnp.float32)
    return pl.pallas_call(
        _make_input_kernel(H, W, K, P, Cin, Cmid),
        grid=(N,),
        in_specs=[_act_spec(H, W, Cin),
                  _rep_spec(scale.shape), _rep_spec(shift.shape),
                  _rep_spec(w_pos.shape), _rep_spec(w_neg.shape),
                  _rep_spec(b_in.shape),
                  _rep_spec(w_sk.shape), _rep_spec(b_sk.shape)],
        out_specs=[_act_spec(H, W, Cmid), _act_spec(H, W, Cmid)],
        out_shape=[sds, sds],
        scratch_shapes=[pltpu.VMEM((Hp, Wp, Cin), jnp.float32),
                        pltpu.VMEM((Hp, Wp, Cin), jnp.float32)],
        compiler_params=_cparams(),
    )(x, scale, shift, w_pos, w_neg, b_in, w_sk, b_sk)


def residual_block(y, x_skip, s1, b1, w1, s2, b2, w2, bias2, w_sk, b_sk):
    N, H, W, C = y.shape
    Hp, Wp = H + 2, W + 2
    act = _act_spec(H, W, C)
    return pl.pallas_call(
        _make_block_kernel(H, W, C),
        grid=(N,),
        in_specs=[act, act,
                  _rep_spec(s1.shape), _rep_spec(b1.shape), _rep_spec(w1.shape),
                  _rep_spec(s2.shape), _rep_spec(b2.shape), _rep_spec(w2.shape),
                  _rep_spec(bias2.shape),
                  _rep_spec(w_sk.shape), _rep_spec(b_sk.shape)],
        out_specs=[act, act],
        out_shape=[jax.ShapeDtypeStruct(y.shape, jnp.float32),
                   jax.ShapeDtypeStruct(x_skip.shape, jnp.float32)],
        scratch_shapes=[pltpu.VMEM((Hp, Wp, C), jnp.float32)],
        input_output_aliases={0: 0, 1: 1},     # update y / x_skip in place
        compiler_params=_cparams(),
    )(y, x_skip, s1, b1, w1, s2, b2, w2, bias2, w_sk, b_sk)


def output_stage(x_skip, scale, shift, w, bias):
    N, H, W, C = x_skip.shape
    Cout = w.shape[-1]
    return pl.pallas_call(
        _make_out_kernel(H, W, C, Cout),
        grid=(N,),
        in_specs=[_act_spec(H, W, C),
                  _rep_spec(scale.shape), _rep_spec(shift.shape),
                  _rep_spec(w.shape), _rep_spec(bias.shape)],
        out_specs=_act_spec(H, W, Cout),
        out_shape=jax.ShapeDtypeStruct((N, H, W, Cout), jnp.float32),
        compiler_params=_cparams(),
    )(x_skip, scale, shift, w, bias)


# --------------------------------- params ------------------------------------

def _init_bn(key, c):
    k1, k2, k3, k4 = jax.random.split(key, 4)
    gamma = 1.0 + 0.1 * jax.random.normal(k1, (c,))
    beta = 0.1 * jax.random.normal(k2, (c,))
    mean = 0.1 * jax.random.normal(k3, (c,))
    var = 1.0 + 0.1 * jnp.abs(jax.random.normal(k4, (c,)))
    scale = gamma / jnp.sqrt(var + 1e-5)
    shift = beta - mean * scale
    return (scale.reshape(1, c).astype(jnp.float32),
            shift.reshape(1, c).astype(jnp.float32))


def _init_wnconv(key, cin, cout, k, use_bias):
    kv, kg, kb = jax.random.split(key, 3)
    v = 0.1 * jax.random.normal(kv, (cout, cin, k, k))
    g = 1.0 + 0.1 * jax.random.normal(kg, (cout,))
    # weight norm: w = g * v / ||v||   (norm over in-channels + spatial taps)
    norm = jnp.sqrt(jnp.sum(v * v, axis=(1, 2, 3)) + 1e-12)
    w = v * (g / norm)[:, None, None, None]                    # OIHW
    w_t = jnp.transpose(w, (2, 3, 1, 0)).reshape(k * k, cin, cout)
    b = (0.1 * jax.random.normal(kb, (cout,))).reshape(1, cout) if use_bias else None
    return (w_t.astype(jnp.bfloat16),
            b.astype(jnp.float32) if use_bias else None)


def init_params(key, cfg):
    cin, mid, cout = cfg['in_channels'], cfg['mid_channels'], cfg['out_channels']
    K = cfg['kernel_size']
    keys = jax.random.split(key, 6 + 2 * cfg['num_blocks'])
    params = {
        'in_norm': _init_bn(keys[0], cin),
        'in_conv': _init_wnconv(keys[1], 2 * cin, mid, K, True),
        'in_skip': _init_wnconv(keys[2], mid, mid, 1, True),
        'out_norm': _init_bn(keys[3], mid),
        'out_conv': _init_wnconv(keys[4], mid, cout, 1, True),
        'blocks': [],
        'skips': [],
    }
    for i in range(cfg['num_blocks']):
        kb, ks = keys[5 + 2 * i], keys[6 + 2 * i]
        k1, k2, k3, k4 = jax.random.split(kb, 4)
        params['blocks'].append({
            'in_norm': _init_bn(k1, mid),
            'in_conv': _init_wnconv(k2, mid, mid, 3, False),
            'out_norm': _init_bn(k3, mid),
            'out_conv': _init_wnconv(k4, mid, mid, 3, True),
        })
        params['skips'].append(_init_wnconv(ks, mid, mid, 1, True))
    return params


# --------------------------------- forward -----------------------------------

def resnet_forward(x_nchw, params, cfg):
    N, Cin, H, W = x_nchw.shape
    x = jnp.transpose(x_nchw, (0, 2, 3, 1))          # NHWC
    K, P = cfg['kernel_size'], cfg['padding']

    s, b = params['in_norm']
    if cfg['double_after_norm']:
        s, b = 2.0 * s, 2.0 * b                      # fold `x *= 2` into affine
    w_in, b_in = params['in_conv']                   # (K*K, 2Cin, mid) bf16
    w_pos, w_neg = w_in[:, :Cin, :], w_in[:, Cin:, :]
    w_isk, b_isk = params['in_skip']
    y, x_skip = input_stage(x, s, b, w_pos, w_neg, b_in, w_isk[0], b_isk, K, P)

    for blk, skp in zip(params['blocks'], params['skips']):
        s1, b1 = blk['in_norm']
        s2, b2 = blk['out_norm']
        w1 = blk['in_conv'][0]
        w2, bias2 = blk['out_conv']
        wsk, bsk = skp
        y, x_skip = residual_block(y, x_skip, s1, b1, w1, s2, b2, w2, bias2,
                                   wsk[0], bsk)

    so, bo = params['out_norm']
    w_out, b_out = params['out_conv']
    out = output_stage(x_skip, so, bo, w_out[0], b_out)
    return jnp.transpose(out, (0, 3, 1, 2))          # back to NCHW


# ------------------------------ pure-JAX reference ----------------------------
# The reference mirrors the kernel's precision policy (bf16 conv operands,
# f32 accumulation) so the check isolates kernel correctness.

def _ref_conv(x, w_t, bias, k, p):
    kk, cin, cout = w_t.shape
    w = jnp.transpose(w_t.reshape(k, k, cin, cout), (3, 2, 0, 1))   # OIHW
    y = lax.conv_general_dilated(
        x.astype(jnp.bfloat16), w.astype(jnp.bfloat16),
        window_strides=(1, 1), padding=[(p, p), (p, p)],
        dimension_numbers=('NCHW', 'OIHW', 'NCHW'),
        preferred_element_type=jnp.float32)
    if bias is not None:
        y = y + bias.reshape(1, -1, 1, 1)
    return y


def ref_forward(x, params, cfg):
    def aff(t, sb):
        s, b = sb
        return t * s.reshape(1, -1, 1, 1) + b.reshape(1, -1, 1, 1)

    y = aff(x, params['in_norm'])
    if cfg['double_after_norm']:
        y = y * 2.0
    y = jax.nn.relu(jnp.concatenate([y, -y], axis=1))
    y = _ref_conv(y, *params['in_conv'], k=cfg['kernel_size'], p=cfg['padding'])
    x_skip = _ref_conv(y, *params['in_skip'], k=1, p=0)
    for blk, skp in zip(params['blocks'], params['skips']):
        a = jax.nn.relu(aff(y, blk['in_norm']))
        t = _ref_conv(a, blk['in_conv'][0], None, k=3, p=1)
        a2 = jax.nn.relu(aff(t, blk['out_norm']))
        y = _ref_conv(a2, blk['out_conv'][0], blk['out_conv'][1], k=3, p=1) + y
        x_skip = x_skip + _ref_conv(y, skp[0], skp[1], k=1, p=0)
    a = jax.nn.relu(aff(x_skip, params['out_norm']))
    return _ref_conv(a, *params['out_conv'], k=1, p=0)


# ----------------------------------- main -------------------------------------

if __name__ == "__main__":
    CFG = dict(in_channels=4, mid_channels=32, out_channels=8,
               num_blocks=2, kernel_size=3, padding=1, double_after_norm=True)
    key = jax.random.PRNGKey(0)
    kx, kp = jax.random.split(key)
    x = jax.random.normal(kx, (2, CFG['in_channels'], 16, 16), jnp.float32)
    params = init_params(kp, CFG)

    fwd = jax.jit(lambda xx: resnet_forward(xx, params, CFG))
    out = jax.block_until_ready(fwd(x))
    assert out.shape == (2, CFG['out_channels'], 16, 16), out.shape

    ref = ref_forward(x, params, CFG)
    err = float(jnp.max(jnp.abs(out - ref)))
    assert err < 2e-2, f"mismatch vs reference: max abs err = {err}"

    print("KERNEL_OK")
</pallas_src>

<mosaic_0001>
module attributes {stable_mosaic.version = 11 : i64} {
  func.func @kernel(%arg0: i32, %arg1: memref<1x16x16x32xf32, #tpu.memory_space<vmem>>, %arg2: memref<1x32xf32, #tpu.memory_space<vmem>>, %arg3: memref<1x32xf32, #tpu.memory_space<vmem>>, %arg4: memref<32x8xbf16, #tpu.memory_space<vmem>>, %arg5: memref<1x8xf32, #tpu.memory_space<vmem>>, %arg6: memref<1x16x16x8xf32, #tpu.memory_space<vmem>>) attributes {dimension_semantics = [#tpu.dimension_semantics<parallel>], iteration_bounds = array<i64: 2>, scalar_prefetch = 0 : i64, scratch_operands = 0 : i64, tpu.core_type = #tpu.core_type<tc>, window_params = [{transform_indices = @transform_0, window_bounds = array<i64: 1, 16, 16, 32>}, {pipeline_mode = #tpu.pipeline_mode<synchronous>, transform_indices = @transform_1, window_bounds = array<i64: 1, 32>}, {pipeline_mode = #tpu.pipeline_mode<synchronous>, transform_indices = @transform_2, window_bounds = array<i64: 1, 32>}, {pipeline_mode = #tpu.pipeline_mode<synchronous>, transform_indices = @transform_3, window_bounds = array<i64: 32, 8>}, {pipeline_mode = #tpu.pipeline_mode<synchronous>, transform_indices = @transform_4, window_bounds = array<i64: 1, 8>}, {transform_indices = @transform_5, window_bounds = array<i64: 1, 16, 16, 8>}]} {
    %c0 = arith.constant 0 : index
    %c0_0 = arith.constant 0 : index
    %c0_1 = arith.constant 0 : index
    %c0_2 = arith.constant 0 : index
    %0 = vector.load %arg1[%c0, %c0_0, %c0_1, %c0_2] : memref<1x16x16x32xf32, #tpu.memory_space<vmem>>, vector<1x16x16x32xf32>
    %1 = vector.shape_cast %0 : vector<1x16x16x32xf32> to vector<256x32xf32>
    %c0_3 = arith.constant 0 : index
    %c0_4 = arith.constant 0 : index
    %2 = vector.load %arg2[%c0_3, %c0_4] : memref<1x32xf32, #tpu.memory_space<vmem>>, vector<1x32xf32>
    %3 = vector.broadcast %2 : vector<1x32xf32> to vector<256x32xf32>
    %4 = arith.mulf %1, %3 : vector<256x32xf32>
    %c0_5 = arith.constant 0 : index
    %c0_6 = arith.constant 0 : index
    %5 = vector.load %arg3[%c0_5, %c0_6] : memref<1x32xf32, #tpu.memory_space<vmem>>, vector<1x32xf32>
    %6 = vector.broadcast %5 : vector<1x32xf32> to vector<256x32xf32>
    %7 = arith.addf %4, %6 : vector<256x32xf32>
    %cst = arith.constant 0.000000e+00 : f32
    %8 = vector.broadcast %cst : f32 to vector<256x32xf32>
    %9 = arith.maximumf %7, %8 : vector<256x32xf32>
    %10 = arith.truncf %9 : vector<256x32xf32> to vector<256x32xbf16>
    %c0_7 = arith.constant 0 : index
    %c0_8 = arith.constant 0 : index
    %11 = vector.load %arg4[%c0_7, %c0_8] : memref<32x8xbf16, #tpu.memory_space<vmem>>, vector<32x8xbf16>
    %cst_9 = arith.constant dense<0.000000e+00> : vector<256x8xf32>
    %12 = tpu.matmul %10, %11, %cst_9 {dimension_numbers = #tpu.dot_dimension_numbers<[1], [0], [0], [1], [0, 0, 1, 1], [], []>} : vector<256x32xbf16>, vector<32x8xbf16>, vector<256x8xf32> -> vector<256x8xf32>
    %c0_10 = arith.constant 0 : index
    %c0_11 = arith.constant 0 : index
    %13 = vector.load %arg5[%c0_10, %c0_11] : memref<1x8xf32, #tpu.memory_space<vmem>>, vector<1x8xf32>
    %14 = vector.broadcast %13 : vector<1x8xf32> to vector<256x8xf32>
    %15 = arith.addf %12, %14 : vector<256x8xf32>
    %16 = vector.shape_cast %15 : vector<256x8xf32> to vector<1x16x16x8xf32>
    %c0_12 = arith.constant 0 : index
    %c0_13 = arith.constant 0 : index
    %c0_14 = arith.constant 0 : index
    %c0_15 = arith.constant 0 : index
    %17 = vector.load %arg6[%c0_12, %c0_13, %c0_14, %c0_15] : memref<1x16x16x8xf32, #tpu.memory_space<vmem>>, vector<1x16x16x8xf32>
    tpu.vector_store %arg6[%c0_12, %c0_13, %c0_14, %c0_15], %16 {strides = array<i32>} : memref<1x16x16x8xf32, #tpu.memory_space<vmem>>, vector<1x16x16x8xf32>,
    return
  }
  func.func @transform_0(%arg0: i32) -> (i32, i32, i32, i32) {
    %c0_i32 = arith.constant 0 : i32
    %c0_i32_0 = arith.constant 0 : i32
    %c0_i32_1 = arith.constant 0 : i32
    %c0_i32_2 = arith.constant 0 : i32
    return %arg0, %c0_i32, %c0_i32_0, %c0_i32_1 : i32, i32, i32, i32
  }
  func.func @transform_1(%arg0: i32) -> (i32, i32) {
    %c0_i32 = arith.constant 0 : i32
    %c0_i32_0 = arith.constant 0 : i32
    %c0_i32_1 = arith.constant 0 : i32
    return %c0_i32, %c0_i32_0 : i32, i32
  }
  func.func @transform_2(%arg0: i32) -> (i32, i32) {
    %c0_i32 = arith.constant 0 : i32
    %c0_i32_0 = arith.constant 0 : i32
    %c0_i32_1 = arith.constant 0 : i32
    return %c0_i32, %c0_i32_0 : i32, i32
  }
  func.func @transform_3(%arg0: i32) -> (i32, i32) {
    %c0_i32 = arith.constant 0 : i32
    %c0_i32_0 = arith.constant 0 : i32
    %c0_i32_1 = arith.constant 0 : i32
    return %c0_i32, %c0_i32_0 : i32, i32
  }
  func.func @transform_4(%arg0: i32) -> (i32, i32) {
    %c0_i32 = arith.constant 0 : i32
    %c0_i32_0 = arith.constant 0 : i32
    %c0_i32_1 = arith.constant 0 : i32
    return %c0_i32, %c0_i32_0 : i32, i32
  }
  func.func @transform_5(%arg0: i32) -> (i32, i32, i32, i32) {
    %c0_i32 = arith.constant 0 : i32
    %c0_i32_0 = arith.constant 0 : i32
    %c0_i32_1 = arith.constant 0 : i32
    %c0_i32_2 = arith.constant 0 : i32
    return %arg0, %c0_i32, %c0_i32_0, %c0_i32_1 : i32, i32, i32, i32
  }
}

module attributes {stable_mosaic.version = 11 : i64} {
  func.func @kernel(%arg0: i32, %arg1: memref<1x16x16x4xf32, #tpu.memory_space<vmem>>, %arg2: memref<1x4xf32, #tpu.memory_space<vmem>>, %arg3: memref<1x4xf32, #tpu.memory_space<vmem>>, %arg4: memref<9x4x32xbf16, #tpu.memory_space<vmem>>, %arg5: memref<9x4x32xbf16, #tpu.memory_space<vmem>>, %arg6: memref<1x32xf32, #tpu.memory_space<vmem>>, %arg7: memref<32x32xbf16, #tpu.memory_space<vmem>>, %arg8: memref<1x32xf32, #tpu.memory_space<vmem>>, %arg9: memref<1x16x16x32xf32, #tpu.memory_space<vmem>>, %arg10: memref<1x16x16x32xf32, #tpu.memory_space<vmem>>, %arg11: memref<18x18x4xf32, #tpu.memory_space<vmem>>, %arg12: memref<18x18x4xf32, #tpu.memory_space<vmem>>) attributes {dimension_semantics = [#tpu.dimension_semantics<parallel>], iteration_bounds = array<i64: 2>, scalar_prefetch = 0 : i64, scratch_operands = 2 : i64, tpu.core_type = #tpu.core_type<tc>, window_params = [{transform_indices = @transform_0, window_bounds = array<i64: 1, 16, 16, 4>}, {pipeline_mode = #tpu.pipeline_mode<synchronous>, transform_indices = @transform_1, window_bounds = array<i64: 1, 4>}, {pipeline_mode = #tpu.pipeline_mode<synchronous>, transform_indices = @transform_2, window_bounds = array<i64: 1, 4>}, {pipeline_mode = #tpu.pipeline_mode<synchronous>, transform_indices = @transform_3, window_bounds = array<i64: 9, 4, 32>}, {pipeline_mode = #tpu.pipeline_mode<synchronous>, transform_indices = @transform_4, window_bounds = array<i64: 9, 4, 32>}, {pipeline_mode = #tpu.pipeline_mode<synchronous>, transform_indices = @transform_5, window_bounds = array<i64: 1, 32>}, {pipeline_mode = #tpu.pipeline_mode<synchronous>, transform_indices = @transform_6, window_bounds = array<i64: 32, 32>}, {pipeline_mode = #tpu.pipeline_mode<synchronous>, transform_indices = @transform_7, window_bounds = array<i64: 1, 32>}, {transform_indices = @transform_8, window_bounds = array<i64: 1, 16, 16, 32>}, {transform_indices = @transform_9, window_bounds = array<i64: 1, 16, 16, 32>}]} {
    %c0 = arith.constant 0 : index
    %c0_0 = arith.constant 0 : index
    %c0_1 = arith.constant 0 : index
    %c0_2 = arith.constant 0 : index
    %0 = vector.load %arg1[%c0, %c0_0, %c0_1, %c0_2] : memref<1x16x16x4xf32, #tpu.memory_space<vmem>>, vector<1x16x16x4xf32>
    %1 = vector.shape_cast %0 : vector<1x16x16x4xf32> to vector<256x4xf32>
    %c0_3 = arith.constant 0 : index
    %c0_4 = arith.constant 0 : index
    %2 = vector.load %arg2[%c0_3, %c0_4] : memref<1x4xf32, #tpu.memory_space<vmem>>, vector<1x4xf32>
    %3 = vector.broadcast %2 : vector<1x4xf32> to vector<256x4xf32>
    %4 = arith.mulf %1, %3 : vector<256x4xf32>
    %c0_5 = arith.constant 0 : index
    %c0_6 = arith.constant 0 : index
    %5 = vector.load %arg3[%c0_5, %c0_6] : memref<1x4xf32, #tpu.memory_space<vmem>>, vector<1x4xf32>
    %6 = vector.broadcast %5 : vector<1x4xf32> to vector<256x4xf32>
    %7 = arith.addf %4, %6 : vector<256x4xf32>
    %cst = arith.constant 0.000000e+00 : f32
    %8 = vector.broadcast %cst : f32 to vector<18x18x4xf32>
    %c0_7 = arith.constant 0 : index
    %c0_8 = arith.constant 0 : index
    %c0_9 = arith.constant 0 : index
    %9 = vector.load %arg11[%c0_7, %c0_8, %c0_9] : memref<18x18x4xf32, #tpu.memory_space<vmem>>, vector<18x18x4xf32>
    tpu.vector_store %arg11[%c0_7, %c0_8, %c0_9], %8 {strides = array<i32>} : memref<18x18x4xf32, #tpu.memory_space<vmem>>, vector<18x18x4xf32>,
    %cst_10 = arith.constant 0.000000e+00 : f32
    %10 = vector.broadcast %cst_10 : f32 to vector<18x18x4xf32>
    %c0_11 = arith.constant 0 : index
    %c0_12 = arith.constant 0 : index
    %c0_13 = arith.constant 0 : index
    %11 = vector.load %arg12[%c0_11, %c0_12, %c0_13] : memref<18x18x4xf32, #tpu.memory_space<vmem>>, vector<18x18x4xf32>
    tpu.vector_store %arg12[%c0_11, %c0_12, %c0_13], %10 {strides = array<i32>} : memref<18x18x4xf32, #tpu.memory_space<vmem>>, vector<18x18x4xf32>,
    %cst_14 = arith.constant 0.000000e+00 : f32
    %12 = vector.broadcast %cst_14 : f32 to vector<256x4xf32>
    %13 = arith.maximumf %7, %12 : vector<256x4xf32>
    %14 = vector.shape_cast %13 : vector<256x4xf32> to vector<16x16x4xf32>
    %c1 = arith.constant 1 : index
    %c1_15 = arith.constant 1 : index
    %c0_16 = arith.constant 0 : index
    %15 = vector.load %arg11[%c1, %c1_15, %c0_16] : memref<18x18x4xf32, #tpu.memory_space<vmem>>, vector<16x16x4xf32>
    tpu.vector_store %arg11[%c1, %c1_15, %c0_16], %14 {strides = array<i32>} : memref<18x18x4xf32, #tpu.memory_space<vmem>>, vector<16x16x4xf32>,
    %cst_17 = arith.constant 0.000000e+00 : f32
    %16 = vector.broadcast %cst_17 : f32 to vector<256x4xf32>
    %17 = arith.subf %16, %7 : vector<256x4xf32>
    %cst_18 = arith.constant 0.000000e+00 : f32
    %18 = vector.broadcast %cst_18 : f32 to vector<256x4xf32>
    %19 = arith.maximumf %17, %18 : vector<256x4xf32>
    %20 = vector.shape_cast %19 : vector<256x4xf32> to vector<16x16x4xf32>
    %c1_19 = arith.constant 1 : index
    %c1_20 = arith.constant 1 : index
    %c0_21 = arith.constant 0 : index
    %21 = vector.load %arg12[%c1_19, %c1_20, %c0_21] : memref<18x18x4xf32, #tpu.memory_space<vmem>>, vector<16x16x4xf32>
    tpu.vector_store %arg12[%c1_19, %c1_20, %c0_21], %20 {strides = array<i32>} : memref<18x18x4xf32, #tpu.memory_space<vmem>>, vector<16x16x4xf32>,
    %c0_22 = arith.constant 0 : index
    %c0_23 = arith.constant 0 : index
    %22 = vector.load %arg6[%c0_22, %c0_23] : memref<1x32xf32, #tpu.memory_space<vmem>>, vector<1x32xf32>
    %c0_24 = arith.constant 0 : index
    %c0_25 = arith.constant 0 : index
    %c0_26 = arith.constant 0 : index
    %23 = vector.load %arg11[%c0_24, %c0_25, %c0_26] : memref<18x18x4xf32, #tpu.memory_space<vmem>>, vector<16x16x4xf32>
    %24 = vector.shape_cast %23 : vector<16x16x4xf32> to vector<256x4xf32>
    %25 = arith.truncf %24 : vector<256x4xf32> to vector<256x4xbf16>
    %c0_27 = arith.constant 0 : index
    %c0_28 = arith.constant 0 : index
    %c0_29 = arith.constant 0 : index
    %26 = vector.load %arg4[%c0_27, %c0_28, %c0_29] : memref<9x4x32xbf16, #tpu.memory_space<vmem>>, vector<1x4x32xbf16>
    %27 = vector.shape_cast %26 : vector<1x4x32xbf16> to vector<4x32xbf16>
    %cst_30 = arith.constant dense<0.000000e+00> : vector<256x32xf32>
    %28 = tpu.matmul %25, %27, %cst_30 {dimension_numbers = #tpu.dot_dimension_numbers<[1], [0], [0], [1], [0, 0, 1, 1], [], []>} : vector<256x4xbf16>, vector<4x32xbf16>, vector<256x32xf32> -> vector<256x32xf32>
    %29 = vector.broadcast %22 : vector<1x32xf32> to vector<256x32xf32>
    %30 = arith.addf %29, %28 : vector<256x32xf32>
    %c0_31 = arith.constant 0 : index
    %c1_32 = arith.constant 1 : index
    %c0_33 = arith.constant 0 : index
    %31 = vector.load %arg11[%c0_31, %c1_32, %c0_33] : memref<18x18x4xf32, #tpu.memory_space<vmem>>, vector<16x16x4xf32>
    %32 = vector.shape_cast %31 : vector<16x16x4xf32> to vector<256x4xf32>
    %33 = arith.truncf %32 : vector<256x4xf32> to vector<256x4xbf16>
    %c1_34 = arith.constant 1 : index
    %c0_35 = arith.constant 0 : index
    %c0_36 = arith.constant 0 : index
    %34 = vector.load %arg4[%c1_34, %c0_35, %c0_36] : memref<9x4x32xbf16, #tpu.memory_space<vmem>>, vector<1x4x32xbf16>
    %35 = vector.shape_cast %34 : vector<1x4x32xbf16> to vector<4x32xbf16>
    %cst_37 = arith.constant dense<0.000000e+00> : vector<256x32xf32>
    %36 = tpu.matmul %33, %35, %cst_37 {dimension_numbers = #tpu.dot_dimension_numbers<[1], [0], [0], [1], [0, 0, 1, 1], [], []>} : vector<256x4xbf16>, vector<4x32xbf16>, vector<256x32xf32> -> vector<256x32xf32>
    %37 = arith.addf %30, %36 : vector<256x32xf32>
    %c0_38 = arith.constant 0 : index
    %c2 = arith.constant 2 : index
    %c0_39 = arith.constant 0 : index
    %38 = vector.load %arg11[%c0_38, %c2, %c0_39] : memref<18x18x4xf32, #tpu.memory_space<vmem>>, vector<16x16x4xf32>
    %39 = vector.shape_cast %38 : vector<16x16x4xf32> to vector<256x4xf32>
    %40 = arith.truncf %39 : vector<256x4xf32> to vector<256x4xbf16>
    %c2_40 = arith.constant 2 : index
    %c0_41 = arith.constant 0 : index
    %c0_42 = arith.constant 0 : index
    %41 = vector.load %arg4[%c2_40, %c0_41, %c0_42] : memref<9x4x32xbf16, #tpu.memory_space<vmem>>, vector<1x4x32xbf16>
    %42 = vector.shape_cast %41 : vector<1x4x32xbf16> to vector<4x32xbf16>
    %cst_43 = arith.constant dense<0.000000e+00> : vector<256x32xf32>
    %43 = tpu.matmul %40, %42, %cst_43 {dimension_numbers = #tpu.dot_dimension_numbers<[1], [0], [0], [1], [0, 0, 1, 1], [], []>} : vector<256x4xbf16>, vector<4x32xbf16>, vector<256x32xf32> -> vector<256x32xf32>
    %44 = arith.addf %37, %43 : vector<256x32xf32>
    %c1_44 = arith.constant 1 : index
    %c0_45 = arith.constant 0 : index
    %c0_46 = arith.constant 0 : index
    %45 = vector.load %arg11[%c1_44, %c0_45, %c0_46] : memref<18x18x4xf32, #tpu.memory_space<vmem>>, vector<16x16x4xf32>
    %46 = vector.shape_cast %45 : vector<16x16x4xf32> to vector<256x4xf32>
    %47 = arith.truncf %46 : vector<256x4xf32> to vector<256x4xbf16>
    %c3 = arith.constant 3 : index
    %c0_47 = arith.constant 0 : index
    %c0_48 = arith.constant 0 : index
    %48 = vector.load %arg4[%c3, %c0_47, %c0_48] : memref<9x4x32xbf16, #tpu.memory_space<vmem>>, vector<1x4x32xbf16>
    %49 = vector.shape_cast %48 : vector<1x4x32xbf16> to vector<4x32xbf16>
    %cst_49 = arith.constant dense<0.000000e+00> : vector<256x32xf32>
    %50 = tpu.matmul %47, %49, %cst_49 {dimension_numbers = #tpu.dot_dimension_numbers<[1], [0], [0], [1], [0, 0, 1, 1], [], []>} : vector<256x4xbf16>, vector<4x32xbf16>, vector<256x32xf32> -> vector<256x32xf32>
    %51 = arith.addf %44, %50 : vector<256x32xf32>
    %c1_50 = arith.constant 1 : index
    %c1_51 = arith.constant 1 : index
    %c0_52 = arith.constant 0 : index
    %52 = vector.load %arg11[%c1_50, %c1_51, %c0_52] : memref<18x18x4xf32, #tpu.memory_space<vmem>>, vector<16x16x4xf32>
    %53 = vector.shape_cast %52 : vector<16x16x4xf32> to vector<256x4xf32>
    %54 = arith.truncf %53 : vector<256x4xf32> to vector<256x4xbf16>
    %c4 = arith.constant 4 : index
    %c0_53 = arith.constant 0 : index
    %c0_54 = arith.constant 0 : index
    %55 = vector.load %arg4[%c4, %c0_53, %c0_54] : memref<9x4x32xbf16, #tpu.memory_space<vmem>>, vector<1x4x32xbf16>
    %56 = vector.shape_cast %55 : vector<1x4x32xbf16> to vector<4x32xbf16>
    %cst_55 = arith.constant dense<0.000000e+00> : vector<256x32xf32>
    %57 = tpu.matmul %54, %56, %cst_55 {dimension_numbers = #tpu.dot_dimension_numbers<[1], [0], [0], [1], [0, 0, 1, 1], [], []>} : vector<256x4xbf16>, vector<4x32xbf16>, vector<256x32xf32> -> vector<256x32xf32>
    %58 = arith.addf %51, %57 : vector<256x32xf32>
    %c1_56 = arith.constant 1 : index
    %c2_57 = arith.constant 2 : index
    %c0_58 = arith.constant 0 : index
    %59 = vector.load %arg11[%c1_56, %c2_57, %c0_58] : memref<18x18x4xf32, #tpu.memory_space<vmem>>, vector<16x16x4xf32>
    %60 = vector.shape_cast %59 : vector<16x16x4xf32> to vector<256x4xf32>
    %61 = arith.truncf %60 : vector<256x4xf32> to vector<256x4xbf16>
    %c5 = arith.constant 5 : index
    %c0_59 = arith.constant 0 : index
    %c0_60 = arith.constant 0 : index
    %62 = vector.load %arg4[%c5, %c0_59, %c0_60] : memref<9x4x32xbf16, #tpu.memory_space<vmem>>, vector<1x4x32xbf16>
    %63 = vector.shape_cast %62 : vector<1x4x32xbf16> to vector<4x32xbf16>
    %cst_61 = arith.constant dense<0.000000e+00> : vector<256x32xf32>
    %64 = tpu.matmul %61, %63, %cst_61 {dimension_numbers = #tpu.dot_dimension_numbers<[1], [0], [0], [1], [0, 0, 1, 1], [], []>} : vector<256x4xbf16>, vector<4x32xbf16>, vector<256x32xf32> -> vector<256x32xf32>
    %65 = arith.addf %58, %64 : vector<256x32xf32>
    %c2_62 = arith.constant 2 : index
    %c0_63 = arith.constant 0 : index
    %c0_64 = arith.constant 0 : index
    %66 = vector.load %arg11[%c2_62, %c0_63, %c0_64] : memref<18x18x4xf32, #tpu.memory_space<vmem>>, vector<16x16x4xf32>
    %67 = vector.shape_cast %66 : vector<16x16x4xf32> to vector<256x4xf32>
    %68 = arith.truncf %67 : vector<256x4xf32> to vector<256x4xbf16>
    %c6 = arith.constant 6 : index
    %c0_65 = arith.constant 0 : index
    %c0_66 = arith.constant 0 : index
    %69 = vector.load %arg4[%c6, %c0_65, %c0_66] : memref<9x4x32xbf16, #tpu.memory_space<vmem>>, vector<1x4x32xbf16>
    %70 = vector.shape_cast %69 : vector<1x4x32xbf16> to vector<4x32xbf16>
    %cst_67 = arith.constant dense<0.000000e+00> : vector<256x32xf32>
    %71 = tpu.matmul %68, %70, %cst_67 {dimension_numbers = #tpu.dot_dimension_numbers<[1], [0], [0], [1], [0, 0, 1, 1], [], []>} : vector<256x4xbf16>, vector<4x32xbf16>, vector<256x32xf32> -> vector<256x32xf32>
    %72 = arith.addf %65, %71 : vector<256x32xf32>
    %c2_68 = arith.constant 2 : index
    %c1_69 = arith.constant 1 : index
    %c0_70 = arith.constant 0 : index
    %73 = vector.load %arg11[%c2_68, %c1_69, %c0_70] : memref<18x18x4xf32, #tpu.memory_space<vmem>>, vector<16x16x4xf32>
    %74 = vector.shape_cast %73 : vector<16x16x4xf32> to vector<256x4xf32>
    %75 = arith.truncf %74 : vector<256x4xf32> to vector<256x4xbf16>
    %c7 = arith.constant 7 : index
    %c0_71 = arith.constant 0 : index
    %c0_72 = arith.constant 0 : index
    %76 = vector.load %arg4[%c7, %c0_71, %c0_72] : memref<9x4x32xbf16, #tpu.memory_space<vmem>>, vector<1x4x32xbf16>
    %77 = vector.shape_cast %76 : vector<1x4x32xbf16> to vector<4x32xbf16>
    %cst_73 = arith.constant dense<0.000000e+00> : vector<256x32xf32>
    %78 = tpu.matmul %75, %77, %cst_73 {dimension_numbers = #tpu.dot_dimension_numbers<[1], [0], [0], [1], [0, 0, 1, 1], [], []>} : vector<256x4xbf16>, vector<4x32xbf16>, vector<256x32xf32> -> vector<256x32xf32>
    %79 = arith.addf %72, %78 : vector<256x32xf32>
    %c2_74 = arith.constant 2 : index
    %c2_75 = arith.constant 2 : index
    %c0_76 = arith.constant 0 : index
    %80 = vector.load %arg11[%c2_74, %c2_75, %c0_76] : memref<18x18x4xf32, #tpu.memory_space<vmem>>, vector<16x16x4xf32>
    %81 = vector.shape_cast %80 : vector<16x16x4xf32> to vector<256x4xf32>
    %82 = arith.truncf %81 : vector<256x4xf32> to vector<256x4xbf16>
    %c8 = arith.constant 8 : index
    %c0_77 = arith.constant 0 : index
    %c0_78 = arith.constant 0 : index
    %83 = vector.load %arg4[%c8, %c0_77, %c0_78] : memref<9x4x32xbf16, #tpu.memory_space<vmem>>, vector<1x4x32xbf16>
    %84 = vector.shape_cast %83 : vector<1x4x32xbf16> to vector<4x32xbf16>
    %cst_79 = arith.constant dense<0.000000e+00> : vector<256x32xf32>
    %85 = tpu.matmul %82, %84, %cst_79 {dimension_numbers = #tpu.dot_dimension_numbers<[1], [0], [0], [1], [0, 0, 1, 1], [], []>} : vector<256x4xbf16>, vector<4x32xbf16>, vector<256x32xf32> -> vector<256x32xf32>
    %86 = arith.addf %79, %85 : vector<256x32xf32>
    %c0_80 = arith.constant 0 : index
    %c0_81 = arith.constant 0 : index
    %c0_82 = arith.constant 0 : index
    %87 = vector.load %arg12[%c0_80, %c0_81, %c0_82] : memref<18x18x4xf32, #tpu.memory_space<vmem>>, vector<16x16x4xf32>
    %88 = vector.shape_cast %87 : vector<16x16x4xf32> to vector<256x4xf32>
    %89 = arith.truncf %88 : vector<256x4xf32> to vector<256x4xbf16>
    %c0_83 = arith.constant 0 : index
    %c0_84 = arith.constant 0 : index
    %c0_85 = arith.constant 0 : index
    %90 = vector.load %arg5[%c0_83, %c0_84, %c0_85] : memref<9x4x32xbf16, #tpu.memory_space<vmem>>, vector<1x4x32xbf16>
    %91 = vector.shape_cast %90 : vector<1x4x32xbf16> to vector<4x32xbf16>
    %cst_86 = arith.constant dense<0.000000e+00> : vector<256x32xf32>
    %92 = tpu.matmul %89, %91, %cst_86 {dimension_numbers = #tpu.dot_dimension_numbers<[1], [0], [0], [1], [0, 0, 1, 1], [], []>} : vector<256x4xbf16>, vector<4x32xbf16>, vector<256x32xf32> -> vector<256x32xf32>
    %93 = arith.addf %86, %92 : vector<256x32xf32>
    %c0_87 = arith.constant 0 : index
    %c1_88 = arith.constant 1 : index
    %c0_89 = arith.constant 0 : index
    %94 = vector.load %arg12[%c0_87, %c1_88, %c0_89] : memref<18x18x4xf32, #tpu.memory_space<vmem>>, vector<16x16x4xf32>
    %95 = vector.shape_cast %94 : vector<16x16x4xf32> to vector<256x4xf32>
    %96 = arith.truncf %95 : vector<256x4xf32> to vector<256x4xbf16>
    %c1_90 = arith.constant 1 : index
    %c0_91 = arith.constant 0 : index
    %c0_92 = arith.constant 0 : index
    %97 = vector.load %arg5[%c1_90, %c0_91, %c0_92] : memref<9x4x32xbf16, #tpu.memory_space<vmem>>, vector<1x4x32xbf16>
    %98 = vector.shape_cast %97 : vector<1x4x32xbf16> to vector<4x32xbf16>
    %cst_93 = arith.constant dense<0.000000e+00> : vector<256x32xf32>
    %99 = tpu.matmul %96, %98, %cst_93 {dimension_numbers = #tpu.dot_dimension_numbers<[1], [0], [0], [1], [0, 0, 1, 1], [], []>} : vector<256x4xbf16>, vector<4x32xbf16>, vector<256x32xf32> -> vector<256x32xf32>
    %100 = arith.addf %93, %99 : vector<256x32xf32>
    %c0_94 = arith.constant 0 : index
    %c2_95 = arith.constant 2 : index
    %c0_96 = arith.constant 0 : index
    %101 = vector.load %arg12[%c0_94, %c2_95, %c0_96] : memref<18x18x4xf32, #tpu.memory_space<vmem>>, vector<16x16x4xf32>
    %102 = vector.shape_cast %101 : vector<16x16x4xf32> to vector<256x4xf32>
    %103 = arith.truncf %102 : vector<256x4xf32> to vector<256x4xbf16>
    %c2_97 = arith.constant 2 : index
    %c0_98 = arith.constant 0 : index
    %c0_99 = arith.constant 0 : index
    %104 = vector.load %arg5[%c2_97, %c0_98, %c0_99] : memref<9x4x32xbf16, #tpu.memory_space<vmem>>, vector<1x4x32xbf16>
    %105 = vector.shape_cast %104 : vector<1x4x32xbf16> to vector<4x32xbf16>
    %cst_100 = arith.constant dense<0.000000e+00> : vector<256x32xf32>
    %106 = tpu.matmul %103, %105, %cst_100 {dimension_numbers = #tpu.dot_dimension_numbers<[1], [0], [0], [1], [0, 0, 1, 1], [], []>} : vector<256x4xbf16>, vector<4x32xbf16>, vector<256x32xf32> -> vector<256x32xf32>
    %107 = arith.addf %100, %106 : vector<256x32xf32>
    %c1_101 = arith.constant 1 : index
    %c0_102 = arith.constant 0 : index
    %c0_103 = arith.constant 0 : index
    %108 = vector.load %arg12[%c1_101, %c0_102, %c0_103] : memref<18x18x4xf32, #tpu.memory_space<vmem>>, vector<16x16x4xf32>
    %109 = vector.shape_cast %108 : vector<16x16x4xf32> to vector<256x4xf32>
    %110 = arith.truncf %109 : vector<256x4xf32> to vector<256x4xbf16>
    %c3_104 = arith.constant 3 : index
    %c0_105 = arith.constant 0 : index
    %c0_106 = arith.constant 0 : index
    %111 = vector.load %arg5[%c3_104, %c0_105, %c0_106] : memref<9x4x32xbf16, #tpu.memory_space<vmem>>, vector<1x4x32xbf16>
    %112 = vector.shape_cast %111 : vector<1x4x32xbf16> to vector<4x32xbf16>
    %cst_107 = arith.constant dense<0.000000e+00> : vector<256x32xf32>
    %113 = tpu.matmul %110, %112, %cst_107 {dimension_numbers = #tpu.dot_dimension_numbers<[1], [0], [0], [1], [0, 0, 1, 1], [], []>} : vector<256x4xbf16>, vector<4x32xbf16>, vector<256x32xf32> -> vector<256x32xf32>
    %114 = arith.addf %107, %113 : vector<256x32xf32>
    %c1_108 = arith.constant 1 : index
    %c1_109 = arith.constant 1 : index
    %c0_110 = arith.constant 0 : index
    %115 = vector.load %arg12[%c1_108, %c1_109, %c0_110] : memref<18x18x4xf32, #tpu.memory_space<vmem>>, vector<16x16x4xf32>
    %116 = vector.shape_cast %115 : vector<16x16x4xf32> to vector<256x4xf32>
    %117 = arith.truncf %116 : vector<256x4xf32> to vector<256x4xbf16>
    %c4_111 = arith.constant 4 : index
    %c0_112 = arith.constant 0 : index
    %c0_113 = arith.constant 0 : index
    %118 = vector.load %arg5[%c4_111, %c0_112, %c0_113] : memref<9x4x32xbf16, #tpu.memory_space<vmem>>, vector<1x4x32xbf16>
    %119 = vector.shape_cast %118 : vector<1x4x32xbf16> to vector<4x32xbf16>
    %cst_114 = arith.constant dense<0.000000e+00> : vector<256x32xf32>
    %120 = tpu.matmul %117, %119, %cst_114 {dimension_numbers = #tpu.dot_dimension_numbers<[1], [0], [0], [1], [0, 0, 1, 1], [], []>} : vector<256x4xbf16>, vector<4x32xbf16>, vector<256x32xf32> -> vector<256x32xf32>
    %121 = arith.addf %114, %120 : vector<256x32xf32>
    %c1_115 = arith.constant 1 : index
    %c2_116 = arith.constant 2 : index
    %c0_117 = arith.constant 0 : index
    %122 = vector.load %arg12[%c1_115, %c2_116, %c0_117] : memref<18x18x4xf32, #tpu.memory_space<vmem>>, vector<16x16x4xf32>
    %123 = vector.shape_cast %122 : vector<16x16x4xf32> to vector<256x4xf32>
    %124 = arith.truncf %123 : vector<256x4xf32> to vector<256x4xbf16>
    %c5_118 = arith.constant 5 : index
    %c0_119 = arith.constant 0 : index
    %c0_120 = arith.constant 0 : index
    %125 = vector.load %arg5[%c5_118, %c0_119, %c0_120] : memref<9x4x32xbf16, #tpu.memory_space<vmem>>, vector<1x4x32xbf16>
    %126 = vector.shape_cast %125 : vector<1x4x32xbf16> to vector<4x32xbf16>
    %cst_121 = arith.constant dense<0.000000e+00> : vector<256x32xf32>
    %127 = tpu.matmul %124, %126, %cst_121 {dimension_numbers = #tpu.dot_dimension_numbers<[1], [0], [0], [1], [0, 0, 1, 1], [], []>} : vector<256x4xbf16>, vector<4x32xbf16>, vector<256x32xf32> -> vector<256x32xf32>
    %128 = arith.addf %121, %127 : vector<256x32xf32>
    %c2_122 = arith.constant 2 : index
    %c0_123 = arith.constant 0 : index
    %c0_124 = arith.constant 0 : index
    %129 = vector.load %arg12[%c2_122, %c0_123, %c0_124] : memref<18x18x4xf32, #tpu.memory_space<vmem>>, vector<16x16x4xf32>
    %130 = vector.shape_cast %129 : vector<16x16x4xf32> to vector<256x4xf32>
    %131 = arith.truncf %130 : vector<256x4xf32> to vector<256x4xbf16>
    %c6_125 = arith.constant 6 : index
    %c0_126 = arith.constant 0 : index
    %c0_127 = arith.constant 0 : index
    %132 = vector.load %arg5[%c6_125, %c0_126, %c0_127] : memref<9x4x32xbf16, #tpu.memory_space<vmem>>, vector<1x4x32xbf16>
    %133 = vector.shape_cast %132 : vector<1x4x32xbf16> to vector<4x32xbf16>
    %cst_128 = arith.constant dense<0.000000e+00> : vector<256x32xf32>
    %134 = tpu.matmul %131, %133, %cst_128 {dimension_numbers = #tpu.dot_dimension_numbers<[1], [0], [0], [1], [0, 0, 1, 1], [], []>} : vector<256x4xbf16>, vector<4x32xbf16>, vector<256x32xf32> -> vector<256x32xf32>
    %135 = arith.addf %128, %134 : vector<256x32xf32>
    %c2_129 = arith.constant 2 : index
    %c1_130 = arith.constant 1 : index
    %c0_131 = arith.constant 0 : index
    %136 = vector.load %arg12[%c2_129, %c1_130, %c0_131] : memref<18x18x4xf32, #tpu.memory_space<vmem>>, vector<16x16x4xf32>
    %137 = vector.shape_cast %136 : vector<16x16x4xf32> to vector<256x4xf32>
    %138 = arith.truncf %137 : vector<256x4xf32> to vector<256x4xbf16>
    %c7_132 = arith.constant 7 : index
    %c0_133 = arith.constant 0 : index
    %c0_134 = arith.constant 0 : index
    %139 = vector.load %arg5[%c7_132, %c0_133, %c0_134] : memref<9x4x32xbf16, #tpu.memory_space<vmem>>, vector<1x4x32xbf16>
    %140 = vector.shape_cast %139 : vector<1x4x32xbf16> to vector<4x32xbf16>
    %cst_135 = arith.constant dense<0.000000e+00> : vector<256x32xf32>
    %141 = tpu.matmul %138, %140, %cst_135 {dimension_numbers = #tpu.dot_dimension_numbers<[1], [0], [0], [1], [0, 0, 1, 1], [], []>} : vector<256x4xbf16>, vector<4x32xbf16>, vector<256x32xf32> -> vector<256x32xf32>
    %142 = arith.addf %135, %141 : vector<256x32xf32>
    %c2_136 = arith.constant 2 : index
    %c2_137 = arith.constant 2 : index
    %c0_138 = arith.constant 0 : index
    %143 = vector.load %arg12[%c2_136, %c2_137, %c0_138] : memref<18x18x4xf32, #tpu.memory_space<vmem>>, vector<16x16x4xf32>
    %144 = vector.shape_cast %143 : vector<16x16x4xf32> to vector<256x4xf32>
    %145 = arith.truncf %144 : vector<256x4xf32> to vector<256x4xbf16>
    %c8_139 = arith.constant 8 : index
    %c0_140 = arith.constant 0 : index
    %c0_141 = arith.constant 0 : index
    %146 = vector.load %arg5[%c8_139, %c0_140, %c0_141] : memref<9x4x32xbf16, #tpu.memory_space<vmem>>, vector<1x4x32xbf16>
    %147 = vector.shape_cast %146 : vector<1x4x32xbf16> to vector<4x32xbf16>
    %cst_142 = arith.constant dense<0.000000e+00> : vector<256x32xf32>
    %148 = tpu.matmul %145, %147, %cst_142 {dimension_numbers = #tpu.dot_dimension_numbers<[1], [0], [0], [1], [0, 0, 1, 1], [], []>} : vector<256x4xbf16>, vector<4x32xbf16>, vector<256x32xf32> -> vector<256x32xf32>
    %149 = arith.addf %142, %148 : vector<256x32xf32>
    %150 = vector.shape_cast %149 : vector<256x32xf32> to vector<1x16x16x32xf32>
    %c0_143 = arith.constant 0 : index
    %c0_144 = arith.constant 0 : index
    %c0_145 = arith.constant 0 : index
    %c0_146 = arith.constant 0 : index
    %151 = vector.load %arg9[%c0_143, %c0_144, %c0_145, %c0_146] : memref<1x16x16x32xf32, #tpu.memory_space<vmem>>, vector<1x16x16x32xf32>
    tpu.vector_store %arg9[%c0_143, %c0_144, %c0_145, %c0_146], %150 {strides = array<i32>} : memref<1x16x16x32xf32, #tpu.memory_space<vmem>>, vector<1x16x16x32xf32>,
    %152 = arith.truncf %149 : vector<256x32xf32> to vector<256x32xbf16>
    %c0_147 = arith.constant 0 : index
    %c0_148 = arith.constant 0 : index
    %153 = vector.load %arg7[%c0_147, %c0_148] : memref<32x32xbf16, #tpu.memory_space<vmem>>, vector<32x32xbf16>
    %cst_149 = arith.constant dense<0.000000e+00> : vector<256x32xf32>
    %154 = tpu.matmul %152, %153, %cst_149 {dimension_numbers = #tpu.dot_dimension_numbers<[1], [0], [0], [1], [0, 0, 1, 1], [], []>} : vector<256x32xbf16>, vector<32x32xbf16>, vector<256x32xf32> -> vector<256x32xf32>
    %c0_150 = arith.constant 0 : index
    %c0_151 = arith.constant 0 : index
    %155 = vector.load %arg8[%c0_150, %c0_151] : memref<1x32xf32, #tpu.memory_space<vmem>>, vector<1x32xf32>
    %156 = vector.broadcast %155 : vector<1x32xf32> to vector<256x32xf32>
    %157 = arith.addf %154, %156 : vector<256x32xf32>
    %158 = vector.shape_cast %157 : vector<256x32xf32> to vector<1x16x16x32xf32>
    %c0_152 = arith.constant 0 : index
    %c0_153 = arith.constant 0 : index
    %c0_154 = arith.constant 0 : index
    %c0_155 = arith.constant 0 : index
    %159 = vector.load %arg10[%c0_152, %c0_153, %c0_154, %c0_155] : memref<1x16x16x32xf32, #tpu.memory_space<vmem>>, vector<1x16x16x32xf32>
    tpu.vector_store %arg10[%c0_152, %c0_153, %c0_154, %c0_155], %158 {strides = array<i32>} : memref<1x16x16x32xf32, #tpu.memory_space<vmem>>, vector<1x16x16x32xf32>,
    return
  }
  func.func @transform_0(%arg0: i32) -> (i32, i32, i32, i32) {
    %c0_i32 = arith.constant 0 : i32
    %c0_i32_0 = arith.constant 0 : i32
    %c0_i32_1 = arith.constant 0 : i32
    %c0_i32_2 = arith.constant 0 : i32
    return %arg0, %c0_i32, %c0_i32_0, %c0_i32_1 : i32, i32, i32, i32
  }
  func.func @transform_1(%arg0: i32) -> (i32, i32) {
    %c0_i32 = arith.constant 0 : i32
    %c0_i32_0 = arith.constant 0 : i32
    %c0_i32_1 = arith.constant 0 : i32
    return %c0_i32, %c0_i32_0 : i32, i32
  }
  func.func @transform_2(%arg0: i32) -> (i32, i32) {
    %c0_i32 = arith.constant 0 : i32
    %c0_i32_0 = arith.constant 0 : i32
    %c0_i32_1 = arith.constant 0 : i32
    return %c0_i32, %c0_i32_0 : i32, i32
  }
  func.func @transform_3(%arg0: i32) -> (i32, i32, i32) {
    %c0_i32 = arith.constant 0 : i32
    %c0_i32_0 = arith.constant 0 : i32
    %c0_i32_1 = arith.constant 0 : i32
    %c0_i32_2 = arith.constant 0 : i32
    return %c0_i32, %c0_i32_0, %c0_i32_1 : i32, i32, i32
  }
  func.func @transform_4(%arg0: i32) -> (i32, i32, i32) {
    %c0_i32 = arith.constant 0 : i32
    %c0_i32_0 = arith.constant 0 : i32
    %c0_i32_1 = arith.constant 0 : i32
    %c0_i32_2 = arith.constant 0 : i32
    return %c0_i32, %c0_i32_0, %c0_i32_1 : i32, i32, i32
  }
  func.func @transform_5(%arg0: i32) -> (i32, i32) {
    %c0_i32 = arith.constant 0 : i32
    %c0_i32_0 = arith.constant 0 : i32
    %c0_i32_1 = arith.constant 0 : i32
    return %c0_i32, %c0_i32_0 : i32, i32
  }
  func.func @transform_6(%arg0: i32) -> (i32, i32) {
    %c0_i32 = arith.constant 0 : i32
    %c0_i32_0 = arith.constant 0 : i32
    %c0_i32_1 = arith.constant 0 : i32
    return %c0_i32, %c0_i32_0 : i32, i32
  }
  func.func @transform_7(%arg0: i32) -> (i32, i32) {
    %c0_i32 = arith.constant 0 : i32
    %c0_i32_0 = arith.constant 0 : i32
    %c0_i32_1 = arith.constant 0 : i32
    return %c0_i32, %c0_i32_0 : i32, i32
  }
  func.func @transform_8(%arg0: i32) -> (i32, i32, i32, i32) {
    %c0_i32 = arith.constant 0 : i32
    %c0_i32_0 = arith.constant 0 : i32
    %c0_i32_1 = arith.constant 0 : i32
    %c0_i32_2 = arith.constant 0 : i32
    return %arg0, %c0_i32, %c0_i32_0, %c0_i32_1 : i32, i32, i32, i32
  }
  func.func @transform_9(%arg0: i32) -> (i32, i32, i32, i32) {
    %c0_i32 = arith.constant 0 : i32
    %c0_i32_0 = arith.constant 0 : i32
    %c0_i32_1 = arith.constant 0 : i32
    %c0_i32_2 = arith.constant 0 : i32
    return %arg0, %c0_i32, %c0_i32_0, %c0_i32_1 : i32, i32, i32, i32
  }
}

module attributes {stable_mosaic.version = 11 : i64} {
  func.func @kernel(%arg0: i32, %arg1: memref<1x16x16x32xf32, #tpu.memory_space<vmem>>, %arg2: memref<1x16x16x32xf32, #tpu.memory_space<vmem>>, %arg3: memref<1x32xf32, #tpu.memory_space<vmem>>, %arg4: memref<1x32xf32, #tpu.memory_space<vmem>>, %arg5: memref<9x32x32xbf16, #tpu.memory_space<vmem>>, %arg6: memref<1x32xf32, #tpu.memory_space<vmem>>, %arg7: memref<1x32xf32, #tpu.memory_space<vmem>>, %arg8: memref<9x32x32xbf16, #tpu.memory_space<vmem>>, %arg9: memref<1x32xf32, #tpu.memory_space<vmem>>, %arg10: memref<32x32xbf16, #tpu.memory_space<vmem>>, %arg11: memref<1x32xf32, #tpu.memory_space<vmem>>, %arg12: memref<1x16x16x32xf32, #tpu.memory_space<vmem>>, %arg13: memref<1x16x16x32xf32, #tpu.memory_space<vmem>>, %arg14: memref<18x18x32xf32, #tpu.memory_space<vmem>>) attributes {dimension_semantics = [#tpu.dimension_semantics<parallel>], iteration_bounds = array<i64: 2>, scalar_prefetch = 0 : i64, scratch_operands = 1 : i64, tpu.core_type = #tpu.core_type<tc>, window_params = [{transform_indices = @transform_0, window_bounds = array<i64: 1, 16, 16, 32>}, {transform_indices = @transform_1, window_bounds = array<i64: 1, 16, 16, 32>}, {pipeline_mode = #tpu.pipeline_mode<synchronous>, transform_indices = @transform_2, window_bounds = array<i64: 1, 32>}, {pipeline_mode = #tpu.pipeline_mode<synchronous>, transform_indices = @transform_3, window_bounds = array<i64: 1, 32>}, {pipeline_mode = #tpu.pipeline_mode<synchronous>, transform_indices = @transform_4, window_bounds = array<i64: 9, 32, 32>}, {pipeline_mode = #tpu.pipeline_mode<synchronous>, transform_indices = @transform_5, window_bounds = array<i64: 1, 32>}, {pipeline_mode = #tpu.pipeline_mode<synchronous>, transform_indices = @transform_6, window_bounds = array<i64: 1, 32>}, {pipeline_mode = #tpu.pipeline_mode<synchronous>, transform_indices = @transform_7, window_bounds = array<i64: 9, 32, 32>}, {pipeline_mode = #tpu.pipeline_mode<synchronous>, transform_indices = @transform_8, window_bounds = array<i64: 1, 32>}, {pipeline_mode = #tpu.pipeline_mode<synchronous>, transform_indices = @transform_9, window_bounds = array<i64: 32, 32>}, {pipeline_mode = #tpu.pipeline_mode<synchronous>, transform_indices = @transform_10, window_bounds = array<i64: 1, 32>}, {transform_indices = @transform_11, window_bounds = array<i64: 1, 16, 16, 32>}, {transform_indices = @transform_12, window_bounds = array<i64: 1, 16, 16, 32>}]} {
    %c0 = arith.constant 0 : index
    %c0_0 = arith.constant 0 : index
    %c0_1 = arith.constant 0 : index
    %c0_2 = arith.constant 0 : index
    %0 = vector.load %arg1[%c0, %c0_0, %c0_1, %c0_2] : memref<1x16x16x32xf32, #tpu.memory_space<vmem>>, vector<1x16x16x32xf32>
    %1 = vector.shape_cast %0 : vector<1x16x16x32xf32> to vector<256x32xf32>
    %cst = arith.constant 0.000000e+00 : f32
    %2 = vector.broadcast %cst : f32 to vector<18x18x32xf32>
    %c0_3 = arith.constant 0 : index
    %c0_4 = arith.constant 0 : index
    %c0_5 = arith.constant 0 : index
    %3 = vector.load %arg14[%c0_3, %c0_4, %c0_5] : memref<18x18x32xf32, #tpu.memory_space<vmem>>, vector<18x18x32xf32>
    tpu.vector_store %arg14[%c0_3, %c0_4, %c0_5], %2 {strides = array<i32>} : memref<18x18x32xf32, #tpu.memory_space<vmem>>, vector<18x18x32xf32>,
    %c0_6 = arith.constant 0 : index
    %c0_7 = arith.constant 0 : index
    %4 = vector.load %arg3[%c0_6, %c0_7] : memref<1x32xf32, #tpu.memory_space<vmem>>, vector<1x32xf32>
    %5 = vector.broadcast %4 : vector<1x32xf32> to vector<256x32xf32>
    %6 = arith.mulf %1, %5 : vector<256x32xf32>
    %c0_8 = arith.constant 0 : index
    %c0_9 = arith.constant 0 : index
    %7 = vector.load %arg4[%c0_8, %c0_9] : memref<1x32xf32, #tpu.memory_space<vmem>>, vector<1x32xf32>
    %8 = vector.broadcast %7 : vector<1x32xf32> to vector<256x32xf32>
    %9 = arith.addf %6, %8 : vector<256x32xf32>
    %cst_10 = arith.constant 0.000000e+00 : f32
    %10 = vector.broadcast %cst_10 : f32 to vector<256x32xf32>
    %11 = arith.maximumf %9, %10 : vector<256x32xf32>
    %12 = vector.shape_cast %11 : vector<256x32xf32> to vector<16x16x32xf32>
    %c1 = arith.constant 1 : index
    %c1_11 = arith.constant 1 : index
    %c0_12 = arith.constant 0 : index
    %13 = vector.load %arg14[%c1, %c1_11, %c0_12] : memref<18x18x32xf32, #tpu.memory_space<vmem>>, vector<16x16x32xf32>
    tpu.vector_store %arg14[%c1, %c1_11, %c0_12], %12 {strides = array<i32>} : memref<18x18x32xf32, #tpu.memory_space<vmem>>, vector<16x16x32xf32>,
    %c0_13 = arith.constant 0 : index
    %c0_14 = arith.constant 0 : index
    %c0_15 = arith.constant 0 : index
    %14 = vector.load %arg14[%c0_13, %c0_14, %c0_15] : memref<18x18x32xf32, #tpu.memory_space<vmem>>, vector<16x16x32xf32>
    %15 = vector.shape_cast %14 : vector<16x16x32xf32> to vector<256x32xf32>
    %16 = arith.truncf %15 : vector<256x32xf32> to vector<256x32xbf16>
    %c0_16 = arith.constant 0 : index
    %c0_17 = arith.constant 0 : index
    %c0_18 = arith.constant 0 : index
    %17 = vector.load %arg5[%c0_16, %c0_17, %c0_18] : memref<9x32x32xbf16, #tpu.memory_space<vmem>>, vector<1x32x32xbf16>
    %18 = vector.shape_cast %17 : vector<1x32x32xbf16> to vector<32x32xbf16>
    %cst_19 = arith.constant dense<0.000000e+00> : vector<256x32xf32>
    %19 = tpu.matmul %16, %18, %cst_19 {dimension_numbers = #tpu.dot_dimension_numbers<[1], [0], [0], [1], [0, 0, 1, 1], [], []>} : vector<256x32xbf16>, vector<32x32xbf16>, vector<256x32xf32> -> vector<256x32xf32>
    %c0_20 = arith.constant 0 : index
    %c1_21 = arith.constant 1 : index
    %c0_22 = arith.constant 0 : index
    %20 = vector.load %arg14[%c0_20, %c1_21, %c0_22] : memref<18x18x32xf32, #tpu.memory_space<vmem>>, vector<16x16x32xf32>
    %21 = vector.shape_cast %20 : vector<16x16x32xf32> to vector<256x32xf32>
    %22 = arith.truncf %21 : vector<256x32xf32> to vector<256x32xbf16>
    %c1_23 = arith.constant 1 : index
    %c0_24 = arith.constant 0 : index
    %c0_25 = arith.constant 0 : index
    %23 = vector.load %arg5[%c1_23, %c0_24, %c0_25] : memref<9x32x32xbf16, #tpu.memory_space<vmem>>, vector<1x32x32xbf16>
    %24 = vector.shape_cast %23 : vector<1x32x32xbf16> to vector<32x32xbf16>
    %cst_26 = arith.constant dense<0.000000e+00> : vector<256x32xf32>
    %25 = tpu.matmul %22, %24, %cst_26 {dimension_numbers = #tpu.dot_dimension_numbers<[1], [0], [0], [1], [0, 0, 1, 1], [], []>} : vector<256x32xbf16>, vector<32x32xbf16>, vector<256x32xf32> -> vector<256x32xf32>
    %26 = arith.addf %19, %25 : vector<256x32xf32>
    %c0_27 = arith.constant 0 : index
    %c2 = arith.constant 2 : index
    %c0_28 = arith.constant 0 : index
    %27 = vector.load %arg14[%c0_27, %c2, %c0_28] : memref<18x18x32xf32, #tpu.memory_space<vmem>>, vector<16x16x32xf32>
    %28 = vector.shape_cast %27 : vector<16x16x32xf32> to vector<256x32xf32>
    %29 = arith.truncf %28 : vector<256x32xf32> to vector<256x32xbf16>
    %c2_29 = arith.constant 2 : index
    %c0_30 = arith.constant 0 : index
    %c0_31 = arith.constant 0 : index
    %30 = vector.load %arg5[%c2_29, %c0_30, %c0_31] : memref<9x32x32xbf16, #tpu.memory_space<vmem>>, vector<1x32x32xbf16>
    %31 = vector.shape_cast %30 : vector<1x32x32xbf16> to vector<32x32xbf16>
    %cst_32 = arith.constant dense<0.000000e+00> : vector<256x32xf32>
    %32 = tpu.matmul %29, %31, %cst_32 {dimension_numbers = #tpu.dot_dimension_numbers<[1], [0], [0], [1], [0, 0, 1, 1], [], []>} : vector<256x32xbf16>, vector<32x32xbf16>, vector<256x32xf32> -> vector<256x32xf32>
    %33 = arith.addf %26, %32 : vector<256x32xf32>
    %c1_33 = arith.constant 1 : index
    %c0_34 = arith.constant 0 : index
    %c0_35 = arith.constant 0 : index
    %34 = vector.load %arg14[%c1_33, %c0_34, %c0_35] : memref<18x18x32xf32, #tpu.memory_space<vmem>>, vector<16x16x32xf32>
    %35 = vector.shape_cast %34 : vector<16x16x32xf32> to vector<256x32xf32>
    %36 = arith.truncf %35 : vector<256x32xf32> to vector<256x32xbf16>
    %c3 = arith.constant 3 : index
    %c0_36 = arith.constant 0 : index
    %c0_37 = arith.constant 0 : index
    %37 = vector.load %arg5[%c3, %c0_36, %c0_37] : memref<9x32x32xbf16, #tpu.memory_space<vmem>>, vector<1x32x32xbf16>
    %38 = vector.shape_cast %37 : vector<1x32x32xbf16> to vector<32x32xbf16>
    %cst_38 = arith.constant dense<0.000000e+00> : vector<256x32xf32>
    %39 = tpu.matmul %36, %38, %cst_38 {dimension_numbers = #tpu.dot_dimension_numbers<[1], [0], [0], [1], [0, 0, 1, 1], [], []>} : vector<256x32xbf16>, vector<32x32xbf16>, vector<256x32xf32> -> vector<256x32xf32>
    %40 = arith.addf %33, %39 : vector<256x32xf32>
    %c1_39 = arith.constant 1 : index
    %c1_40 = arith.constant 1 : index
    %c0_41 = arith.constant 0 : index
    %41 = vector.load %arg14[%c1_39, %c1_40, %c0_41] : memref<18x18x32xf32, #tpu.memory_space<vmem>>, vector<16x16x32xf32>
    %42 = vector.shape_cast %41 : vector<16x16x32xf32> to vector<256x32xf32>
    %43 = arith.truncf %42 : vector<256x32xf32> to vector<256x32xbf16>
    %c4 = arith.constant 4 : index
    %c0_42 = arith.constant 0 : index
    %c0_43 = arith.constant 0 : index
    %44 = vector.load %arg5[%c4, %c0_42, %c0_43] : memref<9x32x32xbf16, #tpu.memory_space<vmem>>, vector<1x32x32xbf16>
    %45 = vector.shape_cast %44 : vector<1x32x32xbf16> to vector<32x32xbf16>
    %cst_44 = arith.constant dense<0.000000e+00> : vector<256x32xf32>
    %46 = tpu.matmul %43, %45, %cst_44 {dimension_numbers = #tpu.dot_dimension_numbers<[1], [0], [0], [1], [0, 0, 1, 1], [], []>} : vector<256x32xbf16>, vector<32x32xbf16>, vector<256x32xf32> -> vector<256x32xf32>
    %47 = arith.addf %40, %46 : vector<256x32xf32>
    %c1_45 = arith.constant 1 : index
    %c2_46 = arith.constant 2 : index
    %c0_47 = arith.constant 0 : index
    %48 = vector.load %arg14[%c1_45, %c2_46, %c0_47] : memref<18x18x32xf32, #tpu.memory_space<vmem>>, vector<16x16x32xf32>
    %49 = vector.shape_cast %48 : vector<16x16x32xf32> to vector<256x32xf32>
    %50 = arith.truncf %49 : vector<256x32xf32> to vector<256x32xbf16>
    %c5 = arith.constant 5 : index
    %c0_48 = arith.constant 0 : index
    %c0_49 = arith.constant 0 : index
    %51 = vector.load %arg5[%c5, %c0_48, %c0_49] : memref<9x32x32xbf16, #tpu.memory_space<vmem>>, vector<1x32x32xbf16>
    %52 = vector.shape_cast %51 : vector<1x32x32xbf16> to vector<32x32xbf16>
    %cst_50 = arith.constant dense<0.000000e+00> : vector<256x32xf32>
    %53 = tpu.matmul %50, %52, %cst_50 {dimension_numbers = #tpu.dot_dimension_numbers<[1], [0], [0], [1], [0, 0, 1, 1], [], []>} : vector<256x32xbf16>, vector<32x32xbf16>, vector<256x32xf32> -> vector<256x32xf32>
    %54 = arith.addf %47, %53 : vector<256x32xf32>
    %c2_51 = arith.constant 2 : index
    %c0_52 = arith.constant 0 : index
    %c0_53 = arith.constant 0 : index
    %55 = vector.load %arg14[%c2_51, %c0_52, %c0_53] : memref<18x18x32xf32, #tpu.memory_space<vmem>>, vector<16x16x32xf32>
    %56 = vector.shape_cast %55 : vector<16x16x32xf32> to vector<256x32xf32>
    %57 = arith.truncf %56 : vector<256x32xf32> to vector<256x32xbf16>
    %c6 = arith.constant 6 : index
    %c0_54 = arith.constant 0 : index
    %c0_55 = arith.constant 0 : index
    %58 = vector.load %arg5[%c6, %c0_54, %c0_55] : memref<9x32x32xbf16, #tpu.memory_space<vmem>>, vector<1x32x32xbf16>
    %59 = vector.shape_cast %58 : vector<1x32x32xbf16> to vector<32x32xbf16>
    %cst_56 = arith.constant dense<0.000000e+00> : vector<256x32xf32>
    %60 = tpu.matmul %57, %59, %cst_56 {dimension_numbers = #tpu.dot_dimension_numbers<[1], [0], [0], [1], [0, 0, 1, 1], [], []>} : vector<256x32xbf16>, vector<32x32xbf16>, vector<256x32xf32> -> vector<256x32xf32>
    %61 = arith.addf %54, %60 : vector<256x32xf32>
    %c2_57 = arith.constant 2 : index
    %c1_58 = arith.constant 1 : index
    %c0_59 = arith.constant 0 : index
    %62 = vector.load %arg14[%c2_57, %c1_58, %c0_59] : memref<18x18x32xf32, #tpu.memory_space<vmem>>, vector<16x16x32xf32>
    %63 = vector.shape_cast %62 : vector<16x16x32xf32> to vector<256x32xf32>
    %64 = arith.truncf %63 : vector<256x32xf32> to vector<256x32xbf16>
    %c7 = arith.constant 7 : index
    %c0_60 = arith.constant 0 : index
    %c0_61 = arith.constant 0 : index
    %65 = vector.load %arg5[%c7, %c0_60, %c0_61] : memref<9x32x32xbf16, #tpu.memory_space<vmem>>, vector<1x32x32xbf16>
    %66 = vector.shape_cast %65 : vector<1x32x32xbf16> to vector<32x32xbf16>
    %cst_62 = arith.constant dense<0.000000e+00> : vector<256x32xf32>
    %67 = tpu.matmul %64, %66, %cst_62 {dimension_numbers = #tpu.dot_dimension_numbers<[1], [0], [0], [1], [0, 0, 1, 1], [], []>} : vector<256x32xbf16>, vector<32x32xbf16>, vector<256x32xf32> -> vector<256x32xf32>
    %68 = arith.addf %61, %67 : vector<256x32xf32>
    %c2_63 = arith.constant 2 : index
    %c2_64 = arith.constant 2 : index
    %c0_65 = arith.constant 0 : index
    %69 = vector.load %arg14[%c2_63, %c2_64, %c0_65] : memref<18x18x32xf32, #tpu.memory_space<vmem>>, vector<16x16x32xf32>
    %70 = vector.shape_cast %69 : vector<16x16x32xf32> to vector<256x32xf32>
    %71 = arith.truncf %70 : vector<256x32xf32> to vector<256x32xbf16>
    %c8 = arith.constant 8 : index
    %c0_66 = arith.constant 0 : index
    %c0_67 = arith.constant 0 : index
    %72 = vector.load %arg5[%c8, %c0_66, %c0_67] : memref<9x32x32xbf16, #tpu.memory_space<vmem>>, vector<1x32x32xbf16>
    %73 = vector.shape_cast %72 : vector<1x32x32xbf16> to vector<32x32xbf16>
    %cst_68 = arith.constant dense<0.000000e+00> : vector<256x32xf32>
    %74 = tpu.matmul %71, %73, %cst_68 {dimension_numbers = #tpu.dot_dimension_numbers<[1], [0], [0], [1], [0, 0, 1, 1], [], []>} : vector<256x32xbf16>, vector<32x32xbf16>, vector<256x32xf32> -> vector<256x32xf32>
    %75 = arith.addf %68, %74 : vector<256x32xf32>
    %c0_69 = arith.constant 0 : index
    %c0_70 = arith.constant 0 : index
    %76 = vector.load %arg6[%c0_69, %c0_70] : memref<1x32xf32, #tpu.memory_space<vmem>>, vector<1x32xf32>
    %77 = vector.broadcast %76 : vector<1x32xf32> to vector<256x32xf32>
    %78 = arith.mulf %75, %77 : vector<256x32xf32>
    %c0_71 = arith.constant 0 : index
    %c0_72 = arith.constant 0 : index
    %79 = vector.load %arg7[%c0_71, %c0_72] : memref<1x32xf32, #tpu.memory_space<vmem>>, vector<1x32xf32>
    %80 = vector.broadcast %79 : vector<1x32xf32> to vector<256x32xf32>
    %81 = arith.addf %78, %80 : vector<256x32xf32>
    %cst_73 = arith.constant 0.000000e+00 : f32
    %82 = vector.broadcast %cst_73 : f32 to vector<256x32xf32>
    %83 = arith.maximumf %81, %82 : vector<256x32xf32>
    %84 = vector.shape_cast %83 : vector<256x32xf32> to vector<16x16x32xf32>
    %c1_74 = arith.constant 1 : index
    %c1_75 = arith.constant 1 : index
    %c0_76 = arith.constant 0 : index
    %85 = vector.load %arg14[%c1_74, %c1_75, %c0_76] : memref<18x18x32xf32, #tpu.memory_space<vmem>>, vector<16x16x32xf32>
    tpu.vector_store %arg14[%c1_74, %c1_75, %c0_76], %84 {strides = array<i32>} : memref<18x18x32xf32, #tpu.memory_space<vmem>>, vector<16x16x32xf32>,
    %c0_77 = arith.constant 0 : index
    %c0_78 = arith.constant 0 : index
    %86 = vector.load %arg9[%c0_77, %c0_78] : memref<1x32xf32, #tpu.memory_space<vmem>>, vector<1x32xf32>
    %87 = vector.broadcast %86 : vector<1x32xf32> to vector<256x32xf32>
    %88 = arith.addf %1, %87 : vector<256x32xf32>
    %c0_79 = arith.constant 0 : index
    %c0_80 = arith.constant 0 : index
    %c0_81 = arith.constant 0 : index
    %89 = vector.load %arg14[%c0_79, %c0_80, %c0_81] : memref<18x18x32xf32, #tpu.memory_space<vmem>>, vector<16x16x32xf32>
    %90 = vector.shape_cast %89 : vector<16x16x32xf32> to vector<256x32xf32>
    %91 = arith.truncf %90 : vector<256x32xf32> to vector<256x32xbf16>
    %c0_82 = arith.constant 0 : index
    %c0_83 = arith.constant 0 : index
    %c0_84 = arith.constant 0 : index
    %92 = vector.load %arg8[%c0_82, %c0_83, %c0_84] : memref<9x32x32xbf16, #tpu.memory_space<vmem>>, vector<1x32x32xbf16>
    %93 = vector.shape_cast %92 : vector<1x32x32xbf16> to vector<32x32xbf16>
    %cst_85 = arith.constant dense<0.000000e+00> : vector<256x32xf32>
    %94 = tpu.matmul %91, %93, %cst_85 {dimension_numbers = #tpu.dot_dimension_numbers<[1], [0], [0], [1], [0, 0, 1, 1], [], []>} : vector<256x32xbf16>, vector<32x32xbf16>, vector<256x32xf32> -> vector<256x32xf32>
    %95 = arith.addf %88, %94 : vector<256x32xf32>
    %c0_86 = arith.constant 0 : index
    %c1_87 = arith.constant 1 : index
    %c0_88 = arith.constant 0 : index
    %96 = vector.load %arg14[%c0_86, %c1_87, %c0_88] : memref<18x18x32xf32, #tpu.memory_space<vmem>>, vector<16x16x32xf32>
    %97 = vector.shape_cast %96 : vector<16x16x32xf32> to vector<256x32xf32>
    %98 = arith.truncf %97 : vector<256x32xf32> to vector<256x32xbf16>
    %c1_89 = arith.constant 1 : index
    %c0_90 = arith.constant 0 : index
    %c0_91 = arith.constant 0 : index
    %99 = vector.load %arg8[%c1_89, %c0_90, %c0_91] : memref<9x32x32xbf16, #tpu.memory_space<vmem>>, vector<1x32x32xbf16>
    %100 = vector.shape_cast %99 : vector<1x32x32xbf16> to vector<32x32xbf16>
    %cst_92 = arith.constant dense<0.000000e+00> : vector<256x32xf32>
    %101 = tpu.matmul %98, %100, %cst_92 {dimension_numbers = #tpu.dot_dimension_numbers<[1], [0], [0], [1], [0, 0, 1, 1], [], []>} : vector<256x32xbf16>, vector<32x32xbf16>, vector<256x32xf32> -> vector<256x32xf32>
    %102 = arith.addf %95, %101 : vector<256x32xf32>
    %c0_93 = arith.constant 0 : index
    %c2_94 = arith.constant 2 : index
    %c0_95 = arith.constant 0 : index
    %103 = vector.load %arg14[%c0_93, %c2_94, %c0_95] : memref<18x18x32xf32, #tpu.memory_space<vmem>>, vector<16x16x32xf32>
    %104 = vector.shape_cast %103 : vector<16x16x32xf32> to vector<256x32xf32>
    %105 = arith.truncf %104 : vector<256x32xf32> to vector<256x32xbf16>
    %c2_96 = arith.constant 2 : index
    %c0_97 = arith.constant 0 : index
    %c0_98 = arith.constant 0 : index
    %106 = vector.load %arg8[%c2_96, %c0_97, %c0_98] : memref<9x32x32xbf16, #tpu.memory_space<vmem>>, vector<1x32x32xbf16>
    %107 = vector.shape_cast %106 : vector<1x32x32xbf16> to vector<32x32xbf16>
    %cst_99 = arith.constant dense<0.000000e+00> : vector<256x32xf32>
    %108 = tpu.matmul %105, %107, %cst_99 {dimension_numbers = #tpu.dot_dimension_numbers<[1], [0], [0], [1], [0, 0, 1, 1], [], []>} : vector<256x32xbf16>, vector<32x32xbf16>, vector<256x32xf32> -> vector<256x32xf32>
    %109 = arith.addf %102, %108 : vector<256x32xf32>
    %c1_100 = arith.constant 1 : index
    %c0_101 = arith.constant 0 : index
    %c0_102 = arith.constant 0 : index
    %110 = vector.load %arg14[%c1_100, %c0_101, %c0_102] : memref<18x18x32xf32, #tpu.memory_space<vmem>>, vector<16x16x32xf32>
    %111 = vector.shape_cast %110 : vector<16x16x32xf32> to vector<256x32xf32>
    %112 = arith.truncf %111 : vector<256x32xf32> to vector<256x32xbf16>
    %c3_103 = arith.constant 3 : index
    %c0_104 = arith.constant 0 : index
    %c0_105 = arith.constant 0 : index
    %113 = vector.load %arg8[%c3_103, %c0_104, %c0_105] : memref<9x32x32xbf16, #tpu.memory_space<vmem>>, vector<1x32x32xbf16>
    %114 = vector.shape_cast %113 : vector<1x32x32xbf16> to vector<32x32xbf16>
    %cst_106 = arith.constant dense<0.000000e+00> : vector<256x32xf32>
    %115 = tpu.matmul %112, %114, %cst_106 {dimension_numbers = #tpu.dot_dimension_numbers<[1], [0], [0], [1], [0, 0, 1, 1], [], []>} : vector<256x32xbf16>, vector<32x32xbf16>, vector<256x32xf32> -> vector<256x32xf32>
    %116 = arith.addf %109, %115 : vector<256x32xf32>
    %c1_107 = arith.constant 1 : index
    %c1_108 = arith.constant 1 : index
    %c0_109 = arith.constant 0 : index
    %117 = vector.load %arg14[%c1_107, %c1_108, %c0_109] : memref<18x18x32xf32, #tpu.memory_space<vmem>>, vector<16x16x32xf32>
    %118 = vector.shape_cast %117 : vector<16x16x32xf32> to vector<256x32xf32>
    %119 = arith.truncf %118 : vector<256x32xf32> to vector<256x32xbf16>
    %c4_110 = arith.constant 4 : index
    %c0_111 = arith.constant 0 : index
    %c0_112 = arith.constant 0 : index
    %120 = vector.load %arg8[%c4_110, %c0_111, %c0_112] : memref<9x32x32xbf16, #tpu.memory_space<vmem>>, vector<1x32x32xbf16>
    %121 = vector.shape_cast %120 : vector<1x32x32xbf16> to vector<32x32xbf16>
    %cst_113 = arith.constant dense<0.000000e+00> : vector<256x32xf32>
    %122 = tpu.matmul %119, %121, %cst_113 {dimension_numbers = #tpu.dot_dimension_numbers<[1], [0], [0], [1], [0, 0, 1, 1], [], []>} : vector<256x32xbf16>, vector<32x32xbf16>, vector<256x32xf32> -> vector<256x32xf32>
    %123 = arith.addf %116, %122 : vector<256x32xf32>
    %c1_114 = arith.constant 1 : index
    %c2_115 = arith.constant 2 : index
    %c0_116 = arith.constant 0 : index
    %124 = vector.load %arg14[%c1_114, %c2_115, %c0_116] : memref<18x18x32xf32, #tpu.memory_space<vmem>>, vector<16x16x32xf32>
    %125 = vector.shape_cast %124 : vector<16x16x32xf32> to vector<256x32xf32>
    %126 = arith.truncf %125 : vector<256x32xf32> to vector<256x32xbf16>
    %c5_117 = arith.constant 5 : index
    %c0_118 = arith.constant 0 : index
    %c0_119 = arith.constant 0 : index
    %127 = vector.load %arg8[%c5_117, %c0_118, %c0_119] : memref<9x32x32xbf16, #tpu.memory_space<vmem>>, vector<1x32x32xbf16>
    %128 = vector.shape_cast %127 : vector<1x32x32xbf16> to vector<32x32xbf16>
    %cst_120 = arith.constant dense<0.000000e+00> : vector<256x32xf32>
    %129 = tpu.matmul %126, %128, %cst_120 {dimension_numbers = #tpu.dot_dimension_numbers<[1], [0], [0], [1], [0, 0, 1, 1], [], []>} : vector<256x32xbf16>, vector<32x32xbf16>, vector<256x32xf32> -> vector<256x32xf32>
    %130 = arith.addf %123, %129 : vector<256x32xf32>
    %c2_121 = arith.constant 2 : index
    %c0_122 = arith.constant 0 : index
    %c0_123 = arith.constant 0 : index
    %131 = vector.load %arg14[%c2_121, %c0_122, %c0_123] : memref<18x18x32xf32, #tpu.memory_space<vmem>>, vector<16x16x32xf32>
    %132 = vector.shape_cast %131 : vector<16x16x32xf32> to vector<256x32xf32>
    %133 = arith.truncf %132 : vector<256x32xf32> to vector<256x32xbf16>
    %c6_124 = arith.constant 6 : index
    %c0_125 = arith.constant 0 : index
    %c0_126 = arith.constant 0 : index
    %134 = vector.load %arg8[%c6_124, %c0_125, %c0_126] : memref<9x32x32xbf16, #tpu.memory_space<vmem>>, vector<1x32x32xbf16>
    %135 = vector.shape_cast %134 : vector<1x32x32xbf16> to vector<32x32xbf16>
    %cst_127 = arith.constant dense<0.000000e+00> : vector<256x32xf32>
    %136 = tpu.matmul %133, %135, %cst_127 {dimension_numbers = #tpu.dot_dimension_numbers<[1], [0], [0], [1], [0, 0, 1, 1], [], []>} : vector<256x32xbf16>, vector<32x32xbf16>, vector<256x32xf32> -> vector<256x32xf32>
    %137 = arith.addf %130, %136 : vector<256x32xf32>
    %c2_128 = arith.constant 2 : index
    %c1_129 = arith.constant 1 : index
    %c0_130 = arith.constant 0 : index
    %138 = vector.load %arg14[%c2_128, %c1_129, %c0_130] : memref<18x18x32xf32, #tpu.memory_space<vmem>>, vector<16x16x32xf32>
    %139 = vector.shape_cast %138 : vector<16x16x32xf32> to vector<256x32xf32>
    %140 = arith.truncf %139 : vector<256x32xf32> to vector<256x32xbf16>
    %c7_131 = arith.constant 7 : index
    %c0_132 = arith.constant 0 : index
    %c0_133 = arith.constant 0 : index
    %141 = vector.load %arg8[%c7_131, %c0_132, %c0_133] : memref<9x32x32xbf16, #tpu.memory_space<vmem>>, vector<1x32x32xbf16>
    %142 = vector.shape_cast %141 : vector<1x32x32xbf16> to vector<32x32xbf16>
    %cst_134 = arith.constant dense<0.000000e+00> : vector<256x32xf32>
    %143 = tpu.matmul %140, %142, %cst_134 {dimension_numbers = #tpu.dot_dimension_numbers<[1], [0], [0], [1], [0, 0, 1, 1], [], []>} : vector<256x32xbf16>, vector<32x32xbf16>, vector<256x32xf32> -> vector<256x32xf32>
    %144 = arith.addf %137, %143 : vector<256x32xf32>
    %c2_135 = arith.constant 2 : index
    %c2_136 = arith.constant 2 : index
    %c0_137 = arith.constant 0 : index
    %145 = vector.load %arg14[%c2_135, %c2_136, %c0_137] : memref<18x18x32xf32, #tpu.memory_space<vmem>>, vector<16x16x32xf32>
    %146 = vector.shape_cast %145 : vector<16x16x32xf32> to vector<256x32xf32>
    %147 = arith.truncf %146 : vector<256x32xf32> to vector<256x32xbf16>
    %c8_138 = arith.constant 8 : index
    %c0_139 = arith.constant 0 : index
    %c0_140 = arith.constant 0 : index
    %148 = vector.load %arg8[%c8_138, %c0_139, %c0_140] : memref<9x32x32xbf16, #tpu.memory_space<vmem>>, vector<1x32x32xbf16>
    %149 = vector.shape_cast %148 : vector<1x32x32xbf16> to vector<32x32xbf16>
    %cst_141 = arith.constant dense<0.000000e+00> : vector<256x32xf32>
    %150 = tpu.matmul %147, %149, %cst_141 {dimension_numbers = #tpu.dot_dimension_numbers<[1], [0], [0], [1], [0, 0, 1, 1], [], []>} : vector<256x32xbf16>, vector<32x32xbf16>, vector<256x32xf32> -> vector<256x32xf32>
    %151 = arith.addf %144, %150 : vector<256x32xf32>
    %152 = vector.shape_cast %151 : vector<256x32xf32> to vector<1x16x16x32xf32>
    %c0_142 = arith.constant 0 : index
    %c0_143 = arith.constant 0 : index
    %c0_144 = arith.constant 0 : index
    %c0_145 = arith.constant 0 : index
    %153 = vector.load %arg12[%c0_142, %c0_143, %c0_144, %c0_145] : memref<1x16x16x32xf32, #tpu.memory_space<vmem>>, vector<1x16x16x32xf32>
    tpu.vector_store %arg12[%c0_142, %c0_143, %c0_144, %c0_145], %152 {strides = array<i32>} : memref<1x16x16x32xf32, #tpu.memory_space<vmem>>, vector<1x16x16x32xf32>,
    %c0_146 = arith.constant 0 : index
    %c0_147 = arith.constant 0 : index
    %c0_148 = arith.constant 0 : index
    %c0_149 = arith.constant 0 : index
    %154 = vector.load %arg2[%c0_146, %c0_147, %c0_148, %c0_149] : memref<1x16x16x32xf32, #tpu.memory_space<vmem>>, vector<1x16x16x32xf32>
    %155 = vector.shape_cast %154 : vector<1x16x16x32xf32> to vector<256x32xf32>
    %c0_150 = arith.constant 0 : index
    %c0_151 = arith.constant 0 : index
    %156 = vector.load %arg11[%c0_150, %c0_151] : memref<1x32xf32, #tpu.memory_space<vmem>>, vector<1x32xf32>
    %157 = vector.broadcast %156 : vector<1x32xf32> to vector<256x32xf32>
    %158 = arith.addf %155, %157 : vector<256x32xf32>
    %159 = arith.truncf %151 : vector<256x32xf32> to vector<256x32xbf16>
    %c0_152 = arith.constant 0 : index
    %c0_153 = arith.constant 0 : index
    %160 = vector.load %arg10[%c0_152, %c0_153] : memref<32x32xbf16, #tpu.memory_space<vmem>>, vector<32x32xbf16>
    %cst_154 = arith.constant dense<0.000000e+00> : vector<256x32xf32>
    %161 = tpu.matmul %159, %160, %cst_154 {dimension_numbers = #tpu.dot_dimension_numbers<[1], [0], [0], [1], [0, 0, 1, 1], [], []>} : vector<256x32xbf16>, vector<32x32xbf16>, vector<256x32xf32> -> vector<256x32xf32>
    %162 = arith.addf %158, %161 : vector<256x32xf32>
    %163 = vector.shape_cast %162 : vector<256x32xf32> to vector<1x16x16x32xf32>
    %c0_155 = arith.constant 0 : index
    %c0_156 = arith.constant 0 : index
    %c0_157 = arith.constant 0 : index
    %c0_158 = arith.constant 0 : index
    %164 = vector.load %arg13[%c0_155, %c0_156, %c0_157, %c0_158] : memref<1x16x16x32xf32, #tpu.memory_space<vmem>>, vector<1x16x16x32xf32>
    tpu.vector_store %arg13[%c0_155, %c0_156, %c0_157, %c0_158], %163 {strides = array<i32>} : memref<1x16x16x32xf32, #tpu.memory_space<vmem>>, vector<1x16x16x32xf32>,
    return
  }
  func.func @transform_0(%arg0: i32) -> (i32, i32, i32, i32) {
    %c0_i32 = arith.constant 0 : i32
    %c0_i32_0 = arith.constant 0 : i32
    %c0_i32_1 = arith.constant 0 : i32
    %c0_i32_2 = arith.constant 0 : i32
    return %arg0, %c0_i32, %c0_i32_0, %c0_i32_1 : i32, i32, i32, i32
  }
  func.func @transform_1(%arg0: i32) -> (i32, i32, i32, i32) {
    %c0_i32 = arith.constant 0 : i32
    %c0_i32_0 = arith.constant 0 : i32
    %c0_i32_1 = arith.constant 0 : i32
    %c0_i32_2 = arith.constant 0 : i32
    return %arg0, %c0_i32, %c0_i32_0, %c0_i32_1 : i32, i32, i32, i32
  }
  func.func @transform_2(%arg0: i32) -> (i32, i32) {
    %c0_i32 = arith.constant 0 : i32
    %c0_i32_0 = arith.constant 0 : i32
    %c0_i32_1 = arith.constant 0 : i32
    return %c0_i32, %c0_i32_0 : i32, i32
  }
  func.func @transform_3(%arg0: i32) -> (i32, i32) {
    %c0_i32 = arith.constant 0 : i32
    %c0_i32_0 = arith.constant 0 : i32
    %c0_i32_1 = arith.constant 0 : i32
    return %c0_i32, %c0_i32_0 : i32, i32
  }
  func.func @transform_4(%arg0: i32) -> (i32, i32, i32) {
    %c0_i32 = arith.constant 0 : i32
    %c0_i32_0 = arith.constant 0 : i32
    %c0_i32_1 = arith.constant 0 : i32
    %c0_i32_2 = arith.constant 0 : i32
    return %c0_i32, %c0_i32_0, %c0_i32_1 : i32, i32, i32
  }
  func.func @transform_5(%arg0: i32) -> (i32, i32) {
    %c0_i32 = arith.constant 0 : i32
    %c0_i32_0 = arith.constant 0 : i32
    %c0_i32_1 = arith.constant 0 : i32
    return %c0_i32, %c0_i32_0 : i32, i32
  }
  func.func @transform_6(%arg0: i32) -> (i32, i32) {
    %c0_i32 = arith.constant 0 : i32
    %c0_i32_0 = arith.constant 0 : i32
    %c0_i32_1 = arith.constant 0 : i32
    return %c0_i32, %c0_i32_0 : i32, i32
  }
  func.func @transform_7(%arg0: i32) -> (i32, i32, i32) {
    %c0_i32 = arith.constant 0 : i32
    %c0_i32_0 = arith.constant 0 : i32
    %c0_i32_1 = arith.constant 0 : i32
    %c0_i32_2 = arith.constant 0 : i32
    return %c0_i32, %c0_i32_0, %c0_i32_1 : i32, i32, i32
  }
  func.func @transform_8(%arg0: i32) -> (i32, i32) {
    %c0_i32 = arith.constant 0 : i32
    %c0_i32_0 = arith.constant 0 : i32
    %c0_i32_1 = arith.constant 0 : i32
    return %c0_i32, %c0_i32_0 : i32, i32
  }
  func.func @transform_9(%arg0: i32) -> (i32, i32) {
    %c0_i32 = arith.constant 0 : i32
    %c0_i32_0 = arith.constant 0 : i32
    %c0_i32_1 = arith.constant 0 : i32
    return %c0_i32, %c0_i32_0 : i32, i32
  }
  func.func @transform_10(%arg0: i32) -> (i32, i32) {
    %c0_i32 = arith.constant 0 : i32
    %c0_i32_0 = arith.constant 0 : i32
    %c0_i32_1 = arith.constant 0 : i32
    return %c0_i32, %c0_i32_0 : i32, i32
  }
  func.func @transform_11(%arg0: i32) -> (i32, i32, i32, i32) {
    %c0_i32 = arith.constant 0 : i32
    %c0_i32_0 = arith.constant 0 : i32
    %c0_i32_1 = arith.constant 0 : i32
    %c0_i32_2 = arith.constant 0 : i32
    return %arg0, %c0_i32, %c0_i32_0, %c0_i32_1 : i32, i32, i32, i32
  }
  func.func @transform_12(%arg0: i32) -> (i32, i32, i32, i32) {
    %c0_i32 = arith.constant 0 : i32
    %c0_i32_0 = arith.constant 0 : i32
    %c0_i32_1 = arith.constant 0 : i32
    %c0_i32_2 = arith.constant 0 : i32
    return %arg0, %c0_i32, %c0_i32_0, %c0_i32_1 : i32, i32, i32, i32
  }
}

</mosaic_0001>

<bundles_post_ra>
// kernel: _lambda_.7
= control target key start
LH: loop header
LB: loop body
LE: loop exit
PB: predicated region body
PF: predicated region fallthrough
CT: control target
= control target key end

     0   :  { %s845_s18 = smov 0   ;;  %s1102_s0 = inlined_call_operand.vmem [shape: f32[2,16,16,32], index: 0, kind: input, shape index: {}]   ;;  %s1103_s1 = inlined_call_operand.vmem [shape: f32[1,32], index: 1, kind: input, shape index: {}]   ;;  %s1104_s2 = inlined_call_operand.vmem [shape: f32[1,32], index: 2, kind: input, shape index: {}]   ;;  %s1105_s3 = inlined_call_operand.vmem [shape: bf16[32,8], index: 3, kind: input, shape index: {}]   ;;  %s1106_s4 = inlined_call_operand.vmem [shape: f32[1,8], index: 4, kind: input, shape index: {}]   ;;  %s1107_s5 = inlined_call_operand.vmem [shape: f32[2,16,16,8], index: 5, kind: output, shape index: {}]  }
   0x1 LB: > { %s705_s19 = sadd.s32 4294967295, %s813_s18   ;;  %p709_p0 = scmp.ge.s32.totalorder %s813_s18, 1  ;;  %s813_s18 = sphi %s845_s18, %s15_s18  }
   0x2   : > { %p187_p1 = scmp.lt.s32.totalorder %s813_s18, 3 }
   0x4   : > { %p188_p2 = pnand %p709_p0, %p187_p1 }
   0x5   : > { %p215_p3 = scmp.lt.s32.totalorder (!%p188_p2), %s705_s19, 1 }
   0x6   : > { %191 = sbr.rel (%p188_p2) target bundleno = 253 (0xfd), region = 40 }
   0xb   : > { %v805_v0 = vld [vmem:[%s1105_s3 + $0x8] sm:$0xff]   ;;  %v806_v1 = vld [vmem:[%s1105_s3] sm:$0xff]   ;;  %s1109_s19 = smov (!%p215_p3, %s705_s19), 1  ;;  %vm407_vm0 = vcmask 261120   ;;  %vm617_vm1 = vcmask 64512  }
   0xc   : > { %757 = vmatprep.subr.bf16.mxu0 %v805_v0  ;;  %793 = vmatprep.subr.bf16.mxu1 %v805_v0  ;;  %s737_s24 = sshll.u32 %s1109_s19, 8  ;;  %v865_v2 = vld [vmem:[%s1103_s1] ss:$0 sm:$0xff] }
   0xd   : > { %758 = vmatpush3.bf16.msra.mxu0 %v805_v0  ;;  %795 = vmatpush3.bf16.msra.mxu1 %v805_v0  ;;  %s872_s29 = scalar_lea.vmem %s1102_s0, %s737_s24  ;;  %v877_v3 = vld [vmem:[%s1104_s2] ss:$0 sm:$0xff]  ;;  %s1001_s11 = scalar_lea.vmem %s1107_s5, %s737_s24 }
   0xe   : > { %759 = vmatprep.subr.bf16.mxu0 %v806_v1  ;;  %794 = vmatprep.subr.bf16.mxu1 %v806_v1  ;;  %v226_v4 = vld [vmem:[%s872_s29] sm:$0xff]  ;;  %v227_v5 = vld [vmem:[%s872_s29 + $0x8] sm:$0xff]  ;;  %v228_v11 = vld [vmem:[%s872_s29 + $0x10] sm:$0xff] }
   0xf   : > { %v242_v6 = vld [vmem:[%s872_s29 + $0x80] sm:$0xff]  ;;  %v265_v7 = vmul.f32 %v865_v2, %v226_v4  ;;  %v266_v8 = vmul.f32 %v865_v2, %v227_v5  ;;  %v243_v9 = vld [vmem:[%s872_s29 + $0x88] sm:$0xff]  ;;  %v229_v12 = vld [vmem:[%s872_s29 + $0x18] sm:$0xff]  ;;  %v267_v14 = vmul.f32 %v865_v2, %v228_v11 }
  0x10   : > { %v281_v10 = vmul.f32 %v865_v2, %v242_v6  ;;  %v282_v13 = vmul.f32 %v865_v2, %v243_v9  ;;  %v268_v15 = vmul.f32 %v865_v2, %v229_v12  ;;  %v244_v16 = vld [vmem:[%s872_s29 + $0x90] sm:$0xff]  ;;  %v245_v17 = vld [vmem:[%s872_s29 + $0x98] sm:$0xff]  ;;  %v230_v26 = vld [vmem:[%s872_s29 + $0x20] sm:$0xff] }
  0x11   : > { %760 = vmatpush3.bf16.msra.mxu0 %v806_v1  ;;  %796 = vmatpush3.bf16.msra.mxu1 %v806_v1  ;;  %v304_v18 = vadd.f32 %v877_v3, %v265_v7  ;;  %v305_v19 = vadd.f32 %v877_v3, %v266_v8  ;;  %v283_v21 = vmul.f32 %v865_v2, %v244_v16  ;;  %v231_v27 = vld [vmem:[%s872_s29 + $0x28] sm:$0xff]  ;;  %v246_v32 = vld [vmem:[%s872_s29 + $0xa0] sm:$0xff]  ;;  %v232_v38 = vld [vmem:[%s872_s29 + $0x30] sm:$0xff] }
  0x12   : > { %v320_v20 = vadd.f32 %v877_v3, %v281_v10  ;;  %v321_v22 = vadd.f32 %v877_v3, %v282_v13  ;;  %v306_v23 = vadd.f32 %v877_v3, %v267_v14  ;;  %v307_v24 = vadd.f32 %v877_v3, %v268_v15  ;;  %v247_v37 = vld [vmem:[%s872_s29 + $0xa8] sm:$0xff]  ;;  %v233_v43 = vld [vmem:[%s872_s29 + $0x38] sm:$0xff]  ;;  %v248_v52 = vld [vmem:[%s872_s29 + $0xb0] sm:$0xff] }
  0x13   : > { %v284_v25 = vmul.f32 %v865_v2, %v245_v17  ;;  %v336_v28 = vmax.f32 %v304_v18, 0.0  ;;  %v337_v29 = vmax.f32 %v305_v19, 0.0  ;;  %v322_v31 = vadd.f32 %v877_v3, %v283_v21  ;;  %v249_v53 = vld [vmem:[%s872_s29 + $0xb8] sm:$0xff]  ;;  %v234_v57 = vld [vmem:[%s872_s29 + $0x40] sm:$0xff]  ;;  %v235_v62 = vld [vmem:[%s872_s29 + $0x48] sm:$0xff] }
  0x14   : > { %v352_v30 = vmax.f32 %v320_v20, 0.0  ;;  %v353_v33 = vmax.f32 %v321_v22, 0.0  ;;  %v338_v34 = vmax.f32 %v306_v23, 0.0  ;;  %v339_v35 = vmax.f32 %v307_v24, 0.0  ;;  %v250_v5 = vld [vmem:[%s872_s29 + $0xc0] sm:$0xff]  ;;  %v251_v6 = vld [vmem:[%s872_s29 + $0xc8] sm:$0xff] }
  0x15   : > { %v323_v36 = vadd.f32 %v877_v3, %v284_v25  ;;  %v368_v39 = vpack.c.bf16 %v337_v29, %v336_v28  ;;  %v354_v40 = vmax.f32 %v322_v31, 0.0  ;;  %v269_v41 = vmul.f32 %v865_v2, %v230_v26  ;;  %v236_v15 = vld [vmem:[%s872_s29 + $0x50] sm:$0xff]  ;;  %v237_v20 = vld [vmem:[%s872_s29 + $0x58] sm:$0xff]  ;;  %v238_v31 = vld [vmem:[%s872_s29 + $0x60] sm:$0xff] }
  0x16   : > { %v270_v42 = vmul.f32 %v865_v2, %v231_v27  ;;  %v376_v44 = vpack.c.bf16 %v353_v33, %v352_v30  ;;  %v369_v45 = vpack.c.bf16 %v339_v35, %v338_v34  ;;  %v285_v47 = vmul.f32 %v865_v2, %v246_v32  ;;  %v252_v21 = vld [vmem:[%s872_s29 + $0xd0] sm:$0xff]  ;;  %v253_v26 = vld [vmem:[%s872_s29 + $0xd8] sm:$0xff] }
  0x17   : > { %v355_v46 = vmax.f32 %v323_v36, 0.0  ;;  %761 = vmatprep.mubr.msk.bf16.mxu0 %vm407_vm0, %v368_v39  ;;  %v308_v48 = vadd.f32 %v877_v3, %v269_v41  ;;  %v286_v50 = vmul.f32 %v865_v2, %v247_v37  ;;  %v271_v51 = vmul.f32 %v865_v2, %v232_v38  ;;  %v239_v36 = vld [vmem:[%s872_s29 + $0x68] sm:$0xff]  ;;  %v254_v41 = vld [vmem:[%s872_s29 + $0xe0] sm:$0xff] }
  0x18   : > { %v309_v49 = vadd.f32 %v877_v3, %v270_v42  ;;  %777 = vmatprep.mubr.msk.bf16.mxu1 %vm407_vm0, %v376_v44  ;;  %762 = vmatmul.mubr.msk.bf16.vlgmr.msra.gmra.mxu0 %vm407_vm0, %v369_v45  ;;  %v324_v55 = vadd.f32 %v877_v3, %v285_v47  ;;  %v272_v56 = vmul.f32 %v865_v2, %v233_v43  ;;  %v240_v47 = vld [vmem:[%s872_s29 + $0x70] sm:$0xff] }
  0x19   : > { %v377_v54 = vpack.c.bf16 %v355_v46, %v354_v40  ;;  %v340_v58 = vmax.f32 %v308_v48, 0.0  ;;  %v325_v60 = vadd.f32 %v877_v3, %v286_v50  ;;  %v310_v61 = vadd.f32 %v877_v3, %v271_v51  ;;  %v255_v46 = vld [vmem:[%s872_s29 + $0xe8] sm:$0xff] }
  0x1a   : > { %v341_v59 = vmax.f32 %v309_v49, 0.0  ;;  %v356_v63 = vmax.f32 %v324_v55, 0.0  ;;  %v311_v0 = vadd.f32 %v877_v3, %v272_v56  ;;  %v287_v1 = vmul.f32 %v865_v2, %v248_v52  ;;  %v241_v52 = vld [vmem:[%s872_s29 + $0x78] sm:$0xff] }
  0x1b   : > { %778 = vmatmul.mubr.msk.bf16.vlgmr.msra.gmra.mxu1 %vm407_vm0, %v377_v54  ;;  %v288_v4 = vmul.f32 %v865_v2, %v249_v53  ;;  %v357_v8 = vmax.f32 %v325_v60, 0.0  ;;  %v342_v9 = vmax.f32 %v310_v61, 0.0  ;;  %v273_v10 = vmul.f32 %v865_v2, %v234_v57  ;;  %v256_v61 = vld [vmem:[%s872_s29 + $0xf0] sm:$0xff] }
  0x1c   : > { %v370_v7 = vpack.c.bf16 %v341_v59, %v340_v58  ;;  %v343_v11 = vmax.f32 %v311_v0, 0.0  ;;  %v326_v12 = vadd.f32 %v877_v3, %v287_v1  ;;  %v274_v14 = vmul.f32 %v865_v2, %v235_v62  ;;  %v257_v62 = vld [vmem:[%s872_s29 + $0xf8] sm:$0xff] }
  0x1d   : > { %v327_v13 = vadd.f32 %v877_v3, %v288_v4  ;;  %v378_v16 = vpack.c.bf16 %v357_v8, %v356_v63  ;;  %v312_v17 = vadd.f32 %v877_v3, %v273_v10  ;;  %v289_v18 = vmul.f32 %v865_v2, %v250_v5 }
  0x1e   : > { %765 = vmatprep.mubr.msk.bf16.mxu0 %vm407_vm0, %v370_v7  ;;  %v290_v19 = vmul.f32 %v865_v2, %v251_v6  ;;  %v371_v22 = vpack.c.bf16 %v343_v11, %v342_v9  ;;  %v358_v23 = vmax.f32 %v326_v12, 0.0  ;;  %v313_v25 = vadd.f32 %v877_v3, %v274_v14 }
  0x1f   : > { %v359_v24 = vmax.f32 %v327_v13, 0.0  ;;  %781 = vmatprep.mubr.msk.bf16.mxu1 %vm407_vm0, %v378_v16  ;;  %v344_v27 = vmax.f32 %v312_v17, 0.0  ;;  %v328_v28 = vadd.f32 %v877_v3, %v289_v18  ;;  %v275_v30 = vmul.f32 %v865_v2, %v236_v15 }
  0x20   : > { %v329_v29 = vadd.f32 %v877_v3, %v290_v19  ;;  %766 = vmatmul.mubr.msk.bf16.gmra.mxu0 %vm407_vm0, %v371_v22  ;;  %v345_v33 = vmax.f32 %v313_v25, 0.0  ;;  %v276_v34 = vmul.f32 %v865_v2, %v237_v20  ;;  %v291_v35 = vmul.f32 %v865_v2, %v252_v21 }
  0x21   : > { %v379_v32 = vpack.c.bf16 %v359_v24, %v358_v23  ;;  %v360_v37 = vmax.f32 %v328_v28, 0.0  ;;  %v314_v39 = vadd.f32 %v877_v3, %v275_v30  ;;  %v292_v40 = vmul.f32 %v865_v2, %v253_v26  ;;  %v994_v23 = vld [vmem:[%s1106_s4] ss:$0 sm:$0xff] }
  0x22   : > { %v361_v38 = vmax.f32 %v329_v29, 0.0  ;;  %v372_v42 = vpack.c.bf16 %v345_v33, %v344_v27  ;;  %v315_v43 = vadd.f32 %v877_v3, %v276_v34  ;;  %v330_v44 = vadd.f32 %v877_v3, %v291_v35 }
  0x23   : > { %782 = vmatmul.mubr.msk.bf16.gmra.mxu1 %vm407_vm0, %v379_v32  ;;  %v277_v45 = vmul.f32 %v865_v2, %v238_v31  ;;  %v346_v49 = vmax.f32 %v314_v39, 0.0  ;;  %v331_v50 = vadd.f32 %v877_v3, %v292_v40  ;;  %v278_v51 = vmul.f32 %v865_v2, %v239_v36 }
  0x24   : > { %v380_v48 = vpack.c.bf16 %v361_v38, %v360_v37  ;;  %769 = vmatprep.mubr.msk.bf16.mxu0 %vm407_vm0, %v372_v42  ;;  %v347_v53 = vmax.f32 %v315_v43, 0.0  ;;  %v362_v54 = vmax.f32 %v330_v44, 0.0  ;;  %v293_v56 = vmul.f32 %v865_v2, %v254_v41 }
  0x25   : > { %v316_v55 = vadd.f32 %v877_v3, %v277_v45  ;;  %v363_v57 = vmax.f32 %v331_v50, 0.0  ;;  %v317_v58 = vadd.f32 %v877_v3, %v278_v51  ;;  %v294_v59 = vmul.f32 %v865_v2, %v255_v46 }
  0x26   : > { %785 = vmatprep.mubr.msk.bf16.mxu1 %vm407_vm0, %v380_v48  ;;  %v279_v60 = vmul.f32 %v865_v2, %v240_v47  ;;  %v373_v63 = vpack.c.bf16 %v347_v53, %v346_v49  ;;  %v332_v1 = vadd.f32 %v877_v3, %v293_v56  ;;  %v280_v4 = vmul.f32 %v865_v2, %v241_v52 }
  0x27   : > { %v348_v0 = vmax.f32 %v316_v55, 0.0  ;;  %v381_v5 = vpack.c.bf16 %v363_v57, %v362_v54  ;;  %v349_v6 = vmax.f32 %v317_v58, 0.0  ;;  %v333_v7 = vadd.f32 %v877_v3, %v294_v59 }
  0x28   : > { %v318_v8 = vadd.f32 %v877_v3, %v279_v60  ;;  %770 = vmatmul.mubr.msk.bf16.gmra.mxu0 %vm407_vm0, %v373_v63  ;;  %v364_v9 = vmax.f32 %v332_v1, 0.0  ;;  %v319_v10 = vadd.f32 %v877_v3, %v280_v4  ;;  %v295_v11 = vmul.f32 %v865_v2, %v256_v61 }
  0x29   : > { %v296_v12 = vmul.f32 %v865_v2, %v257_v62  ;;  %v374_v13 = vpack.c.bf16 %v349_v6, %v348_v0  ;;  %v365_v14 = vmax.f32 %v333_v7, 0.0 }
  0x2a   : > { %v350_v15 = vmax.f32 %v318_v8, 0.0  ;;  %v351_v16 = vmax.f32 %v319_v10, 0.0  ;;  %v334_v17 = vadd.f32 %v877_v3, %v295_v11 }
  0x2b   : > { %786 = vmatmul.mubr.msk.bf16.gmra.mxu1 %vm407_vm0, %v381_v5  ;;  %v335_v18 = vadd.f32 %v877_v3, %v296_v12  ;;  %773 = vmatprep.mubr.msk.bf16.mxu0 %vm407_vm0, %v374_v13  ;;  %v382_v19 = vpack.c.bf16 %v365_v14, %v364_v9 }
  0x2c   : > { %v375_v20 = vpack.c.bf16 %v351_v16, %v350_v15  ;;  %v366_v21 = vmax.f32 %v334_v17, 0.0 }
  0x2d   : > { %v367_v22 = vmax.f32 %v335_v18, 0.0  ;;  %789 = vmatprep.mubr.msk.bf16.mxu1 %vm407_vm0, %v382_v19 }
  0x2f   : > { %v383_v2 = vpack.c.bf16 %v367_v22, %v366_v21 }
  0x30   : > { %774 = vmatmul.mubr.msk.bf16.gmra.mxu0 %vm407_vm0, %v375_v20 }
  0x33   : > { %790 = vmatmul.mubr.msk.bf16.gmra.mxu1 %vm407_vm0, %v383_v2 }
  0xd8   : > { %v763_v3 = vpop.f32.mrf.mxu0 }
  0xd9   : > { %v499_v24 = vadd.f32 %v763_v3, %v994_v23 }
  0xda   : > { %v490_v26 = vpop.f32.mrf.mxu0 }
  0xdb   : > { %v779_v25 = vpop.f32.mrf.mxu1  ;;  %620 = vst.msk [vmem:[%s1001_s11 + $0x10] sm:$0xff] %vm617_vm1, %v499_v24  ;;  %v491_v28 = vadd.f32 %v994_v23, %v490_v26 }
  0xdc   : > { %v563_v27 = vadd.f32 %v779_v25, %v994_v23  ;;  %v764_v30 = vpop.f32.mrf.mxu0 }
  0xdd   : > { %v554_v29 = vpop.f32.mrf.mxu1  ;;  %618 = vst.msk [vmem:[%s1001_s11] sm:$0xff] %vm617_vm1, %v491_v28  ;;  %v502_v32 = vadd.f32 %v764_v30, %v994_v23 }
  0xde   : > { %636 = vst.msk [vmem:[%s1001_s11 + $0x90] sm:$0xff] %vm617_vm1, %v563_v27  ;;  %v555_v31 = vadd.f32 %v994_v23, %v554_v29  ;;  %v493_v34 = vpop.f32.mrf.mxu0 }
  0xdf   : > { %v780_v33 = vpop.f32.mrf.mxu1  ;;  %621 = vst.msk [vmem:[%s1001_s11 + $0x18] sm:$0xff] %vm617_vm1, %v502_v32  ;;  %v494_v36 = vadd.f32 %v994_v23, %v493_v34 }
  0xe0   : > { %634 = vst.msk [vmem:[%s1001_s11 + $0x80] sm:$0xff] %vm617_vm1, %v555_v31  ;;  %v566_v35 = vadd.f32 %v780_v33, %v994_v23  ;;  %v767_v38 = vpop.f32.mrf.mxu0 }
  0xe1   : > { %v557_v37 = vpop.f32.mrf.mxu1  ;;  %619 = vst.msk [vmem:[%s1001_s11 + $0x8] sm:$0xff] %vm617_vm1, %v494_v36  ;;  %v515_v40 = vadd.f32 %v767_v38, %v994_v23 }
  0xe2   : > { %637 = vst.msk [vmem:[%s1001_s11 + $0x98] sm:$0xff] %vm617_vm1, %v566_v35  ;;  %v558_v39 = vadd.f32 %v994_v23, %v557_v37  ;;  %v506_v42 = vpop.f32.mrf.mxu0 }
  0xe3   : > { %v783_v41 = vpop.f32.mrf.mxu1  ;;  %624 = vst.msk [vmem:[%s1001_s11 + $0x30] sm:$0xff] %vm617_vm1, %v515_v40  ;;  %v507_v44 = vadd.f32 %v994_v23, %v506_v42 }
  0xe4   : > { %635 = vst.msk [vmem:[%s1001_s11 + $0x88] sm:$0xff] %vm617_vm1, %v558_v39  ;;  %v579_v43 = vadd.f32 %v783_v41, %v994_v23  ;;  %v768_v46 = vpop.f32.mrf.mxu0 }
  0xe5   : > { %v570_v45 = vpop.f32.mrf.mxu1  ;;  %622 = vst.msk [vmem:[%s1001_s11 + $0x20] sm:$0xff] %vm617_vm1, %v507_v44  ;;  %v518_v48 = vadd.f32 %v768_v46, %v994_v23 }
  0xe6   : > { %640 = vst.msk [vmem:[%s1001_s11 + $0xb0] sm:$0xff] %vm617_vm1, %v579_v43  ;;  %v571_v47 = vadd.f32 %v994_v23, %v570_v45  ;;  %v509_v50 = vpop.f32.mrf.mxu0 }
  0xe7   : > { %v784_v49 = vpop.f32.mrf.mxu1  ;;  %625 = vst.msk [vmem:[%s1001_s11 + $0x38] sm:$0xff] %vm617_vm1, %v518_v48  ;;  %v510_v52 = vadd.f32 %v994_v23, %v509_v50 }
  0xe8   : > { %638 = vst.msk [vmem:[%s1001_s11 + $0xa0] sm:$0xff] %vm617_vm1, %v571_v47  ;;  %v582_v51 = vadd.f32 %v784_v49, %v994_v23  ;;  %v771_v54 = vpop.f32.mrf.mxu0 }
  0xe9   : > { %v573_v53 = vpop.f32.mrf.mxu1  ;;  %623 = vst.msk [vmem:[%s1001_s11 + $0x28] sm:$0xff] %vm617_vm1, %v510_v52  ;;  %v531_v56 = vadd.f32 %v771_v54, %v994_v23 }
  0xea   : > { %641 = vst.msk [vmem:[%s1001_s11 + $0xb8] sm:$0xff] %vm617_vm1, %v582_v51  ;;  %v574_v55 = vadd.f32 %v994_v23, %v573_v53  ;;  %v522_v58 = vpop.f32.mrf.mxu0 }
  0xeb   : > { %v787_v57 = vpop.f32.mrf.mxu1  ;;  %628 = vst.msk [vmem:[%s1001_s11 + $0x50] sm:$0xff] %vm617_vm1, %v531_v56  ;;  %v523_v60 = vadd.f32 %v994_v23, %v522_v58 }
  0xec   : > { %639 = vst.msk [vmem:[%s1001_s11 + $0xa8] sm:$0xff] %vm617_vm1, %v574_v55  ;;  %v595_v59 = vadd.f32 %v787_v57, %v994_v23  ;;  %v772_v62 = vpop.f32.mrf.mxu0 }
  0xed   : > { %v586_v61 = vpop.f32.mrf.mxu1  ;;  %626 = vst.msk [vmem:[%s1001_s11 + $0x40] sm:$0xff] %vm617_vm1, %v523_v60  ;;  %v534_v0 = vadd.f32 %v772_v62, %v994_v23 }
  0xee   : > { %644 = vst.msk [vmem:[%s1001_s11 + $0xd0] sm:$0xff] %vm617_vm1, %v595_v59  ;;  %v587_v63 = vadd.f32 %v994_v23, %v586_v61  ;;  %v525_v4 = vpop.f32.mrf.mxu0 }
  0xef   : > { %v788_v1 = vpop.f32.mrf.mxu1  ;;  %629 = vst.msk [vmem:[%s1001_s11 + $0x58] sm:$0xff] %vm617_vm1, %v534_v0  ;;  %v526_v6 = vadd.f32 %v994_v23, %v525_v4 }
  0xf0   : > { %642 = vst.msk [vmem:[%s1001_s11 + $0xc0] sm:$0xff] %vm617_vm1, %v587_v63  ;;  %v598_v5 = vadd.f32 %v788_v1, %v994_v23  ;;  %v775_v8 = vpop.f32.mrf.mxu0 }
  0xf1   : > { %v589_v7 = vpop.f32.mrf.mxu1  ;;  %627 = vst.msk [vmem:[%s1001_s11 + $0x48] sm:$0xff] %vm617_vm1, %v526_v6  ;;  %v547_v10 = vadd.f32 %v775_v8, %v994_v23 }
  0xf2   : > { %645 = vst.msk [vmem:[%s1001_s11 + $0xd8] sm:$0xff] %vm617_vm1, %v598_v5  ;;  %v590_v9 = vadd.f32 %v994_v23, %v589_v7  ;;  %v538_v12 = vpop.f32.mrf.mxu0 }
  0xf3   : > { %v791_v11 = vpop.f32.mrf.mxu1  ;;  %632 = vst.msk [vmem:[%s1001_s11 + $0x70] sm:$0xff] %vm617_vm1, %v547_v10  ;;  %v539_v14 = vadd.f32 %v994_v23, %v538_v12 }
  0xf4   : > { %643 = vst.msk [vmem:[%s1001_s11 + $0xc8] sm:$0xff] %vm617_vm1, %v590_v9  ;;  %v611_v13 = vadd.f32 %v791_v11, %v994_v23  ;;  %v776_v16 = vpop.f32.mrf.mxu0 }
  0xf5   : > { %v602_v15 = vpop.f32.mrf.mxu1  ;;  %630 = vst.msk [vmem:[%s1001_s11 + $0x60] sm:$0xff] %vm617_vm1, %v539_v14  ;;  %v550_v18 = vadd.f32 %v776_v16, %v994_v23 }
  0xf6   : > { %648 = vst.msk [vmem:[%s1001_s11 + $0xf0] sm:$0xff] %vm617_vm1, %v611_v13  ;;  %v603_v17 = vadd.f32 %v994_v23, %v602_v15  ;;  %v541_v20 = vpop.f32.mrf.mxu0 }
  0xf7   : > { %v792_v19 = vpop.f32.mrf.mxu1  ;;  %633 = vst.msk [vmem:[%s1001_s11 + $0x78] sm:$0xff] %vm617_vm1, %v550_v18  ;;  %v542_v22 = vadd.f32 %v994_v23, %v541_v20 }
  0xf8   : > { %646 = vst.msk [vmem:[%s1001_s11 + $0xe0] sm:$0xff] %vm617_vm1, %v603_v17  ;;  %v614_v21 = vadd.f32 %v792_v19, %v994_v23 }
  0xf9   : > { %v605_v2 = vpop.f32.mrf.mxu1  ;;  %631 = vst.msk [vmem:[%s1001_s11 + $0x68] sm:$0xff] %vm617_vm1, %v542_v22 }
  0xfa   : > { %649 = vst.msk [vmem:[%s1001_s11 + $0xf8] sm:$0xff] %vm617_vm1, %v614_v21  ;;  %v606_v3 = vadd.f32 %v994_v23, %v605_v2 }
  0xfc   : > { %647 = vst.msk [vmem:[%s1001_s11 + $0xe8] sm:$0xff] %vm617_vm1, %v606_v3 }
  0xfd PF: > { %s15_s18 = sadd.s32 1, %s813_s18  }
  0xfe   : > { %p12_p4 = scmp.ge.s32.totalorder %s15_s18, 4  }
 0x100   :  { %14 = sbr.rel (!%p12_p4) target bundleno = 1 (0x1), region = 70 }

// kernel: _lambda_.4
= control target key start
LH: loop header
LB: loop body
LE: loop exit
PB: predicated region body
PF: predicated region fallthrough
CT: control target
= control target key end

     0   :  { %s7835_s30 = smov 0   ;;  %s10452_s0 = inlined_call_operand.vmem [shape: f32[2,16,16,4], index: 0, kind: input, shape index: {}]   ;;  %s10453_s1 = inlined_call_operand.vmem [shape: f32[1,4], index: 1, kind: input, shape index: {}]   ;;  %s10454_s2 = inlined_call_operand.vmem [shape: f32[1,4], index: 2, kind: input, shape index: {}]   ;;  %s10455_s3 = inlined_call_operand.vmem [shape: bf16[9,4,32], index: 3, kind: input, shape index: {}]   ;;  %s10456_s4 = inlined_call_operand.vmem [shape: bf16[9,4,32], index: 4, kind: input, shape index: {}]   ;;  %s10457_s5 = inlined_call_operand.vmem [shape: f32[1,32], index: 5, kind: input, shape index: {}]   ;;  %s10458_s6 = inlined_call_operand.vmem [shape: bf16[32,32], index: 6, kind: input, shape index: {}]   ;;  %s10459_s7 = inlined_call_operand.vmem [shape: f32[1,32], index: 7, kind: input, shape index: {}]   ;;  %s10460_s8 = inlined_call_operand.vmem [shape: f32[2,16,16,32], index: 8, kind: output, shape index: {0}]   ;;  %s10461_s9 = inlined_call_operand.vmem [shape: f32[2,16,16,32], index: 9, kind: output, shape index: {1}]  }
   0x1 LB: > { %s6430_s10 = sadd.s32 4294967295, %s7782_s30   ;;  %p6434_p0 = scmp.ge.s32.totalorder %s7782_s30, 1  ;;  %s7782_s30 = sphi %s7835_s30, %s20_s30  }
   0x2   : > { %p290_p1 = scmp.lt.s32.totalorder %s7782_s30, 3 }
   0x4   : > { %p291_p2 = pnand %p6434_p0, %p290_p1 }
   0x6   : > { %294 = sbr.rel (%p291_p2) target bundleno = 1084 (0x43c), region = 52 }
   0xb   : > { %v778_v0 = vld [vmem:[%s10455_s3] sm:$0x3]  ;;  %vm827_vm0 = vcmask 1041408   ;;  %p331_p3 = scmp.lt.s32.totalorder %s6430_s10, 1  ;;  %vm457_vm1 = vcmask 31744   ;;  %vm460_vm2 = vcmask 25600  }
   0xc   : > { %7747 = vmatprep.subr.msk.bf16.mxu1 %vm827_vm0, %v778_v0  ;;  %v829_v1 = vsel %vm827_vm0, %v778_v0, 0  ;;  %7746 = vmatprep.subr.msk.bf16.mxu0 %vm827_vm0, %v778_v0  ;;  %v7784_v2 = vmov 0.0   ;;  %v8070_v3 = vld [vmem:[%s10455_s3 + $0x2] sm:$0x3]  ;;  %v8075_v4 = vld [vmem:[%s10455_s3 + $0x4] sm:$0x3] }
   0xd   : > { %7745 = vmatpush3.bf16.msra.mxu1 %v829_v1  ;;  %7097 = vmatpush3.bf16.msra.mxu0 %v829_v1  ;;  %s10663_s10 = smov (!%p331_p3, %s6430_s10), 1  ;;  %483 = vst.msk [vmem:[#allocation2 + $0xc0] sm:$0xff] %vm457_vm1, %v7784_v2  ;;  %484 = vst.msk [vmem:[#allocation2 + $0xc8] sm:$0xff] %vm457_vm1, %v7784_v2  ;;  %v8087_v5 = vld [vmem:[%s10453_s1] ss:$0 sm:$0xff]  ;;  %vm6029_vm3 = vcmask 261120  }
   0xe   : > { %485 = vst.msk [vmem:[#allocation2 + $0xd0] sm:$0x3] %vm460_vm2, %v7784_v2  ;;  %461 = vst.msk [vmem:[#allocation2 + $0x10] sm:$0x3] %vm460_vm2, %v7784_v2  ;;  %7748 = vmatprep.subr.msk.bf16.mxu1 %vm827_vm0, %v8070_v3  ;;  %7749 = vmatprep.subr.msk.bf16.mxu0 %vm827_vm0, %v8075_v4  ;;  %s8082_s17 = sshll.u32 %s10663_s10, 8 }
   0xf   : > { %458 = vst.msk [vmem:[#allocation2] sm:$0xff] %vm457_vm1, %v7784_v2  ;;  %459 = vst.msk [vmem:[#allocation2 + $0x8] sm:$0xff] %vm457_vm1, %v7784_v2  ;;  %s8093_s22 = scalar_lea.vmem %s10452_s0, %s8082_s17  ;;  %v8098_v6 = vld [vmem:[%s10454_s2] ss:$0 sm:$0xff]  ;;  %s10142_s25 = scalar_lea.vmem %s10460_s8, %s8082_s17 }
  0x10   : > { %462 = vst.msk [vmem:[#allocation2 + $0x18] sm:$0xff] %vm457_vm1, %v7784_v2  ;;  %463 = vst.msk [vmem:[#allocation2 + $0x20] sm:$0xff] %vm457_vm1, %v7784_v2  ;;  %v361_v7 = vld [vmem:[%s8093_s22 + $0x70] sm:$0xff]  ;;  %v362_v8 = vld [vmem:[%s8093_s22 + $0x78] sm:$0xff]  ;;  %s10351_s10 = scalar_lea.vmem %s10461_s9, %s8082_s17 }
  0x11   : > { %464 = vst.msk [vmem:[#allocation2 + $0x28] sm:$0x3] %vm460_vm2, %v7784_v2  ;;  %467 = vst.msk [vmem:[#allocation2 + $0x40] sm:$0x3] %vm460_vm2, %v7784_v2  ;;  %v363_v9 = vld [vmem:[%s8093_s22 + $0x80] sm:$0xff]  ;;  %v400_v10 = vmul.f32 %v8087_v5, %v361_v7  ;;  %v401_v11 = vmul.f32 %v8087_v5, %v362_v8  ;;  %v364_v12 = vld [vmem:[%s8093_s22 + $0x88] sm:$0xff] }
  0x12   : > { %465 = vst.msk [vmem:[#allocation2 + $0x30] sm:$0xff] %vm457_vm1, %v7784_v2  ;;  %466 = vst.msk [vmem:[#allocation2 + $0x38] sm:$0xff] %vm457_vm1, %v7784_v2  ;;  %v402_v13 = vmul.f32 %v8087_v5, %v363_v9  ;;  %v347_v14 = vld [vmem:[%s8093_s22] sm:$0xff]  ;;  %v348_v15 = vld [vmem:[%s8093_s22 + $0x8] sm:$0xff]  ;;  %v403_v16 = vmul.f32 %v8087_v5, %v364_v12 }
  0x13   : > { %468 = vst.msk [vmem:[#allocation2 + $0x48] sm:$0xff] %vm457_vm1, %v7784_v2  ;;  %469 = vst.msk [vmem:[#allocation2 + $0x50] sm:$0xff] %vm457_vm1, %v7784_v2  ;;  %v386_v17 = vmul.f32 %v8087_v5, %v347_v14  ;;  %v387_v18 = vmul.f32 %v8087_v5, %v348_v15  ;;  %v365_v19 = vld [vmem:[%s8093_s22 + $0x90] sm:$0xff]  ;;  %v439_v20 = vadd.f32 %v8098_v6, %v400_v10  ;;  %v366_v34 = vld [vmem:[%s8093_s22 + $0x98] sm:$0xff] }
  0x14   : > { %470 = vst.msk [vmem:[#allocation2 + $0x58] sm:$0x3] %vm460_vm2, %v7784_v2  ;;  %473 = vst.msk [vmem:[#allocation2 + $0x70] sm:$0x3] %vm460_vm2, %v7784_v2  ;;  %v440_v21 = vadd.f32 %v8098_v6, %v401_v11  ;;  %v8116_v22 = vadd.f32 %v8098_v6, %v402_v13  ;;  %v404_v25 = vmul.f32 %v8087_v5, %v365_v19  ;;  %v367_v35 = vld [vmem:[%s8093_s22 + $0xa0] sm:$0xff]  ;;  %v368_v38 = vld [vmem:[%s8093_s22 + $0xa8] sm:$0xff] }
  0x15   : > { %471 = vst.msk [vmem:[#allocation2 + $0x60] sm:$0xff] %vm457_vm1, %v7784_v2  ;;  %472 = vst.msk [vmem:[#allocation2 + $0x68] sm:$0xff] %vm457_vm1, %v7784_v2  ;;  %v8120_v26 = vadd.f32 %v8098_v6, %v403_v16  ;;  %v425_v28 = vadd.f32 %v8098_v6, %v386_v17  ;;  %v426_v29 = vadd.f32 %v8098_v6, %v387_v18  ;;  %v581_v30 = vmax.f32 %v439_v20, 0.0  ;;  %v349_v39 = vld [vmem:[%s8093_s22 + $0x10] sm:$0xff]  ;;  %v350_v40 = vld [vmem:[%s8093_s22 + $0x18] sm:$0xff] }
  0x16   : > { %474 = vst.msk [vmem:[#allocation2 + $0x78] sm:$0xff] %vm457_vm1, %v7784_v2  ;;  %475 = vst.msk [vmem:[#allocation2 + $0x80] sm:$0xff] %vm457_vm1, %v7784_v2  ;;  %v730_v23 = vld [vmem:[#allocation2] sm:$0xff]  ;;  %v731_v24 = vld [vmem:[#allocation2 + $0x8] sm:$0xff]  ;;  %v582_v31 = vmax.f32 %v440_v21, 0.0  ;;  %v646_v32 = vsub.f32 0.0, %v439_v20  ;;  %v405_v47 = vmul.f32 %v8087_v5, %v366_v34  ;;  %v8138_v48 = vadd.f32 %v8098_v6, %v404_v25 }
  0x17   : > { %476 = vst.msk [vmem:[#allocation2 + $0x88] sm:$0x3] %vm460_vm2, %v7784_v2  ;;  %479 = vst.msk [vmem:[#allocation2 + $0xa0] sm:$0x3] %vm460_vm2, %v7784_v2  ;;  %v762_v27 = vpack.c.bf16 %v731_v24, %v730_v23  ;;  %v647_v33 = vsub.f32 0.0, %v440_v21  ;;  %v583_v36 = vmax.f32 %v8116_v22, 0.0  ;;  %v406_v49 = vmul.f32 %v8087_v5, %v367_v35 }
  0x18   : > { %477 = vst.msk [vmem:[#allocation2 + $0x90] sm:$0xff] %vm457_vm1, %v7784_v2  ;;  %478 = vst.msk [vmem:[#allocation2 + $0x98] sm:$0xff] %vm457_vm1, %v7784_v2  ;;  %v584_v37 = vmax.f32 %v8120_v26, 0.0  ;;  %v678_v41 = vmax.f32 %v646_v32, 0.0  ;;  %v567_v43 = vmax.f32 %v425_v28, 0.0  ;;  %v568_v44 = vmax.f32 %v426_v29, 0.0 }
  0x19   : > { %480 = vst.msk [vmem:[#allocation2 + $0xa8] sm:$0xff] %vm457_vm1, %v7784_v2  ;;  %481 = vst.msk [vmem:[#allocation2 + $0xb0] sm:$0xff] %vm457_vm1, %v7784_v2  ;;  %7098 = vmatprep.mubr.msk.bf16.mxu0 %vm457_vm1, %v762_v27  ;;  %v679_v42 = vmax.f32 %v647_v33, 0.0  ;;  %v632_v45 = vsub.f32 0.0, %v425_v28  ;;  %v633_v46 = vsub.f32 0.0, %v426_v29  ;;  %v407_v50 = vmul.f32 %v8087_v5, %v368_v38  ;;  %v351_v53 = vld [vmem:[%s8093_s22 + $0x20] sm:$0xff] }
  0x1a   : > { %482 = vst.msk [vmem:[#allocation2 + $0xb8] sm:$0x3] %vm460_vm2, %v7784_v2  ;;  %488 = vst.msk [vmem:[#allocation2 + $0xe8] sm:$0x3] %vm460_vm2, %v7784_v2  ;;  %v388_v51 = vmul.f32 %v8087_v5, %v349_v39  ;;  %v389_v52 = vmul.f32 %v8087_v5, %v350_v40  ;;  %v352_v54 = vld [vmem:[%s8093_s22 + $0x28] sm:$0xff]  ;;  %v369_v55 = vld [vmem:[%s8093_s22 + $0xb0] sm:$0xff]  ;;  %v8152_v58 = vadd.f32 %v8098_v6, %v405_v47 }
  0x1b   : > { %486 = vst.msk [vmem:[#allocation2 + $0xd8] sm:$0xff] %vm457_vm1, %v7784_v2  ;;  %487 = vst.msk [vmem:[#allocation2 + $0xe0] sm:$0xff] %vm457_vm1, %v7784_v2  ;;  %v664_v56 = vmax.f32 %v632_v45, 0.0  ;;  %v665_v57 = vmax.f32 %v633_v46, 0.0  ;;  %v585_v59 = vmax.f32 %v8138_v48, 0.0  ;;  %v8156_v60 = vadd.f32 %v8098_v6, %v406_v49  ;;  %v370_v7 = vld [vmem:[%s8093_s22 + $0xb8] sm:$0xff] }
  0x1c   : > { %489 = vst.msk [vmem:[#allocation2 + $0xf0] sm:$0xff] %vm457_vm1, %v7784_v2  ;;  %490 = vst.msk [vmem:[#allocation2 + $0xf8] sm:$0xff] %vm457_vm1, %v7784_v2  ;;  %v8159_v61 = vadd.f32 %v8098_v6, %v407_v50  ;;  %v8162_v62 = vadd.f32 %v8098_v6, %v388_v51  ;;  %v8165_v63 = vadd.f32 %v8098_v6, %v389_v52  ;;  %v586_v0 = vmax.f32 %v8152_v58, 0.0  ;;  %v371_v9 = vld [vmem:[%s8093_s22 + $0xc0] sm:$0xff]  ;;  %v372_v12 = vld [vmem:[%s8093_s22 + $0xc8] sm:$0xff] }
  0x1d   : > { %491 = vst.msk [vmem:[#allocation2 + $0x100] sm:$0x3] %vm460_vm2, %v7784_v2  ;;  %494 = vst.msk [vmem:[#allocation2 + $0x118] sm:$0x3] %vm460_vm2, %v7784_v2  ;;  %v390_v1 = vmul.f32 %v8087_v5, %v351_v53  ;;  %v408_v8 = vmul.f32 %v8087_v5, %v369_v55  ;;  %v587_v10 = vmax.f32 %v8156_v60, 0.0  ;;  %v353_v13 = vld [vmem:[%s8093_s22 + $0x30] sm:$0xff]  ;;  %v409_v25 = vmul.f32 %v8087_v5, %v370_v7 }
  0x1e   : > { %492 = vst.msk [vmem:[#allocation2 + $0x108] sm:$0xff] %vm457_vm1, %v7784_v2  ;;  %493 = vst.msk [vmem:[#allocation2 + $0x110] sm:$0xff] %vm457_vm1, %v7784_v2  ;;  %v588_v11 = vmax.f32 %v8159_v61, 0.0  ;;  %v569_v16 = vmax.f32 %v8162_v62, 0.0  ;;  %v570_v17 = vmax.f32 %v8165_v63, 0.0  ;;  %v354_v20 = vld [vmem:[%s8093_s22 + $0x38] sm:$0xff]  ;;  %v410_v28 = vmul.f32 %v8087_v5, %v371_v9 }
  0x1f   : > { %495 = vst.msk [vmem:[#allocation2 + $0x120] sm:$0xff] %vm457_vm1, %v7784_v2  ;;  %496 = vst.msk [vmem:[#allocation2 + $0x128] sm:$0xff] %vm457_vm1, %v7784_v2  ;;  %v8184_v18 = vadd.f32 %v8098_v6, %v390_v1  ;;  %v8194_v27 = vadd.f32 %v8098_v6, %v408_v8  ;;  %v355_v29 = vld [vmem:[%s8093_s22 + $0x40] sm:$0xff]  ;;  %v8211_v38 = vadd.f32 %v8098_v6, %v409_v25  ;;  %v373_v39 = vld [vmem:[%s8093_s22 + $0xd0] sm:$0xff]  ;;  %v1423_v40 = vsel %vm827_vm0, %v8075_v4, 0 }
  0x20   : > { %497 = vst.msk [vmem:[#allocation2 + $0x130] sm:$0x3] %vm460_vm2, %v7784_v2  ;;  %500 = vst.msk [vmem:[#allocation2 + $0x148] sm:$0x3] %vm460_vm2, %v7784_v2  ;;  %v392_v4 = vmul.f32 %v8087_v5, %v353_v13  ;;  %v374_v45 = vld [vmem:[%s8093_s22 + $0xd8] sm:$0xff]  ;;  %v394_v50 = vmul.f32 %v8087_v5, %v355_v29  ;;  %v412_v55 = vmul.f32 %v8087_v5, %v373_v39  ;;  %v376_v7 = vld [vmem:[%s8093_s22 + $0xe8] sm:$0xff] }
  0x21   : > { %498 = vst.msk [vmem:[#allocation2 + $0x138] sm:$0xff] %vm457_vm1, %v7784_v2  ;;  %499 = vst.msk [vmem:[#allocation2 + $0x140] sm:$0xff] %vm457_vm1, %v7784_v2  ;;  %v571_v34 = vmax.f32 %v8184_v18, 0.0  ;;  %v8236_v46 = vld [vmem:[%s10455_s3 + $0x8] sm:$0x3]  ;;  %v590_v49 = vmax.f32 %v8211_v38, 0.0 }
  0x22   : > { %501 = vst.msk [vmem:[#allocation2 + $0x150] sm:$0xff] %vm457_vm1, %v7784_v2  ;;  %502 = vst.msk [vmem:[#allocation2 + $0x158] sm:$0xff] %vm457_vm1, %v7784_v2  ;;  %v357_v8 = vld [vmem:[%s8093_s22 + $0x50] sm:$0xff] }
  0x23   : > { %503 = vst.msk [vmem:[#allocation2 + $0x160] sm:$0x3] %vm460_vm2, %v7784_v2  ;;  %506 = vst.msk [vmem:[#allocation2 + $0x178] sm:$0x3] %vm460_vm2, %v7784_v2 }
  0x24   : > { %504 = vst.msk [vmem:[#allocation2 + $0x168] sm:$0xff] %vm457_vm1, %v7784_v2  ;;  %505 = vst.msk [vmem:[#allocation2 + $0x170] sm:$0xff] %vm457_vm1, %v7784_v2 }
  0x25   : > { %507 = vst.msk [vmem:[#allocation2 + $0x180] sm:$0xff] %vm457_vm1, %v7784_v2  ;;  %508 = vst.msk [vmem:[#allocation2 + $0x188] sm:$0xff] %vm457_vm1, %v7784_v2 }
  0x26   : > { %509 = vst.msk [vmem:[#allocation2 + $0x190] sm:$0x3] %vm460_vm2, %v7784_v2  ;;  %512 = vst.msk [vmem:[#allocation2 + $0x1a8] sm:$0x3] %vm460_vm2, %v7784_v2 }
  0x27   : > { %510 = vst.msk [vmem:[#allocation2 + $0x198] sm:$0xff] %vm457_vm1, %v7784_v2  ;;  %511 = vst.msk [vmem:[#allocation2 + $0x1a0] sm:$0xff] %vm457_vm1, %v7784_v2 }
  0x28   : > { %513 = vst.msk [vmem:[#allocation3] sm:$0xff] %vm457_vm1, %v7784_v2  ;;  %514 = vst.msk [vmem:[#allocation3 + $0x8] sm:$0xff] %vm457_vm1, %v7784_v2 }
  0x29   : > { %515 = vst.msk [vmem:[#allocation3 + $0x10] sm:$0x3] %vm460_vm2, %v7784_v2  ;;  %518 = vst.msk [vmem:[#allocation3 + $0x28] sm:$0x3] %vm460_vm2, %v7784_v2 }
  0x2a   : > { %516 = vst.msk [vmem:[#allocation3 + $0x18] sm:$0xff] %vm457_vm1, %v7784_v2  ;;  %517 = vst.msk [vmem:[#allocation3 + $0x20] sm:$0xff] %vm457_vm1, %v7784_v2 }
  0x2b   : > { %519 = vst.msk [vmem:[#allocation3 + $0x30] sm:$0xff] %vm457_vm1, %v7784_v2  ;;  %520 = vst.msk [vmem:[#allocation3 + $0x38] sm:$0xff] %vm457_vm1, %v7784_v2 }
  0x2c   : > { %521 = vst.msk [vmem:[#allocation3 + $0x40] sm:$0x3] %vm460_vm2, %v7784_v2  ;;  %524 = vst.msk [vmem:[#allocation3 + $0x58] sm:$0x3] %vm460_vm2, %v7784_v2 }
  0x2d   : > { %522 = vst.msk [vmem:[#allocation3 + $0x48] sm:$0xff] %vm457_vm1, %v7784_v2  ;;  %523 = vst.msk [vmem:[#allocation3 + $0x50] sm:$0xff] %vm457_vm1, %v7784_v2 }
  0x2e   : > { %525 = vst.msk [vmem:[#allocation3 + $0x60] sm:$0xff] %vm457_vm1, %v7784_v2  ;;  %526 = vst.msk [vmem:[#allocation3 + $0x68] sm:$0xff] %vm457_vm1, %v7784_v2 }
  0x2f   : > { %527 = vst.msk [vmem:[#allocation3 + $0x70] sm:$0x3] %vm460_vm2, %v7784_v2  ;;  %530 = vst.msk [vmem:[#allocation3 + $0x88] sm:$0x3] %vm460_vm2, %v7784_v2 }
  0x30   : > { %528 = vst.msk [vmem:[#allocation3 + $0x78] sm:$0xff] %vm457_vm1, %v7784_v2  ;;  %529 = vst.msk [vmem:[#allocation3 + $0x80] sm:$0xff] %vm457_vm1, %v7784_v2 }
  0x31   : > { %531 = vst.msk [vmem:[#allocation3 + $0x90] sm:$0xff] %vm457_vm1, %v7784_v2  ;;  %532 = vst.msk [vmem:[#allocation3 + $0x98] sm:$0xff] %vm457_vm1, %v7784_v2 }
  0x32   : > { %533 = vst.msk [vmem:[#allocation3 + $0xa0] sm:$0x3] %vm460_vm2, %v7784_v2  ;;  %536 = vst.msk [vmem:[#allocation3 + $0xb8] sm:$0x3] %vm460_vm2, %v7784_v2 }
  0x33   : > { %534 = vst.msk [vmem:[#allocation3 + $0xa8] sm:$0xff] %vm457_vm1, %v7784_v2  ;;  %535 = vst.msk [vmem:[#allocation3 + $0xb0] sm:$0xff] %vm457_vm1, %v7784_v2 }
  0x34   : > { %537 = vst.msk [vmem:[#allocation3 + $0xc0] sm:$0xff] %vm457_vm1, %v7784_v2  ;;  %538 = vst.msk [vmem:[#allocation3 + $0xc8] sm:$0xff] %vm457_vm1, %v7784_v2 }
  0x35   : > { %539 = vst.msk [vmem:[#allocation3 + $0xd0] sm:$0x3] %vm460_vm2, %v7784_v2  ;;  %542 = vst.msk [vmem:[#allocation3 + $0xe8] sm:$0x3] %vm460_vm2, %v7784_v2 }
  0x36   : > { %540 = vst.msk [vmem:[#allocation3 + $0xd8] sm:$0xff] %vm457_vm1, %v7784_v2  ;;  %541 = vst.msk [vmem:[#allocation3 + $0xe0] sm:$0xff] %vm457_vm1, %v7784_v2 }
  0x37   : > { %543 = vst.msk [vmem:[#allocation3 + $0xf0] sm:$0xff] %vm457_vm1, %v7784_v2  ;;  %544 = vst.msk [vmem:[#allocation3 + $0xf8] sm:$0xff] %vm457_vm1, %v7784_v2 }
  0x38   : > { %545 = vst.msk [vmem:[#allocation3 + $0x100] sm:$0x3] %vm460_vm2, %v7784_v2  ;;  %548 = vst.msk [vmem:[#allocation3 + $0x118] sm:$0x3] %vm460_vm2, %v7784_v2 }
  0x39   : > { %546 = vst.msk [vmem:[#allocation3 + $0x108] sm:$0xff] %vm457_vm1, %v7784_v2  ;;  %547 = vst.msk [vmem:[#allocation3 + $0x110] sm:$0xff] %vm457_vm1, %v7784_v2 }
  0x3a   : > { %549 = vst.msk [vmem:[#allocation3 + $0x120] sm:$0xff] %vm457_vm1, %v7784_v2  ;;  %550 = vst.msk [vmem:[#allocation3 + $0x128] sm:$0xff] %vm457_vm1, %v7784_v2 }
  0x3b   : > { %551 = vst.msk [vmem:[#allocation3 + $0x130] sm:$0x3] %vm460_vm2, %v7784_v2  ;;  %554 = vst.msk [vmem:[#allocation3 + $0x148] sm:$0x3] %vm460_vm2, %v7784_v2 }
  0x3c   : > { %552 = vst.msk [vmem:[#allocation3 + $0x138] sm:$0xff] %vm457_vm1, %v7784_v2  ;;  %553 = vst.msk [vmem:[#allocation3 + $0x140] sm:$0xff] %vm457_vm1, %v7784_v2 }
  0x3d   : > { %555 = vst.msk [vmem:[#allocation3 + $0x150] sm:$0xff] %vm457_vm1, %v7784_v2  ;;  %556 = vst.msk [vmem:[#allocation3 + $0x158] sm:$0xff] %vm457_vm1, %v7784_v2 }
  0x3e   : > { %557 = vst.msk [vmem:[#allocation3 + $0x160] sm:$0x3] %vm460_vm2, %v7784_v2  ;;  %560 = vst.msk [vmem:[#allocation3 + $0x178] sm:$0x3] %vm460_vm2, %v7784_v2 }
  0x3f   : > { %558 = vst.msk [vmem:[#allocation3 + $0x168] sm:$0xff] %vm457_vm1, %v7784_v2  ;;  %559 = vst.msk [vmem:[#allocation3 + $0x170] sm:$0xff] %vm457_vm1, %v7784_v2 }
  0x40   : > { %561 = vst.msk [vmem:[#allocation3 + $0x180] sm:$0xff] %vm457_vm1, %v7784_v2  ;;  %562 = vst.msk [vmem:[#allocation3 + $0x188] sm:$0xff] %vm457_vm1, %v7784_v2 }
  0x41   : > { %563 = vst.msk [vmem:[#allocation3 + $0x190] sm:$0x3] %vm460_vm2, %v7784_v2  ;;  %566 = vst.msk [vmem:[#allocation3 + $0x1a8] sm:$0x3] %vm460_vm2, %v7784_v2 }
  0x42   : > { %564 = vst.msk [vmem:[#allocation3 + $0x198] sm:$0xff] %vm457_vm1, %v7784_v2  ;;  %565 = vst.msk [vmem:[#allocation3 + $0x1a0] sm:$0xff] %vm457_vm1, %v7784_v2  ;;  %v391_v2 = vmul.f32 %v8087_v5, %v352_v54  ;;  %v8249_v54 = vadd.f32 %v8098_v6, %v392_v4 }
  0x43   : > { %614 = vst.msk [vmem:[#allocation2 + $0xc1] sm:$0xff] %vm457_vm1, %v581_v30  ;;  %615 = vst.msk [vmem:[#allocation2 + $0xc9] sm:$0xff] %vm457_vm1, %v582_v31  ;;  %v1129_v31 = vsel %vm827_vm0, %v8070_v3, 0  ;;  %v589_v3 = vmax.f32 %v8194_v27, 0.0 }
  0x44   : > { %616 = vst.msk [vmem:[#allocation2 + $0xd9] sm:$0xff] %vm457_vm1, %v583_v36  ;;  %617 = vst.msk [vmem:[#allocation2 + $0xe1] sm:$0xff] %vm457_vm1, %v584_v37  ;;  %v8187_v19 = vadd.f32 %v8098_v6, %v391_v2  ;;  %v356_v36 = vld [vmem:[%s8093_s22 + $0x48] sm:$0xff]  ;;  %v413_v2 = vmul.f32 %v8087_v5, %v374_v45  ;;  %v573_v13 = vmax.f32 %v8249_v54, 0.0 }
  0x45   : > { %10490 = vst [vmem:[#allocation4_spill] sm:$0xff] %v8138_v48  ;;  %711 = vst.msk [vmem:[#allocation3 + $0xc1] sm:$0xff] %vm457_vm1, %v678_v41  ;;  %v8220_v41 = vld [vmem:[%s10455_s3 + $0x6] sm:$0x3]  ;;  %v395_v51 = vmul.f32 %v8087_v5, %v356_v36  ;;  %v360_v36 = vld [vmem:[%s8093_s22 + $0x68] sm:$0xff] }
  0x46   : > { %712 = vst.msk [vmem:[#allocation3 + $0xc9] sm:$0xff] %vm457_vm1, %v679_v42  ;;  %600 = vst.msk [vmem:[#allocation2 + $0x19] sm:$0xff] %vm457_vm1, %v567_v43  ;;  %v572_v35 = vmax.f32 %v8187_v19, 0.0  ;;  %v411_v42 = vmul.f32 %v8087_v5, %v372_v12  ;;  %v8228_v43 = vadd.f32 %v8098_v6, %v410_v28  ;;  %v8289_v28 = vadd.f32 %v8098_v6, %v412_v55 }
  0x47   : > { %601 = vst.msk [vmem:[#allocation2 + $0x21] sm:$0xff] %vm457_vm1, %v568_v44  ;;  %10491 = vst [vmem:[#allocation5_spill] sm:$0xff] %v8152_v58  ;;  %v393_v44 = vmul.f32 %v8087_v5, %v354_v20  ;;  %v8263_v1 = vadd.f32 %v8098_v6, %v395_v51 }
  0x48   : > { %10492 = vst [vmem:[#allocation6_spill] sm:$0xff] %v8156_v60  ;;  %10493 = vst [vmem:[#allocation7_spill] sm:$0xff] %v8159_v61  ;;  %v8245_v52 = vadd.f32 %v8098_v6, %v411_v42  ;;  %v591_v53 = vmax.f32 %v8228_v43, 0.0 }
  0x49   : > { %697 = vst.msk [vmem:[#allocation3 + $0x19] sm:$0xff] %vm457_vm1, %v664_v56  ;;  %698 = vst.msk [vmem:[#allocation3 + $0x21] sm:$0xff] %vm457_vm1, %v665_v57  ;;  %v375_v56 = vld [vmem:[%s8093_s22 + $0xe0] sm:$0xff] }
  0x4a   : > { %618 = vst.msk [vmem:[#allocation2 + $0xf1] sm:$0xff] %vm457_vm1, %v585_v59  ;;  %v746_v14 = vld [vmem:[#allocation2 + $0xc0] sm:$0xff]  ;;  %v747_v15 = vld [vmem:[#allocation2 + $0xc8] sm:$0xff]  ;;  %619 = vst.msk [vmem:[#allocation2 + $0xf9] sm:$0xff] %vm457_vm1, %v586_v0  ;;  %v8257_v59 = vadd.f32 %v8098_v6, %v393_v44  ;;  %v8260_v0 = vadd.f32 %v8098_v6, %v394_v50  ;;  %v592_v12 = vmax.f32 %v8245_v52, 0.0 }
  0x4b   : > { %v770_v21 = vpack.c.bf16 %v747_v15, %v746_v14  ;;  %v748_v23 = vld [vmem:[#allocation2 + $0xd8] sm:$0xff]  ;;  %v749_v24 = vld [vmem:[#allocation2 + $0xe0] sm:$0xff]  ;;  %620 = vst.msk [vmem:[#allocation2 + $0x109] sm:$0xff] %vm457_vm1, %v587_v10  ;;  %621 = vst.msk [vmem:[#allocation2 + $0x111] sm:$0xff] %vm457_vm1, %v588_v11 }
  0x4c   : > { %10494 = vst [vmem:[#allocation8_spill] sm:$0xff] %v8194_v27  ;;  %v8198_v30 = vpack.c.bf16 %v749_v24, %v748_v23  ;;  %602 = vst.msk [vmem:[#allocation2 + $0x31] sm:$0xff] %vm457_vm1, %v569_v16  ;;  %v358_v14 = vld [vmem:[%s8093_s22 + $0x58] sm:$0xff]  ;;  %v574_v20 = vmax.f32 %v8257_v59, 0.0  ;;  %v576_v23 = vmax.f32 %v8263_v1, 0.0  ;;  %v359_v24 = vld [vmem:[%s8093_s22 + $0x60] sm:$0xff] }
  0x4d   : > { %v732_v32 = vld [vmem:[#allocation2 + $0x18] sm:$0xff]  ;;  %603 = vst.msk [vmem:[#allocation2 + $0x39] sm:$0xff] %vm457_vm1, %v570_v17  ;;  %7114 = vmatprep.mubr.msk.bf16.mxu1 %vm457_vm1, %v770_v21  ;;  %10495 = vst [vmem:[#allocation9_spill] sm:$0xff] %v8211_v38  ;;  %v575_v21 = vmax.f32 %v8260_v0, 0.0  ;;  %v397_v42 = vmul.f32 %v8087_v5, %v358_v14  ;;  %v398_v4 = vmul.f32 %v8087_v5, %v359_v24 }
  0x4e   : > { %v733_v33 = vld [vmem:[#allocation2 + $0x20] sm:$0xff]  ;;  %7115 = vmatmul.mubr.msk.bf16.vlgmr.msra.gmra.mxu1 %vm457_vm1, %v8198_v30  ;;  %604 = vst.msk [vmem:[#allocation2 + $0x49] sm:$0xff] %vm457_vm1, %v571_v34  ;;  %605 = vst.msk [vmem:[#allocation2 + $0x51] sm:$0xff] %vm457_vm1, %v572_v35  ;;  %v415_v34 = vmul.f32 %v8087_v5, %v376_v7  ;;  %v396_v35 = vmul.f32 %v8087_v5, %v357_v8 }
  0x4f   : > { %v8208_v37 = vpack.c.bf16 %v733_v33, %v732_v32  ;;  %10496 = vst [vmem:[#allocation10_spill] sm:$0xff] %v8228_v43  ;;  %7131 = vmatpush3.bf16.msra.mxu1 %v1129_v31  ;;  %622 = vst.msk [vmem:[#allocation2 + $0x121] sm:$0xff] %vm457_vm1, %v589_v3  ;;  %v8295_v32 = vadd.f32 %v8098_v6, %v413_v2  ;;  %v414_v33 = vmul.f32 %v8087_v5, %v375_v56 }
  0x50   : > { %10497 = vst [vmem:[#allocation11_spill] sm:$0xff] %v8245_v52  ;;  %7750 = vmatprep.subr.msk.bf16.mxu1 %vm827_vm0, %v8220_v41  ;;  %623 = vst.msk [vmem:[#allocation2 + $0x129] sm:$0xff] %vm457_vm1, %v590_v49  ;;  %v8318_v49 = vadd.f32 %v8098_v6, %v396_v35  ;;  %v8324_v51 = vadd.f32 %v8098_v6, %v397_v42  ;;  %v8328_v55 = vadd.f32 %v8098_v6, %v398_v4  ;;  %v1031_v35 = vld [vmem:[#allocation2 + $0x9] sm:$0xff] }
  0x51   : > { %7099 = vmatmul.mubr.msk.bf16.vlgmr.msra.gmra.mxu0 %vm457_vm1, %v8208_v37  ;;  %v750_v47 = vld [vmem:[#allocation2 + $0xf0] sm:$0xff]  ;;  %v751_v57 = vld [vmem:[#allocation2 + $0xf8] sm:$0xff]  ;;  %624 = vst.msk [vmem:[#allocation2 + $0x139] sm:$0xff] %vm457_vm1, %v591_v53  ;;  %625 = vst.msk [vmem:[#allocation2 + $0x141] sm:$0xff] %vm457_vm1, %v592_v12  ;;  %v594_v44 = vmax.f32 %v8295_v32, 0.0  ;;  %v8312_v45 = vadd.f32 %v8098_v6, %v414_v33  ;;  %v399_v53 = vmul.f32 %v8087_v5, %v360_v36 }
  0x52   : > { %7165 = vmatpush3.bf16.msra.mxu0 %v1423_v40  ;;  %v8270_v9 = vpack.c.bf16 %v751_v57, %v750_v47  ;;  %v752_v10 = vld [vmem:[#allocation2 + $0x108] sm:$0xff]  ;;  %v753_v11 = vld [vmem:[#allocation2 + $0x110] sm:$0xff]  ;;  %606 = vst.msk [vmem:[#allocation2 + $0x61] sm:$0xff] %vm457_vm1, %v573_v13  ;;  %10498 = vst [vmem:[#allocation12_spill] sm:$0xff] %v8289_v28  ;;  %v593_v40 = vmax.f32 %v8289_v28, 0.0  ;;  %v8315_v47 = vadd.f32 %v8098_v6, %v415_v34  ;;  %v577_v8 = vmax.f32 %v8318_v49, 0.0 }
  0x53   : > { %7751 = vmatprep.subr.msk.bf16.mxu0 %vm827_vm0, %v8236_v46  ;;  %v8276_v15 = vpack.c.bf16 %v753_v11, %v752_v10  ;;  %v734_v16 = vld [vmem:[#allocation2 + $0x30] sm:$0xff]  ;;  %607 = vst.msk [vmem:[#allocation2 + $0x69] sm:$0xff] %vm457_vm1, %v574_v20  ;;  %608 = vst.msk [vmem:[#allocation2 + $0x79] sm:$0xff] %vm457_vm1, %v575_v21  ;;  %v595_v2 = vmax.f32 %v8312_v45, 0.0  ;;  %v578_v10 = vmax.f32 %v8324_v51, 0.0  ;;  %v8338_v11 = vadd.f32 %v8098_v6, %v399_v53  ;;  %v1030_v34 = vld [vmem:[#allocation2 + $0x1] sm:$0xff] }
  0x54   : > { %v735_v17 = vld [vmem:[#allocation2 + $0x38] sm:$0xff]  ;;  %7118 = vmatprep.mubr.msk.bf16.mxu1 %vm457_vm1, %v8270_v9  ;;  %609 = vst.msk [vmem:[#allocation2 + $0x81] sm:$0xff] %vm457_vm1, %v576_v23  ;;  %10499 = vst [vmem:[#allocation13_spill] sm:$0xff] %v8295_v32  ;;  %v596_v7 = vmax.f32 %v8315_v47, 0.0  ;;  %v579_v14 = vmax.f32 %v8328_v55, 0.0  ;;  %v1325_v4 = vld [vmem:[#allocation2 + $0xa] sm:$0xff] }
  0x55   : > { %v8284_v25 = vpack.c.bf16 %v735_v17, %v734_v16  ;;  %v736_v29 = vld [vmem:[#allocation2 + $0x48] sm:$0xff]  ;;  %v737_v31 = vld [vmem:[#allocation2 + $0x50] sm:$0xff]  ;;  %10500 = vst [vmem:[#allocation14_spill] sm:$0xff] %v8312_v45  ;;  %10501 = vst [vmem:[#allocation15_spill] sm:$0xff] %v8315_v47  ;;  %v580_v23 = vmax.f32 %v8338_v11, 0.0 }
  0x56   : > { %7119 = vmatmul.mubr.msk.bf16.gmra.mxu1 %vm457_vm1, %v8276_v15  ;;  %v8305_v3 = vpack.c.bf16 %v737_v31, %v736_v29  ;;  %v754_v39 = vld [vmem:[#allocation2 + $0x120] sm:$0xff]  ;;  %626 = vst.msk [vmem:[#allocation2 + $0x151] sm:$0xff] %vm457_vm1, %v593_v40  ;;  %627 = vst.msk [vmem:[#allocation2 + $0x159] sm:$0xff] %vm457_vm1, %v594_v44  ;;  %v1052_v52 = vld [vmem:[#allocation2 + $0x109] sm:$0xff] }
  0x57   : > { %7102 = vmatprep.mubr.msk.bf16.mxu0 %vm457_vm1, %v8284_v25  ;;  %v755_v50 = vld [vmem:[#allocation2 + $0x128] sm:$0xff]  ;;  %628 = vst.msk [vmem:[#allocation2 + $0x169] sm:$0xff] %vm457_vm1, %v595_v2  ;;  %629 = vst.msk [vmem:[#allocation2 + $0x171] sm:$0xff] %vm457_vm1, %v596_v7  ;;  %v1048_v47 = vld [vmem:[#allocation2 + $0xd9] sm:$0xff] }
  0x58   : > { %v8330_v56 = vpack.c.bf16 %v755_v50, %v754_v39  ;;  %v756_v57 = vld [vmem:[#allocation2 + $0x138] sm:$0xff]  ;;  %v757_v12 = vld [vmem:[#allocation2 + $0x140] sm:$0xff]  ;;  %610 = vst.msk [vmem:[#allocation2 + $0x91] sm:$0xff] %vm457_vm1, %v577_v8  ;;  %611 = vst.msk [vmem:[#allocation2 + $0x99] sm:$0xff] %vm457_vm1, %v578_v10 }
  0x59   : > { %7103 = vmatmul.mubr.msk.bf16.gmra.mxu0 %vm457_vm1, %v8305_v3  ;;  %v738_v13 = vld [vmem:[#allocation2 + $0x60] sm:$0xff]  ;;  %v8345_v16 = vpack.c.bf16 %v757_v12, %v756_v57  ;;  %612 = vst.msk [vmem:[#allocation2 + $0xa9] sm:$0xff] %vm457_vm1, %v579_v14  ;;  %613 = vst.msk [vmem:[#allocation2 + $0xb1] sm:$0xff] %vm457_vm1, %v580_v23  ;;  %v1062_v57 = vpack.c.bf16 %v1031_v35, %v1030_v34  ;;  %v1053_v43 = vld [vmem:[#allocation2 + $0x111] sm:$0xff] }
  0x5a   : > { %7122 = vmatprep.mubr.msk.bf16.mxu1 %vm457_vm1, %v8330_v56  ;;  %v739_v17 = vld [vmem:[#allocation2 + $0x68] sm:$0xff]  ;;  %v740_v20 = vld [vmem:[#allocation2 + $0x78] sm:$0xff] }
  0x5b   : > { %v741_v21 = vld [vmem:[#allocation2 + $0x80] sm:$0xff]  ;;  %v8350_v24 = vpack.c.bf16 %v739_v17, %v738_v13  ;;  %v1034_v17 = vld [vmem:[#allocation2 + $0x31] sm:$0xff] }
  0x5c   : > { %v8352_v29 = vpack.c.bf16 %v741_v21, %v740_v20  ;;  %v1324_v39 = vld [vmem:[#allocation2 + $0x2] sm:$0xff]  ;;  %v1032_v13 = vld [vmem:[#allocation2 + $0x19] sm:$0xff]  ;;  %v377_v21 = vld [vmem:[%s8093_s22 + $0xf0] sm:$0xff] }
  0x5d   : > { %7106 = vmatprep.mubr.msk.bf16.mxu0 %vm457_vm1, %v8350_v24  ;;  %v758_v31 = vld [vmem:[#allocation2 + $0x150] sm:$0xff]  ;;  %v759_v33 = vld [vmem:[#allocation2 + $0x158] sm:$0xff]  ;;  %v1356_v10 = vpack.c.bf16 %v1325_v4, %v1324_v39  ;;  %v1033_v14 = vld [vmem:[#allocation2 + $0x21] sm:$0xff]  ;;  %v416_v34 = vmul.f32 %v8087_v5, %v377_v21 }
  0x5e   : > { %7123 = vmatmul.mubr.msk.bf16.gmra.mxu1 %vm457_vm1, %v8345_v16  ;;  %v8362_v36 = vpack.c.bf16 %v759_v33, %v758_v31  ;;  %v760_v40 = vld [vmem:[#allocation2 + $0x168] sm:$0xff]  ;;  %v761_v42 = vld [vmem:[#allocation2 + $0x170] sm:$0xff]  ;;  %v1035_v20 = vld [vmem:[#allocation2 + $0x39] sm:$0xff]  ;;  %v8383_v35 = vpack.c.bf16 %v1033_v14, %v1032_v13 }
  0x5f   : > { %v8366_v44 = vpack.c.bf16 %v761_v42, %v760_v40  ;;  %v742_v50 = vld [vmem:[#allocation2 + $0x90] sm:$0xff]  ;;  %v743_v53 = vld [vmem:[#allocation2 + $0x98] sm:$0xff]  ;;  %v1327_v31 = vld [vmem:[#allocation2 + $0x22] sm:$0xff]  ;;  %v8386_v4 = vpack.c.bf16 %v1035_v20, %v1034_v17 }
  0x60   : > { %7126 = vmatprep.mubr.msk.bf16.mxu1 %vm457_vm1, %v8362_v36  ;;  %v8368_v2 = vpack.c.bf16 %v743_v53, %v742_v50  ;;  %v744_v7 = vld [vmem:[#allocation2 + $0xa8] sm:$0xff]  ;;  %v745_v8 = vld [vmem:[#allocation2 + $0xb0] sm:$0xff]  ;;  %v1326_v23 = vld [vmem:[#allocation2 + $0x1a] sm:$0xff]  ;;  %v8389_v50 = vadd.f32 %v8098_v6, %v416_v34  ;;  %v1717_v53 = vsel %vm827_vm0, %v8220_v41, 0  ;;  %v2011_v41 = vsel %vm827_vm0, %v8236_v46, 0 }
  0x61   : > { %7107 = vmatmul.mubr.msk.bf16.gmra.mxu0 %vm457_vm1, %v8352_v29  ;;  %v8374_v12 = vpack.c.bf16 %v745_v8, %v744_v7  ;;  %v378_v33 = vld [vmem:[%s8093_s22 + $0xf8] sm:$0xff]  ;;  %v8417_v17 = vld [vmem:[%s10455_s3 + $0xc] sm:$0x3]  ;;  %v1038_v20 = vld [vmem:[#allocation2 + $0x61] sm:$0xff] }
  0x62   : > { %7110 = vmatprep.mubr.msk.bf16.mxu0 %vm457_vm1, %v8368_v2  ;;  %v1328_v39 = vld [vmem:[#allocation2 + $0x32] sm:$0xff]  ;;  %v1329_v40 = vld [vmem:[#allocation2 + $0x3a] sm:$0xff]  ;;  %v417_v42 = vmul.f32 %v8087_v5, %v378_v33  ;;  %10502 = vst [vmem:[#allocation16_spill] sm:$0xff] %v8389_v50  ;;  %v597_v5 = vmax.f32 %v8389_v50, 0.0  ;;  %v1039_v46 = vld [vmem:[#allocation2 + $0x69] sm:$0xff] }
  0x63   : > { %v8398_v8 = vpack.c.bf16 %v1329_v40, %v1328_v39  ;;  %v1037_v14 = vld [vmem:[#allocation2 + $0x51] sm:$0xff]  ;;  %v1332_v33 = vld [vmem:[#allocation2 + $0x62] sm:$0xff]  ;;  %v8430_v39 = vpack.c.bf16 %v1039_v46, %v1038_v20 }
  0x64   : > { %v8396_v7 = vadd.f32 %v8098_v6, %v417_v42  ;;  %v1036_v6 = vld [vmem:[#allocation2 + $0x49] sm:$0xff]  ;;  %630 = vst.msk [vmem:[#allocation2 + $0x181] sm:$0xff] %vm457_vm1, %v597_v5  ;;  %v1041_v5 = vld [vmem:[#allocation2 + $0x81] sm:$0xff]  ;;  %v1336_v46 = vld [vmem:[#allocation2 + $0x92] sm:$0xff] }
  0x65   : > { %v1330_v21 = vld [vmem:[#allocation2 + $0x4a] sm:$0xff]  ;;  %v1049_v45 = vld [vmem:[#allocation2 + $0xe1] sm:$0xff] }
  0x66   : > { %7127 = vmatmul.mubr.msk.bf16.gmra.mxu1 %vm457_vm1, %v8366_v44  ;;  %10503 = vst [vmem:[#allocation17_spill] sm:$0xff] %v8396_v7  ;;  %v598_v13 = vmax.f32 %v8396_v7, 0.0  ;;  %v1333_v34 = vld [vmem:[#allocation2 + $0x6a] sm:$0xff] }
  0x67   : > { %7132 = vmatprep.mubr.msk.bf16.mxu1 %vm457_vm1, %v1062_v57  ;;  %v8393_v57 = vpack.c.bf16 %v1327_v31, %v1326_v23  ;;  %v1331_v23 = vld [vmem:[#allocation2 + $0x52] sm:$0xff]  ;;  %v8426_v31 = vpack.c.bf16 %v1037_v14, %v1036_v6  ;;  %v8434_v42 = vpack.c.bf16 %v1333_v34, %v1332_v33  ;;  %v1334_v6 = vld [vmem:[#allocation2 + $0x7a] sm:$0xff]  ;;  %v1335_v14 = vld [vmem:[#allocation2 + $0x82] sm:$0xff] }
  0x68   : > { %631 = vst.msk [vmem:[#allocation2 + $0x189] sm:$0xff] %vm457_vm1, %v598_v13  ;;  %v8432_v40 = vpack.c.bf16 %v1331_v23, %v1330_v21  ;;  %v1043_v13 = vld [vmem:[#allocation2 + $0x99] sm:$0xff]  ;;  %v8448_v33 = vpack.c.bf16 %v1335_v14, %v1334_v6  ;;  %v1044_v7 = vld [vmem:[#allocation2 + $0xa9] sm:$0xff]  ;;  %v1045_v50 = vld [vmem:[#allocation2 + $0xb1] sm:$0xff] }
  0x69   : > { %7111 = vmatmul.mubr.msk.bf16.gmra.mxu0 %vm457_vm1, %v8374_v12  ;;  %v1337_v21 = vld [vmem:[#allocation2 + $0x9a] sm:$0xff]  ;;  %v8460_v6 = vpack.c.bf16 %v1045_v50, %v1044_v7  ;;  %v1340_v14 = vld [vmem:[#allocation2 + $0xc2] sm:$0xff]  ;;  %v1050_v50 = vld [vmem:[#allocation2 + $0xf1] sm:$0xff] }
  0x6a   : > { %7166 = vmatprep.mubr.msk.bf16.mxu0 %vm457_vm1, %v1356_v10  ;;  %v8403_v10 = vld [vmem:[%s10455_s3 + $0xa] sm:$0x3]  ;;  %v8450_v34 = vpack.c.bf16 %v1337_v21, %v1336_v46  ;;  %v1051_v7 = vld [vmem:[#allocation2 + $0xf9] sm:$0xff]  ;;  %v1061_v60 = vld [vmem:[#allocation2 + $0x171] sm:$0xff] }
  0x6b   : > { %v1341_v46 = vld [vmem:[#allocation2 + $0xca] sm:$0xff] }
  0x6c   : > { %v8466_v28 = vpack.c.bf16 %v1341_v46, %v1340_v14  ;;  %v1345_v14 = vld [vmem:[#allocation2 + $0xfa] sm:$0xff]  ;;  %v8478_v46 = vpack.c.bf16 %v1051_v7, %v1050_v50  ;;  %v1346_v50 = vld [vmem:[#allocation2 + $0x10a] sm:$0xff]  ;;  %v1347_v7 = vld [vmem:[#allocation2 + $0x112] sm:$0xff] }
  0x6d   : > { %v8496_v58 = vpack.c.bf16 %v1347_v7, %v1346_v50  ;;  %v1352_v7 = vld [vmem:[#allocation2 + $0x152] sm:$0xff] }
  0x6e   : > { %7133 = vmatmul.mubr.msk.bf16.vlgmr.msra.gmra.mxu1 %vm457_vm1, %v8383_v35  ;;  %10504 = vst [vmem:[#allocation18_spill] sm:$0xff] %v8466_v28 }
  0x6f   : > { %7199 = vmatpush3.bf16.msra.mxu1 %v1717_v53  ;;  %7136 = vmatprep.mubr.msk.bf16.mxu1 %vm457_vm1, %v8386_v4  ;;  %v1040_v53 = vld [vmem:[#allocation2 + $0x79] sm:$0xff]  ;;  %10507 = vst [vmem:[#allocation21_spill] sm:$0xff] %v8496_v58 }
  0x70   : > { %7752 = vmatprep.subr.msk.bf16.mxu1 %vm827_vm0, %v8403_v10  ;;  %v8444_v20 = vpack.c.bf16 %v1041_v5, %v1040_v53  ;;  %v1046_v53 = vld [vmem:[#allocation2 + $0xc1] sm:$0xff]  ;;  %v1047_v5 = vld [vmem:[#allocation2 + $0xc9] sm:$0xff] }
  0x71   : > { %7167 = vmatmul.mubr.msk.bf16.vlgmr.msra.gmra.mxu0 %vm457_vm1, %v8393_v57  ;;  %v8462_v21 = vpack.c.bf16 %v1047_v5, %v1046_v53  ;;  %v1342_v53 = vld [vmem:[#allocation2 + $0xda] sm:$0xff]  ;;  %v1343_v5 = vld [vmem:[#allocation2 + $0xe2] sm:$0xff] }
  0x72   : > { %7170 = vmatprep.mubr.msk.bf16.mxu0 %vm457_vm1, %v8398_v8  ;;  %7233 = vmatpush3.bf16.msra.mxu0 %v2011_v41  ;;  %v1042_v41 = vld [vmem:[#allocation2 + $0x91] sm:$0xff]  ;;  %v8480_v38 = vpack.c.bf16 %v1343_v5, %v1342_v53  ;;  %v8492_v53 = vpack.c.bf16 %v1053_v43, %v1052_v52  ;;  %v1348_v5 = vld [vmem:[#allocation2 + $0x122] sm:$0xff]  ;;  %v1059_v52 = vld [vmem:[#allocation2 + $0x159] sm:$0xff] }
  0x73   : > { %7753 = vmatprep.subr.msk.bf16.mxu0 %vm827_vm0, %v8417_v17  ;;  %v8446_v23 = vpack.c.bf16 %v1043_v13, %v1042_v41  ;;  %v1338_v41 = vld [vmem:[#allocation2 + $0xaa] sm:$0xff]  ;;  %v1339_v13 = vld [vmem:[#allocation2 + $0xb2] sm:$0xff] }
  0x74   : > { %v8464_v32 = vpack.c.bf16 %v1339_v13, %v1338_v41  ;;  %v8476_v41 = vpack.c.bf16 %v1049_v45, %v1048_v47  ;;  %v1344_v13 = vld [vmem:[#allocation2 + $0xf2] sm:$0xff]  ;;  %10505 = vst [vmem:[#allocation19_spill] sm:$0xff] %v8480_v38  ;;  %v1054_v45 = vld [vmem:[#allocation2 + $0x121] sm:$0xff]  ;;  %v1055_v47 = vld [vmem:[#allocation2 + $0x129] sm:$0xff] }
  0x75   : > { %v8482_v27 = vpack.c.bf16 %v1345_v14, %v1344_v13  ;;  %v1349_v13 = vld [vmem:[#allocation2 + $0x12a] sm:$0xff]  ;;  %v8494_v14 = vpack.c.bf16 %v1055_v47, %v1054_v45  ;;  %v1350_v45 = vld [vmem:[#allocation2 + $0x13a] sm:$0xff]  ;;  %v1351_v47 = vld [vmem:[#allocation2 + $0x142] sm:$0xff] }
  0x76   : > { %7137 = vmatmul.mubr.msk.bf16.gmra.mxu1 %vm457_vm1, %v8426_v31  ;;  %v8498_v48 = vpack.c.bf16 %v1349_v13, %v1348_v5  ;;  %v1058_v43 = vld [vmem:[#allocation2 + $0x151] sm:$0xff]  ;;  %v1353_v5 = vld [vmem:[#allocation2 + $0x15a] sm:$0xff] }
  0x77   : > { %7140 = vmatprep.mubr.msk.bf16.mxu1 %vm457_vm1, %v8430_v39  ;;  %10506 = vst [vmem:[#allocation20_spill] sm:$0xff] %v8482_v27  ;;  %v1076_v13 = vpack.c.bf16 %v1059_v52, %v1058_v43  ;;  %v8510_v61 = vpack.c.bf16 %v1353_v5, %v1352_v7  ;;  %v2305_v52 = vsel %vm827_vm0, %v8403_v10, 0  ;;  %v1633_v10 = vld [vmem:[#allocation2 + $0xc8] sm:$0xff]  ;;  %v8630_v5 = vld [vmem:[%s10456_s4 + $0x2] sm:$0x3] }
  0x78   : > { %10508 = vst [vmem:[#allocation22_spill] sm:$0xff] %v8498_v48 }
  0x79   : > { %7171 = vmatmul.mubr.msk.bf16.gmra.mxu0 %vm457_vm1, %v8432_v40 }
  0x7a   : > { %7174 = vmatprep.mubr.msk.bf16.mxu0 %vm457_vm1, %v8434_v42 }
  0x7e   : > { %7141 = vmatmul.mubr.msk.bf16.gmra.mxu1 %vm457_vm1, %v8444_v20 }
  0x7f   : > { %7144 = vmatprep.mubr.msk.bf16.mxu1 %vm457_vm1, %v8446_v23 }
  0x81   : > { %7175 = vmatmul.mubr.msk.bf16.gmra.mxu0 %vm457_vm1, %v8448_v33 }
  0x82   : > { %7178 = vmatprep.mubr.msk.bf16.mxu0 %vm457_vm1, %v8450_v34 }
  0x86   : > { %7145 = vmatmul.mubr.msk.bf16.gmra.mxu1 %vm457_vm1, %v8460_v6 }
  0x87   : > { %7148 = vmatprep.mubr.msk.bf16.mxu1 %vm457_vm1, %v8462_v21 }
  0x89   : > { %7179 = vmatmul.mubr.msk.bf16.gmra.mxu0 %vm457_vm1, %v8464_v32 }
  0x8a   : > { %7182 = vmatprep.mubr.msk.bf16.mxu0 %vm457_vm1, %v8466_v28  ;;  %v8508_v28 = vpack.c.bf16 %v1351_v47, %v1350_v45  ;;  %v634_v45 = vsub.f32 0.0, %v8162_v62  ;;  %v8618_v62 = vld [vmem:[%s10456_s4] sm:$0x3] }
  0x8c   : > { %v666_v47 = vmax.f32 %v634_v45, 0.0 }
  0x8e   : > { %7149 = vmatmul.mubr.msk.bf16.gmra.mxu1 %vm457_vm1, %v8476_v41  ;;  %699 = vst.msk [vmem:[#allocation3 + $0x31] sm:$0xff] %vm457_vm1, %v666_v47 }
  0x8f   : > { %7152 = vmatprep.mubr.msk.bf16.mxu1 %vm457_vm1, %v8478_v46 }
  0x91   : > { %7183 = vmatmul.mubr.msk.bf16.gmra.mxu0 %vm457_vm1, %v8480_v38  ;;  %v1056_v38 = vld [vmem:[#allocation2 + $0x139] sm:$0xff] }
  0x92   : > { %7186 = vmatprep.mubr.msk.bf16.mxu0 %vm457_vm1, %v8482_v27  ;;  %v1057_v27 = vld [vmem:[#allocation2 + $0x141] sm:$0xff] }
  0x93   : > { %v1075_v50 = vpack.c.bf16 %v1057_v27, %v1056_v38  ;;  %v1354_v27 = vld [vmem:[#allocation2 + $0x16a] sm:$0xff]  ;;  %v1355_v38 = vld [vmem:[#allocation2 + $0x172] sm:$0xff] }
  0x94   : > { %v8518_v43 = vpack.c.bf16 %v1355_v38, %v1354_v27 }
  0x96   : > { %7153 = vmatmul.mubr.msk.bf16.gmra.mxu1 %vm457_vm1, %v8492_v53 }
  0x97   : > { %7156 = vmatprep.mubr.msk.bf16.mxu1 %vm457_vm1, %v8494_v14 }
  0x99   : > { %7187 = vmatmul.mubr.msk.bf16.gmra.mxu0 %vm457_vm1, %v8496_v58  ;;  %v1060_v58 = vld [vmem:[#allocation2 + $0x169] sm:$0xff] }
  0x9a   : > { %7190 = vmatprep.mubr.msk.bf16.mxu0 %vm457_vm1, %v8498_v48  ;;  %v1077_v48 = vpack.c.bf16 %v1061_v60, %v1060_v58  ;;  %v6562_v58 = vld [vmem:[%s10455_s3 + $0xe] sm:$0x3]  ;;  %v2600_v60 = vsel %vm827_vm0, %v8417_v17, 0 }
  0x9e   : > { %7157 = vmatmul.mubr.msk.bf16.gmra.mxu1 %vm457_vm1, %v1075_v50 }
  0x9f   : > { %7160 = vmatprep.mubr.msk.bf16.mxu1 %vm457_vm1, %v1076_v13 }
  0xa1   : > { %7191 = vmatmul.mubr.msk.bf16.gmra.mxu0 %vm457_vm1, %v8508_v28 }
  0xa2   : > { %7194 = vmatprep.mubr.msk.bf16.mxu0 %vm457_vm1, %v8510_v61 }
  0xa6   : > { %7161 = vmatmul.mubr.msk.bf16.gmra.mxu1 %vm457_vm1, %v1077_v48 }
  0xa7   : > { %7200 = vmatprep.mubr.msk.bf16.mxu1 %vm457_vm1, %v8208_v37  ;;  %v6579_v37 = vld [vmem:[%s10455_s3 + $0x10] sm:$0x3] }
  0xa8   : > { %v3188_v7 = vsel %vm827_vm0, %v6579_v37, 0 }
  0xa9   : > { %7195 = vmatmul.mubr.msk.bf16.gmra.mxu0 %vm457_vm1, %v8518_v43 }
  0xaa   : > { %7234 = vmatprep.mubr.msk.bf16.mxu0 %vm457_vm1, %v8383_v35  ;;  %v1632_v35 = vld [vmem:[#allocation2 + $0xc0] sm:$0xff] }
  0xab   : > { %v8563_v17 = vpack.c.bf16 %v1633_v10, %v1632_v35  ;;  %v2518_v35 = vld [vmem:[#allocation2 + $0xf8] sm:$0xff] }
  0xae   : > { %7201 = vmatmul.mubr.msk.bf16.vlgmr.msra.gmra.mxu1 %vm457_vm1, %v8284_v25 }
  0xaf   : > { %7267 = vmatpush3.bf16.msra.mxu1 %v2305_v52  ;;  %7204 = vmatprep.mubr.msk.bf16.mxu1 %vm457_vm1, %v8305_v3 }
  0xb0   : > { %7754 = vmatprep.subr.msk.bf16.mxu1 %vm827_vm0, %v6562_v58 }
  0xb1   : > { %7235 = vmatmul.mubr.msk.bf16.vlgmr.msra.gmra.mxu0 %vm457_vm1, %v8386_v4 }
  0xb2   : > { %7238 = vmatprep.mubr.msk.bf16.mxu0 %vm457_vm1, %v8426_v31  ;;  %7301 = vmatpush3.bf16.msra.mxu0 %v2600_v60 }
  0xb3   : > { %7755 = vmatprep.subr.msk.bf16.mxu0 %vm827_vm0, %v6579_v37  ;;  %v2517_v37 = vld [vmem:[#allocation2 + $0xf0] sm:$0xff] }
  0xb6   : > { %7205 = vmatmul.mubr.msk.bf16.gmra.mxu1 %vm457_vm1, %v8350_v24 }
  0xb7   : > { %7208 = vmatprep.mubr.msk.bf16.mxu1 %vm457_vm1, %v8352_v29 }
  0xb9   : > { %7239 = vmatmul.mubr.msk.bf16.gmra.mxu0 %vm457_vm1, %v8430_v39 }
  0xba   : > { %7242 = vmatprep.mubr.msk.bf16.mxu0 %vm457_vm1, %v8444_v20 }
  0xbe   : > { %7209 = vmatmul.mubr.msk.bf16.gmra.mxu1 %vm457_vm1, %v8368_v2 }
  0xbf   : > { %7212 = vmatprep.mubr.msk.bf16.mxu1 %vm457_vm1, %v8374_v12 }
  0xc1   : > { %7243 = vmatmul.mubr.msk.bf16.gmra.mxu0 %vm457_vm1, %v8446_v23 }
  0xc2   : > { %7246 = vmatprep.mubr.msk.bf16.mxu0 %vm457_vm1, %v8460_v6 }
  0xc6   : > { %7213 = vmatmul.mubr.msk.bf16.gmra.mxu1 %vm457_vm1, %v8563_v17 }
  0xc7   : > { %7216 = vmatprep.mubr.msk.bf16.mxu1 %vm457_vm1, %v8198_v30  ;;  %v1648_v30 = vld [vmem:[#allocation2 + $0x180] sm:$0xff] }
  0xc9   : > { %7247 = vmatmul.mubr.msk.bf16.gmra.mxu0 %vm457_vm1, %v8462_v21  ;;  %v1943_v21 = vld [vmem:[#allocation2 + $0x189] sm:$0xff] }
  0xca   : > { %7250 = vmatprep.mubr.msk.bf16.mxu0 %vm457_vm1, %v8476_v41 }
  0xce   : > { %7217 = vmatmul.mubr.msk.bf16.gmra.mxu1 %vm457_vm1, %v8270_v9  ;;  %v1649_v9 = vld [vmem:[#allocation2 + $0x188] sm:$0xff] }
  0xcf   : > { %7220 = vmatprep.mubr.msk.bf16.mxu1 %vm457_vm1, %v8276_v15  ;;  %v1942_v15 = vld [vmem:[#allocation2 + $0x181] sm:$0xff]  ;;  %v8594_v41 = vpack.c.bf16 %v1649_v9, %v1648_v30  ;;  %v10509_v9 = vld [vmem:[#allocation6_spill] sm:$0xff] }
  0xd1   : > { %7251 = vmatmul.mubr.msk.bf16.gmra.mxu0 %vm457_vm1, %v8478_v46  ;;  %v8596_v46 = vpack.c.bf16 %v1943_v21, %v1942_v15  ;;  %v652_v15 = vsub.f32 0.0, %v10509_v9  ;;  %v10510_v21 = vld [vmem:[#allocation7_spill] sm:$0xff] }
  0xd2   : > { %7254 = vmatprep.mubr.msk.bf16.mxu0 %vm457_vm1, %v8492_v53  ;;  %v636_v53 = vsub.f32 0.0, %v8184_v18 }
  0xd6   : > { %7221 = vmatmul.mubr.msk.bf16.gmra.mxu1 %vm457_vm1, %v8330_v56 }
  0xd7   : > { %7224 = vmatprep.mubr.msk.bf16.mxu1 %vm457_vm1, %v8345_v16 }
  0xd9   : > { %7255 = vmatmul.mubr.msk.bf16.gmra.mxu0 %vm457_vm1, %v8494_v14  ;;  %v637_v14 = vsub.f32 0.0, %v8187_v19 }
  0xda   : > { %7258 = vmatprep.mubr.msk.bf16.mxu0 %vm457_vm1, %v1075_v50  ;;  %v668_v50 = vmax.f32 %v636_v53, 0.0  ;;  %v653_v53 = vsub.f32 0.0, %v10510_v21  ;;  %v10523_v21 = vld [vmem:[#allocation22_spill] sm:$0xff] }
  0xdb   : > { %v669_v19 = vmax.f32 %v637_v14, 0.0  ;;  %v10513_v14 = vld [vmem:[#allocation4_spill] sm:$0xff] }
  0xdc   : > { %701 = vst.msk [vmem:[#allocation3 + $0x49] sm:$0xff] %vm457_vm1, %v668_v50  ;;  %v650_v45 = vsub.f32 0.0, %v10513_v14  ;;  %v2520_v50 = vld [vmem:[#allocation2 + $0x110] sm:$0xff] }
  0xdd   : > { %702 = vst.msk [vmem:[#allocation3 + $0x51] sm:$0xff] %vm457_vm1, %v669_v19 }
  0xde   : > { %7225 = vmatmul.mubr.msk.bf16.gmra.mxu1 %vm457_vm1, %v8362_v36  ;;  %v682_v19 = vmax.f32 %v650_v45, 0.0 }
  0xdf   : > { %7228 = vmatprep.mubr.msk.bf16.mxu1 %vm457_vm1, %v8366_v44 }
  0xe0   : > { %715 = vst.msk [vmem:[#allocation3 + $0xf1] sm:$0xff] %vm457_vm1, %v682_v19 }
  0xe1   : > { %7259 = vmatmul.mubr.msk.bf16.gmra.mxu0 %vm457_vm1, %v1076_v13  ;;  %v638_v13 = vsub.f32 0.0, %v8249_v54  ;;  %v644_v54 = vsub.f32 0.0, %v8328_v55 }
  0xe2   : > { %7262 = vmatprep.mubr.msk.bf16.mxu0 %vm457_vm1, %v1077_v48  ;;  %v635_v48 = vsub.f32 0.0, %v8165_v63  ;;  %v640_v63 = vsub.f32 0.0, %v8260_v0  ;;  %v639_v0 = vsub.f32 0.0, %v8257_v59  ;;  %v645_v59 = vsub.f32 0.0, %v8338_v11 }
  0xe3   : > { %v676_v60 = vmax.f32 %v644_v54, 0.0 }
  0xe4   : > { %v667_v18 = vmax.f32 %v635_v48, 0.0  ;;  %v671_v27 = vmax.f32 %v639_v0, 0.0  ;;  %v672_v38 = vmax.f32 %v640_v63, 0.0  ;;  %v677_v11 = vmax.f32 %v645_v59, 0.0  ;;  %v10514_v48 = vld [vmem:[#allocation5_spill] sm:$0xff] }
  0xe5   : > { %709 = vst.msk [vmem:[#allocation3 + $0xa9] sm:$0xff] %vm457_vm1, %v676_v60  ;;  %v651_v47 = vsub.f32 0.0, %v10514_v48  ;;  %v684_v63 = vmax.f32 %v652_v15, 0.0  ;;  %v10518_v59 = vld [vmem:[#allocation21_spill] sm:$0xff] }
  0xe6   : > { %7229 = vmatmul.mubr.msk.bf16.gmra.mxu1 %vm457_vm1, %v8594_v41  ;;  %700 = vst.msk [vmem:[#allocation3 + $0x39] sm:$0xff] %vm457_vm1, %v667_v18  ;;  %704 = vst.msk [vmem:[#allocation3 + $0x69] sm:$0xff] %vm457_vm1, %v671_v27  ;;  %v2519_v18 = vld [vmem:[#allocation2 + $0x108] sm:$0xff] }
  0xe7   : > { %7268 = vmatprep.mubr.msk.bf16.mxu1 %vm457_vm1, %v8393_v57  ;;  %v2894_v57 = vsel %vm827_vm0, %v6562_v58, 0  ;;  %705 = vst.msk [vmem:[#allocation3 + $0x79] sm:$0xff] %vm457_vm1, %v672_v38  ;;  %710 = vst.msk [vmem:[#allocation3 + $0xb1] sm:$0xff] %vm457_vm1, %v677_v11 }
  0xe8   : > { %717 = vst.msk [vmem:[#allocation3 + $0x109] sm:$0xff] %vm457_vm1, %v684_v63 }
  0xe9   : > { %7263 = vmatmul.mubr.msk.bf16.gmra.mxu0 %vm457_vm1, %v8596_v46 }
  0xea   : > { %7302 = vmatprep.mubr.msk.bf16.mxu0 %vm457_vm1, %v8284_v25  ;;  %v641_v25 = vsub.f32 0.0, %v8263_v1  ;;  %v670_v1 = vmax.f32 %v638_v13, 0.0  ;;  %v10515_v13 = vld [vmem:[#allocation10_spill] sm:$0xff] }
  0xeb   : > { %v656_v0 = vsub.f32 0.0, %v10515_v13  ;;  %v2237_v13 = vld [vmem:[#allocation2 + $0x18a] sm:$0xff] }
  0xec   : > { %v673_v52 = vmax.f32 %v641_v25, 0.0  ;;  %703 = vst.msk [vmem:[#allocation3 + $0x61] sm:$0xff] %vm457_vm1, %v670_v1  ;;  %v685_v25 = vmax.f32 %v653_v53, 0.0  ;;  %v10516_v1 = vld [vmem:[#allocation11_spill] sm:$0xff]  ;;  %v10524_v53 = vld [vmem:[#allocation12_spill] sm:$0xff] }
  0xed   : > { %v657_v27 = vsub.f32 0.0, %v10516_v1 }
  0xee   : > { %7269 = vmatmul.mubr.msk.bf16.vlgmr.msra.gmra.mxu1 %vm457_vm1, %v8398_v8  ;;  %706 = vst.msk [vmem:[#allocation3 + $0x81] sm:$0xff] %vm457_vm1, %v673_v52  ;;  %718 = vst.msk [vmem:[#allocation3 + $0x111] sm:$0xff] %vm457_vm1, %v685_v25  ;;  %v10517_v52 = vld [vmem:[#allocation20_spill] sm:$0xff] }
  0xef   : > { %7335 = vmatpush3.bf16.msra.mxu1 %v2894_v57  ;;  %7272 = vmatprep.mubr.msk.bf16.mxu1 %vm457_vm1, %v8432_v40  ;;  %v683_v57 = vmax.f32 %v651_v47, 0.0 }
  0xf0   : > { %7756 = vmatprep.subr.msk.bf16.mxu1 %vm827_vm0, %v8618_v62 }
  0xf1   : > { %7303 = vmatmul.mubr.msk.bf16.vlgmr.msra.gmra.mxu0 %vm457_vm1, %v8305_v3  ;;  %v642_v3 = vsub.f32 0.0, %v8318_v49  ;;  %v648_v49 = vsub.f32 0.0, %v8116_v22  ;;  %716 = vst.msk [vmem:[#allocation3 + $0xf9] sm:$0xff] %vm457_vm1, %v683_v57 }
  0xf2   : > { %7306 = vmatprep.mubr.msk.bf16.mxu0 %vm457_vm1, %v8350_v24  ;;  %7369 = vmatpush3.bf16.msra.mxu0 %v3188_v7  ;;  %v643_v24 = vsub.f32 0.0, %v8324_v51  ;;  %v649_v51 = vsub.f32 0.0, %v8120_v26  ;;  %v2541_v26 = vpack.c.bf16 %v2518_v35, %v2517_v37  ;;  %v2542_v7 = vpack.c.bf16 %v2520_v50, %v2519_v18 }
  0xf3   : > { %7757 = vmatprep.subr.msk.bf16.mxu0 %vm827_vm0, %v8630_v5  ;;  %v674_v58 = vmax.f32 %v642_v3, 0.0  ;;  %v680_v10 = vmax.f32 %v648_v49, 0.0  ;;  %v10519_v3 = vld [vmem:[#allocation8_spill] sm:$0xff]  ;;  %v689_v37 = vmax.f32 %v657_v27, 0.0  ;;  %v2531_v27 = vld [vmem:[#allocation2 + $0x198] sm:$0xff] }
  0xf4   : > { %v675_v55 = vmax.f32 %v643_v24, 0.0  ;;  %v681_v22 = vmax.f32 %v649_v51, 0.0  ;;  %v654_v24 = vsub.f32 0.0, %v10519_v3 }
  0xf5   : > { %707 = vst.msk [vmem:[#allocation3 + $0x91] sm:$0xff] %vm457_vm1, %v674_v58  ;;  %713 = vst.msk [vmem:[#allocation3 + $0xd9] sm:$0xff] %vm457_vm1, %v680_v10  ;;  %v10520_v58 = vld [vmem:[#allocation9_spill] sm:$0xff] }
  0xf6   : > { %7273 = vmatmul.mubr.msk.bf16.gmra.mxu1 %vm457_vm1, %v8434_v42  ;;  %708 = vst.msk [vmem:[#allocation3 + $0x99] sm:$0xff] %vm457_vm1, %v675_v55  ;;  %714 = vst.msk [vmem:[#allocation3 + $0xe1] sm:$0xff] %vm457_vm1, %v681_v22  ;;  %v655_v55 = vsub.f32 0.0, %v10520_v58  ;;  %v686_v49 = vmax.f32 %v654_v24, 0.0 }
  0xf7   : > { %7276 = vmatprep.mubr.msk.bf16.mxu1 %vm457_vm1, %v8448_v33  ;;  %722 = vst.msk [vmem:[#allocation3 + $0x141] sm:$0xff] %vm457_vm1, %v689_v37 }
  0xf8   : > { %v687_v51 = vmax.f32 %v655_v55, 0.0  ;;  %719 = vst.msk [vmem:[#allocation3 + $0x121] sm:$0xff] %vm457_vm1, %v686_v49 }
  0xf9   : > { %7307 = vmatmul.mubr.msk.bf16.gmra.mxu0 %vm457_vm1, %v8352_v29  ;;  %v2515_v29 = vld [vmem:[#allocation2 + $0xd8] sm:$0xff] }
  0xfa   : > { %7310 = vmatprep.mubr.msk.bf16.mxu0 %vm457_vm1, %v8368_v2  ;;  %v2516_v2 = vld [vmem:[#allocation2 + $0xe0] sm:$0xff]  ;;  %720 = vst.msk [vmem:[#allocation3 + $0x129] sm:$0xff] %vm457_vm1, %v687_v51 }
  0xfb   : > { %v2540_v30 = vpack.c.bf16 %v2516_v2, %v2515_v29  ;;  %v688_v2 = vmax.f32 %v656_v0, 0.0  ;;  %v8793_v51 = vld [vmem:[%s10457_s5] ss:$0 sm:$0xff] }
  0xfd   : > { %721 = vst.msk [vmem:[#allocation3 + $0x139] sm:$0xff] %vm457_vm1, %v688_v2 }
  0xfe   : > { %7277 = vmatmul.mubr.msk.bf16.gmra.mxu1 %vm457_vm1, %v8450_v34 }
  0xff   : > { %7280 = vmatprep.mubr.msk.bf16.mxu1 %vm457_vm1, %v8464_v32 }
 0x101   : > { %7311 = vmatmul.mubr.msk.bf16.gmra.mxu0 %vm457_vm1, %v8374_v12  ;;  %v10511_v12 = vld [vmem:[#allocation18_spill] sm:$0xff] }
 0x102   : > { %7314 = vmatprep.mubr.msk.bf16.mxu0 %vm457_vm1, %v8563_v17  ;;  %v10512_v17 = vld [vmem:[#allocation19_spill] sm:$0xff] }
 0x106   : > { %7281 = vmatmul.mubr.msk.bf16.gmra.mxu1 %vm457_vm1, %v10511_v12  ;;  %v658_v12 = vsub.f32 0.0, %v10524_v53 }
 0x107   : > { %7284 = vmatprep.mubr.msk.bf16.mxu1 %vm457_vm1, %v10512_v17  ;;  %v10525_v17 = vld [vmem:[#allocation13_spill] sm:$0xff] }
 0x108   : > { %v659_v14 = vsub.f32 0.0, %v10525_v17  ;;  %v690_v47 = vmax.f32 %v658_v12, 0.0 }
 0x109   : > { %7315 = vmatmul.mubr.msk.bf16.gmra.mxu0 %vm457_vm1, %v2540_v30 }
 0x10a   : > { %7318 = vmatprep.mubr.msk.bf16.mxu0 %vm457_vm1, %v2541_v26  ;;  %v10522_v26 = vld [vmem:[#allocation15_spill] sm:$0xff]  ;;  %v691_v18 = vmax.f32 %v659_v14, 0.0  ;;  %723 = vst.msk [vmem:[#allocation3 + $0x151] sm:$0xff] %vm457_vm1, %v690_v47 }
 0x10b   : > { %v661_v9 = vsub.f32 0.0, %v10522_v26  ;;  %v3481_v26 = vsel %vm827_vm0, %v8618_v62, 0 }
 0x10c   : > { %724 = vst.msk [vmem:[#allocation3 + $0x159] sm:$0xff] %vm457_vm1, %v691_v18 }
 0x10d   : > { %v693_v57 = vmax.f32 %v661_v9, 0.0  ;;  %v8812_v9 = vld [vmem:[%s10456_s4 + $0x4] sm:$0x3] }
 0x10e   : > { %v8690_v38 = vpop.f32.mrf.mxu1  ;;  %7285 = vmatmul.mubr.msk.bf16.gmra.mxu1 %vm457_vm1, %v10517_v52  ;;  %v2532_v52 = vld [vmem:[#allocation2 + $0x1a0] sm:$0xff] }
 0x10f   : > { %7288 = vmatprep.mubr.msk.bf16.mxu1 %vm457_vm1, %v10518_v59  ;;  %726 = vst.msk [vmem:[#allocation3 + $0x171] sm:$0xff] %vm457_vm1, %v693_v57  ;;  %v2548_v58 = vpack.c.bf16 %v2532_v52, %v2531_v27 }
 0x110   : > { %v8700_v60 = vpop.f32.mrf.mxu1 }
 0x111   : > { %v8694_v54 = vpop.f32.mrf.mxu0  ;;  %7319 = vmatmul.mubr.msk.bf16.gmra.mxu0 %vm457_vm1, %v2542_v7  ;;  %v2236_v7 = vld [vmem:[#allocation2 + $0x182] sm:$0xff] }
 0x112   : > { %7322 = vmatprep.mubr.msk.bf16.mxu0 %vm457_vm1, %v8330_v56  ;;  %v8707_v29 = vpop.f32.mrf.mxu1  ;;  %v10521_v56 = vld [vmem:[#allocation14_spill] sm:$0xff]  ;;  %v8769_v3 = vpack.c.bf16 %v2237_v13, %v2236_v7 }
 0x113   : > { %v8703_v11 = vpop.f32.mrf.mxu0  ;;  %v660_v30 = vsub.f32 0.0, %v10521_v56 }
 0x114   : > { %v8713_v10 = vpop.f32.mrf.mxu1 }
 0x115   : > { %v8709_v35 = vpop.f32.mrf.mxu0 }
 0x116   : > { %v8721_v15 = vpop.f32.mrf.mxu1  ;;  %7289 = vmatmul.mubr.msk.bf16.gmra.mxu1 %vm457_vm1, %v10523_v21  ;;  %v1001_v62 = vadd.f32 %v8709_v35, %v8793_v51 }
 0x117   : > { %v8717_v22 = vpop.f32.mrf.mxu0  ;;  %7292 = vmatprep.mubr.msk.bf16.mxu1 %vm457_vm1, %v8508_v28  ;;  %v692_v28 = vmax.f32 %v660_v30, 0.0 }
 0x118   : > { %v8731_v48 = vpop.f32.mrf.mxu1 }
 0x119   : > { %v8729_v45 = vpop.f32.mrf.mxu0  ;;  %7323 = vmatmul.mubr.msk.bf16.gmra.mxu0 %vm457_vm1, %v8345_v16  ;;  %725 = vst.msk [vmem:[#allocation3 + $0x169] sm:$0xff] %vm457_vm1, %v692_v28 }
 0x11a   : > { %7326 = vmatprep.mubr.msk.bf16.mxu0 %vm457_vm1, %v8362_v36  ;;  %v8739_v19 = vpop.f32.mrf.mxu1 }
 0x11b   : > { %v8737_v50 = vpop.f32.mrf.mxu0 }
 0x11c   : > { %v8745_v25 = vpop.f32.mrf.mxu1  ;;  %v1002_v7 = vadd.f32 %v8793_v51, %v8737_v50  ;;  %v2807_v50 = vld [vmem:[#allocation2 + $0xc1] sm:$0xff] }
 0x11d   : > { %v8743_v63 = vpop.f32.mrf.mxu0 }
 0x11e   : > { %v8751_v36 = vpop.f32.mrf.mxu1  ;;  %7293 = vmatmul.mubr.msk.bf16.gmra.mxu1 %vm457_vm1, %v8510_v61 }
 0x11f   : > { %v8749_v16 = vpop.f32.mrf.mxu0  ;;  %7296 = vmatprep.mubr.msk.bf16.mxu1 %vm457_vm1, %v8518_v43 }
 0x120   : > { %v8759_v1 = vpop.f32.mrf.mxu1 }
 0x121   : > { %v8757_v0 = vpop.f32.mrf.mxu0  ;;  %7327 = vmatmul.mubr.msk.bf16.gmra.mxu0 %vm457_vm1, %v8366_v44 }
 0x122   : > { %7330 = vmatprep.mubr.msk.bf16.mxu0 %vm457_vm1, %v8594_v41  ;;  %v8767_v61 = vpop.f32.mrf.mxu1 }
 0x123   : > { %v8765_v59 = vpop.f32.mrf.mxu0 }
 0x124   : > { %v8773_v24 = vpop.f32.mrf.mxu1 }
 0x125   : > { %v8771_v43 = vpop.f32.mrf.mxu0 }
 0x126   : > { %v8777_v49 = vpop.f32.mrf.mxu1  ;;  %7297 = vmatmul.mubr.msk.bf16.gmra.mxu1 %vm457_vm1, %v8769_v3 }
 0x127   : > { %v8775_v55 = vpop.f32.mrf.mxu0  ;;  %7336 = vmatprep.mubr.msk.bf16.mxu1 %vm457_vm1, %v8386_v4  ;;  %v1000_v4 = vadd.f32 %v8694_v54, %v8793_v51  ;;  %v3775_v54 = vsel %vm827_vm0, %v8630_v5, 0 }
 0x128   : > { %v8785_v41 = vpop.f32.mrf.mxu1 }
 0x129   : > { %v8783_v44 = vpop.f32.mrf.mxu0  ;;  %7331 = vmatmul.mubr.msk.bf16.gmra.mxu0 %vm457_vm1, %v2548_v58  ;;  %v1005_v58 = vadd.f32 %v8743_v63, %v8793_v51 }
 0x12a   : > { %7370 = vmatprep.mubr.msk.bf16.mxu0 %vm457_vm1, %v8398_v8  ;;  %v8797_v37 = vpop.f32.mrf.mxu1  ;;  %v998_v8 = vadd.f32 %v8793_v51, %v8703_v11  ;;  %v8827_v11 = vld [vmem:[%s10456_s4 + $0x6] sm:$0x3] }
 0x12b   : > { %v8795_v2 = vpop.f32.mrf.mxu0 }
 0x12c   : > { %v8803_v30 = vpop.f32.mrf.mxu1 }
 0x12d   : > { %v8801_v56 = vpop.f32.mrf.mxu0 }
 0x12e   : > { %v7134_v53 = vpop.f32.mrf.mxu1  ;;  %7337 = vmatmul.mubr.msk.bf16.vlgmr.msra.gmra.mxu1 %vm457_vm1, %v8426_v31  ;;  %v999_v31 = vadd.f32 %v8793_v51, %v8717_v22 }
 0x12f   : > { %v8814_v21 = vpop.f32.mrf.mxu0  ;;  %v1294_v12 = vadd.f32 %v7134_v53, %v1000_v4  ;;  %7403 = vmatpush3.bf16.msra.mxu1 %v3481_v26  ;;  %7340 = vmatprep.mubr.msk.bf16.mxu1 %vm457_vm1, %v8430_v39  ;;  %v2808_v53 = vld [vmem:[#allocation2 + $0xc9] sm:$0xff] }
 0x130   : > { %v1165_v17 = vpop.f32.mrf.mxu1  ;;  %7758 = vmatprep.subr.msk.bf16.mxu1 %vm827_vm0, %v8812_v9 }
 0x131   : > { %v7168_v14 = vpop.f32.mrf.mxu0  ;;  %7371 = vmatmul.mubr.msk.bf16.vlgmr.msra.gmra.mxu0 %vm457_vm1, %v8432_v40  ;;  %v1292_v5 = vadd.f32 %v1165_v17, %v998_v8  ;;  %v1004_v40 = vadd.f32 %v8729_v45, %v8793_v51  ;;  %v3101_v17 = vld [vmem:[#allocation2 + $0xc2] sm:$0xff] }
 0x132   : > { %v8835_v35 = vadd.f32 %v7168_v14, %v1294_v12  ;;  %7374 = vmatprep.mubr.msk.bf16.mxu0 %vm457_vm1, %v8434_v42  ;;  %7437 = vmatpush3.bf16.msra.mxu0 %v3775_v54  ;;  %v7135_v39 = vpop.f32.mrf.mxu1  ;;  %v1003_v54 = vadd.f32 %v8793_v51, %v8749_v16  ;;  %v1008_v14 = vadd.f32 %v8757_v0, %v8793_v51 }
 0x133   : > { %v1459_v47 = vpop.f32.mrf.mxu0  ;;  %7759 = vmatprep.subr.msk.bf16.mxu0 %vm827_vm0, %v8827_v11  ;;  %v1295_v18 = vadd.f32 %v7135_v39, %v1001_v62  ;;  %v1006_v16 = vadd.f32 %v8793_v51, %v8765_v59  ;;  %v1009_v0 = vadd.f32 %v8771_v43, %v8793_v51  ;;  %v3103_v43 = vld [vmem:[#allocation2 + $0xda] sm:$0xff] }
 0x134   : > { %v8843_v28 = vadd.f32 %v1459_v47, %v1292_v5  ;;  %v1168_v57 = vpop.f32.mrf.mxu1  ;;  %v2833_v5 = vpack.c.bf16 %v2808_v53, %v2807_v50  ;;  %v3104_v53 = vld [vmem:[#allocation2 + $0xe2] sm:$0xff] }
 0x135   : > { %v7169_v22 = vpop.f32.mrf.mxu0  ;;  %v1293_v13 = vadd.f32 %v1168_v57, %v999_v31 }
 0x136   : > { %v8847_v27 = vadd.f32 %v7169_v22, %v1295_v18  ;;  %v7138_v42 = vpop.f32.mrf.mxu1  ;;  %7341 = vmatmul.mubr.msk.bf16.gmra.mxu1 %vm457_vm1, %v8444_v20 }
 0x137   : > { %v1462_v52 = vpop.f32.mrf.mxu0  ;;  %v1298_v45 = vadd.f32 %v7138_v42, %v1004_v40  ;;  %7344 = vmatprep.mubr.msk.bf16.mxu1 %vm457_vm1, %v8446_v23  ;;  %v3102_v23 = vld [vmem:[#allocation2 + $0xca] sm:$0xff]  ;;  %v2809_v42 = vld [vmem:[#allocation2 + $0xd9] sm:$0xff] }
 0x138   : > { %v8853_v4 = vadd.f32 %v1462_v52, %v1293_v13  ;;  %v1181_v26 = vpop.f32.mrf.mxu1  ;;  %v2810_v52 = vld [vmem:[#allocation2 + $0xe1] sm:$0xff] }
 0x139   : > { %v7172_v8 = vpop.f32.mrf.mxu0  ;;  %7375 = vmatmul.mubr.msk.bf16.gmra.mxu0 %vm457_vm1, %v8448_v33  ;;  %v1296_v20 = vadd.f32 %v1181_v26, %v1002_v7  ;;  %v2812_v26 = vld [vmem:[#allocation2 + $0xf9] sm:$0xff] }
 0x13a   : > { %v8861_v62 = vadd.f32 %v7172_v8, %v1298_v45  ;;  %7378 = vmatprep.mubr.msk.bf16.mxu0 %vm457_vm1, %v8450_v34  ;;  %v7139_v63 = vpop.f32.mrf.mxu1  ;;  %v3127_v34 = vpack.c.bf16 %v3102_v23, %v3101_v17  ;;  %v2811_v45 = vld [vmem:[#allocation2 + $0xf1] sm:$0xff]  ;;  %v3106_v17 = vld [vmem:[#allocation2 + $0xfa] sm:$0xff] }
 0x13b   : > { %v1475_v12 = vpop.f32.mrf.mxu0  ;;  %v1299_v31 = vadd.f32 %v7139_v63, %v1005_v58  ;;  %v2834_v63 = vpack.c.bf16 %v2810_v52, %v2809_v42  ;;  %v2813_v42 = vld [vmem:[#allocation2 + $0x109] sm:$0xff]  ;;  %v2814_v52 = vld [vmem:[#allocation2 + $0x111] sm:$0xff] }
 0x13c   : > { %v8867_v33 = vadd.f32 %v1475_v12, %v1296_v20  ;;  %v1184_v39 = vpop.f32.mrf.mxu1  ;;  %v3105_v12 = vld [vmem:[#allocation2 + $0xf2] sm:$0xff] }
 0x13d   : > { %v7173_v47 = vpop.f32.mrf.mxu0  ;;  %v1297_v40 = vadd.f32 %v1184_v39, %v1003_v54  ;;  %v3128_v39 = vpack.c.bf16 %v3104_v53, %v3103_v43  ;;  %v3108_v43 = vld [vmem:[#allocation2 + $0x112] sm:$0xff] }
 0x13e   : > { %v8871_v18 = vadd.f32 %v7173_v47, %v1299_v31  ;;  %v7142_v57 = vpop.f32.mrf.mxu1  ;;  %7345 = vmatmul.mubr.msk.bf16.gmra.mxu1 %vm457_vm1, %v8460_v6  ;;  %v1007_v6 = vadd.f32 %v8793_v51, %v8775_v55  ;;  %v2835_v31 = vpack.c.bf16 %v2812_v26, %v2811_v45  ;;  %v1010_v47 = vadd.f32 %v8793_v51, %v8795_v2  ;;  %v2816_v45 = vld [vmem:[#allocation2 + $0x129] sm:$0xff] }
 0x13f   : > { %v1478_v22 = vpop.f32.mrf.mxu0  ;;  %v1302_v7 = vadd.f32 %v7142_v57, %v1008_v14  ;;  %7348 = vmatprep.mubr.msk.bf16.mxu1 %vm457_vm1, %v2833_v5  ;;  %v1011_v26 = vadd.f32 %v8793_v51, %v8814_v21  ;;  %v1016_v21 = vadd.f32 %v8690_v38, %v8793_v51 }
 0x140   : > { %v8877_v13 = vadd.f32 %v1478_v22, %v1297_v40  ;;  %v1197_v59 = vpop.f32.mrf.mxu1 }
 0x141   : > { %v7176_v58 = vpop.f32.mrf.mxu0  ;;  %7379 = vmatmul.mubr.msk.bf16.gmra.mxu0 %vm457_vm1, %v8464_v32  ;;  %v1300_v8 = vadd.f32 %v1197_v59, %v1006_v16  ;;  %v1012_v32 = vadd.f32 %v8783_v44, %v8793_v51  ;;  %v1013_v44 = vadd.f32 %v8801_v56, %v8793_v51  ;;  %v3107_v56 = vld [vmem:[#allocation2 + $0x10a] sm:$0xff] }
 0x142   : > { %v8884_v50 = vadd.f32 %v7176_v58, %v1302_v7  ;;  %7382 = vmatprep.mubr.msk.bf16.mxu0 %vm457_vm1, %v3127_v34  ;;  %v7143_v54 = vpop.f32.mrf.mxu1  ;;  %v3129_v34 = vpack.c.bf16 %v3106_v17, %v3105_v12  ;;  %v2815_v58 = vld [vmem:[#allocation2 + $0x121] sm:$0xff]  ;;  %v3110_v12 = vld [vmem:[#allocation2 + $0x12a] sm:$0xff] }
 0x143   : > { %v1491_v20 = vpop.f32.mrf.mxu0  ;;  %v1303_v23 = vadd.f32 %v7143_v54, %v1009_v0 }
 0x144   : > { %v8889_v14 = vadd.f32 %v1491_v20, %v1300_v8  ;;  %v1200_v55 = vpop.f32.mrf.mxu1  ;;  %v2836_v20 = vpack.c.bf16 %v2814_v52, %v2813_v42  ;;  %v2817_v42 = vld [vmem:[#allocation2 + $0x139] sm:$0xff]  ;;  %v2818_v52 = vld [vmem:[#allocation2 + $0x141] sm:$0xff] }
 0x145   : > { %v7177_v5 = vpop.f32.mrf.mxu0  ;;  %v1301_v16 = vadd.f32 %v1200_v55, %v1007_v6 }
 0x146   : > { %v8893_v40 = vadd.f32 %v7177_v5, %v1303_v23  ;;  %v7146_v57 = vpop.f32.mrf.mxu1  ;;  %7349 = vmatmul.mubr.msk.bf16.gmra.mxu1 %vm457_vm1, %v2834_v63  ;;  %v3109_v63 = vld [vmem:[#allocation2 + $0x122] sm:$0xff]  ;;  %v2837_v23 = vpack.c.bf16 %v2816_v45, %v2815_v58  ;;  %v3130_v5 = vpack.c.bf16 %v3108_v43, %v3107_v56  ;;  %v2820_v58 = vld [vmem:[#allocation2 + $0x159] sm:$0xff]  ;;  %v1017_v45 = vadd.f32 %v8707_v29, %v8793_v51 }
 0x147   : > { %v1494_v22 = vpop.f32.mrf.mxu0  ;;  %v1306_v0 = vadd.f32 %v7146_v57, %v1012_v32  ;;  %7352 = vmatprep.mubr.msk.bf16.mxu1 %vm457_vm1, %v2835_v31  ;;  %v3112_v56 = vld [vmem:[#allocation2 + $0x142] sm:$0xff] }
 0x148   : > { %v8898_v7 = vadd.f32 %v1494_v22, %v1301_v16  ;;  %v1213_v59 = vpop.f32.mrf.mxu1  ;;  %v3131_v16 = vpack.c.bf16 %v3110_v12, %v3109_v63  ;;  %v1014_v22 = vadd.f32 %v8793_v51, %v8700_v60  ;;  %v3111_v60 = vld [vmem:[#allocation2 + $0x13a] sm:$0xff]  ;;  %v1015_v12 = vadd.f32 %v8793_v51, %v8713_v10 }
 0x149   : > { %v7180_v2 = vpop.f32.mrf.mxu0  ;;  %7383 = vmatmul.mubr.msk.bf16.gmra.mxu0 %vm457_vm1, %v3128_v39  ;;  %v1304_v6 = vadd.f32 %v1213_v59, %v1010_v47  ;;  %v3114_v63 = vld [vmem:[#allocation2 + $0x15a] sm:$0xff]  ;;  %v1018_v10 = vadd.f32 %v8793_v51, %v8731_v48 }
 0x14a   : > { %v8904_v8 = vadd.f32 %v7180_v2, %v1306_v0  ;;  %7386 = vmatprep.mubr.msk.bf16.mxu0 %vm457_vm1, %v3129_v34  ;;  %v7147_v53 = vpop.f32.mrf.mxu1  ;;  %v2819_v2 = vld [vmem:[#allocation2 + $0x151] sm:$0xff] }
 0x14b   : > { %v1507_v54 = vpop.f32.mrf.mxu0  ;;  %v1307_v17 = vadd.f32 %v7147_v53, %v1013_v44 }
 0x14c   : > { %v8907_v32 = vadd.f32 %v1507_v54, %v1304_v6  ;;  %v1216_v31 = vpop.f32.mrf.mxu1  ;;  %v2838_v54 = vpack.c.bf16 %v2818_v52, %v2817_v42  ;;  %v2821_v52 = vld [vmem:[#allocation2 + $0x169] sm:$0xff] }
 0x14d   : > { %v7181_v55 = vpop.f32.mrf.mxu0  ;;  %v1305_v39 = vadd.f32 %v1216_v31, %v1011_v26  ;;  %v2839_v31 = vpack.c.bf16 %v2820_v58, %v2819_v2  ;;  %v10527_v2 = vld [vmem:[#allocation17_spill] sm:$0xff] }
 0x14e   : > { %v8911_v47 = vadd.f32 %v7181_v55, %v1307_v17  ;;  %v7150_v34 = vpop.f32.mrf.mxu1  ;;  %7353 = vmatmul.mubr.msk.bf16.gmra.mxu1 %vm457_vm1, %v2836_v20  ;;  %v3113_v20 = vld [vmem:[#allocation2 + $0x152] sm:$0xff]  ;;  %v663_v58 = vsub.f32 0.0, %v10527_v2 }
 0x14f   : > { %v1510_v57 = vpop.f32.mrf.mxu0  ;;  %v1310_v44 = vadd.f32 %v7150_v34, %v1016_v21  ;;  %7356 = vmatprep.mubr.msk.bf16.mxu1 %vm457_vm1, %v2837_v23  ;;  %v1020_v21 = vadd.f32 %v8721_v15, %v8793_v51  ;;  %v3133_v34 = vpack.c.bf16 %v3114_v63, %v3113_v20  ;;  %v3383_v2 = vld [vmem:[#allocation3] sm:$0xff] }
 0x150   : > { %v8916_v0 = vadd.f32 %v1510_v57, %v1305_v39  ;;  %v1229_v59 = vpop.f32.mrf.mxu1 }
 0x151   : > { %v7184_v38 = vpop.f32.mrf.mxu0  ;;  %7387 = vmatmul.mubr.msk.bf16.gmra.mxu0 %vm457_vm1, %v3130_v5  ;;  %v1308_v26 = vadd.f32 %v1229_v59, %v1014_v22  ;;  %v3132_v5 = vpack.c.bf16 %v3112_v56, %v3111_v60  ;;  %v2822_v59 = vld [vmem:[#allocation2 + $0x171] sm:$0xff]  ;;  %v1021_v60 = vadd.f32 %v8739_v19, %v8793_v51 }
 0x152   : > { %v8922_v6 = vadd.f32 %v7184_v38, %v1310_v44  ;;  %7390 = vmatprep.mubr.msk.bf16.mxu0 %vm457_vm1, %v3131_v16  ;;  %v7151_v43 = vpop.f32.mrf.mxu1  ;;  %v10526_v38 = vld [vmem:[#allocation16_spill] sm:$0xff]  ;;  %v2840_v63 = vpack.c.bf16 %v2822_v59, %v2821_v52 }
 0x153   : > { %v1523_v53 = vpop.f32.mrf.mxu0  ;;  %v1311_v17 = vadd.f32 %v7151_v43, %v1017_v45  ;;  %v662_v15 = vsub.f32 0.0, %v10526_v38  ;;  %v3115_v43 = vld [vmem:[#allocation2 + $0x16a] sm:$0xff]  ;;  %v2826_v59 = vld [vmem:[#allocation2 + $0x1a1] sm:$0xff] }
 0x154   : > { %v8927_v23 = vadd.f32 %v1523_v53, %v1308_v26  ;;  %v1232_v29 = vpop.f32.mrf.mxu1  ;;  %v3116_v53 = vld [vmem:[#allocation2 + $0x172] sm:$0xff] }
 0x155   : > { %v7185_v55 = vpop.f32.mrf.mxu0  ;;  %v1309_v39 = vadd.f32 %v1232_v29, %v1015_v12  ;;  %v1019_v12 = vadd.f32 %v8793_v51, %v8745_v25  ;;  %v694_v19 = vmax.f32 %v662_v15, 0.0  ;;  %v1022_v25 = vadd.f32 %v8793_v51, %v8759_v1  ;;  %v3119_v1 = vld [vmem:[#allocation2 + $0x19a] sm:$0xff] }
 0x156   : > { %v8931_v16 = vadd.f32 %v7185_v55, %v1311_v17  ;;  %v7154_v57 = vpop.f32.mrf.mxu1  ;;  %7357 = vmatmul.mubr.msk.bf16.gmra.mxu1 %vm457_vm1, %v2838_v54 }
 0x157   : > { %v1526_v22 = vpop.f32.mrf.mxu0  ;;  %v1314_v44 = vadd.f32 %v7154_v57, %v1020_v21  ;;  %7360 = vmatprep.mubr.msk.bf16.mxu1 %vm457_vm1, %v2839_v31  ;;  %v695_v21 = vmax.f32 %v663_v58, 0.0  ;;  %727 = vst.msk [vmem:[#allocation3 + $0x181] sm:$0xff] %vm457_vm1, %v694_v19  ;;  %v3384_v58 = vld [vmem:[#allocation3 + $0x8] sm:$0xff] }
 0x158   : > { %v8936_v42 = vadd.f32 %v1526_v22, %v1309_v39  ;;  %v1245_v45 = vpop.f32.mrf.mxu1  ;;  %v1024_v39 = vadd.f32 %v8751_v36, %v8793_v51  ;;  %v2825_v36 = vld [vmem:[#allocation2 + $0x199] sm:$0xff] }
 0x159   : > { %v7188_v26 = vpop.f32.mrf.mxu0  ;;  %7391 = vmatmul.mubr.msk.bf16.gmra.mxu0 %vm457_vm1, %v3132_v5  ;;  %v1312_v56 = vadd.f32 %v1245_v45, %v1018_v10  ;;  %v3134_v5 = vpack.c.bf16 %v3116_v53, %v3115_v43  ;;  %728 = vst.msk [vmem:[#allocation3 + $0x189] sm:$0xff] %vm457_vm1, %v695_v21  ;;  %v1025_v45 = vadd.f32 %v8767_v61, %v8793_v51 }
 0x15a   : > { %v8944_v48 = vadd.f32 %v7188_v26, %v1314_v44  ;;  %7394 = vmatprep.mubr.msk.bf16.mxu0 %vm457_vm1, %v3133_v34  ;;  %v7155_v54 = vpop.f32.mrf.mxu1  ;;  %v2842_v53 = vpack.c.bf16 %v2826_v59, %v2825_v36  ;;  %v3415_v61 = vpack.c.bf16 %v3384_v58, %v3383_v2  ;;  %v3386_v36 = vld [vmem:[#allocation3 + $0x20] sm:$0xff]  ;;  %v1029_v2 = vadd.f32 %v8797_v37, %v8793_v51 }
 0x15b   : > { %v1539_v20 = vpop.f32.mrf.mxu0  ;;  %v1315_v17 = vadd.f32 %v7155_v54, %v1021_v60  ;;  %v3676_v54 = vld [vmem:[#allocation3 + $0x1] sm:$0xff] }
 0x15c   : > { %v8949_v31 = vadd.f32 %v1539_v20, %v1312_v56  ;;  %v1248_v29 = vpop.f32.mrf.mxu1  ;;  %v3120_v56 = vld [vmem:[#allocation2 + $0x1a2] sm:$0xff]  ;;  %v3677_v20 = vld [vmem:[#allocation3 + $0x9] sm:$0xff] }
 0x15d   : > { %v7189_v55 = vpop.f32.mrf.mxu0  ;;  %v1313_v34 = vadd.f32 %v1248_v29, %v1019_v12 }
 0x15e   : > { %v8953_v57 = vadd.f32 %v7189_v55, %v1315_v17  ;;  %v7158_v22 = vpop.f32.mrf.mxu1  ;;  %7361 = vmatmul.mubr.msk.bf16.gmra.mxu1 %vm457_vm1, %v2840_v63  ;;  %v1023_v63 = vadd.f32 %v8793_v51, %v8773_v24  ;;  %v1026_v24 = vadd.f32 %v8793_v51, %v8785_v41  ;;  %v3678_v41 = vld [vmem:[#allocation3 + $0x19] sm:$0xff] }
 0x15f   : > { %v1542_v10 = vpop.f32.mrf.mxu0  ;;  %v1318_v44 = vadd.f32 %v7158_v22, %v1024_v39  ;;  %7364 = vmatprep.mubr.msk.bf16.mxu1 %vm457_vm1, %v8596_v46  ;;  %v3708_v39 = vpack.c.bf16 %v3677_v20, %v3676_v54  ;;  %v1027_v54 = vadd.f32 %v8793_v51, %v8803_v30 }
 0x160   : > { %v8960_v52 = vadd.f32 %v1542_v10, %v1313_v34  ;;  %v1261_v38 = vpop.f32.mrf.mxu1 }
 0x161   : > { %v7192_v15 = vpop.f32.mrf.mxu0  ;;  %7395 = vmatmul.mubr.msk.bf16.gmra.mxu0 %vm457_vm1, %v3134_v5  ;;  %v1316_v26 = vadd.f32 %v1261_v38, %v1022_v25  ;;  %v3136_v5 = vpack.c.bf16 %v3120_v56, %v3119_v1  ;;  %v3387_v38 = vld [vmem:[#allocation3 + $0x30] sm:$0xff] }
 0x162   : > { %v8967_v60 = vadd.f32 %v7192_v15, %v1318_v44  ;;  %7398 = vmatprep.mubr.msk.bf16.mxu0 %vm457_vm1, %v8769_v3  ;;  %v7159_v46 = vpop.f32.mrf.mxu1  ;;  %v1028_v3 = vadd.f32 %v8777_v49, %v8793_v51  ;;  %v3385_v44 = vld [vmem:[#allocation3 + $0x18] sm:$0xff] }
 0x163   : > { %v1555_v43 = vpop.f32.mrf.mxu0  ;;  %v1319_v12 = vadd.f32 %v7159_v46, %v1025_v45  ;;  %v3388_v15 = vld [vmem:[#allocation3 + $0x38] sm:$0xff]  ;;  %v8991_v46 = vpack.c.bf16 %v3386_v36, %v3385_v44 }
 0x164   : > { %v8973_v17 = vadd.f32 %v1555_v43, %v1316_v26  ;;  %v1264_v29 = vpop.f32.mrf.mxu1  ;;  %v3679_v26 = vld [vmem:[#allocation3 + $0x21] sm:$0xff]  ;;  %v3680_v43 = vld [vmem:[#allocation3 + $0x31] sm:$0xff]  ;;  %v8997_v37 = vpack.c.bf16 %v3388_v15, %v3387_v38  ;;  %v9020_v44 = vld [vmem:[%s10456_s4 + $0xa] sm:$0x3] }
 0x165   : > { %v7193_v55 = vpop.f32.mrf.mxu0  ;;  %v1317_v19 = vadd.f32 %v1264_v29, %v1023_v63  ;;  %v4069_v29 = vsel %vm827_vm0, %v8812_v9, 0  ;;  %v3682_v15 = vld [vmem:[#allocation3 + $0x49] sm:$0xff] }
 0x166   : > { %v8977_v21 = vadd.f32 %v7193_v55, %v1319_v12  ;;  %v7162_v34 = vpop.f32.mrf.mxu1  ;;  %7365 = vmatmul.mubr.msk.bf16.gmra.mxu1 %vm457_vm1, %v2842_v53  ;;  %v3681_v53 = vld [vmem:[#allocation3 + $0x39] sm:$0xff]  ;;  %v3709_v55 = vpack.c.bf16 %v3679_v26, %v3678_v41 }
 0x167   : > { %v1558_v22 = vpop.f32.mrf.mxu0  ;;  %v1322_v10 = vadd.f32 %v7162_v34, %v1028_v3  ;;  %7404 = vmatprep.mubr.msk.bf16.mxu1 %vm457_vm1, %v3415_v61  ;;  %v4363_v34 = vsel %vm827_vm0, %v8827_v11, 0  ;;  %v3391_v11 = vld [vmem:[#allocation3 + $0x60] sm:$0xff] }
 0x168   : > { %v8982_v25 = vadd.f32 %v1558_v22, %v1317_v19  ;;  %v1277_v59 = vpop.f32.mrf.mxu1  ;;  %v3710_v19 = vpack.c.bf16 %v3681_v53, %v3680_v43 }
 0x169   : > { %v7196_v49 = vpop.f32.mrf.mxu0  ;;  %7399 = vmatmul.mubr.msk.bf16.gmra.mxu0 %vm457_vm1, %v3136_v5  ;;  %v1320_v58 = vadd.f32 %v1277_v59, %v1026_v24  ;;  %v3389_v24 = vld [vmem:[#allocation3 + $0x48] sm:$0xff] }
 0x16a   : > { %v8988_v45 = vadd.f32 %v7196_v49, %v1322_v10  ;;  %7438 = vmatprep.mubr.msk.bf16.mxu0 %vm457_vm1, %v3708_v39  ;;  %v7163_v1 = vpop.f32.mrf.mxu1  ;;  %v9006_v39 = vld [vmem:[%s10456_s4 + $0x8] sm:$0x3]  ;;  %v3390_v10 = vld [vmem:[#allocation3 + $0x50] sm:$0xff]  ;;  %v3392_v49 = vld [vmem:[#allocation3 + $0x68] sm:$0xff] }
 0x16b   : > { %v1571_v56 = vpop.f32.mrf.mxu0  ;;  %v1323_v20 = vadd.f32 %v7163_v1, %v1029_v2  ;;  %v3683_v2 = vld [vmem:[#allocation3 + $0x51] sm:$0xff]  ;;  %v9029_v26 = vpack.c.bf16 %v3390_v10, %v3389_v24  ;;  %v3684_v1 = vld [vmem:[#allocation3 + $0x61] sm:$0xff] }
 0x16c   : > { %v8995_v63 = vadd.f32 %v1571_v56, %v1320_v58  ;;  %v1280_v12 = vpop.f32.mrf.mxu1  ;;  %v3685_v56 = vld [vmem:[#allocation3 + $0x69] sm:$0xff]  ;;  %v3396_v10 = vld [vmem:[#allocation3 + $0x98] sm:$0xff] }
 0x16d   : > { %v7197_v61 = vpop.f32.mrf.mxu0  ;;  %v1321_v5 = vadd.f32 %v1280_v12, %v1027_v54  ;;  %v3711_v12 = vpack.c.bf16 %v3683_v2, %v3682_v15  ;;  %v3688_v2 = vld [vmem:[#allocation3 + $0x91] sm:$0xff] }
 0x16e   : > { %v9001_v3 = vadd.f32 %v7197_v61, %v1323_v20  ;;  %v7202_v30 = vpop.f32.mrf.mxu1  ;;  %7405 = vmatmul.mubr.msk.bf16.vlgmr.msra.gmra.mxu1 %vm457_vm1, %v8991_v46 }
 0x16f   : > { %v1574_v51 = vpop.f32.mrf.mxu0  ;;  %v1882_v9 = vadd.f32 %v7202_v30, %v8835_v35  ;;  %7471 = vmatpush3.bf16.msra.mxu1 %v4069_v29  ;;  %7408 = vmatprep.mubr.msk.bf16.mxu1 %vm457_vm1, %v8997_v37  ;;  %v3393_v30 = vld [vmem:[#allocation3 + $0x78] sm:$0xff] }
 0x170   : > { %v9012_v22 = vadd.f32 %v1574_v51, %v1321_v5  ;;  %v1753_v36 = vpop.f32.mrf.mxu1  ;;  %7760 = vmatprep.subr.msk.bf16.mxu1 %vm827_vm0, %v9006_v39 }
 0x171   : > { %v7236_v59 = vpop.f32.mrf.mxu0  ;;  %7439 = vmatmul.mubr.msk.bf16.vlgmr.msra.gmra.mxu0 %vm457_vm1, %v3709_v55  ;;  %v1880_v35 = vadd.f32 %v1753_v36, %v8843_v28  ;;  %v9036_v28 = vpack.c.bf16 %v3392_v49, %v3391_v11  ;;  %v3712_v55 = vpack.c.bf16 %v3685_v56, %v3684_v1  ;;  %v3687_v11 = vld [vmem:[#allocation3 + $0x81] sm:$0xff] }
 0x172   : > { %v9026_v38 = vadd.f32 %v7236_v59, %v1882_v9  ;;  %7442 = vmatprep.mubr.msk.bf16.mxu0 %vm457_vm1, %v3710_v19  ;;  %7505 = vmatpush3.bf16.msra.mxu0 %v4363_v34  ;;  %v7203_v58 = vpop.f32.mrf.mxu1  ;;  %v3394_v34 = vld [vmem:[#allocation3 + $0x80] sm:$0xff] }
 0x173   : > { %v2047_v41 = vpop.f32.mrf.mxu0  ;;  %7761 = vmatprep.subr.msk.bf16.mxu0 %vm827_vm0, %v9020_v44  ;;  %v1883_v43 = vadd.f32 %v7203_v58, %v8847_v27  ;;  %v9053_v15 = vpack.c.bf16 %v3394_v34, %v3393_v30  ;;  %v3689_v58 = vld [vmem:[#allocation3 + $0x99] sm:$0xff]  ;;  %v3398_v30 = vld [vmem:[#allocation3 + $0xb0] sm:$0xff] }
 0x174   : > { %v9034_v53 = vadd.f32 %v2047_v41, %v1880_v35  ;;  %v1756_v54 = vpop.f32.mrf.mxu1 }
 0x175   : > { %v7237_v20 = vpop.f32.mrf.mxu0  ;;  %v1881_v61 = vadd.f32 %v1756_v54, %v8853_v4  ;;  %v3395_v4 = vld [vmem:[#allocation3 + $0x90] sm:$0xff] }
 0x176   : > { %v9039_v29 = vadd.f32 %v7237_v20, %v1883_v43  ;;  %v7206_v5 = vpop.f32.mrf.mxu1  ;;  %7409 = vmatmul.mubr.msk.bf16.gmra.mxu1 %vm457_vm1, %v9029_v26  ;;  %v9058_v56 = vpack.c.bf16 %v3396_v10, %v3395_v4 }
 0x177   : > { %v2050_v19 = vpop.f32.mrf.mxu0  ;;  %v1886_v51 = vadd.f32 %v7206_v5, %v8861_v62  ;;  %7412 = vmatprep.mubr.msk.bf16.mxu1 %vm457_vm1, %v9036_v28  ;;  %v3686_v62 = vld [vmem:[#allocation3 + $0x79] sm:$0xff] }
 0x178   : > { %v9044_v27 = vadd.f32 %v2050_v19, %v1881_v61  ;;  %v1769_v9 = vpop.f32.mrf.mxu1  ;;  %v3713_v54 = vpack.c.bf16 %v3687_v11, %v3686_v62  ;;  %v3714_v61 = vpack.c.bf16 %v3689_v58, %v3688_v2  ;;  %v3693_v2 = vld [vmem:[#allocation3 + $0xc9] sm:$0xff] }
 0x179   : > { %v7240_v24 = vpop.f32.mrf.mxu0  ;;  %7443 = vmatmul.mubr.msk.bf16.gmra.mxu0 %vm457_vm1, %v3711_v12  ;;  %v1884_v36 = vadd.f32 %v1769_v9, %v8867_v33 }
 0x17a   : > { %v9050_v59 = vadd.f32 %v7240_v24, %v1886_v51  ;;  %7446 = vmatprep.mubr.msk.bf16.mxu0 %vm457_vm1, %v3712_v55  ;;  %v7207_v49 = vpop.f32.mrf.mxu1  ;;  %v3397_v51 = vld [vmem:[#allocation3 + $0xa8] sm:$0xff] }
 0x17b   : > { %v2063_v35 = vpop.f32.mrf.mxu0  ;;  %v1887_v41 = vadd.f32 %v7207_v49, %v8871_v18  ;;  %v3400_v24 = vld [vmem:[#allocation3 + $0xc8] sm:$0xff]  ;;  %v9075_v49 = vpack.c.bf16 %v3398_v30, %v3397_v51  ;;  %v3401_v30 = vld [vmem:[#allocation3 + $0xd8] sm:$0xff] }
 0x17c   : > { %v9056_v1 = vadd.f32 %v2063_v35, %v1884_v36  ;;  %v1772_v43 = vpop.f32.mrf.mxu1  ;;  %v3691_v36 = vld [vmem:[#allocation3 + $0xb1] sm:$0xff]  ;;  %v3692_v35 = vld [vmem:[#allocation3 + $0xc1] sm:$0xff] }
 0x17d   : > { %v7241_v33 = vpop.f32.mrf.mxu0  ;;  %v1885_v20 = vadd.f32 %v1772_v43, %v8877_v13  ;;  %v3399_v13 = vld [vmem:[#allocation3 + $0xc0] sm:$0xff] }
 0x17e   : > { %v9061_v12 = vadd.f32 %v7241_v33, %v1887_v41  ;;  %v7210_v55 = vpop.f32.mrf.mxu1  ;;  %7413 = vmatmul.mubr.msk.bf16.gmra.mxu1 %vm457_vm1, %v9053_v15  ;;  %v9080_v43 = vpack.c.bf16 %v3400_v24, %v3399_v13  ;;  %v3404_v24 = vld [vmem:[#allocation3 + $0xf8] sm:$0xff] }
 0x17f   : > { %v2066_v5 = vpop.f32.mrf.mxu0  ;;  %v1890_v19 = vadd.f32 %v7210_v55, %v8884_v50  ;;  %7416 = vmatprep.mubr.msk.bf16.mxu1 %vm457_vm1, %v9058_v56  ;;  %v3690_v50 = vld [vmem:[#allocation3 + $0xa9] sm:$0xff]  ;;  %v3716_v55 = vpack.c.bf16 %v3693_v2, %v3692_v35  ;;  %v3696_v2 = vld [vmem:[#allocation3 + $0xf1] sm:$0xff] }
 0x180   : > { %v9066_v18 = vadd.f32 %v2066_v5, %v1885_v20  ;;  %v1785_v34 = vpop.f32.mrf.mxu1 }
 0x181   : > { %v7244_v9 = vpop.f32.mrf.mxu0  ;;  %7447 = vmatmul.mubr.msk.bf16.gmra.mxu0 %vm457_vm1, %v3713_v54  ;;  %v1888_v4 = vadd.f32 %v1785_v34, %v8889_v14  ;;  %v3715_v54 = vpack.c.bf16 %v3691_v36, %v3690_v50  ;;  %v3402_v34 = vld [vmem:[#allocation3 + $0xe0] sm:$0xff] }
 0x182   : > { %v9072_v10 = vadd.f32 %v7244_v9, %v1890_v19  ;;  %7450 = vmatprep.mubr.msk.bf16.mxu0 %vm457_vm1, %v3714_v61  ;;  %v7211_v62 = vpop.f32.mrf.mxu1  ;;  %v3695_v36 = vld [vmem:[#allocation3 + $0xe1] sm:$0xff]  ;;  %v9097_v35 = vpack.c.bf16 %v3402_v34, %v3401_v30 }
 0x183   : > { %v2079_v11 = vpop.f32.mrf.mxu0  ;;  %v1891_v58 = vadd.f32 %v7211_v62, %v8893_v40  ;;  %v3405_v34 = vld [vmem:[#allocation3 + $0x108] sm:$0xff] }
 0x184   : > { %v9078_v41 = vadd.f32 %v2079_v11, %v1888_v4  ;;  %v1788_v33 = vpop.f32.mrf.mxu1 }
 0x185   : > { %v7245_v14 = vpop.f32.mrf.mxu0  ;;  %v1889_v20 = vadd.f32 %v1788_v33, %v8898_v7  ;;  %v3403_v7 = vld [vmem:[#allocation3 + $0xf0] sm:$0xff] }
 0x186   : > { %v9083_v61 = vadd.f32 %v7245_v14, %v1891_v58  ;;  %v7214_v5 = vpop.f32.mrf.mxu1  ;;  %7417 = vmatmul.mubr.msk.bf16.gmra.mxu1 %vm457_vm1, %v9075_v49  ;;  %v3697_v58 = vld [vmem:[#allocation3 + $0xf9] sm:$0xff] }
 0x187   : > { %v2082_v19 = vpop.f32.mrf.mxu0  ;;  %v1894_v51 = vadd.f32 %v7214_v5, %v8904_v8  ;;  %7420 = vmatprep.mubr.msk.bf16.mxu1 %vm457_vm1, %v9080_v43  ;;  %v3694_v8 = vld [vmem:[#allocation3 + $0xd9] sm:$0xff] }
 0x188   : > { %v9088_v40 = vadd.f32 %v2082_v19, %v1889_v20  ;;  %v1801_v9 = vpop.f32.mrf.mxu1  ;;  %v3717_v5 = vpack.c.bf16 %v3695_v36, %v3694_v8  ;;  %v3408_v8 = vld [vmem:[#allocation3 + $0x128] sm:$0xff] }
 0x189   : > { %v7248_v13 = vpop.f32.mrf.mxu0  ;;  %7451 = vmatmul.mubr.msk.bf16.gmra.mxu0 %vm457_vm1, %v3715_v54  ;;  %v1892_v4 = vadd.f32 %v1801_v9, %v8907_v32  ;;  %v9102_v54 = vpack.c.bf16 %v3404_v24, %v3403_v7  ;;  %v3406_v7 = vld [vmem:[#allocation3 + $0x110] sm:$0xff] }
 0x18a   : > { %v9094_v50 = vadd.f32 %v7248_v13, %v1894_v51  ;;  %7454 = vmatprep.mubr.msk.bf16.mxu0 %vm457_vm1, %v3716_v55  ;;  %v7215_v62 = vpop.f32.mrf.mxu1  ;;  %v3718_v51 = vpack.c.bf16 %v3697_v58, %v3696_v2 }
 0x18b   : > { %v2095_v11 = vpop.f32.mrf.mxu0  ;;  %v1895_v33 = vadd.f32 %v7215_v62, %v8911_v47  ;;  %10528 = vst [vmem:[#allocation6_spill] sm:$0xff] %v9102_v54 }
 0x18c   : > { %v9100_v14 = vadd.f32 %v2095_v11, %v1892_v4  ;;  %v1804_v20 = vpop.f32.mrf.mxu1  ;;  %v3699_v11 = vld [vmem:[#allocation3 + $0x111] sm:$0xff] }
 0x18d   : > { %v7249_v32 = vpop.f32.mrf.mxu0  ;;  %v1893_v19 = vadd.f32 %v1804_v20, %v8916_v0  ;;  %v3407_v0 = vld [vmem:[#allocation3 + $0x120] sm:$0xff] }
 0x18e   : > { %v9105_v55 = vadd.f32 %v7249_v32, %v1895_v33  ;;  %v7218_v9 = vpop.f32.mrf.mxu1  ;;  %7421 = vmatmul.mubr.msk.bf16.gmra.mxu1 %vm457_vm1, %v9097_v35  ;;  %v9119_v33 = vpack.c.bf16 %v3406_v7, %v3405_v34  ;;  %v3700_v20 = vld [vmem:[#allocation3 + $0x121] sm:$0xff]  ;;  %v3701_v32 = vld [vmem:[#allocation3 + $0x129] sm:$0xff] }
 0x18f   : > { %v2098_v13 = vpop.f32.mrf.mxu0  ;;  %v1898_v30 = vadd.f32 %v7218_v9, %v8922_v6  ;;  %7424 = vmatprep.mubr.msk.bf16.mxu1 %vm457_vm1, %v9102_v54  ;;  %v3698_v6 = vld [vmem:[#allocation3 + $0x109] sm:$0xff] }
 0x190   : > { %v9110_v47 = vadd.f32 %v2098_v13, %v1893_v19  ;;  %v1817_v24 = vpop.f32.mrf.mxu1 }
 0x191   : > { %v7252_v4 = vpop.f32.mrf.mxu0  ;;  %7455 = vmatmul.mubr.msk.bf16.gmra.mxu0 %vm457_vm1, %v3717_v5  ;;  %v1896_v36 = vadd.f32 %v1817_v24, %v8927_v23  ;;  %v9124_v5 = vpack.c.bf16 %v3408_v8, %v3407_v0  ;;  %v3409_v0 = vld [vmem:[#allocation3 + $0x138] sm:$0xff]  ;;  %v3410_v8 = vld [vmem:[#allocation3 + $0x140] sm:$0xff] }
 0x192   : > { %v9116_v62 = vadd.f32 %v7252_v4, %v1898_v30  ;;  %7458 = vmatprep.mubr.msk.bf16.mxu0 %vm457_vm1, %v3718_v51  ;;  %v7219_v2 = vpop.f32.mrf.mxu1  ;;  %v3719_v30 = vpack.c.bf16 %v3699_v11, %v3698_v6  ;;  %v9129_v4 = vpack.c.bf16 %v3701_v32, %v3700_v20  ;;  %v3411_v6 = vld [vmem:[#allocation3 + $0x150] sm:$0xff]  ;;  %v3412_v11 = vld [vmem:[#allocation3 + $0x158] sm:$0xff] }
 0x193   : > { %v2111_v58 = vpop.f32.mrf.mxu0  ;;  %v1899_v19 = vadd.f32 %v7219_v2, %v8931_v16  ;;  %10529 = vst [vmem:[#allocation7_spill] sm:$0xff] %v9124_v5 }
 0x194   : > { %v9122_v9 = vadd.f32 %v2111_v58, %v1896_v36  ;;  %v1820_v13 = vpop.f32.mrf.mxu1  ;;  %10530 = vst [vmem:[#allocation18_spill] sm:$0xff] %v9129_v4 }
 0x195   : > { %v7253_v23 = vpop.f32.mrf.mxu0  ;;  %v1897_v24 = vadd.f32 %v1820_v13, %v8936_v42  ;;  %v3704_v13 = vld [vmem:[#allocation3 + $0x151] sm:$0xff] }
 0x196   : > { %v9127_v51 = vadd.f32 %v7253_v23, %v1899_v19  ;;  %v7222_v54 = vpop.f32.mrf.mxu1  ;;  %7425 = vmatmul.mubr.msk.bf16.gmra.mxu1 %vm457_vm1, %v9119_v33  ;;  %v9144_v19 = vpack.c.bf16 %v3410_v8, %v3409_v0  ;;  %v3705_v23 = vld [vmem:[#allocation3 + $0x159] sm:$0xff] }
 0x197   : > { %v2114_v34 = vpop.f32.mrf.mxu0  ;;  %v1902_v16 = vadd.f32 %v7222_v54, %v8944_v48  ;;  %7428 = vmatprep.mubr.msk.bf16.mxu1 %vm457_vm1, %v9124_v5  ;;  %v3702_v48 = vld [vmem:[#allocation3 + $0x139] sm:$0xff]  ;;  %v3703_v54 = vld [vmem:[#allocation3 + $0x141] sm:$0xff]  ;;  %v9154_v5 = vpack.c.bf16 %v3705_v23, %v3704_v13 }
 0x198   : > { %v9134_v7 = vadd.f32 %v2114_v34, %v1897_v24  ;;  %v1833_v36 = vpop.f32.mrf.mxu1  ;;  %v9149_v34 = vpack.c.bf16 %v3412_v11, %v3411_v6  ;;  %v3413_v6 = vld [vmem:[#allocation3 + $0x168] sm:$0xff]  ;;  %v3414_v11 = vld [vmem:[#allocation3 + $0x170] sm:$0xff] }
 0x199   : > { %v7256_v42 = vpop.f32.mrf.mxu0  ;;  %7459 = vmatmul.mubr.msk.bf16.gmra.mxu0 %vm457_vm1, %v3719_v30  ;;  %v1900_v2 = vadd.f32 %v1833_v36, %v8949_v31  ;;  %v3721_v36 = vpack.c.bf16 %v3703_v54, %v3702_v48  ;;  %10533 = vst [vmem:[#allocation5_spill] sm:$0xff] %v9154_v5  ;;  %v3970_v48 = vld [vmem:[#allocation3 + $0x2] sm:$0xff]  ;;  %v3971_v54 = vld [vmem:[#allocation3 + $0xa] sm:$0xff] }
 0x19a   : > { %v9140_v58 = vadd.f32 %v7256_v42, %v1902_v16  ;;  %7462 = vmatprep.mubr.msk.bf16.mxu0 %vm457_vm1, %v9129_v4  ;;  %v7223_v20 = vpop.f32.mrf.mxu1  ;;  %10532 = vst [vmem:[#allocation4_spill] sm:$0xff] %v9149_v34 }
 0x19b   : > { %v2127_v32 = vpop.f32.mrf.mxu0  ;;  %v1903_v24 = vadd.f32 %v7223_v20, %v8953_v57 }
 0x19c   : > { %10531 = vst [vmem:[#allocation19_spill] sm:$0xff] %v9140_v58  ;;  %v9147_v30 = vadd.f32 %v2127_v32, %v1900_v2  ;;  %v1836_v31 = vpop.f32.mrf.mxu1 }
 0x19d   : > { %v7257_v16 = vpop.f32.mrf.mxu0  ;;  %v1901_v42 = vadd.f32 %v1836_v31, %v8960_v52 }
 0x19e   : > { %v9152_v4 = vadd.f32 %v7257_v16, %v1903_v24  ;;  %v7226_v58 = vpop.f32.mrf.mxu1  ;;  %7429 = vmatmul.mubr.msk.bf16.gmra.mxu1 %vm457_vm1, %v9144_v19  ;;  %v9169_v24 = vpack.c.bf16 %v3414_v11, %v3413_v6 }
 0x19f   : > { %v2130_v0 = vpop.f32.mrf.mxu0  ;;  %v1906_v57 = vadd.f32 %v7226_v58, %v8967_v60  ;;  %7432 = vmatprep.mubr.msk.bf16.mxu1 %vm457_vm1, %v9149_v34  ;;  %v3706_v60 = vld [vmem:[#allocation3 + $0x169] sm:$0xff]  ;;  %v3707_v58 = vld [vmem:[#allocation3 + $0x171] sm:$0xff] }
 0x1a0   : > { %v9159_v8 = vadd.f32 %v2130_v0, %v1901_v42  ;;  %v1849_v2 = vpop.f32.mrf.mxu1  ;;  %v9174_v34 = vpack.c.bf16 %v3707_v58, %v3706_v60  ;;  %v3975_v60 = vld [vmem:[#allocation3 + $0x3a] sm:$0xff] }
 0x1a1   : > { %v7260_v52 = vpop.f32.mrf.mxu0  ;;  %7463 = vmatmul.mubr.msk.bf16.gmra.mxu0 %vm457_vm1, %v3721_v36  ;;  %v1904_v20 = vadd.f32 %v1849_v2, %v8973_v17  ;;  %v4002_v36 = vpack.c.bf16 %v3971_v54, %v3970_v48  ;;  %v3973_v48 = vld [vmem:[#allocation3 + $0x22] sm:$0xff] }
 0x1a2   : > { %v9165_v32 = vadd.f32 %v7260_v52, %v1906_v57  ;;  %7466 = vmatprep.mubr.msk.bf16.mxu0 %vm457_vm1, %v9154_v5  ;;  %v7227_v13 = vpop.f32.mrf.mxu1  ;;  %10534 = vst [vmem:[#allocation10_spill] sm:$0xff] %v9174_v34 }
 0x1a3   : > { %v2143_v23 = vpop.f32.mrf.mxu0  ;;  %v1907_v31 = vadd.f32 %v7227_v13, %v8977_v21  ;;  %v3972_v21 = vld [vmem:[#allocation3 + $0x1a] sm:$0xff] }
 0x1a4   : > { %v9172_v16 = vadd.f32 %v2143_v23, %v1904_v20  ;;  %v1852_v42 = vpop.f32.mrf.mxu1 }
 0x1a5   : > { %v7261_v0 = vpop.f32.mrf.mxu0  ;;  %v1905_v17 = vadd.f32 %v1852_v42, %v8982_v25  ;;  %v3974_v25 = vld [vmem:[#allocation3 + $0x32] sm:$0xff] }
 0x1a6   : > { %v9177_v57 = vadd.f32 %v7261_v0, %v1907_v31  ;;  %v7230_v2 = vpop.f32.mrf.mxu1  ;;  %7433 = vmatmul.mubr.msk.bf16.gmra.mxu1 %vm457_vm1, %v9169_v24  ;;  %v9192_v31 = vpack.c.bf16 %v3973_v48, %v3972_v21  ;;  %v9197_v0 = vpack.c.bf16 %v3975_v60, %v3974_v25  ;;  %v4951_v48 = vsel %vm827_vm0, %v9020_v44, 0  ;;  %v9221_v25 = vld [vmem:[%s10456_s4 + $0xe] sm:$0x3]  ;;  %v3978_v44 = vld [vmem:[#allocation3 + $0x62] sm:$0xff] }
 0x1a7   : > { %v2146_v52 = vpop.f32.mrf.mxu0  ;;  %v1910_v6 = vadd.f32 %v7230_v2, %v8988_v45  ;;  %7472 = vmatprep.mubr.msk.bf16.mxu1 %vm457_vm1, %v4002_v36 }
 0x1a8   : > { %v9182_v11 = vadd.f32 %v2146_v52, %v1905_v17  ;;  %v1865_v54 = vpop.f32.mrf.mxu1 }
 0x1a9   : > { %v7264_v20 = vpop.f32.mrf.mxu0  ;;  %7467 = vmatmul.mubr.msk.bf16.gmra.mxu0 %vm457_vm1, %v9174_v34  ;;  %v1908_v58 = vadd.f32 %v1865_v54, %v8995_v63  ;;  %v4657_v63 = vsel %vm827_vm0, %v9006_v39, 0 }
 0x1aa   : > { %v9188_v13 = vadd.f32 %v7264_v20, %v1910_v6  ;;  %7506 = vmatprep.mubr.msk.bf16.mxu0 %vm457_vm1, %v8991_v46  ;;  %v7231_v45 = vpop.f32.mrf.mxu1  ;;  %v9207_v46 = vld [vmem:[%s10456_s4 + $0xc] sm:$0x3]  ;;  %v3977_v20 = vld [vmem:[#allocation3 + $0x52] sm:$0xff] }
 0x1ab   : > { %v2159_v23 = vpop.f32.mrf.mxu0  ;;  %v1911_v36 = vadd.f32 %v7231_v45, %v9001_v3  ;;  %v3979_v45 = vld [vmem:[#allocation3 + $0x6a] sm:$0xff] }
 0x1ac   : > { %v9195_v42 = vadd.f32 %v2159_v23, %v1908_v58  ;;  %v1868_v17 = vpop.f32.mrf.mxu1 }
 0x1ad   : > { %v7265_v2 = vpop.f32.mrf.mxu0  ;;  %v1909_v52 = vadd.f32 %v1868_v17, %v9012_v22  ;;  %v3976_v22 = vld [vmem:[#allocation3 + $0x4a] sm:$0xff] }
 0x1ae   : > { %v9202_v6 = vadd.f32 %v7265_v2, %v1911_v36  ;;  %v7270_v3 = vpop.f32.mrf.mxu1  ;;  %7473 = vmatmul.mubr.msk.bf16.vlgmr.msra.gmra.mxu1 %vm457_vm1, %v9192_v31  ;;  %v9232_v2 = vpack.c.bf16 %v3977_v20, %v3976_v22 }
 0x1af   : > { %v2162_v21 = vpop.f32.mrf.mxu0  ;;  %v2470_v39 = vadd.f32 %v7270_v3, %v9026_v38  ;;  %7539 = vmatpush3.bf16.msra.mxu1 %v4657_v63  ;;  %7476 = vmatprep.mubr.msk.bf16.mxu1 %vm457_vm1, %v9197_v0 }
 0x1b0   : > { %v9213_v54 = vadd.f32 %v2162_v21, %v1909_v52  ;;  %v2341_v60 = vpop.f32.mrf.mxu1  ;;  %7762 = vmatprep.subr.msk.bf16.mxu1 %vm827_vm0, %v9207_v46  ;;  %v9239_v52 = vpack.c.bf16 %v3979_v45, %v3978_v44  ;;  %v3983_v45 = vld [vmem:[#allocation3 + $0x9a] sm:$0xff] }
 0x1b1   : > { %v7304_v58 = vpop.f32.mrf.mxu0  ;;  %7507 = vmatmul.mubr.msk.bf16.vlgmr.msra.gmra.mxu0 %vm457_vm1, %v8997_v37  ;;  %v2468_v38 = vadd.f32 %v2341_v60, %v9034_v53  ;;  %v3981_v60 = vld [vmem:[#allocation3 + $0x82] sm:$0xff] }
 0x1b2   : > { %v9228_v23 = vadd.f32 %v7304_v58, %v2470_v39  ;;  %7510 = vmatprep.mubr.msk.bf16.mxu0 %vm457_vm1, %v9029_v26  ;;  %7573 = vmatpush3.bf16.msra.mxu0 %v4951_v48  ;;  %v7271_v36 = vpop.f32.mrf.mxu1 }
 0x1b3   : > { %v2636_v17 = vpop.f32.mrf.mxu0  ;;  %7763 = vmatprep.subr.msk.bf16.mxu0 %vm827_vm0, %v9221_v25  ;;  %v2471_v37 = vadd.f32 %v7271_v36, %v9039_v29  ;;  %v3980_v29 = vld [vmem:[#allocation3 + $0x7a] sm:$0xff] }
 0x1b4   : > { %v9237_v63 = vadd.f32 %v2636_v17, %v2468_v38  ;;  %v2344_v53 = vpop.f32.mrf.mxu1 }
 0x1b5   : > { %v7305_v21 = vpop.f32.mrf.mxu0  ;;  %v2469_v3 = vadd.f32 %v2344_v53, %v9044_v27  ;;  %v3982_v27 = vld [vmem:[#allocation3 + $0x92] sm:$0xff] }
 0x1b6   : > { %v9242_v39 = vadd.f32 %v7305_v21, %v2471_v37  ;;  %v7274_v26 = vpop.f32.mrf.mxu1  ;;  %7477 = vmatmul.mubr.msk.bf16.gmra.mxu1 %vm457_vm1, %v9232_v2  ;;  %v9258_v37 = vpack.c.bf16 %v3981_v60, %v3980_v29  ;;  %v3985_v60 = vld [vmem:[#allocation3 + $0xb2] sm:$0xff] }
 0x1b7   : > { %v2639_v48 = vpop.f32.mrf.mxu0  ;;  %v2474_v22 = vadd.f32 %v7274_v26, %v9050_v59  ;;  %7480 = vmatprep.mubr.msk.bf16.mxu1 %vm457_vm1, %v9239_v52 }
 0x1b8   : > { %v9247_v20 = vadd.f32 %v2639_v48, %v2469_v3  ;;  %v2357_v58 = vpop.f32.mrf.mxu1  ;;  %v9263_v3 = vpack.c.bf16 %v3983_v45, %v3982_v27  ;;  %v3987_v45 = vld [vmem:[#allocation3 + $0xca] sm:$0xff] }
 0x1b9   : > { %v7308_v44 = vpop.f32.mrf.mxu0  ;;  %7511 = vmatmul.mubr.msk.bf16.gmra.mxu0 %vm457_vm1, %v9036_v28  ;;  %v2472_v38 = vadd.f32 %v2357_v58, %v9056_v1 }
 0x1ba   : > { %v9254_v36 = vadd.f32 %v7308_v44, %v2474_v22  ;;  %7514 = vmatprep.mubr.msk.bf16.mxu0 %vm457_vm1, %v9053_v15  ;;  %v7275_v59 = vpop.f32.mrf.mxu1 }
 0x1bb   : > { %v2652_v17 = vpop.f32.mrf.mxu0  ;;  %v2475_v53 = vadd.f32 %v7275_v59, %v9061_v12  ;;  %v3984_v12 = vld [vmem:[#allocation3 + $0xaa] sm:$0xff] }
 0x1bc   : > { %v9261_v21 = vadd.f32 %v2652_v17, %v2472_v38  ;;  %v2360_v28 = vpop.f32.mrf.mxu1 }
 0x1bd   : > { %v7309_v26 = vpop.f32.mrf.mxu0  ;;  %v2473_v48 = vadd.f32 %v2360_v28, %v9066_v18  ;;  %v3986_v18 = vld [vmem:[#allocation3 + $0xc2] sm:$0xff] }
 0x1be   : > { %v9266_v1 = vadd.f32 %v7309_v26, %v2475_v53  ;;  %v7278_v22 = vpop.f32.mrf.mxu1  ;;  %7481 = vmatmul.mubr.msk.bf16.gmra.mxu1 %vm457_vm1, %v9258_v37  ;;  %v9282_v53 = vpack.c.bf16 %v3985_v60, %v3984_v12  ;;  %v3989_v60 = vld [vmem:[#allocation3 + $0xe2] sm:$0xff] }
 0x1bf   : > { %v2655_v58 = vpop.f32.mrf.mxu0  ;;  %v2478_v15 = vadd.f32 %v7278_v22, %v9072_v10  ;;  %7484 = vmatprep.mubr.msk.bf16.mxu1 %vm457_vm1, %v9263_v3 }
 0x1c0   : > { %v9271_v29 = vadd.f32 %v2655_v58, %v2473_v48  ;;  %v2373_v44 = vpop.f32.mrf.mxu1  ;;  %v9287_v48 = vpack.c.bf16 %v3987_v45, %v3986_v18  ;;  %v3991_v45 = vld [vmem:[#allocation3 + $0xfa] sm:$0xff] }
 0x1c1   : > { %v7312_v27 = vpop.f32.mrf.mxu0  ;;  %7515 = vmatmul.mubr.msk.bf16.gmra.mxu0 %vm457_vm1, %v9058_v56  ;;  %v2476_v38 = vadd.f32 %v2373_v44, %v9078_v41 }
 0x1c2   : > { %v9278_v59 = vadd.f32 %v7312_v27, %v2478_v15  ;;  %7518 = vmatprep.mubr.msk.bf16.mxu0 %vm457_vm1, %v9075_v49  ;;  %v7279_v10 = vpop.f32.mrf.mxu1 }
 0x1c3   : > { %v2668_v17 = vpop.f32.mrf.mxu0  ;;  %v2479_v28 = vadd.f32 %v7279_v10, %v9083_v61  ;;  %v3988_v61 = vld [vmem:[#allocation3 + $0xda] sm:$0xff] }
 0x1c4   : > { %v9285_v26 = vadd.f32 %v2668_v17, %v2476_v38  ;;  %v2376_v56 = vpop.f32.mrf.mxu1 }
 0x1c5   : > { %v7313_v22 = vpop.f32.mrf.mxu0  ;;  %v2477_v58 = vadd.f32 %v2376_v56, %v9088_v40  ;;  %v3990_v40 = vld [vmem:[#allocation3 + $0xf2] sm:$0xff] }
 0x1c6   : > { %v9290_v41 = vadd.f32 %v7313_v22, %v2479_v28  ;;  %v7282_v15 = vpop.f32.mrf.mxu1  ;;  %7485 = vmatmul.mubr.msk.bf16.gmra.mxu1 %vm457_vm1, %v9282_v53  ;;  %v9306_v28 = vpack.c.bf16 %v3989_v60, %v3988_v61  ;;  %v3993_v60 = vld [vmem:[#allocation3 + $0x112] sm:$0xff] }
 0x1c7   : > { %v2671_v44 = vpop.f32.mrf.mxu0  ;;  %v2482_v49 = vadd.f32 %v7282_v15, %v9094_v50  ;;  %7488 = vmatprep.mubr.msk.bf16.mxu1 %vm457_vm1, %v9287_v48 }
 0x1c8   : > { %v9295_v12 = vadd.f32 %v2671_v44, %v2477_v58  ;;  %v2389_v27 = vpop.f32.mrf.mxu1  ;;  %v9311_v58 = vpack.c.bf16 %v3991_v45, %v3990_v40  ;;  %v10535_v45 = vld [vmem:[#allocation6_spill] sm:$0xff] }
 0x1c9   : > { %v7316_v18 = vpop.f32.mrf.mxu0  ;;  %7519 = vmatmul.mubr.msk.bf16.gmra.mxu0 %vm457_vm1, %v9080_v43  ;;  %v2480_v38 = vadd.f32 %v2389_v27, %v9100_v14 }
 0x1ca   : > { %v9302_v10 = vadd.f32 %v7316_v18, %v2482_v49  ;;  %7522 = vmatprep.mubr.msk.bf16.mxu0 %vm457_vm1, %v9097_v35  ;;  %v7283_v50 = vpop.f32.mrf.mxu1 }
 0x1cb   : > { %v2684_v17 = vpop.f32.mrf.mxu0  ;;  %v2483_v56 = vadd.f32 %v7283_v50, %v9105_v55  ;;  %v3992_v55 = vld [vmem:[#allocation3 + $0x10a] sm:$0xff] }
 0x1cc   : > { %v9309_v22 = vadd.f32 %v2684_v17, %v2480_v38  ;;  %v2392_v43 = vpop.f32.mrf.mxu1  ;;  %v3995_v38 = vld [vmem:[#allocation3 + $0x12a] sm:$0xff] }
 0x1cd   : > { %v7317_v15 = vpop.f32.mrf.mxu0  ;;  %v2481_v44 = vadd.f32 %v2392_v43, %v9110_v47  ;;  %v3994_v47 = vld [vmem:[#allocation3 + $0x122] sm:$0xff]  ;;  %v9330_v43 = vpack.c.bf16 %v3993_v60, %v3992_v55 }
 0x1ce   : > { %v9314_v14 = vadd.f32 %v7317_v15, %v2483_v56  ;;  %v7286_v49 = vpop.f32.mrf.mxu1  ;;  %7489 = vmatmul.mubr.msk.bf16.gmra.mxu1 %vm457_vm1, %v9306_v28 }
 0x1cf   : > { %v2687_v27 = vpop.f32.mrf.mxu0  ;;  %v2486_v35 = vadd.f32 %v7286_v49, %v9116_v62  ;;  %7492 = vmatprep.mubr.msk.bf16.mxu1 %vm457_vm1, %v9311_v58  ;;  %v9335_v49 = vpack.c.bf16 %v3995_v38, %v3994_v47 }
 0x1d0   : > { %v9319_v61 = vadd.f32 %v2687_v27, %v2481_v44  ;;  %v2405_v18 = vpop.f32.mrf.mxu1 }
 0x1d1   : > { %v7320_v40 = vpop.f32.mrf.mxu0  ;;  %7523 = vmatmul.mubr.msk.bf16.gmra.mxu0 %vm457_vm1, %v10535_v45  ;;  %v2484_v50 = vadd.f32 %v2405_v18, %v9122_v9  ;;  %10536 = vst [vmem:[#allocation11_spill] sm:$0xff] %v9335_v49 }
 0x1d2   : > { %v9326_v17 = vadd.f32 %v7320_v40, %v2486_v35  ;;  %7526 = vmatprep.mubr.msk.bf16.mxu0 %vm457_vm1, %v9119_v33  ;;  %v7287_v62 = vpop.f32.mrf.mxu1  ;;  %v10537_v33 = vld [vmem:[#allocation19_spill] sm:$0xff] }
 0x1d3   : > { %v2700_v56 = vpop.f32.mrf.mxu0  ;;  %v2487_v15 = vadd.f32 %v7287_v62, %v9127_v51  ;;  %v3996_v51 = vld [vmem:[#allocation3 + $0x13a] sm:$0xff]  ;;  %v3997_v40 = vld [vmem:[#allocation3 + $0x142] sm:$0xff] }
 0x1d4   : > { %v9333_v44 = vadd.f32 %v2700_v56, %v2484_v50  ;;  %v2408_v27 = vpop.f32.mrf.mxu1  ;;  %v10538_v50 = vld [vmem:[#allocation7_spill] sm:$0xff]  ;;  %v3999_v62 = vld [vmem:[#allocation3 + $0x15a] sm:$0xff] }
 0x1d5   : > { %v7321_v45 = vpop.f32.mrf.mxu0  ;;  %v2485_v34 = vadd.f32 %v2408_v27, %v9134_v7  ;;  %v3998_v7 = vld [vmem:[#allocation3 + $0x152] sm:$0xff] }
 0x1d6   : > { %v9338_v9 = vadd.f32 %v7321_v45, %v2487_v15  ;;  %v7290_v35 = vpop.f32.mrf.mxu1  ;;  %7493 = vmatmul.mubr.msk.bf16.gmra.mxu1 %vm457_vm1, %v9330_v43  ;;  %v9354_v45 = vpack.c.bf16 %v3997_v40, %v3996_v51  ;;  %v4001_v40 = vld [vmem:[#allocation3 + $0x172] sm:$0xff] }
 0x1d7   : > { %v2703_v18 = vpop.f32.mrf.mxu0  ;;  %v2490_v55 = vadd.f32 %v7290_v35, %v10537_v33  ;;  %7496 = vmatprep.mubr.msk.bf16.mxu1 %vm457_vm1, %v9335_v49  ;;  %v9359_v33 = vpack.c.bf16 %v3999_v62, %v3998_v7  ;;  %v10542_v62 = vld [vmem:[#allocation4_spill] sm:$0xff] }
 0x1d8   : > { %v9343_v60 = vadd.f32 %v2703_v18, %v2485_v34  ;;  %v2421_v47 = vpop.f32.mrf.mxu1 }
 0x1d9   : > { %v7324_v38 = vpop.f32.mrf.mxu0  ;;  %7527 = vmatmul.mubr.msk.bf16.gmra.mxu0 %vm457_vm1, %v10538_v50  ;;  %v2488_v56 = vadd.f32 %v2421_v47, %v9147_v30  ;;  %10539 = vst [vmem:[#allocation20_spill] sm:$0xff] %v9359_v33 }
 0x1da   : > { %v9350_v15 = vadd.f32 %v7324_v38, %v2490_v55  ;;  %7530 = vmatprep.mubr.msk.bf16.mxu0 %vm457_vm1, %v9144_v19  ;;  %v7291_v34 = vpop.f32.mrf.mxu1 }
 0x1db   : > { %v2716_v27 = vpop.f32.mrf.mxu0  ;;  %v2491_v35 = vadd.f32 %v7291_v34, %v9152_v4  ;;  %v4000_v4 = vld [vmem:[#allocation3 + $0x16a] sm:$0xff] }
 0x1dc   : > { %v9357_v18 = vadd.f32 %v2716_v27, %v2488_v56  ;;  %v2424_v50 = vpop.f32.mrf.mxu1 }
 0x1dd   : > { %v7325_v5 = vpop.f32.mrf.mxu0  ;;  %v2489_v49 = vadd.f32 %v2424_v50, %v9159_v8  ;;  %v4559_v8 = vld [vmem:[#allocation3 + $0x21] sm:$0xff]  ;;  %v9378_v50 = vpack.c.bf16 %v4001_v40, %v4000_v4 }
 0x1de   : > { %v9362_v30 = vadd.f32 %v7325_v5, %v2491_v35  ;;  %v7294_v55 = vpop.f32.mrf.mxu1  ;;  %7497 = vmatmul.mubr.msk.bf16.gmra.mxu1 %vm457_vm1, %v9354_v45  ;;  %v4558_v5 = vld [vmem:[#allocation3 + $0x19] sm:$0xff] }
 0x1df   : > { %v2719_v47 = vpop.f32.mrf.mxu0  ;;  %v2494_v19 = vadd.f32 %v7294_v55, %v9165_v32  ;;  %7500 = vmatprep.mubr.msk.bf16.mxu1 %vm457_vm1, %v9359_v33  ;;  %v4294_v32 = vld [vmem:[#allocation3 + $0x180] sm:$0xff] }
 0x1e0   : > { %10540 = vst [vmem:[#allocation21_spill] sm:$0xff] %v9362_v30  ;;  %v9367_v51 = vadd.f32 %v2719_v47, %v2489_v49  ;;  %v2437_v38 = vpop.f32.mrf.mxu1  ;;  %v4295_v49 = vld [vmem:[#allocation3 + $0x188] sm:$0xff] }
 0x1e1   : > { %v7328_v7 = vpop.f32.mrf.mxu0  ;;  %7531 = vmatmul.mubr.msk.bf16.gmra.mxu0 %vm457_vm1, %v10542_v62  ;;  %v2492_v56 = vadd.f32 %v2437_v38, %v9172_v16  ;;  %v4590_v62 = vpack.c.bf16 %v4559_v8, %v4558_v5  ;;  %v9383_v30 = vpack.c.bf16 %v4295_v49, %v4294_v32 }
 0x1e2   : > { %10541 = vst [vmem:[#allocation8_spill] sm:$0xff] %v9367_v51  ;;  %v9374_v34 = vadd.f32 %v7328_v7, %v2494_v19  ;;  %7534 = vmatprep.mubr.msk.bf16.mxu0 %vm457_vm1, %v9169_v24  ;;  %v7295_v27 = vpop.f32.mrf.mxu1  ;;  %v4561_v7 = vld [vmem:[#allocation3 + $0x39] sm:$0xff] }
 0x1e3   : > { %v2732_v35 = vpop.f32.mrf.mxu0  ;;  %v2495_v55 = vadd.f32 %v7295_v27, %v9177_v57  ;;  %10543 = vst [vmem:[#allocation9_spill] sm:$0xff] %v9383_v30  ;;  %v4560_v57 = vld [vmem:[#allocation3 + $0x31] sm:$0xff] }
 0x1e4   : > { %v9381_v47 = vadd.f32 %v2732_v35, %v2492_v56  ;;  %v2440_v33 = vpop.f32.mrf.mxu1  ;;  %v9401_v49 = vpack.c.bf16 %v4561_v7, %v4560_v57  ;;  %v5540_v57 = vsel %vm827_vm0, %v9221_v25, 0 }
 0x1e5   : > { %v7329_v51 = vpop.f32.mrf.mxu0  ;;  %v2493_v16 = vadd.f32 %v2440_v33, %v9182_v11  ;;  %v4562_v11 = vld [vmem:[#allocation3 + $0x49] sm:$0xff]  ;;  %v4563_v33 = vld [vmem:[#allocation3 + $0x51] sm:$0xff] }
 0x1e6   : > { %v9386_v19 = vadd.f32 %v7329_v51, %v2495_v55  ;;  %v7298_v24 = vpop.f32.mrf.mxu1  ;;  %7501 = vmatmul.mubr.msk.bf16.gmra.mxu1 %vm457_vm1, %v9378_v50  ;;  %v9406_v55 = vpack.c.bf16 %v4563_v33, %v4562_v11  ;;  %v4566_v33 = vld [vmem:[#allocation3 + $0x79] sm:$0xff] }
 0x1e7   : > { %v2735_v38 = vpop.f32.mrf.mxu0  ;;  %v2498_v4 = vadd.f32 %v7298_v24, %v9188_v13  ;;  %7540 = vmatprep.mubr.msk.bf16.mxu1 %vm457_vm1, %v4590_v62 }
 0x1e8   : > { %v9391_v40 = vadd.f32 %v2735_v38, %v2493_v16  ;;  %v2453_v5 = vpop.f32.mrf.mxu1 }
 0x1e9   : > { %v7332_v8 = vpop.f32.mrf.mxu0  ;;  %7535 = vmatmul.mubr.msk.bf16.gmra.mxu0 %vm457_vm1, %v9383_v30  ;;  %v2496_v51 = vadd.f32 %v2453_v5, %v9195_v42  ;;  %v5246_v42 = vsel %vm827_vm0, %v9207_v46, 0  ;;  %v4565_v5 = vld [vmem:[#allocation3 + $0x69] sm:$0xff] }
 0x1ea   : > { %v9397_v56 = vadd.f32 %v7332_v8, %v2498_v4  ;;  %7574 = vmatprep.mubr.msk.bf16.mxu0 %vm457_vm1, %v9192_v31  ;;  %v7299_v13 = vpop.f32.mrf.mxu1  ;;  %v9416_v31 = vld [vmem:[%s10456_s4 + $0x10] sm:$0x3] }
 0x1eb   : > { %v2748_v32 = vpop.f32.mrf.mxu0  ;;  %v2499_v27 = vadd.f32 %v7299_v13, %v9202_v6 }
 0x1ec   : > { %v9404_v35 = vadd.f32 %v2748_v32, %v2496_v51  ;;  %v2456_v62 = vpop.f32.mrf.mxu1  ;;  %v4567_v51 = vld [vmem:[#allocation3 + $0x81] sm:$0xff] }
 0x1ed   : > { %v7333_v16 = vpop.f32.mrf.mxu0  ;;  %v2497_v24 = vadd.f32 %v2456_v62, %v9213_v54  ;;  %v4564_v54 = vld [vmem:[#allocation3 + $0x61] sm:$0xff] }
 0x1ee   : > { %v9411_v38 = vadd.f32 %v7333_v16, %v2499_v27  ;;  %v7338_v6 = vpop.f32.mrf.mxu1  ;;  %7541 = vmatmul.mubr.msk.bf16.vlgmr.msra.gmra.mxu1 %vm457_vm1, %v9401_v49  ;;  %v9436_v27 = vpack.c.bf16 %v4565_v5, %v4564_v54  ;;  %v9441_v16 = vpack.c.bf16 %v4567_v51, %v4566_v33  ;;  %v4569_v54 = vld [vmem:[#allocation3 + $0x99] sm:$0xff] }
 0x1ef   : > { %v2751_v4 = vpop.f32.mrf.mxu0  ;;  %v3059_v46 = vadd.f32 %v7338_v6, %v9228_v23  ;;  %7607 = vmatpush3.bf16.msra.mxu1 %v5246_v42  ;;  %7544 = vmatprep.mubr.msk.bf16.mxu1 %vm457_vm1, %v9406_v55 }
 0x1f0   : > { %v9422_v7 = vadd.f32 %v2751_v4, %v2497_v24  ;;  %v2930_v8 = vpop.f32.mrf.mxu1  ;;  %7764 = vmatprep.subr.msk.bf16.mxu1 %vm827_vm0, %v9416_v31 }
 0x1f1   : > { %v7372_v11 = vpop.f32.mrf.mxu0  ;;  %7575 = vmatmul.mubr.msk.bf16.vlgmr.msra.gmra.mxu0 %vm457_vm1, %v9197_v0  ;;  %v3057_v25 = vadd.f32 %v2930_v8, %v9237_v63 }
 0x1f2   : > { %v9432_v13 = vadd.f32 %v7372_v11, %v3059_v46  ;;  %7578 = vmatprep.mubr.msk.bf16.mxu0 %vm457_vm1, %v9232_v2  ;;  %7641 = vmatpush3.bf16.msra.mxu0 %v5540_v57  ;;  %v7339_v23 = vpop.f32.mrf.mxu1  ;;  %v4571_v11 = vld [vmem:[#allocation3 + $0xb1] sm:$0xff] }
 0x1f3   : > { %v3224_v32 = vpop.f32.mrf.mxu0  ;;  %v3060_v62 = vadd.f32 %v7339_v23, %v9242_v39  ;;  %v4568_v39 = vld [vmem:[#allocation3 + $0x91] sm:$0xff] }
 0x1f4   : > { %v9439_v0 = vadd.f32 %v3224_v32, %v3057_v25  ;;  %v2933_v42 = vpop.f32.mrf.mxu1  ;;  %v9460_v23 = vpack.c.bf16 %v4569_v54, %v4568_v39  ;;  %v4573_v39 = vld [vmem:[#allocation3 + $0xc9] sm:$0xff] }
 0x1f5   : > { %v7373_v24 = vpop.f32.mrf.mxu0  ;;  %v3058_v63 = vadd.f32 %v2933_v42, %v9247_v20  ;;  %v4570_v20 = vld [vmem:[#allocation3 + $0xa9] sm:$0xff] }
 0x1f6   : > { %v9444_v4 = vadd.f32 %v7373_v24, %v3060_v62  ;;  %v7342_v6 = vpop.f32.mrf.mxu1  ;;  %7545 = vmatmul.mubr.msk.bf16.gmra.mxu1 %vm457_vm1, %v9436_v27  ;;  %v9465_v42 = vpack.c.bf16 %v4571_v11, %v4570_v20 }
 0x1f7   : > { %v3227_v46 = vpop.f32.mrf.mxu0  ;;  %v3063_v2 = vadd.f32 %v7342_v6, %v9254_v36  ;;  %7548 = vmatprep.mubr.msk.bf16.mxu1 %vm457_vm1, %v9441_v16 }
 0x1f8   : > { %v9449_v57 = vadd.f32 %v3227_v46, %v3058_v63  ;;  %v2946_v5 = vpop.f32.mrf.mxu1 }
 0x1f9   : > { %v7376_v8 = vpop.f32.mrf.mxu0  ;;  %7579 = vmatmul.mubr.msk.bf16.gmra.mxu0 %vm457_vm1, %v9239_v52  ;;  %v3061_v33 = vadd.f32 %v2946_v5, %v9261_v21 }
 0x1fa   : > { %v9456_v51 = vadd.f32 %v7376_v8, %v3063_v2  ;;  %7582 = vmatprep.mubr.msk.bf16.mxu0 %vm457_vm1, %v9258_v37  ;;  %v7343_v36 = vpop.f32.mrf.mxu1  ;;  %v4575_v8 = vld [vmem:[#allocation3 + $0xe1] sm:$0xff] }
 0x1fb   : > { %v3240_v25 = vpop.f32.mrf.mxu0  ;;  %v3064_v32 = vadd.f32 %v7343_v36, %v9266_v1  ;;  %v4572_v1 = vld [vmem:[#allocation3 + $0xc1] sm:$0xff] }
 0x1fc   : > { %v9463_v62 = vadd.f32 %v3240_v25, %v3061_v33  ;;  %v2949_v52 = vpop.f32.mrf.mxu1  ;;  %v9484_v36 = vpack.c.bf16 %v4573_v39, %v4572_v1  ;;  %v4577_v1 = vld [vmem:[#allocation3 + $0xf9] sm:$0xff] }
 0x1fd   : > { %v7377_v24 = vpop.f32.mrf.mxu0  ;;  %v3062_v63 = vadd.f32 %v2949_v52, %v9271_v29  ;;  %v4574_v29 = vld [vmem:[#allocation3 + $0xd9] sm:$0xff] }
 0x1fe   : > { %v9468_v21 = vadd.f32 %v7377_v24, %v3064_v32  ;;  %v7346_v6 = vpop.f32.mrf.mxu1  ;;  %7549 = vmatmul.mubr.msk.bf16.gmra.mxu1 %vm457_vm1, %v9460_v23  ;;  %v9489_v52 = vpack.c.bf16 %v4575_v8, %v4574_v29 }
 0x1ff   : > { %v3243_v46 = vpop.f32.mrf.mxu0  ;;  %v3067_v37 = vadd.f32 %v7346_v6, %v9278_v59  ;;  %7552 = vmatprep.mubr.msk.bf16.mxu1 %vm457_vm1, %v9465_v42 }
 0x200   : > { %v9473_v2 = vadd.f32 %v3243_v46, %v3062_v63  ;;  %v2962_v54 = vpop.f32.mrf.mxu1 }
 0x201   : > { %v7380_v5 = vpop.f32.mrf.mxu0  ;;  %7583 = vmatmul.mubr.msk.bf16.gmra.mxu0 %vm457_vm1, %v9263_v3  ;;  %v3065_v20 = vadd.f32 %v2962_v54, %v9285_v26 }
 0x202   : > { %v9480_v11 = vadd.f32 %v7380_v5, %v3067_v37  ;;  %7586 = vmatprep.mubr.msk.bf16.mxu0 %vm457_vm1, %v9282_v53  ;;  %v7347_v59 = vpop.f32.mrf.mxu1  ;;  %v4579_v5 = vld [vmem:[#allocation3 + $0x111] sm:$0xff] }
 0x203   : > { %v3256_v33 = vpop.f32.mrf.mxu0  ;;  %v3068_v25 = vadd.f32 %v7347_v59, %v9290_v41  ;;  %v4576_v41 = vld [vmem:[#allocation3 + $0xf1] sm:$0xff] }
 0x204   : > { %v9487_v32 = vadd.f32 %v3256_v33, %v3065_v20  ;;  %v2965_v3 = vpop.f32.mrf.mxu1  ;;  %v9508_v59 = vpack.c.bf16 %v4577_v1, %v4576_v41  ;;  %v4583_v1 = vld [vmem:[#allocation3 + $0x141] sm:$0xff] }
 0x205   : > { %v7381_v24 = vpop.f32.mrf.mxu0  ;;  %v3066_v63 = vadd.f32 %v2965_v3, %v9295_v12  ;;  %v4578_v12 = vld [vmem:[#allocation3 + $0x109] sm:$0xff] }
 0x206   : > { %v9492_v26 = vadd.f32 %v7381_v24, %v3068_v25  ;;  %v7350_v6 = vpop.f32.mrf.mxu1  ;;  %7553 = vmatmul.mubr.msk.bf16.gmra.mxu1 %vm457_vm1, %v9484_v36  ;;  %v9513_v3 = vpack.c.bf16 %v4579_v5, %v4578_v12 }
 0x207   : > { %v3259_v46 = vpop.f32.mrf.mxu0  ;;  %v3071_v53 = vadd.f32 %v7350_v6, %v9302_v10  ;;  %7556 = vmatprep.mubr.msk.bf16.mxu1 %vm457_vm1, %v9489_v52 }
 0x208   : > { %v9497_v37 = vadd.f32 %v3259_v46, %v3066_v63  ;;  %v2978_v39 = vpop.f32.mrf.mxu1 }
 0x209   : > { %v7384_v54 = vpop.f32.mrf.mxu0  ;;  %7587 = vmatmul.mubr.msk.bf16.gmra.mxu0 %vm457_vm1, %v9287_v48  ;;  %v3069_v29 = vadd.f32 %v2978_v39, %v9309_v22 }
 0x20a   : > { %v9504_v8 = vadd.f32 %v7384_v54, %v3071_v53  ;;  %7590 = vmatprep.mubr.msk.bf16.mxu0 %vm457_vm1, %v9306_v28  ;;  %v7351_v10 = vpop.f32.mrf.mxu1 }
 0x20b   : > { %v3272_v20 = vpop.f32.mrf.mxu0  ;;  %v3072_v33 = vadd.f32 %v7351_v10, %v9314_v14 }
 0x20c   : > { %v9511_v25 = vadd.f32 %v3272_v20, %v3069_v29  ;;  %v2981_v48 = vpop.f32.mrf.mxu1 }
 0x20d   : > { %v7385_v24 = vpop.f32.mrf.mxu0  ;;  %v3070_v63 = vadd.f32 %v2981_v48, %v9319_v61  ;;  %v4582_v61 = vld [vmem:[#allocation3 + $0x139] sm:$0xff] }
 0x20e   : > { %v9516_v22 = vadd.f32 %v7385_v24, %v3072_v33  ;;  %v7354_v6 = vpop.f32.mrf.mxu1  ;;  %7557 = vmatmul.mubr.msk.bf16.gmra.mxu1 %vm457_vm1, %v9508_v59  ;;  %v9535_v10 = vpack.c.bf16 %v4583_v1, %v4582_v61 }
 0x20f   : > { %v3275_v46 = vpop.f32.mrf.mxu0  ;;  %v3075_v28 = vadd.f32 %v7354_v6, %v9326_v17  ;;  %7560 = vmatprep.mubr.msk.bf16.mxu1 %vm457_vm1, %v9513_v3 }
 0x210   : > { %v9521_v53 = vadd.f32 %v3275_v46, %v3070_v63  ;;  %v2994_v14 = vpop.f32.mrf.mxu1  ;;  %v10544_v63 = vld [vmem:[#allocation18_spill] sm:$0xff] }
 0x211   : > { %v7388_v41 = vpop.f32.mrf.mxu0  ;;  %7591 = vmatmul.mubr.msk.bf16.gmra.mxu0 %vm457_vm1, %v9311_v58  ;;  %v3073_v39 = vadd.f32 %v2994_v14, %v9333_v44 }
 0x212   : > { %v9528_v54 = vadd.f32 %v7388_v41, %v3075_v28  ;;  %7594 = vmatprep.mubr.msk.bf16.mxu0 %vm457_vm1, %v9330_v43  ;;  %v7355_v17 = vpop.f32.mrf.mxu1  ;;  %v10545_v28 = vld [vmem:[#allocation11_spill] sm:$0xff] }
 0x213   : > { %v3288_v12 = vpop.f32.mrf.mxu0  ;;  %v3076_v5 = vadd.f32 %v7355_v17, %v9338_v9 }
 0x214   : > { %v9533_v29 = vadd.f32 %v3288_v12, %v3073_v39  ;;  %v2997_v20 = vpop.f32.mrf.mxu1 }
 0x215   : > { %v7389_v33 = vpop.f32.mrf.mxu0  ;;  %v3074_v58 = vadd.f32 %v2997_v20, %v9343_v60 }
 0x216   : > { %v9538_v48 = vadd.f32 %v7389_v33, %v3076_v5  ;;  %v7358_v44 = vpop.f32.mrf.mxu1  ;;  %7561 = vmatmul.mubr.msk.bf16.gmra.mxu1 %vm457_vm1, %v10544_v63  ;;  %v10547_v5 = vld [vmem:[#allocation8_spill] sm:$0xff]  ;;  %v10549_v63 = vld [vmem:[#allocation10_spill] sm:$0xff] }
 0x217   : > { %v3291_v24 = vpop.f32.mrf.mxu0  ;;  %v3079_v43 = vadd.f32 %v7358_v44, %v9350_v15  ;;  %7564 = vmatprep.mubr.msk.bf16.mxu1 %vm457_vm1, %v9535_v10  ;;  %v10546_v15 = vld [vmem:[#allocation21_spill] sm:$0xff] }
 0x218   : > { %v9543_v6 = vadd.f32 %v3291_v24, %v3074_v58  ;;  %v3010_v9 = vpop.f32.mrf.mxu1 }
 0x219   : > { %v7392_v46 = vpop.f32.mrf.mxu0  ;;  %7595 = vmatmul.mubr.msk.bf16.gmra.mxu0 %vm457_vm1, %v10545_v28  ;;  %v3077_v60 = vadd.f32 %v3010_v9, %v9357_v18  ;;  %v10548_v18 = vld [vmem:[#allocation5_spill] sm:$0xff]  ;;  %v4589_v9 = vld [vmem:[#allocation3 + $0x189] sm:$0xff] }
 0x21a   : > { %v9550_v14 = vadd.f32 %v7392_v46, %v3079_v43  ;;  %7598 = vmatprep.mubr.msk.bf16.mxu0 %vm457_vm1, %v9354_v45  ;;  %v7359_v41 = vpop.f32.mrf.mxu1  ;;  %v4588_v43 = vld [vmem:[#allocation3 + $0x181] sm:$0xff] }
 0x21b   : > { %v3304_v61 = vpop.f32.mrf.mxu0  ;;  %v3080_v1 = vadd.f32 %v7359_v41, %v10546_v15  ;;  %v5147_v41 = vld [vmem:[#allocation3 + $0x30] sm:$0xff] }
 0x21c   : > { %v9555_v39 = vadd.f32 %v3304_v61, %v3077_v60  ;;  %v3013_v17 = vpop.f32.mrf.mxu1  ;;  %v10550_v60 = vld [vmem:[#allocation20_spill] sm:$0xff]  ;;  %v5148_v61 = vld [vmem:[#allocation3 + $0x38] sm:$0xff] }
 0x21d   : > { %v7393_v12 = vpop.f32.mrf.mxu0  ;;  %v3078_v20 = vadd.f32 %v3013_v17, %v10547_v5  ;;  %v4883_v17 = vld [vmem:[#allocation3 + $0x18a] sm:$0xff] }
 0x21e   : > { %v9558_v33 = vadd.f32 %v7393_v12, %v3080_v1  ;;  %v7362_v58 = vpop.f32.mrf.mxu1  ;;  %7565 = vmatmul.mubr.msk.bf16.gmra.mxu1 %vm457_vm1, %v10548_v18  ;;  %v5179_v18 = vpack.c.bf16 %v5148_v61, %v5147_v41 }
 0x21f   : > { %v3307_v44 = vpop.f32.mrf.mxu0  ;;  %v3083_v24 = vadd.f32 %v7362_v58, %v9374_v34  ;;  %7568 = vmatprep.mubr.msk.bf16.mxu1 %vm457_vm1, %v10549_v63  ;;  %v4882_v34 = vld [vmem:[#allocation3 + $0x182] sm:$0xff] }
 0x220   : > { %v9563_v45 = vadd.f32 %v3307_v44, %v3078_v20  ;;  %v3026_v46 = vpop.f32.mrf.mxu1  ;;  %v9574_v20 = vpack.c.bf16 %v4589_v9, %v4588_v43  ;;  %v9579_v30 = vpack.c.bf16 %v4883_v17, %v4882_v34 }
 0x221   : > { %v7396_v28 = vpop.f32.mrf.mxu0  ;;  %7599 = vmatmul.mubr.msk.bf16.gmra.mxu0 %vm457_vm1, %v10550_v60  ;;  %v3081_v15 = vadd.f32 %v3026_v46, %v9381_v47 }
 0x222   : > { %v9570_v1 = vadd.f32 %v7396_v28, %v3083_v24  ;;  %7602 = vmatprep.mubr.msk.bf16.mxu0 %vm457_vm1, %v9378_v50  ;;  %v7363_v12 = vpop.f32.mrf.mxu1  ;;  %v5150_v28 = vld [vmem:[#allocation3 + $0x50] sm:$0xff] }
 0x223   : > { %v3320_v5 = vpop.f32.mrf.mxu0  ;;  %v3084_v58 = vadd.f32 %v7363_v12, %v9386_v19  ;;  %v5149_v19 = vld [vmem:[#allocation3 + $0x48] sm:$0xff] }
 0x224   : > { %v9577_v44 = vadd.f32 %v3320_v5, %v3081_v15  ;;  %v3029_v63 = vpop.f32.mrf.mxu1  ;;  %v5152_v15 = vld [vmem:[#allocation3 + $0x68] sm:$0xff]  ;;  %v5180_v5 = vpack.c.bf16 %v5150_v28, %v5149_v19  ;;  %v5153_v19 = vld [vmem:[#allocation3 + $0x78] sm:$0xff]  ;;  %v5154_v28 = vld [vmem:[#allocation3 + $0x80] sm:$0xff] }
 0x225   : > { %v7397_v60 = vpop.f32.mrf.mxu0  ;;  %v3082_v47 = vadd.f32 %v3029_v63, %v9391_v40  ;;  %v5151_v40 = vld [vmem:[#allocation3 + $0x60] sm:$0xff] }
 0x226   : > { %v9582_v24 = vadd.f32 %v7397_v60, %v3084_v58  ;;  %v7366_v50 = vpop.f32.mrf.mxu1  ;;  %7569 = vmatmul.mubr.msk.bf16.gmra.mxu1 %vm457_vm1, %v9574_v20  ;;  %v5181_v63 = vpack.c.bf16 %v5152_v15, %v5151_v40 }
 0x227   : > { %v3323_v46 = vpop.f32.mrf.mxu0  ;;  %v3087_v43 = vadd.f32 %v7366_v50, %v9397_v56  ;;  %7608 = vmatprep.mubr.msk.bf16.mxu1 %vm457_vm1, %v5179_v18  ;;  %v5834_v50 = vsel %vm827_vm0, %v9416_v31, 0  ;;  %v5155_v31 = vld [vmem:[#allocation3 + $0x90] sm:$0xff] }
 0x228   : > { %v9587_v9 = vadd.f32 %v3323_v46, %v3082_v47  ;;  %v3042_v41 = vpop.f32.mrf.mxu1 }
 0x229   : > { %v7400_v61 = vpop.f32.mrf.mxu0  ;;  %7603 = vmatmul.mubr.msk.bf16.gmra.mxu0 %vm457_vm1, %v9579_v30  ;;  %v3085_v34 = vadd.f32 %v3042_v41, %v9404_v35 }
 0x22a   : > { %v9593_v17 = vadd.f32 %v7400_v61, %v3087_v43  ;;  %7642 = vmatprep.mubr.msk.bf16.mxu0 %vm457_vm1, %v9401_v49  ;;  %v7367_v56 = vpop.f32.mrf.mxu1 }
 0x22b   : > { %v3336_v12 = vpop.f32.mrf.mxu0  ;;  %v3088_v58 = vadd.f32 %v7367_v56, %v9411_v38 }
 0x22c   : > { %v9598_v18 = vadd.f32 %v3336_v12, %v3085_v34  ;;  %v3045_v60 = vpop.f32.mrf.mxu1  ;;  %v5182_v12 = vpack.c.bf16 %v5154_v28, %v5153_v19  ;;  %v5160_v28 = vld [vmem:[#allocation3 + $0xc8] sm:$0xff] }
 0x22d   : > { %v7401_v47 = vpop.f32.mrf.mxu0  ;;  %v3086_v35 = vadd.f32 %v3045_v60, %v9422_v7  ;;  %v5156_v7 = vld [vmem:[#allocation3 + $0x98] sm:$0xff] }
 0x22e   : > { %v9603_v46 = vadd.f32 %v7401_v47, %v3088_v58  ;;  %v7406_v41 = vpop.f32.mrf.mxu1  ;;  %7609 = vmatmul.mubr.msk.bf16.vlgmr.msra.gmra.mxu1 %vm457_vm1, %v5180_v5 }
 0x22f   : > { %v3339_v43 = vpop.f32.mrf.mxu0  ;;  %v3646_v38 = vadd.f32 %v7406_v41, %v9432_v13  ;;  %7675 = vmatpush3.bf16.msra.mxu1 %v5834_v50  ;;  %7612 = vmatprep.mubr.msk.bf16.mxu1 %vm457_vm1, %v5181_v63  ;;  %v5183_v63 = vpack.c.bf16 %v5156_v7, %v5155_v31  ;;  %v5158_v41 = vld [vmem:[#allocation3 + $0xb0] sm:$0xff] }
 0x230   : > { %v9606_v49 = vadd.f32 %v3339_v43, %v3086_v35  ;;  %v3517_v61 = vpop.f32.mrf.mxu1 }
 0x231   : > { %v7440_v40 = vpop.f32.mrf.mxu0  ;;  %7643 = vmatmul.mubr.msk.bf16.vlgmr.msra.gmra.mxu0 %vm457_vm1, %v9406_v55  ;;  %v3644_v15 = vadd.f32 %v3517_v61, %v9439_v0 }
 0x232   : > { %v9613_v34 = vadd.f32 %v7440_v40, %v3646_v38  ;;  %7646 = vmatprep.mubr.msk.bf16.mxu0 %vm457_vm1, %v9436_v27  ;;  %v7407_v13 = vpop.f32.mrf.mxu1 }
 0x233   : > { %v3811_v56 = vpop.f32.mrf.mxu0  ;;  %v3647_v5 = vadd.f32 %v7407_v13, %v9444_v4  ;;  %v5157_v4 = vld [vmem:[#allocation3 + $0xa8] sm:$0xff] }
 0x234   : > { %v9618_v58 = vadd.f32 %v3811_v56, %v3644_v15  ;;  %v3520_v60 = vpop.f32.mrf.mxu1  ;;  %v5184_v7 = vpack.c.bf16 %v5158_v41, %v5157_v4 }
 0x235   : > { %v7441_v47 = vpop.f32.mrf.mxu0  ;;  %v3645_v55 = vadd.f32 %v3520_v60, %v9449_v57  ;;  %v5159_v57 = vld [vmem:[#allocation3 + $0xc0] sm:$0xff] }
 0x236   : > { %v9621_v50 = vadd.f32 %v7441_v47, %v3647_v5  ;;  %v7410_v0 = vpop.f32.mrf.mxu1  ;;  %7613 = vmatmul.mubr.msk.bf16.gmra.mxu1 %vm457_vm1, %v5182_v12  ;;  %v5185_v56 = vpack.c.bf16 %v5160_v28, %v5159_v57 }
 0x237   : > { %v3814_v35 = vpop.f32.mrf.mxu0  ;;  %v3650_v27 = vadd.f32 %v7410_v0, %v9456_v51  ;;  %7616 = vmatprep.mubr.msk.bf16.mxu1 %vm457_vm1, %v5183_v63 }
 0x238   : > { %v9625_v43 = vadd.f32 %v3814_v35, %v3645_v55  ;;  %v3533_v38 = vpop.f32.mrf.mxu1  ;;  %v5162_v55 = vld [vmem:[#allocation3 + $0xe0] sm:$0xff] }
 0x239   : > { %v7444_v19 = vpop.f32.mrf.mxu0  ;;  %7647 = vmatmul.mubr.msk.bf16.gmra.mxu0 %vm457_vm1, %v9441_v16  ;;  %v3648_v61 = vadd.f32 %v3533_v38, %v9463_v62 }
 0x23a   : > { %v9631_v40 = vadd.f32 %v7444_v19, %v3650_v27  ;;  %7650 = vmatprep.mubr.msk.bf16.mxu0 %vm457_vm1, %v9460_v23  ;;  %v7411_v51 = vpop.f32.mrf.mxu1  ;;  %v5164_v27 = vld [vmem:[#allocation3 + $0xf8] sm:$0xff] }
 0x23b   : > { %v3827_v31 = vpop.f32.mrf.mxu0  ;;  %v3651_v15 = vadd.f32 %v7411_v51, %v9468_v21  ;;  %v5161_v21 = vld [vmem:[#allocation3 + $0xd8] sm:$0xff] }
 0x23c   : > { %v9636_v13 = vadd.f32 %v3827_v31, %v3648_v61  ;;  %v3536_v12 = vpop.f32.mrf.mxu1  ;;  %v5186_v19 = vpack.c.bf16 %v5162_v55, %v5161_v21 }
 0x23d   : > { %v7445_v5 = vpop.f32.mrf.mxu0  ;;  %v3649_v16 = vadd.f32 %v3536_v12, %v9473_v2  ;;  %v5163_v2 = vld [vmem:[#allocation3 + $0xf0] sm:$0xff] }
 0x23e   : > { %v9639_v63 = vadd.f32 %v7445_v5, %v3651_v15  ;;  %v7414_v62 = vpop.f32.mrf.mxu1  ;;  %7617 = vmatmul.mubr.msk.bf16.gmra.mxu1 %vm457_vm1, %v5184_v7  ;;  %v5187_v61 = vpack.c.bf16 %v5164_v27, %v5163_v2  ;;  %v5166_v12 = vld [vmem:[#allocation3 + $0x110] sm:$0xff] }
 0x23f   : > { %v3830_v60 = vpop.f32.mrf.mxu0  ;;  %v3654_v23 = vadd.f32 %v7414_v62, %v9480_v11  ;;  %7620 = vmatprep.mubr.msk.bf16.mxu1 %vm457_vm1, %v5185_v56  ;;  %v5168_v62 = vld [vmem:[#allocation3 + $0x128] sm:$0xff] }
 0x240   : > { %v9643_v47 = vadd.f32 %v3830_v60, %v3649_v16  ;;  %v3549_v0 = vpop.f32.mrf.mxu1 }
 0x241   : > { %v7448_v35 = vpop.f32.mrf.mxu0  ;;  %7651 = vmatmul.mubr.msk.bf16.gmra.mxu0 %vm457_vm1, %v9465_v42  ;;  %v3652_v4 = vadd.f32 %v3549_v0, %v9487_v32  ;;  %v5461_v0 = vld [vmem:[#allocation3 + $0x121] sm:$0xff] }
 0x242   : > { %v9649_v41 = vadd.f32 %v7448_v35, %v3654_v23  ;;  %7654 = vmatprep.mubr.msk.bf16.mxu0 %vm457_vm1, %v9484_v36  ;;  %v7415_v11 = vpop.f32.mrf.mxu1  ;;  %v5462_v35 = vld [vmem:[#allocation3 + $0x129] sm:$0xff] }
 0x243   : > { %v3843_v38 = vpop.f32.mrf.mxu0  ;;  %v3655_v57 = vadd.f32 %v7415_v11, %v9492_v26  ;;  %v5165_v26 = vld [vmem:[#allocation3 + $0x108] sm:$0xff] }
 0x244   : > { %v9654_v28 = vadd.f32 %v3843_v38, %v3652_v4  ;;  %v3552_v51 = vpop.f32.mrf.mxu1  ;;  %v5188_v55 = vpack.c.bf16 %v5166_v12, %v5165_v26 }
 0x245   : > { %v7449_v31 = vpop.f32.mrf.mxu0  ;;  %v3653_v42 = vadd.f32 %v3552_v51, %v9497_v37  ;;  %v5167_v37 = vld [vmem:[#allocation3 + $0x120] sm:$0xff] }
 0x246   : > { %v9657_v7 = vadd.f32 %v7449_v31, %v3655_v57  ;;  %v7418_v32 = vpop.f32.mrf.mxu1  ;;  %7621 = vmatmul.mubr.msk.bf16.gmra.mxu1 %vm457_vm1, %v5186_v19  ;;  %v5189_v4 = vpack.c.bf16 %v5168_v62, %v5167_v37  ;;  %v5483_v19 = vpack.c.bf16 %v5462_v35, %v5461_v0  ;;  %v5170_v31 = vld [vmem:[#allocation3 + $0x140] sm:$0xff] }
 0x247   : > { %v3846_v15 = vpop.f32.mrf.mxu0  ;;  %v3658_v36 = vadd.f32 %v7418_v32, %v9504_v8  ;;  %7624 = vmatprep.mubr.msk.bf16.mxu1 %vm457_vm1, %v5187_v61  ;;  %v5466_v37 = vld [vmem:[#allocation3 + $0x159] sm:$0xff] }
 0x248   : > { %v9661_v56 = vadd.f32 %v3846_v15, %v3653_v42  ;;  %v3565_v5 = vpop.f32.mrf.mxu1  ;;  %v5172_v15 = vld [vmem:[#allocation3 + $0x158] sm:$0xff] }
 0x249   : > { %v7452_v16 = vpop.f32.mrf.mxu0  ;;  %7655 = vmatmul.mubr.msk.bf16.gmra.mxu0 %vm457_vm1, %v9489_v52  ;;  %v3656_v60 = vadd.f32 %v3565_v5, %v9511_v25 }
 0x24a   : > { %v9667_v23 = vadd.f32 %v7452_v16, %v3658_v36  ;;  %7658 = vmatprep.mubr.msk.bf16.mxu0 %vm457_vm1, %v9508_v59  ;;  %v7419_v8 = vpop.f32.mrf.mxu1  ;;  %v5465_v16 = vld [vmem:[#allocation3 + $0x151] sm:$0xff] }
 0x24b   : > { %v3859_v21 = vpop.f32.mrf.mxu0  ;;  %v3659_v2 = vadd.f32 %v7419_v8, %v9516_v22  ;;  %v5169_v22 = vld [vmem:[#allocation3 + $0x138] sm:$0xff]  ;;  %v5485_v0 = vpack.c.bf16 %v5466_v37, %v5465_v16  ;;  %v5178_v16 = vld [vmem:[#allocation3 + $0x1a0] sm:$0xff] }
 0x24c   : > { %v9672_v27 = vadd.f32 %v3859_v21, %v3656_v60  ;;  %v3568_v52 = vpop.f32.mrf.mxu1  ;;  %v5190_v5 = vpack.c.bf16 %v5170_v31, %v5169_v22 }
 0x24d   : > { %v7453_v11 = vpop.f32.mrf.mxu0  ;;  %v3657_v38 = vadd.f32 %v3568_v52, %v9521_v53  ;;  %v5171_v53 = vld [vmem:[#allocation3 + $0x150] sm:$0xff] }
 0x24e   : > { %v9675_v25 = vadd.f32 %v7453_v11, %v3659_v2  ;;  %v7422_v57 = vpop.f32.mrf.mxu1  ;;  %7625 = vmatmul.mubr.msk.bf16.gmra.mxu1 %vm457_vm1, %v5188_v55  ;;  %v5191_v8 = vpack.c.bf16 %v5172_v15, %v5171_v53  ;;  %v5174_v52 = vld [vmem:[#allocation3 + $0x170] sm:$0xff] }
 0x24f   : > { %v3862_v61 = vpop.f32.mrf.mxu0  ;;  %v3662_v59 = vadd.f32 %v7422_v57, %v9528_v54  ;;  %7628 = vmatprep.mubr.msk.bf16.mxu1 %vm457_vm1, %v5189_v4  ;;  %v5467_v57 = vld [vmem:[#allocation3 + $0x169] sm:$0xff] }
 0x250   : > { %v9679_v51 = vadd.f32 %v3862_v61, %v3657_v38  ;;  %v3581_v42 = vpop.f32.mrf.mxu1  ;;  %v5468_v61 = vld [vmem:[#allocation3 + $0x171] sm:$0xff] }
 0x251   : > { %v7456_v32 = vpop.f32.mrf.mxu0  ;;  %7659 = vmatmul.mubr.msk.bf16.gmra.mxu0 %vm457_vm1, %v9513_v3  ;;  %v3660_v36 = vadd.f32 %v3581_v42, %v9533_v29  ;;  %v5486_v15 = vpack.c.bf16 %v5468_v61, %v5467_v57 }
 0x252   : > { %v9685_v26 = vadd.f32 %v7456_v32, %v3662_v59  ;;  %7662 = vmatprep.mubr.msk.bf16.mxu0 %vm457_vm1, %v5483_v19  ;;  %v7423_v54 = vpop.f32.mrf.mxu1 }
 0x253   : > { %v3875_v12 = vpop.f32.mrf.mxu0  ;;  %v3663_v62 = vadd.f32 %v7423_v54, %v9538_v48  ;;  %v5173_v48 = vld [vmem:[#allocation3 + $0x168] sm:$0xff] }
 0x254   : > { %v9689_v60 = vadd.f32 %v3875_v12, %v3660_v36  ;;  %v3584_v21 = vpop.f32.mrf.mxu1 }
 0x255   : > { %v7457_v3 = vpop.f32.mrf.mxu0  ;;  %v9692_v55 = vadd.f32 %v3584_v21, %v9543_v6 }
 0x256   : > { %v9694_v29 = vadd.f32 %v7457_v3, %v3663_v62  ;;  %v7426_v35 = vpop.f32.mrf.mxu1  ;;  %7629 = vmatmul.mubr.msk.bf16.gmra.mxu1 %vm457_vm1, %v5190_v5  ;;  %v10551_v5 = vld [vmem:[#allocation9_spill] sm:$0xff] }
 0x257   : > { %v9696_v2 = vpop.f32.mrf.mxu0  ;;  %v3666_v4 = vadd.f32 %v7426_v35, %v9550_v14  ;;  %7632 = vmatprep.mubr.msk.bf16.mxu1 %vm457_vm1, %v5191_v8  ;;  %v5192_v14 = vpack.c.bf16 %v5174_v52, %v5173_v48  ;;  %v5736_v8 = vld [vmem:[#allocation3 + $0x3a] sm:$0xff] }
 0x258   : > { %v3597_v11 = vpop.f32.mrf.mxu1 }
 0x259   : > { %v7460_v38 = vpop.f32.mrf.mxu0  ;;  %7663 = vmatmul.mubr.msk.bf16.gmra.mxu0 %vm457_vm1, %v9535_v10  ;;  %v3664_v6 = vadd.f32 %v3597_v11, %v9555_v39 }
 0x25a   : > { %v9704_v19 = vadd.f32 %v7460_v38, %v3666_v4  ;;  %7666 = vmatprep.mubr.msk.bf16.mxu0 %vm457_vm1, %v5485_v0  ;;  %v7427_v59 = vpop.f32.mrf.mxu1  ;;  %v5471_v0 = vld [vmem:[#allocation3 + $0x199] sm:$0xff] }
 0x25b   : > { %v3891_v22 = vpop.f32.mrf.mxu0  ;;  %v3667_v31 = vadd.f32 %v7427_v59, %v9558_v33  ;;  %v5177_v33 = vld [vmem:[#allocation3 + $0x198] sm:$0xff] }
 0x25c   : > { %v9708_v42 = vadd.f32 %v3891_v22, %v3664_v6  ;;  %v3600_v32 = vpop.f32.mrf.mxu1  ;;  %v5194_v48 = vpack.c.bf16 %v5178_v16, %v5177_v33 }
 0x25d   : > { %v7461_v53 = vpop.f32.mrf.mxu0  ;;  %v9711_v10 = vadd.f32 %v3600_v32, %v9563_v45  ;;  %v5735_v45 = vld [vmem:[#allocation3 + $0x32] sm:$0xff] }
 0x25e   : > { %v9713_v39 = vadd.f32 %v7461_v53, %v3667_v31  ;;  %v7430_v36 = vpop.f32.mrf.mxu1  ;;  %7633 = vmatmul.mubr.msk.bf16.gmra.mxu1 %vm457_vm1, %v5192_v14  ;;  %v5767_v38 = vpack.c.bf16 %v5736_v8, %v5735_v45  ;;  %v5738_v31 = vld [vmem:[#allocation3 + $0x52] sm:$0xff] }
 0x25f   : > { %v9715_v54 = vpop.f32.mrf.mxu0  ;;  %v3670_v12 = vadd.f32 %v7430_v36, %v9570_v1  ;;  %7636 = vmatprep.mubr.msk.bf16.mxu1 %vm457_vm1, %v10551_v5  ;;  %v5472_v1 = vld [vmem:[#allocation3 + $0x1a1] sm:$0xff] }
 0x260   : > { %v3613_v37 = vpop.f32.mrf.mxu1  ;;  %v5488_v61 = vpack.c.bf16 %v5472_v1, %v5471_v0 }
 0x261   : > { %v7464_v62 = vpop.f32.mrf.mxu0  ;;  %7667 = vmatmul.mubr.msk.bf16.gmra.mxu0 %vm457_vm1, %v5486_v15  ;;  %v3668_v21 = vadd.f32 %v3613_v37, %v9577_v44  ;;  %v5739_v15 = vld [vmem:[#allocation3 + $0x62] sm:$0xff] }
 0x262   : > { %v9723_v3 = vadd.f32 %v7464_v62, %v3670_v12  ;;  %7670 = vmatprep.mubr.msk.bf16.mxu0 %vm457_vm1, %v9574_v20  ;;  %v7431_v35 = vpop.f32.mrf.mxu1 }
 0x263   : > { %v3907_v4 = vpop.f32.mrf.mxu0  ;;  %v3671_v52 = vadd.f32 %v7431_v35, %v9582_v24  ;;  %v5737_v24 = vld [vmem:[#allocation3 + $0x4a] sm:$0xff] }
 0x264   : > { %v9728_v11 = vadd.f32 %v3907_v4, %v3668_v21  ;;  %v3616_v6 = vpop.f32.mrf.mxu1  ;;  %v5768_v16 = vpack.c.bf16 %v5738_v31, %v5737_v24  ;;  %v5742_v4 = vld [vmem:[#allocation3 + $0x82] sm:$0xff] }
 0x265   : > { %v7465_v57 = vpop.f32.mrf.mxu0  ;;  %v9731_v44 = vadd.f32 %v3616_v6, %v9587_v9  ;;  %v5740_v9 = vld [vmem:[#allocation3 + $0x6a] sm:$0xff]  ;;  %v5744_v6 = vld [vmem:[#allocation3 + $0x9a] sm:$0xff] }
 0x266   : > { %v9733_v59 = vadd.f32 %v7465_v57, %v3671_v52  ;;  %v7434_v22 = vpop.f32.mrf.mxu1  ;;  %7637 = vmatmul.mubr.msk.bf16.gmra.mxu1 %vm457_vm1, %v5194_v48  ;;  %v5769_v62 = vpack.c.bf16 %v5740_v9, %v5739_v15 }
 0x267   : > { %v9735_v20 = vpop.f32.mrf.mxu0  ;;  %v3674_v14 = vadd.f32 %v7434_v22, %v9593_v17  ;;  %7676 = vmatprep.mubr.msk.bf16.mxu1 %vm457_vm1, %v5767_v38  ;;  %v5743_v38 = vld [vmem:[#allocation3 + $0x92] sm:$0xff] }
 0x268   : > { %v3629_v32 = vpop.f32.mrf.mxu1 }
 0x269   : > { %v7468_v53 = vpop.f32.mrf.mxu0  ;;  %7671 = vmatmul.mubr.msk.bf16.gmra.mxu0 %vm457_vm1, %v5488_v61  ;;  %v3672_v36 = vadd.f32 %v3629_v32, %v9598_v18 }
 0x26a   : > { %v9742_v12 = vadd.f32 %v7468_v53, %v3674_v14  ;;  %v7435_v5 = vpop.f32.mrf.mxu1 }
 0x26b   : > { %v3923_v33 = vpop.f32.mrf.mxu0  ;;  %v3675_v37 = vadd.f32 %v7435_v5, %v9603_v46  ;;  %v5741_v46 = vld [vmem:[#allocation3 + $0x7a] sm:$0xff] }
 0x26c   : > { %v9745_v17 = vadd.f32 %v3923_v33, %v3672_v36  ;;  %v3632_v45 = vpop.f32.mrf.mxu1  ;;  %v5770_v14 = vpack.c.bf16 %v5742_v4, %v5741_v46  ;;  %v5746_v33 = vld [vmem:[#allocation3 + $0xb2] sm:$0xff] }
 0x26d   : > { %v7469_v8 = vpop.f32.mrf.mxu0  ;;  %v9748_v21 = vadd.f32 %v3632_v45, %v9606_v49  ;;  %v5748_v45 = vld [vmem:[#allocation3 + $0xca] sm:$0xff] }
 0x26e   : > { %v9750_v0 = vadd.f32 %v7469_v8, %v3675_v37  ;;  %v7474_v18 = vpop.f32.mrf.mxu1  ;;  %7677 = vmatmul.mubr.msk.bf16.vlgmr.msra.gmra.mxu1 %vm457_vm1, %v5768_v16 }
 0x26f   : > { %v9752_v1 = vpop.f32.mrf.mxu0  ;;  %v4234_v35 = vadd.f32 %v7474_v18, %v9613_v34  ;;  %7680 = vmatprep.mubr.msk.bf16.mxu1 %vm457_vm1, %v5769_v62  ;;  %v5771_v34 = vpack.c.bf16 %v5744_v6, %v5743_v38  ;;  %v5747_v62 = vld [vmem:[#allocation3 + $0xc2] sm:$0xff]  ;;  %v7774_v18 = vld [vmem:[%s10458_s6 + $0x8] sm:$0xff]  }
 0x270   : > { %v4105_v48 = vpop.f32.mrf.mxu1  ;;  %7708 = vmatprep.subr.bf16.mxu0 %v7774_v18 }
 0x271   : > { %v7508_v52 = vpop.f32.mrf.mxu0  ;;  %v4232_v49 = vadd.f32 %v4105_v48, %v9618_v58  ;;  %7709 = vmatpush3.bf16.msra.mxu0 %v7774_v18 }
 0x272   : > { %v9758_v57 = vadd.f32 %v7508_v52, %v4234_v35  ;;  %v7475_v61 = vpop.f32.mrf.mxu1  ;;  %v5773_v52 = vpack.c.bf16 %v5748_v45, %v5747_v62 }
 0x273   : > { %v4399_v22 = vpop.f32.mrf.mxu0  ;;  %v4235_v24 = vadd.f32 %v7475_v61, %v9621_v50  ;;  %v5745_v50 = vld [vmem:[#allocation3 + $0xaa] sm:$0xff] }
 0x274   : > { %v9761_v31 = vadd.f32 %v4399_v22, %v4232_v49  ;;  %v4108_v32 = vpop.f32.mrf.mxu1  ;;  %v5772_v4 = vpack.c.bf16 %v5746_v33, %v5745_v50 }
 0x275   : > { %v7509_v53 = vpop.f32.mrf.mxu0  ;;  %v9764_v15 = vadd.f32 %v4108_v32, %v9625_v43 }
 0x276   : > { %v9766_v9 = vadd.f32 %v7509_v53, %v4235_v24  ;;  %v7478_v36 = vpop.f32.mrf.mxu1  ;;  %7681 = vmatmul.mubr.msk.bf16.gmra.mxu1 %vm457_vm1, %v5770_v14  ;;  %v5750_v24 = vld [vmem:[#allocation3 + $0xe2] sm:$0xff]  ;;  %v5751_v53 = vld [vmem:[#allocation3 + $0xf2] sm:$0xff] }
 0x277   : > { %v9768_v5 = vpop.f32.mrf.mxu0  ;;  %v4238_v58 = vadd.f32 %v7478_v36, %v9631_v40  ;;  %7684 = vmatprep.mubr.msk.bf16.mxu1 %vm457_vm1, %v5771_v34  ;;  %v5752_v36 = vld [vmem:[#allocation3 + $0xfa] sm:$0xff] }
 0x278   : > { %v4121_v16 = vpop.f32.mrf.mxu1 }
 0x279   : > { %v7512_v37 = vpop.f32.mrf.mxu0  ;;  %v4236_v43 = vadd.f32 %v4121_v16, %v9636_v13 }
 0x27a   : > { %v9774_v8 = vadd.f32 %v7512_v37, %v4238_v58  ;;  %v7479_v35 = vpop.f32.mrf.mxu1 }
 0x27b   : > { %v4415_v46 = vpop.f32.mrf.mxu0  ;;  %v4239_v40 = vadd.f32 %v7479_v35, %v9639_v63  ;;  %v5749_v63 = vld [vmem:[#allocation3 + $0xda] sm:$0xff] }
 0x27c   : > { %v9780_v48 = vadd.f32 %v4415_v46, %v4236_v43  ;;  %v4124_v38 = vpop.f32.mrf.mxu1  ;;  %v5774_v16 = vpack.c.bf16 %v5750_v24, %v5749_v63 }
 0x27d   : > { %v7513_v6 = vpop.f32.mrf.mxu0  ;;  %v9783_v13 = vadd.f32 %v4124_v38, %v9643_v47 }
 0x27e   : > { %v9785_v49 = vadd.f32 %v7513_v6, %v4239_v40  ;;  %v7482_v61 = vpop.f32.mrf.mxu1  ;;  %7685 = vmatmul.mubr.msk.bf16.gmra.mxu1 %vm457_vm1, %v5772_v4  ;;  %v5754_v40 = vld [vmem:[#allocation3 + $0x112] sm:$0xff]  ;;  %v5755_v6 = vld [vmem:[#allocation3 + $0x122] sm:$0xff] }
 0x27f   : > { %v9787_v22 = vpop.f32.mrf.mxu0  ;;  %v4242_v14 = vadd.f32 %v7482_v61, %v9649_v41  ;;  %7688 = vmatprep.mubr.msk.bf16.mxu1 %vm457_vm1, %v5773_v52  ;;  %v5775_v41 = vpack.c.bf16 %v5752_v36, %v5751_v53  ;;  %v5756_v61 = vld [vmem:[#allocation3 + $0x12a] sm:$0xff] }
 0x280   : > { %v4137_v34 = vpop.f32.mrf.mxu1 }
 0x281   : > { %v7516_v32 = vpop.f32.mrf.mxu0  ;;  %v4240_v47 = vadd.f32 %v4137_v34, %v9654_v28 }
 0x282   : > { %v9793_v58 = vadd.f32 %v7516_v32, %v4242_v14  ;;  %v7483_v50 = vpop.f32.mrf.mxu1 }
 0x283   : > { %v4431_v33 = vpop.f32.mrf.mxu0  ;;  %v4243_v37 = vadd.f32 %v7483_v50, %v9657_v7  ;;  %v5753_v7 = vld [vmem:[#allocation3 + $0x10a] sm:$0xff] }
 0x284   : > { %v9796_v62 = vadd.f32 %v4431_v33, %v4240_v47  ;;  %v4140_v45 = vpop.f32.mrf.mxu1  ;;  %v5776_v34 = vpack.c.bf16 %v5754_v40, %v5753_v7 }
 0x285   : > { %v7517_v43 = vpop.f32.mrf.mxu0  ;;  %v9799_v18 = vadd.f32 %v4140_v45, %v9661_v56 }
 0x286   : > { %v9801_v35 = vadd.f32 %v7517_v43, %v4243_v37  ;;  %v7486_v46 = vpop.f32.mrf.mxu1  ;;  %7689 = vmatmul.mubr.msk.bf16.gmra.mxu1 %vm457_vm1, %v5774_v16 }
 0x287   : > { %v9803_v4 = vpop.f32.mrf.mxu0  ;;  %v4246_v28 = vadd.f32 %v7486_v46, %v9667_v23  ;;  %7692 = vmatprep.mubr.msk.bf16.mxu1 %vm457_vm1, %v5775_v41  ;;  %v5777_v23 = vpack.c.bf16 %v5756_v61, %v5755_v6  ;;  %v5758_v41 = vld [vmem:[#allocation3 + $0x142] sm:$0xff]  ;;  %v5759_v46 = vld [vmem:[#allocation3 + $0x152] sm:$0xff]  ;;  %v3955_v6 = vadd.f32 %v9696_v2, %v9692_v55  ;;  %v5761_v55 = vld [vmem:[#allocation3 + $0x16a] sm:$0xff] }
 0x288   : > { %v4153_v52 = vpop.f32.mrf.mxu1 }
 0x289   : > { %v7520_v38 = vpop.f32.mrf.mxu0  ;;  %v4244_v56 = vadd.f32 %v4153_v52, %v9672_v27 }
 0x28a   : > { %v9809_v14 = vadd.f32 %v7520_v38, %v4246_v28  ;;  %v7487_v63 = vpop.f32.mrf.mxu1  ;;  %v5760_v28 = vld [vmem:[#allocation3 + $0x15a] sm:$0xff] }
 0x28b   : > { %v4447_v24 = vpop.f32.mrf.mxu0  ;;  %v4247_v32 = vadd.f32 %v7487_v63, %v9675_v25  ;;  %v5757_v25 = vld [vmem:[#allocation3 + $0x13a] sm:$0xff] }
 0x28c   : > { %v9812_v53 = vadd.f32 %v4447_v24, %v4244_v56  ;;  %v4156_v36 = vpop.f32.mrf.mxu1  ;;  %v5778_v38 = vpack.c.bf16 %v5758_v41, %v5757_v25  ;;  %v5779_v56 = vpack.c.bf16 %v5760_v28, %v5759_v46  ;;  %v7775_v41 = vld [vmem:[%s10458_s6] sm:$0xff]  }
 0x28d   : > { %v7521_v47 = vpop.f32.mrf.mxu0  ;;  %v9815_v50 = vadd.f32 %v4156_v36, %v9679_v51  ;;  %7710 = vmatprep.subr.bf16.mxu0 %v7775_v41 }
 0x28e   : > { %v9817_v33 = vadd.f32 %v7521_v47, %v4247_v32  ;;  %v7490_v16 = vpop.f32.mrf.mxu1  ;;  %7693 = vmatmul.mubr.msk.bf16.gmra.mxu1 %vm457_vm1, %v5776_v34  ;;  %7711 = vmatpush3.bf16.msra.mxu0 %v7775_v41 }
 0x28f   : > { %v9819_v37 = vpop.f32.mrf.mxu0  ;;  %v4250_v27 = vadd.f32 %v7490_v16, %v9685_v26  ;;  %7696 = vmatprep.mubr.msk.bf16.mxu1 %vm457_vm1, %v5777_v23 }
 0x290   : > { %v4169_v45 = vpop.f32.mrf.mxu1 }
 0x291   : > { %v7524_v43 = vpop.f32.mrf.mxu0  ;;  %v4248_v51 = vadd.f32 %v4169_v45, %v9689_v60 }
 0x292   : > { %v9825_v7 = vadd.f32 %v7524_v43, %v4250_v27  ;;  %v7491_v40 = vpop.f32.mrf.mxu1 }
 0x293   : > { %v4463_v52 = vpop.f32.mrf.mxu0  ;;  %v4251_v26 = vadd.f32 %v7491_v40, %v9694_v29  ;;  %v5762_v29 = vld [vmem:[#allocation3 + $0x172] sm:$0xff] }
 0x294   : > { %v9830_v61 = vadd.f32 %v4463_v52, %v4248_v51  ;;  %v4172_v63 = vpop.f32.mrf.mxu1  ;;  %v5780_v46 = vpack.c.bf16 %v5762_v29, %v5761_v55  ;;  %v3963_v29 = vadd.f32 %v9735_v20, %v9731_v44 }
 0x295   : > { %v7525_v24 = vpop.f32.mrf.mxu0  ;;  %v4249_v34 = vadd.f32 %v4172_v63, %v3955_v6 }
 0x296   : > { %v9832_v32 = vadd.f32 %v7525_v24, %v4251_v26  ;;  %v7494_v23 = vpop.f32.mrf.mxu1  ;;  %7697 = vmatmul.mubr.msk.bf16.gmra.mxu1 %vm457_vm1, %v5778_v38 }
 0x297   : > { %v4466_v60 = vpop.f32.mrf.mxu0  ;;  %v4254_v36 = vadd.f32 %v7494_v23, %v9704_v19  ;;  %7700 = vmatprep.mubr.msk.bf16.mxu1 %vm457_vm1, %v5779_v56  ;;  %v3959_v19 = vadd.f32 %v9715_v54, %v9711_v10  ;;  %v5765_v10 = vld [vmem:[#allocation3 + $0x19a] sm:$0xff] }
 0x298   : > { %v9836_v47 = vadd.f32 %v4466_v60, %v4249_v34  ;;  %v4185_v2 = vpop.f32.mrf.mxu1 }
 0x299   : > { %v7528_v16 = vpop.f32.mrf.mxu0  ;;  %v4252_v27 = vadd.f32 %v4185_v2, %v9708_v42 }
 0x29a   : > { %v9840_v25 = vadd.f32 %v7528_v16, %v4254_v36  ;;  %v7495_v45 = vpop.f32.mrf.mxu1 }
 0x29b   : > { %v4479_v43 = vpop.f32.mrf.mxu0  ;;  %v4255_v28 = vadd.f32 %v7495_v45, %v9713_v39  ;;  %v5766_v39 = vld [vmem:[#allocation3 + $0x1a2] sm:$0xff] }
 0x29c   : > { %v9848_v51 = vadd.f32 %v4479_v43, %v4252_v27  ;;  %v4188_v40 = vpop.f32.mrf.mxu1  ;;  %v5782_v55 = vpack.c.bf16 %v5766_v39, %v5765_v10 }
 0x29d   : > { %v7529_v52 = vpop.f32.mrf.mxu0  ;;  %v4253_v42 = vadd.f32 %v4188_v40, %v3959_v19 }
 0x29e   : > { %v9850_v38 = vadd.f32 %v7529_v52, %v4255_v28  ;;  %v7498_v6 = vpop.f32.mrf.mxu1  ;;  %7701 = vmatmul.mubr.msk.bf16.gmra.mxu1 %vm457_vm1, %v5780_v46  ;;  %v3967_v52 = vadd.f32 %v9752_v1, %v9748_v21 }
 0x29f   : > { %v4482_v26 = vpop.f32.mrf.mxu0  ;;  %v4258_v56 = vadd.f32 %v7498_v6, %v9723_v3  ;;  %7704 = vmatprep.mubr.msk.bf16.mxu1 %vm457_vm1, %v9579_v30 }
 0x2a0   : > { %v9854_v63 = vadd.f32 %v4482_v26, %v4253_v42  ;;  %v4201_v54 = vpop.f32.mrf.mxu1 }
 0x2a1   : > { %v7532_v24 = vpop.f32.mrf.mxu0  ;;  %v4256_v34 = vadd.f32 %v4201_v54, %v9728_v11 }
 0x2a2   : > { %v9859_v23 = vadd.f32 %v7532_v24, %v4258_v56  ;;  %v7499_v60 = vpop.f32.mrf.mxu1 }
 0x2a3   : > { %v4495_v36 = vpop.f32.mrf.mxu0  ;;  %v4259_v3 = vadd.f32 %v7499_v60, %v9733_v59 }
 0x2a4   : > { %v9864_v2 = vadd.f32 %v4495_v36, %v4256_v34  ;;  %v4204_v16 = vpop.f32.mrf.mxu1  ;;  %v4527_v36 = vadd.f32 %v9768_v5, %v9764_v15  ;;  %v4531_v5 = vadd.f32 %v9787_v22, %v9783_v13  ;;  %v4535_v22 = vadd.f32 %v9803_v4, %v9799_v18 }
 0x2a5   : > { %v7533_v30 = vpop.f32.mrf.mxu0  ;;  %v4257_v27 = vadd.f32 %v4204_v16, %v3963_v29  ;;  %v4539_v4 = vadd.f32 %v9819_v37, %v9815_v50 }
 0x2a6   : > { %v9866_v41 = vadd.f32 %v7533_v30, %v4259_v3  ;;  %v7502_v45 = vpop.f32.mrf.mxu1  ;;  %7705 = vmatmul.mubr.msk.bf16.gmra.mxu1 %vm457_vm1, %v5782_v55 }
 0x2a7   : > { %v4498_v43 = vpop.f32.mrf.mxu0  ;;  %v4262_v11 = vadd.f32 %v7502_v45, %v9742_v12 }
 0x2a8   : > { %v9870_v46 = vadd.f32 %v4498_v43, %v4257_v27  ;;  %v4217_v19 = vpop.f32.mrf.mxu1 }
 0x2a9   : > { %v7536_v28 = vpop.f32.mrf.mxu0  ;;  %v4260_v44 = vadd.f32 %v4217_v19, %v9745_v17 }
 0x2aa   : > { %v9873_v59 = vadd.f32 %v7536_v28, %v4262_v11  ;;  %v7503_v20 = vpop.f32.mrf.mxu1 }
 0x2ab   : > { %v4511_v40 = vpop.f32.mrf.mxu0  ;;  %v4263_v42 = vadd.f32 %v7503_v20, %v9750_v0 }
 0x2ac   : > { %v9878_v6 = vadd.f32 %v4511_v40, %v4260_v44  ;;  %v4220_v26 = vpop.f32.mrf.mxu1 }
 0x2ad   : > { %v7537_v56 = vpop.f32.mrf.mxu0  ;;  %v4261_v12 = vadd.f32 %v4220_v26, %v3967_v52 }
 0x2ae   : > { %v9880_v10 = vadd.f32 %v7537_v56, %v4263_v42  ;;  %v7542_v54 = vpop.f32.mrf.mxu1 }
 0x2af   : > { %v4514_v39 = vpop.f32.mrf.mxu0  ;;  %v9885_v17 = vadd.f32 %v7542_v54, %v9758_v57 }
 0x2b0   : > { %v9882_v24 = vadd.f32 %v4514_v39, %v4261_v12  ;;  %v4693_v34 = vpop.f32.mrf.mxu1 }
 0x2b1   : > { %v9887_v60 = vpop.f32.mrf.mxu0  ;;  %v9890_v21 = vadd.f32 %v4693_v34, %v9761_v31 }
 0x2b2   : > { %v7543_v0 = vpop.f32.mrf.mxu1 }
 0x2b3   : > { %v9892_v1 = vpop.f32.mrf.mxu0  ;;  %v9897_v55 = vadd.f32 %v7543_v0, %v9766_v9 }
 0x2b4   : > { %v4696_v29 = vpop.f32.mrf.mxu1 }
 0x2b5   : > { %v9899_v3 = vpop.f32.mrf.mxu0  ;;  %v9901_v57 = vadd.f32 %v4696_v29, %v4527_v36 }
 0x2b6   : > { %v7546_v16 = vpop.f32.mrf.mxu1 }
 0x2b7   : > { %v9903_v30 = vpop.f32.mrf.mxu0  ;;  %v9906_v31 = vadd.f32 %v7546_v16, %v9774_v8 }
 0x2b8   : > { %v4709_v27 = vpop.f32.mrf.mxu1 }
 0x2b9   : > { %v9908_v45 = vpop.f32.mrf.mxu0  ;;  %v9911_v43 = vadd.f32 %v4709_v27, %v9780_v48 }
 0x2ba   : > { %v7547_v15 = vpop.f32.mrf.mxu1 }
 0x2bb   : > { %v9913_v9 = vpop.f32.mrf.mxu0  ;;  %v9918_v11 = vadd.f32 %v7547_v15, %v9785_v49 }
 0x2bc   : > { %v4712_v19 = vpop.f32.mrf.mxu1 }
 0x2bd   : > { %v9920_v28 = vpop.f32.mrf.mxu0  ;;  %v9922_v8 = vadd.f32 %v4712_v19, %v4531_v5 }
 0x2be   : > { %v7550_v44 = vpop.f32.mrf.mxu1 }
 0x2bf   : > { %v9924_v20 = vpop.f32.mrf.mxu0  ;;  %v9927_v48 = vadd.f32 %v7550_v44, %v9793_v58 }
 0x2c0   : > { %v4725_v40 = vpop.f32.mrf.mxu1 }
 0x2c1   : > { %v9929_v52 = vpop.f32.mrf.mxu0  ;;  %v9932_v42 = vadd.f32 %v4725_v40, %v9796_v62 }
 0x2c2   : > { %v7551_v13 = vpop.f32.mrf.mxu1 }
 0x2c3   : > { %v9934_v49 = vpop.f32.mrf.mxu0  ;;  %v9939_v26 = vadd.f32 %v7551_v13, %v9801_v35 }
 0x2c4   : > { %v4728_v56 = vpop.f32.mrf.mxu1 }
 0x2c5   : > { %v9941_v12 = vpop.f32.mrf.mxu0  ;;  %v9943_v58 = vadd.f32 %v4728_v56, %v4535_v22 }
 0x2c6   : > { %v7554_v39 = vpop.f32.mrf.mxu1 }
 0x2c7   : > { %v9945_v54 = vpop.f32.mrf.mxu0  ;;  %v9948_v62 = vadd.f32 %v7554_v39, %v9809_v14 }
 0x2c8   : > { %v4741_v34 = vpop.f32.mrf.mxu1 }
 0x2c9   : > { %v9950_v0 = vpop.f32.mrf.mxu0  ;;  %v9953_v36 = vadd.f32 %v4741_v34, %v9812_v53 }
 0x2ca   : > { %v7555_v18 = vpop.f32.mrf.mxu1 }
 0x2cb   : > { %v9955_v35 = vpop.f32.mrf.mxu0  ;;  %v9960_v29 = vadd.f32 %v7555_v18, %v9817_v33 }
 0x2cc   : > { %v4744_v16 = vpop.f32.mrf.mxu1 }
 0x2cd   : > { %v9962_v27 = vpop.f32.mrf.mxu0  ;;  %v9964_v14 = vadd.f32 %v4744_v16, %v4539_v4 }
 0x2ce   : > { %10552 = vst [vmem:[#allocation14_spill] sm:$0xff] %v9962_v27  ;;  %v7558_v15 = vpop.f32.mrf.mxu1 }
 0x2cf   : > { %10553 = vst [vmem:[#allocation15_spill] sm:$0xff] %v9964_v14  ;;  %v9966_v5 = vpop.f32.mrf.mxu0  ;;  %v9969_v53 = vadd.f32 %v7558_v15, %v9825_v7 }
 0x2d0   : > { %10554 = vst [vmem:[#allocation22_spill] sm:$0xff] %v9966_v5  ;;  %v4757_v19 = vpop.f32.mrf.mxu1 }
 0x2d1   : > { %10555 = vst [vmem:[#allocation12_spill] sm:$0xff] %v9969_v53  ;;  %v9971_v44 = vpop.f32.mrf.mxu0  ;;  %v9974_v40 = vadd.f32 %v4757_v19, %v9830_v61 }
 0x2d2   : > { %10556 = vst [vmem:[#allocation13_spill] sm:$0xff] %v9971_v44  ;;  %v7559_v50 = vpop.f32.mrf.mxu1 }
 0x2d3   : > { %10557 = vst [vmem:[#allocation16_spill] sm:$0xff] %v9974_v40  ;;  %v9976_v33 = vpop.f32.mrf.mxu0  ;;  %v9979_v37 = vadd.f32 %v7559_v50, %v9832_v32 }
 0x2d4   : > { %10558 = vst [vmem:[#allocation17_spill] sm:$0xff] %v9976_v33  ;;  %v4760_v13 = vpop.f32.mrf.mxu1 }
 0x2d5   : > { %10559 = vst [vmem:[#allocation6_spill] sm:$0xff] %v9979_v37  ;;  %v9981_v22 = vpop.f32.mrf.mxu0  ;;  %v9984_v56 = vadd.f32 %v4760_v13, %v9836_v47 }
 0x2d6   : > { %10560 = vst [vmem:[#allocation19_spill] sm:$0xff] %v9981_v22  ;;  %v7562_v7 = vpop.f32.mrf.mxu1 }
 0x2d7   : > { %10561 = vst [vmem:[#allocation7_spill] sm:$0xff] %v9984_v56  ;;  %v9986_v39 = vpop.f32.mrf.mxu0  ;;  %v9989_v34 = vadd.f32 %v7562_v7, %v9840_v25 }
 0x2d8   : > { %10562 = vst [vmem:[#allocation4_spill] sm:$0xff] %v9986_v39  ;;  %v4773_v61 = vpop.f32.mrf.mxu1 }
 0x2d9   : > { %10563 = vst [vmem:[#allocation18_spill] sm:$0xff] %v9989_v34  ;;  %v9991_v18 = vpop.f32.mrf.mxu0  ;;  %v9994_v4 = vadd.f32 %v4773_v61, %v9848_v51 }
 0x2da   : > { %10564 = vst [vmem:[#allocation11_spill] sm:$0xff] %v9991_v18  ;;  %v7563_v32 = vpop.f32.mrf.mxu1 }
 0x2db   : > { %10565 = vst [vmem:[#allocation21_spill] sm:$0xff] %v9994_v4  ;;  %v9996_v16 = vpop.f32.mrf.mxu0  ;;  %v9999_v15 = vadd.f32 %v7563_v32, %v9850_v38 }
 0x2dc   : > { %10566 = vst [vmem:[#allocation8_spill] sm:$0xff] %v9996_v16  ;;  %v4776_v47 = vpop.f32.mrf.mxu1 }
 0x2dd   : > { %10567 = vst [vmem:[#allocation5_spill] sm:$0xff] %v9999_v15  ;;  %v10001_v19 = vpop.f32.mrf.mxu0  ;;  %v10004_v50 = vadd.f32 %v4776_v47, %v9854_v63 }
 0x2de   : > { %10568 = vst [vmem:[#allocation10_spill] sm:$0xff] %v10001_v19  ;;  %v7566_v25 = vpop.f32.mrf.mxu1 }
 0x2df   : > { %10569 = vst [vmem:[#allocation20_spill] sm:$0xff] %v10004_v50  ;;  %v10006_v13 = vpop.f32.mrf.mxu0  ;;  %v10009_v7 = vadd.f32 %v7566_v25, %v9859_v23 }
 0x2e0   : > { %10570 = vst [vmem:[#allocation9_spill] sm:$0xff] %v10006_v13  ;;  %v4789_v51 = vpop.f32.mrf.mxu1 }
 0x2e1   : > { %10571 = vst [vmem:[#allocation23_spill] sm:$0xff] %v10009_v7  ;;  %v10011_v61 = vpop.f32.mrf.mxu0  ;;  %v10014_v16 = vadd.f32 %v4789_v51, %v9864_v2 }
 0x2e2   : > { %10572 = vst [vmem:[#allocation24_spill] sm:$0xff] %v10011_v61  ;;  %v7567_v38 = vpop.f32.mrf.mxu1 }
 0x2e3   : > { %10573 = vst [vmem:[#allocation25_spill] sm:$0xff] %v10014_v16  ;;  %v10016_v32 = vpop.f32.mrf.mxu0  ;;  %v10019_v19 = vadd.f32 %v7567_v38, %v9866_v41 }
 0x2e4   : > { %10574 = vst [vmem:[#allocation26_spill] sm:$0xff] %v10016_v32  ;;  %v4792_v63 = vpop.f32.mrf.mxu1 }
 0x2e5   : > { %10575 = vst [vmem:[#allocation27_spill] sm:$0xff] %v10019_v19  ;;  %v10021_v47 = vpop.f32.mrf.mxu0  ;;  %v10024_v13 = vadd.f32 %v4792_v63, %v9870_v46 }
 0x2e6   : > { %10576 = vst [vmem:[#allocation28_spill] sm:$0xff] %v10021_v47  ;;  %v7570_v23 = vpop.f32.mrf.mxu1 }
 0x2e7   : > { %10577 = vst [vmem:[#allocation29_spill] sm:$0xff] %v10024_v13  ;;  %v10026_v25 = vpop.f32.mrf.mxu0  ;;  %v10029_v61 = vadd.f32 %v7570_v23, %v9873_v59 }
 0x2e8   : > { %10578 = vst [vmem:[#allocation30_spill] sm:$0xff] %v10026_v25  ;;  %v4805_v2 = vpop.f32.mrf.mxu1 }
 0x2e9   : > { %10579 = vst [vmem:[#allocation31_spill] sm:$0xff] %v10029_v61  ;;  %v10031_v51 = vpop.f32.mrf.mxu0  ;;  %v10034_v32 = vadd.f32 %v4805_v2, %v9878_v6 }
 0x2ea   : > { %10580 = vst [vmem:[#allocation32_spill] sm:$0xff] %v10031_v51  ;;  %v7571_v41 = vpop.f32.mrf.mxu1 }
 0x2eb   : > { %10581 = vst [vmem:[#allocation33_spill] sm:$0xff] %v10034_v32  ;;  %v10036_v38 = vpop.f32.mrf.mxu0  ;;  %v10039_v47 = vadd.f32 %v7571_v41, %v9880_v10 }
 0x2ec   : > { %10582 = vst [vmem:[#allocation34_spill] sm:$0xff] %v10036_v38  ;;  %v4808_v46 = vpop.f32.mrf.mxu1 }
 0x2ed   : > { %10583 = vst [vmem:[#allocation35_spill] sm:$0xff] %v10039_v47  ;;  %v10041_v63 = vpop.f32.mrf.mxu0  ;;  %v10044_v25 = vadd.f32 %v4808_v46, %v9882_v24 }
 0x2ee   : > { %10584 = vst [vmem:[#allocation36_spill] sm:$0xff] %v10041_v63  ;;  %v7610_v23 = vpop.f32.mrf.mxu1 }
 0x2ef   : > { %10585 = vst [vmem:[#allocation37_spill] sm:$0xff] %v10044_v25  ;;  %v10046_v59 = vpop.f32.mrf.mxu0 }
 0x2f0   : > { %10586 = vst [vmem:[#allocation38_spill] sm:$0xff] %v10046_v59  ;;  %v5282_v61 = vpop.f32.mrf.mxu1 }
 0x2f1   : > { %v7644_v51 = vpop.f32.mrf.mxu0 }
 0x2f2   : > { %v7611_v13 = vpop.f32.mrf.mxu1 }
 0x2f3   : > { %v5576_v6 = vpop.f32.mrf.mxu0 }
 0x2f4   : > { %v5285_v2 = vpop.f32.mrf.mxu1 }
 0x2f5   : > { %v7645_v32 = vpop.f32.mrf.mxu0 }
 0x2f6   : > { %v7614_v19 = vpop.f32.mrf.mxu1 }
 0x2f7   : > { %v10048_v38 = vpop.f32.mrf.mxu0 }
 0x2f8   : > { %v10050_v10 = vpop.f32.mrf.mxu1 }
 0x2f9   : > { %v10054_v63 = vpop.f32.mrf.mxu0 }
 0x2fa   : > { %v10052_v41 = vpop.f32.mrf.mxu1 }
 0x2fb   : > { %v10060_v59 = vpop.f32.mrf.mxu0 }
 0x2fc   : > { %v10056_v24 = vpop.f32.mrf.mxu1 }
 0x2fd   : > { %v10066_v16 = vpop.f32.mrf.mxu0 }
 0x2fe   : > { %v10058_v46 = vpop.f32.mrf.mxu1 }
 0x2ff   : > { %v10072_v15 = vpop.f32.mrf.mxu0 }
 0x300   : > { %v10062_v25 = vpop.f32.mrf.mxu1 }
 0x301   : > { %v10078_v34 = vpop.f32.mrf.mxu0 }
 0x302   : > { %v10064_v47 = vpop.f32.mrf.mxu1 }
 0x303   : > { %v10084_v22 = vpop.f32.mrf.mxu0 }
 0x304   : > { %v10068_v7 = vpop.f32.mrf.mxu1 }
 0x305   : > { %v10090_v40 = vpop.f32.mrf.mxu0 }
 0x306   : > { %v10070_v50 = vpop.f32.mrf.mxu1 }
 0x307   : > { %v10096_v5 = vpop.f32.mrf.mxu0 }
 0x308   : > { %v10074_v4 = vpop.f32.mrf.mxu1 }
 0x309   : > { %10587 = vst [vmem:[#allocation39_spill] sm:$0xff] %v10074_v4 }
 0x30a   : > { %v10076_v18 = vpop.f32.mrf.mxu1 }
 0x30b   : > { %10588 = vst [vmem:[#allocation40_spill] sm:$0xff] %v10076_v18 }
 0x30c   : > { %v10080_v39 = vpop.f32.mrf.mxu1 }
 0x30d   : > { %10589 = vst [vmem:[#allocation41_spill] sm:$0xff] %v10080_v39  ;;  %v10102_v39 = vpop.f32.mrf.mxu0 }
 0x30e   : > { %v10082_v56 = vpop.f32.mrf.mxu1  ;;  %10597 = vst [vmem:[#allocation49_spill] sm:$0xff] %v10102_v39 }
 0x30f   : > { %10590 = vst [vmem:[#allocation42_spill] sm:$0xff] %v10082_v56 }
 0x310   : > { %v10086_v37 = vpop.f32.mrf.mxu1 }
 0x311   : > { %10591 = vst [vmem:[#allocation43_spill] sm:$0xff] %v10086_v37  ;;  %v10108_v37 = vpop.f32.mrf.mxu0 }
 0x312   : > { %v10088_v33 = vpop.f32.mrf.mxu1  ;;  %10600 = vst [vmem:[#allocation52_spill] sm:$0xff] %v10108_v37 }
 0x313   : > { %10592 = vst [vmem:[#allocation44_spill] sm:$0xff] %v10088_v33 }
 0x314   : > { %v10092_v44 = vpop.f32.mrf.mxu1 }
 0x315   : > { %10593 = vst [vmem:[#allocation45_spill] sm:$0xff] %v10092_v44  ;;  %v10114_v44 = vpop.f32.mrf.mxu0 }
 0x316   : > { %v10094_v53 = vpop.f32.mrf.mxu1  ;;  %10603 = vst [vmem:[#allocation55_spill] sm:$0xff] %v10114_v44 }
 0x317   : > { %10594 = vst [vmem:[#allocation46_spill] sm:$0xff] %v10094_v53  ;;  %v10122_v39 = vpop.f32.mrf.mxu0 }
 0x318   : > { %v10098_v18 = vpop.f32.mrf.mxu1  ;;  %10606 = vst [vmem:[#allocation58_spill] sm:$0xff] %v10122_v39 }
 0x319   : > { %10595 = vst [vmem:[#allocation47_spill] sm:$0xff] %v10098_v18 }
 0x31a   : > { %v10100_v14 = vpop.f32.mrf.mxu1 }
 0x31b   : > { %10596 = vst [vmem:[#allocation48_spill] sm:$0xff] %v10100_v14  ;;  %v5116_v14 = vadd.f32 %v9887_v60, %v9885_v17  ;;  %v5115_v17 = vadd.f32 %v9903_v30, %v9901_v57  ;;  %v5118_v30 = vadd.f32 %v9913_v9, %v9911_v43  ;;  %v5119_v43 = vadd.f32 %v9924_v20, %v9922_v8 }
 0x31c   : > { %v10104_v56 = vpop.f32.mrf.mxu1 }
 0x31d   : > { %10598 = vst [vmem:[#allocation50_spill] sm:$0xff] %v10104_v56  ;;  %v5414_v8 = vadd.f32 %v10056_v24, %v5119_v43  ;;  %v5125_v24 = vadd.f32 %v9941_v12, %v9939_v26  ;;  %v10612_v43 = vld [vmem:[#allocation40_spill] sm:$0xff] }
 0x31e   : > { %v10106_v4 = vpop.f32.mrf.mxu1 }
 0x31f   : > { %10599 = vst [vmem:[#allocation51_spill] sm:$0xff] %v10106_v4  ;;  %v5114_v4 = vadd.f32 %v9892_v1, %v9890_v21  ;;  %v5120_v1 = vadd.f32 %v9908_v45, %v9906_v31  ;;  %v5413_v45 = vadd.f32 %v10050_v10, %v5118_v30 }
 0x320   : > { %v10110_v33 = vpop.f32.mrf.mxu1 }
 0x321   : > { %10601 = vst [vmem:[#allocation53_spill] sm:$0xff] %v10110_v33  ;;  %v5411_v33 = vadd.f32 %v7610_v23, %v5116_v14  ;;  %v5409_v44 = vadd.f32 %v5282_v61, %v5114_v4 }
 0x322   : > { %v10112_v27 = vpop.f32.mrf.mxu1 }
 0x323   : > { %10602 = vst [vmem:[#allocation54_spill] sm:$0xff] %v10112_v27  ;;  %v5117_v27 = vadd.f32 %v9899_v3, %v9897_v55  ;;  %v5705_v60 = vadd.f32 %v7644_v51, %v5411_v33  ;;  %v5703_v55 = vadd.f32 %v5576_v6, %v5409_v44  ;;  %v5410_v3 = vadd.f32 %v5285_v2, %v5115_v17 }
 0x324   : > { %v10116_v53 = vpop.f32.mrf.mxu1  ;;  %v5415_v33 = vadd.f32 %v7614_v19, %v5120_v1  ;;  %v5121_v51 = vadd.f32 %v9920_v28, %v9918_v11  ;;  %v5707_v6 = vadd.f32 %v10060_v59, %v5413_v45  ;;  %v10611_v45 = vld [vmem:[#allocation49_spill] sm:$0xff] }
 0x325   : > { %10604 = vst [vmem:[#allocation56_spill] sm:$0xff] %v10116_v53  ;;  %v10132_v53 = vpop.f32.mrf.mxu0  ;;  %v5412_v39 = vadd.f32 %v7611_v13, %v5117_v27  ;;  %v5704_v31 = vadd.f32 %v10048_v38, %v5410_v3  ;;  %v5124_v38 = vadd.f32 %v9929_v52, %v9927_v48 }
 0x326   : > { %v10118_v18 = vpop.f32.mrf.mxu1  ;;  %v5709_v19 = vadd.f32 %v10054_v63, %v5415_v33 }
 0x327   : > { %10605 = vst [vmem:[#allocation57_spill] sm:$0xff] %v10118_v18  ;;  %v10146_v4 = vpop.f32.mrf.mxu0  ;;  %v5706_v27 = vadd.f32 %v7645_v32, %v5412_v39  ;;  %v5416_v32 = vadd.f32 %v10052_v41, %v5121_v51  ;;  %v5122_v41 = vadd.f32 %v9934_v49, %v9932_v42  ;;  %v5419_v48 = vadd.f32 %v10058_v46, %v5124_v38  ;;  %v10615_v38 = vld [vmem:[#allocation52_spill] sm:$0xff] }
 0x328   : > { %v10124_v56 = vpop.f32.mrf.mxu1 }
 0x329   : > { %v10160_v9 = vpop.f32.mrf.mxu0  ;;  %v5710_v17 = vadd.f32 %v10066_v16, %v5416_v32  ;;  %v5417_v42 = vadd.f32 %v10062_v25, %v5122_v41  ;;  %v5123_v16 = vadd.f32 %v9945_v54, %v9943_v58  ;;  %v5713_v1 = vadd.f32 %v10078_v34, %v5419_v48  ;;  %v10614_v32 = vld [vmem:[#allocation13_spill] sm:$0xff] }
 0x32a   : > { %v10128_v37 = vpop.f32.mrf.mxu1  ;;  %v10618_v48 = vld [vmem:[#allocation17_spill] sm:$0xff] }
 0x32b   : > { %v10172_v2 = vpop.f32.mrf.mxu0  ;;  %v5711_v3 = vadd.f32 %v10084_v22, %v5417_v42  ;;  %v5418_v58 = vadd.f32 %v10068_v7, %v5123_v16  ;;  %v10607_v7 = vld [vmem:[#allocation14_spill] sm:$0xff] }
 0x32c   : > { %v10134_v18 = vpop.f32.mrf.mxu1 }
 0x32d   : > { %v10190_v46 = vpop.f32.mrf.mxu0  ;;  %v5712_v33 = vadd.f32 %v10096_v5, %v5418_v58  ;;  %v10625_v58 = vld [vmem:[#allocation7_spill] sm:$0xff] }
 0x32e   : > { %v7678_v21 = vpop.f32.mrf.mxu1 }
 0x32f   : > { %v5999_v14 = vadd.f32 %v7678_v21, %v5705_v60  ;;  %v5708_v60 = vadd.f32 %v10072_v15, %v5414_v8  ;;  %v5128_v15 = vadd.f32 %v9950_v0, %v9948_v62 }
 0x330   : > { %v5870_v57 = vpop.f32.mrf.mxu1 }
 0x331   : > { %6032 = vst.msk [vmem:[%s10142_s25 + $0x10] sm:$0xff] %vm6029_vm3, %v5999_v14  ;;  %v5997_v13 = vadd.f32 %v5870_v57, %v5703_v55  ;;  %v5420_v55 = vadd.f32 %v10064_v47, %v5125_v24  ;;  %v5126_v57 = vadd.f32 %v9955_v35, %v9953_v36  ;;  %v5423_v62 = vadd.f32 %v10070_v50, %v5128_v15  ;;  %v10610_v50 = vld [vmem:[#allocation22_spill] sm:$0xff]  ;;  %v10624_v15 = vld [vmem:[#allocation43_spill] sm:$0xff] }
 0x332   : > { %v7679_v61 = vpop.f32.mrf.mxu1 }
 0x333   : > { %6030 = vst.msk [vmem:[%s10142_s25] sm:$0xff] %vm6029_vm3, %v5997_v13  ;;  %v6000_v44 = vadd.f32 %v7679_v61, %v5706_v27  ;;  %v5714_v30 = vadd.f32 %v10090_v40, %v5420_v55  ;;  %v5129_v27 = vadd.f32 %v10607_v7, %v9960_v29  ;;  %v10609_v40 = vld [vmem:[#allocation15_spill] sm:$0xff] }
 0x334   : > { %v5873_v39 = vpop.f32.mrf.mxu1  ;;  %v5127_v61 = vadd.f32 %v10610_v50, %v10609_v40  ;;  %v10630_v40 = vld [vmem:[#allocation45_spill] sm:$0xff] }
 0x335   : > { %6033 = vst.msk [vmem:[%s10142_s25 + $0x18] sm:$0xff] %vm6029_vm3, %v6000_v44  ;;  %v6063_v11 = vpack.c.bf16 %v6000_v44, %v5999_v14  ;;  %v5998_v28 = vadd.f32 %v5873_v39, %v5704_v31  ;;  %v10202_v14 = vpop.f32.mrf.mxu0  ;;  %v5717_v44 = vadd.f32 %v10611_v45, %v5423_v62  ;;  %v5424_v39 = vadd.f32 %v10612_v43, %v5129_v27  ;;  %v10627_v62 = vld [vmem:[#allocation44_spill] sm:$0xff]  ;;  %v10628_v27 = vld [vmem:[#allocation18_spill] sm:$0xff] }
 0x336   : > { %v7682_v23 = vpop.f32.mrf.mxu1  ;;  %v10632_v43 = vld [vmem:[#allocation8_spill] sm:$0xff] }
 0x337   : > { %6031 = vst.msk [vmem:[%s10142_s25 + $0x8] sm:$0xff] %vm6029_vm3, %v5998_v28  ;;  %v6062_v20 = vpack.c.bf16 %v5998_v28, %v5997_v13  ;;  %v6003_v63 = vadd.f32 %v7682_v23, %v5709_v19  ;;  %v10608_v13 = vld [vmem:[#allocation39_spill] sm:$0xff]  ;;  %v10220_v51 = vpop.f32.mrf.mxu0  ;;  %v10613_v19 = vld [vmem:[#allocation12_spill] sm:$0xff] }
 0x338   : > { %v5886_v10 = vpop.f32.mrf.mxu1  ;;  %v5421_v36 = vadd.f32 %v10608_v13, %v5126_v57 }
 0x339   : > { %6036 = vst.msk [vmem:[%s10142_s25 + $0x30] sm:$0xff] %vm6029_vm3, %v6003_v63  ;;  %v6001_v52 = vadd.f32 %v5886_v10, %v5707_v6  ;;  %7712 = vmatprep.mubr.msk.bf16.mxu0 %vm6029_vm3, %v6062_v20  ;;  %v10616_v6 = vld [vmem:[#allocation41_spill] sm:$0xff]  ;;  %v10232_v10 = vpop.f32.mrf.mxu0 }
 0x33a   : > { %v7683_v59 = vpop.f32.mrf.mxu1  ;;  %7713 = vmatmul.mubr.msk.bf16.vlgmr.msra.gmra.mxu0 %vm6029_vm3, %v6063_v11  ;;  %v5132_v11 = vadd.f32 %v10614_v32, %v10613_v19  ;;  %v5715_v23 = vadd.f32 %v10615_v38, %v5421_v36  ;;  %v5422_v8 = vadd.f32 %v10616_v6, %v5127_v61  ;;  %v10636_v6 = vld [vmem:[#allocation47_spill] sm:$0xff] }
 0x33b   : > { %6034 = vst.msk [vmem:[%s10142_s25 + $0x20] sm:$0xff] %vm6029_vm3, %v6001_v52  ;;  %v6004_v49 = vadd.f32 %v7683_v59, %v5710_v17  ;;  %v10617_v17 = vld [vmem:[#allocation16_spill] sm:$0xff]  ;;  %v10619_v59 = vld [vmem:[#allocation55_spill] sm:$0xff] }
 0x33c   : > { %v5889_v21 = vpop.f32.mrf.mxu1  ;;  %v5718_v24 = vadd.f32 %v10619_v59, %v5424_v39  ;;  %v10639_v59 = vld [vmem:[#allocation48_spill] sm:$0xff] }
 0x33d   : > { %6037 = vst.msk [vmem:[%s10142_s25 + $0x38] sm:$0xff] %vm6029_vm3, %v6004_v49  ;;  %v6065_v26 = vpack.c.bf16 %v6004_v49, %v6003_v63  ;;  %v6002_v12 = vadd.f32 %v5889_v21, %v5708_v60  ;;  %v10620_v60 = vld [vmem:[#allocation42_spill] sm:$0xff] }
 0x33e   : > { %v7686_v25 = vpop.f32.mrf.mxu1  ;;  %v5427_v42 = vadd.f32 %v10620_v60, %v5132_v11  ;;  %v10621_v21 = vld [vmem:[#allocation6_spill] sm:$0xff]  ;;  %v10634_v11 = vld [vmem:[#allocation5_spill] sm:$0xff] }
 0x33f   : > { %6035 = vst.msk [vmem:[%s10142_s25 + $0x28] sm:$0xff] %vm6029_vm3, %v6002_v12  ;;  %v6064_v54 = vpack.c.bf16 %v6002_v12, %v6001_v52  ;;  %v6007_v34 = vadd.f32 %v7686_v25, %v5713_v1  ;;  %v5130_v52 = vadd.f32 %v10618_v48, %v10617_v17  ;;  %v10622_v1 = vld [vmem:[#allocation19_spill] sm:$0xff] }
 0x340   : > { %v5902_v47 = vpop.f32.mrf.mxu1  ;;  %v5133_v55 = vadd.f32 %v10622_v1, %v10621_v21 }
 0x341   : > { %6040 = vst.msk [vmem:[%s10142_s25 + $0x50] sm:$0xff] %vm6029_vm3, %v6007_v34  ;;  %v6005_v0 = vadd.f32 %v5902_v47, %v5711_v3  ;;  %7716 = vmatprep.mubr.msk.bf16.mxu0 %vm6029_vm3, %v6064_v54  ;;  %v5425_v25 = vadd.f32 %v10624_v15, %v5130_v52  ;;  %v10626_v54 = vld [vmem:[#allocation4_spill] sm:$0xff]  ;;  %v7668_v47 = vpop.f32.mrf.mxu0 }
 0x342   : > { %v7687_v22 = vpop.f32.mrf.mxu1  ;;  %7717 = vmatmul.mubr.msk.bf16.gmra.mxu0 %vm6029_vm3, %v6065_v26  ;;  %v10623_v26 = vld [vmem:[#allocation58_spill] sm:$0xff] }
 0x343   : > { %6038 = vst.msk [vmem:[%s10142_s25 + $0x40] sm:$0xff] %vm6029_vm3, %v6005_v0  ;;  %v6008_v35 = vadd.f32 %v7687_v22, %v5714_v30  ;;  %v5716_v12 = vadd.f32 %v10623_v26, %v5422_v8  ;;  %v5721_v30 = vadd.f32 %v10132_v53, %v5427_v42  ;;  %v10640_v42 = vld [vmem:[#allocation23_spill] sm:$0xff] }
 0x344   : > { %v5905_v31 = vpop.f32.mrf.mxu1 }
 0x345   : > { %6041 = vst.msk [vmem:[%s10142_s25 + $0x58] sm:$0xff] %vm6029_vm3, %v6008_v35  ;;  %v6067_v29 = vpack.c.bf16 %v6008_v35, %v6007_v34  ;;  %v6006_v5 = vadd.f32 %v5905_v31, %v5712_v33  ;;  %v5131_v34 = vadd.f32 %v10626_v54, %v10625_v58  ;;  %v10629_v33 = vld [vmem:[#allocation11_spill] sm:$0xff]  ;;  %v5719_v35 = vadd.f32 %v10146_v4, %v5425_v25  ;;  %v5672_v31 = vpop.f32.mrf.mxu0  ;;  %v10644_v58 = vld [vmem:[#allocation26_spill] sm:$0xff] }
 0x346   : > { %v7690_v28 = vpop.f32.mrf.mxu1  ;;  %v5136_v13 = vadd.f32 %v10629_v33, %v10628_v27  ;;  %v10648_v33 = vld [vmem:[#allocation53_spill] sm:$0xff] }
 0x347   : > { %6039 = vst.msk [vmem:[%s10142_s25 + $0x48] sm:$0xff] %vm6029_vm3, %v6006_v5  ;;  %v6066_v20 = vpack.c.bf16 %v6006_v5, %v6005_v0  ;;  %v6011_v63 = vadd.f32 %v7690_v28, %v5717_v44  ;;  %v5428_v0 = vadd.f32 %v10627_v62, %v5133_v55  ;;  %v5426_v50 = vadd.f32 %v10630_v40, %v5131_v34  ;;  %v10631_v44 = vld [vmem:[#allocation21_spill] sm:$0xff]  ;;  %v10633_v5 = vld [vmem:[#allocation46_spill] sm:$0xff]  ;;  %v7669_v17 = vpop.f32.mrf.mxu0 }
 0x348   : > { %v5918_v41 = vpop.f32.mrf.mxu1  ;;  %v5134_v39 = vadd.f32 %v10632_v43, %v10631_v44  ;;  %v5431_v19 = vadd.f32 %v10633_v5, %v5136_v13  ;;  %v10635_v28 = vld [vmem:[#allocation10_spill] sm:$0xff] }
 0x349   : > { %6044 = vst.msk [vmem:[%s10142_s25 + $0x70] sm:$0xff] %vm6029_vm3, %v6011_v63  ;;  %v6009_v49 = vadd.f32 %v5918_v41, %v5715_v23  ;;  %7720 = vmatprep.mubr.msk.bf16.mxu0 %vm6029_vm3, %v6066_v20  ;;  %v5137_v38 = vadd.f32 %v10635_v28, %v10634_v11  ;;  %v5720_v23 = vadd.f32 %v10172_v2, %v5426_v50  ;;  %v10637_v20 = vld [vmem:[#allocation20_spill] sm:$0xff]  ;;  %v10642_v55 = vld [vmem:[#allocation50_spill] sm:$0xff]  ;;  %v5675_v15 = vpop.f32.mrf.mxu0 }
 0x34a   : > { %v7691_v16 = vpop.f32.mrf.mxu1  ;;  %7721 = vmatmul.mubr.msk.bf16.gmra.mxu0 %vm6029_vm3, %v6067_v29  ;;  %v5722_v29 = vadd.f32 %v10160_v9, %v5428_v0  ;;  %v5429_v8 = vadd.f32 %v10636_v6, %v5134_v39  ;;  %v5725_v52 = vadd.f32 %v10190_v46, %v5431_v19  ;;  %v10646_v0 = vld [vmem:[#allocation27_spill] sm:$0xff]  ;;  %v10655_v6 = vld [vmem:[#allocation33_spill] sm:$0xff] }
 0x34b   : > { %6042 = vst.msk [vmem:[%s10142_s25 + $0x60] sm:$0xff] %vm6029_vm3, %v6009_v49  ;;  %v6012_v3 = vadd.f32 %v7691_v16, %v5718_v24  ;;  %v5432_v24 = vadd.f32 %v10639_v59, %v5137_v38  ;;  %v7672_v50 = vpop.f32.mrf.mxu0  ;;  %v10659_v59 = vld [vmem:[#allocation36_spill] sm:$0xff] }
 0x34c   : > { %v5921_v57 = vpop.f32.mrf.mxu1  ;;  %v5723_v1 = vadd.f32 %v10202_v14, %v5429_v8  ;;  %v10656_v8 = vld [vmem:[#allocation34_spill] sm:$0xff] }
 0x34d   : > { %6045 = vst.msk [vmem:[%s10142_s25 + $0x78] sm:$0xff] %vm6029_vm3, %v6012_v3  ;;  %v6069_v22 = vpack.c.bf16 %v6012_v3, %v6011_v63  ;;  %v6010_v7 = vadd.f32 %v5921_v57, %v5716_v12  ;;  %v10638_v63 = vld [vmem:[#allocation9_spill] sm:$0xff]  ;;  %v5726_v34 = vadd.f32 %v10220_v51, %v5432_v24  ;;  %v10645_v57 = vld [vmem:[#allocation51_spill] sm:$0xff] }
 0x34e   : > { %v7694_v36 = vpop.f32.mrf.mxu1  ;;  %v5135_v41 = vadd.f32 %v10638_v63, %v10637_v20  ;;  %v10643_v3 = vld [vmem:[#allocation25_spill] sm:$0xff] }
 0x34f   : > { %6043 = vst.msk [vmem:[%s10142_s25 + $0x68] sm:$0xff] %vm6029_vm3, %v6010_v7  ;;  %v6068_v61 = vpack.c.bf16 %v6010_v7, %v6009_v49  ;;  %v6015_v53 = vadd.f32 %v7694_v36, %v5721_v30  ;;  %v10641_v49 = vld [vmem:[#allocation24_spill] sm:$0xff]  ;;  %v5138_v54 = vadd.f32 %v10644_v58, %v10643_v3  ;;  %v10649_v36 = vld [vmem:[#allocation29_spill] sm:$0xff] }
 0x350   : > { %v5934_v45 = vpop.f32.mrf.mxu1  ;;  %v5140_v16 = vadd.f32 %v10641_v49, %v10640_v42  ;;  %v5430_v26 = vadd.f32 %v10642_v55, %v5135_v41  ;;  %v10657_v63 = vld [vmem:[#allocation57_spill] sm:$0xff]  ;;  %v10661_v49 = vld [vmem:[#allocation38_spill] sm:$0xff] }
 0x351   : > { %6048 = vst.msk [vmem:[%s10142_s25 + $0x90] sm:$0xff] %vm6029_vm3, %v6015_v53  ;;  %v6013_v4 = vadd.f32 %v5934_v45, %v5719_v35  ;;  %7724 = vmatprep.mubr.msk.bf16.mxu0 %vm6029_vm3, %v6068_v61  ;;  %v5433_v13 = vadd.f32 %v10648_v33, %v5138_v54  ;;  %v10650_v35 = vld [vmem:[#allocation30_spill] sm:$0xff]  ;;  %v10660_v42 = vld [vmem:[#allocation37_spill] sm:$0xff] }
 0x352   : > { %v7695_v32 = vpop.f32.mrf.mxu1  ;;  %7725 = vmatmul.mubr.msk.bf16.gmra.mxu0 %vm6029_vm3, %v6069_v22  ;;  %v5435_v30 = vadd.f32 %v10645_v57, %v5140_v16  ;;  %v10647_v22 = vld [vmem:[#allocation28_spill] sm:$0xff]  ;;  %v5724_v27 = vadd.f32 %v10232_v10, %v5430_v26  ;;  %v5139_v40 = vadd.f32 %v10650_v35, %v10649_v36  ;;  %v10651_v45 = vld [vmem:[#allocation54_spill] sm:$0xff]  ;;  %v10652_v10 = vld [vmem:[#allocation31_spill] sm:$0xff]  ;;  %v5143_v16 = vadd.f32 %v10661_v49, %v10660_v42 }
 0x353   : > { %6046 = vst.msk [vmem:[%s10142_s25 + $0x80] sm:$0xff] %vm6029_vm3, %v6013_v4  ;;  %v6016_v9 = vadd.f32 %v7695_v32, %v5722_v29  ;;  %v5141_v7 = vadd.f32 %v10647_v22, %v10646_v0  ;;  %v10653_v29 = vld [vmem:[#allocation32_spill] sm:$0xff] }
 0x354   : > { %v5937_v48 = vpop.f32.mrf.mxu1  ;;  %v5144_v5 = vadd.f32 %v10653_v29, %v10652_v10  ;;  %v10654_v32 = vld [vmem:[#allocation56_spill] sm:$0xff] }
 0x355   : > { %6049 = vst.msk [vmem:[%s10142_s25 + $0x98] sm:$0xff] %vm6029_vm3, %v6016_v9  ;;  %v6071_v60 = vpack.c.bf16 %v6016_v9, %v6015_v53  ;;  %v6014_v2 = vadd.f32 %v5937_v48, %v5720_v23  ;;  %v5729_v53 = vadd.f32 %v7668_v47, %v5435_v30  ;;  %v5436_v44 = vadd.f32 %v10651_v45, %v5141_v7  ;;  %v5688_v47 = vpop.f32.mrf.mxu0 }
 0x356   : > { %v7698_v21 = vpop.f32.mrf.mxu1  ;;  %v5434_v11 = vadd.f32 %v10654_v32, %v5139_v40  ;;  %v5142_v9 = vadd.f32 %v10656_v8, %v10655_v6  ;;  %v5439_v41 = vadd.f32 %v10657_v63, %v5144_v5 }
 0x357   : > { %6047 = vst.msk [vmem:[%s10142_s25 + $0x88] sm:$0xff] %vm6029_vm3, %v6014_v2  ;;  %v6070_v12 = vpack.c.bf16 %v6014_v2, %v6013_v4  ;;  %v6019_v46 = vadd.f32 %v7698_v21, %v5725_v52  ;;  %v5727_v4 = vadd.f32 %v5672_v31, %v5433_v13  ;;  %v5730_v20 = vadd.f32 %v7669_v17, %v5436_v44  ;;  %v10658_v52 = vld [vmem:[#allocation35_spill] sm:$0xff]  ;;  %v7673_v21 = vpop.f32.mrf.mxu0 }
 0x358   : > { %v5950_v25 = vpop.f32.mrf.mxu1  ;;  %v5145_v24 = vadd.f32 %v10659_v59, %v10658_v52  ;;  %v5437_v2 = vadd.f32 %v10124_v56, %v5142_v9  ;;  %v5733_v55 = vadd.f32 %v7672_v50, %v5439_v41  ;;  %v5438_v56 = vadd.f32 %v10134_v18, %v5143_v16 }
 0x359   : > { %6052 = vst.msk [vmem:[%s10142_s25 + $0xb0] sm:$0xff] %vm6029_vm3, %v6019_v46  ;;  %v6017_v14 = vadd.f32 %v5950_v25, %v5723_v1  ;;  %7728 = vmatprep.mubr.msk.bf16.mxu0 %vm6029_vm3, %v6070_v12  ;;  %v5691_v54 = vpop.f32.mrf.mxu0 }
 0x35a   : > { %v7699_v62 = vpop.f32.mrf.mxu1  ;;  %7729 = vmatmul.mubr.msk.bf16.gmra.mxu0 %vm6029_vm3, %v6071_v60  ;;  %v5728_v60 = vadd.f32 %v5675_v15, %v5434_v11  ;;  %v5440_v26 = vadd.f32 %v10128_v37, %v5145_v24  ;;  %v5731_v25 = vadd.f32 %v5688_v47, %v5437_v2 }
 0x35b   : > { %6050 = vst.msk [vmem:[%s10142_s25 + $0xa0] sm:$0xff] %vm6029_vm3, %v6017_v14  ;;  %v6020_v51 = vadd.f32 %v7699_v62, %v5726_v34 }
 0x35c   : > { %v5953_v61 = vpop.f32.mrf.mxu1  ;;  %v5734_v57 = vadd.f32 %v7673_v21, %v5440_v26 }
 0x35d   : > { %6053 = vst.msk [vmem:[%s10142_s25 + $0xb8] sm:$0xff] %vm6029_vm3, %v6020_v51  ;;  %v6073_v43 = vpack.c.bf16 %v6020_v51, %v6019_v46  ;;  %v6018_v39 = vadd.f32 %v5953_v61, %v5724_v27  ;;  %v10345_v27 = vld [vmem:[%s10459_s7] ss:$0 sm:$0xff] }
 0x35e   : > { %v7702_v19 = vpop.f32.mrf.mxu1 }
 0x35f   : > { %6051 = vst.msk [vmem:[%s10142_s25 + $0xa8] sm:$0xff] %vm6029_vm3, %v6018_v39  ;;  %v6072_v28 = vpack.c.bf16 %v6018_v39, %v6017_v14  ;;  %v6023_v38 = vadd.f32 %v7702_v19, %v5729_v53  ;;  %v5732_v14 = vadd.f32 %v5691_v54, %v5438_v56 }
 0x360   : > { %v5966_v23 = vpop.f32.mrf.mxu1 }
 0x361   : > { %6056 = vst.msk [vmem:[%s10142_s25 + $0xd0] sm:$0xff] %vm6029_vm3, %v6023_v38  ;;  %v6021_v48 = vadd.f32 %v5966_v23, %v5727_v4  ;;  %7732 = vmatprep.mubr.msk.bf16.mxu0 %vm6029_vm3, %v6072_v28 }
 0x362   : > { %v7703_v31 = vpop.f32.mrf.mxu1  ;;  %7733 = vmatmul.mubr.msk.bf16.gmra.mxu0 %vm6029_vm3, %v6073_v43 }
 0x363   : > { %6054 = vst.msk [vmem:[%s10142_s25 + $0xc0] sm:$0xff] %vm6029_vm3, %v6021_v48  ;;  %v6024_v17 = vadd.f32 %v7703_v31, %v5730_v20 }
 0x364   : > { %v5969_v1 = vpop.f32.mrf.mxu1 }
 0x365   : > { %6057 = vst.msk [vmem:[%s10142_s25 + $0xd8] sm:$0xff] %vm6029_vm3, %v6024_v17  ;;  %v6075_v12 = vpack.c.bf16 %v6024_v17, %v6023_v38  ;;  %v6022_v46 = vadd.f32 %v5969_v1, %v5728_v60 }
 0x366   : > { %v7706_v15 = vpop.f32.mrf.mxu1 }
 0x367   : > { %6055 = vst.msk [vmem:[%s10142_s25 + $0xc8] sm:$0xff] %vm6029_vm3, %v6022_v46  ;;  %v6074_v3 = vpack.c.bf16 %v6022_v46, %v6021_v48  ;;  %v6027_v58 = vadd.f32 %v7706_v15, %v5733_v55 }
 0x368   : > { %v5982_v34 = vpop.f32.mrf.mxu1 }
 0x369   : > { %6060 = vst.msk [vmem:[%s10142_s25 + $0xf0] sm:$0xff] %vm6029_vm3, %v6027_v58  ;;  %v6025_v37 = vadd.f32 %v5982_v34, %v5731_v25  ;;  %7736 = vmatprep.mubr.msk.bf16.mxu0 %vm6029_vm3, %v6074_v3 }
 0x36a   : > { %v7707_v30 = vpop.f32.mrf.mxu1  ;;  %7737 = vmatmul.mubr.msk.bf16.gmra.mxu0 %vm6029_vm3, %v6075_v12 }
 0x36b   : > { %6058 = vst.msk [vmem:[%s10142_s25 + $0xe0] sm:$0xff] %vm6029_vm3, %v6025_v37  ;;  %v6028_v18 = vadd.f32 %v7707_v30, %v5734_v57 }
 0x36c   : > { %v5985_v62 = vpop.f32.mrf.mxu1 }
 0x36d   : > { %6061 = vst.msk [vmem:[%s10142_s25 + $0xf8] sm:$0xff] %vm6029_vm3, %v6028_v18  ;;  %v6077_v0 = vpack.c.bf16 %v6028_v18, %v6027_v58  ;;  %v6026_v22 = vadd.f32 %v5985_v62, %v5732_v14 }
 0x36f   : > { %6059 = vst.msk [vmem:[%s10142_s25 + $0xe8] sm:$0xff] %vm6029_vm3, %v6026_v22  ;;  %v6076_v7 = vpack.c.bf16 %v6026_v22, %v6025_v37 }
 0x371   : > { %7740 = vmatprep.mubr.msk.bf16.mxu0 %vm6029_vm3, %v6076_v7 }
 0x372   : > { %7741 = vmatmul.mubr.msk.bf16.gmra.mxu0 %vm6029_vm3, %v6077_v0 }
 0x3fa   : > { %v7714_v33 = vpop.f32.mrf.mxu0 }
 0x3fb   : > { %v6192_v13 = vadd.f32 %v7714_v33, %v10345_v27 }
 0x3fc   : > { %v6183_v51 = vpop.f32.mrf.mxu0 }
 0x3fd   : > { %6312 = vst.msk [vmem:[%s10351_s10 + $0x10] sm:$0xff] %vm6029_vm3, %v6192_v13  ;;  %v6184_v36 = vadd.f32 %v10345_v27, %v6183_v51 }
 0x3fe   : > { %v7715_v35 = vpop.f32.mrf.mxu0 }
 0x3ff   : > { %6310 = vst.msk [vmem:[%s10351_s10] sm:$0xff] %vm6029_vm3, %v6184_v36  ;;  %v6195_v40 = vadd.f32 %v7715_v35, %v10345_v27 }
 0x400   : > { %v6186_v50 = vpop.f32.mrf.mxu0 }
 0x401   : > { %6313 = vst.msk [vmem:[%s10351_s10 + $0x18] sm:$0xff] %vm6029_vm3, %v6195_v40  ;;  %v6187_v61 = vadd.f32 %v10345_v27, %v6186_v50 }
 0x402   : > { %v7718_v53 = vpop.f32.mrf.mxu0 }
 0x403   : > { %6311 = vst.msk [vmem:[%s10351_s10 + $0x8] sm:$0xff] %vm6029_vm3, %v6187_v61  ;;  %v6208_v45 = vadd.f32 %v7718_v53, %v10345_v27 }
 0x404   : > { %v6199_v44 = vpop.f32.mrf.mxu0 }
 0x405   : > { %6316 = vst.msk [vmem:[%s10351_s10 + $0x30] sm:$0xff] %vm6029_vm3, %v6208_v45  ;;  %v6200_v43 = vadd.f32 %v10345_v27, %v6199_v44 }
 0x406   : > { %v7719_v39 = vpop.f32.mrf.mxu0 }
 0x407   : > { %6314 = vst.msk [vmem:[%s10351_s10 + $0x20] sm:$0xff] %vm6029_vm3, %v6200_v43  ;;  %v6211_v10 = vadd.f32 %v7719_v39, %v10345_v27 }
 0x408   : > { %v6202_v29 = vpop.f32.mrf.mxu0 }
 0x409   : > { %6317 = vst.msk [vmem:[%s10351_s10 + $0x38] sm:$0xff] %vm6029_vm3, %v6211_v10  ;;  %v6203_v5 = vadd.f32 %v10345_v27, %v6202_v29 }
 0x40a   : > { %v7722_v19 = vpop.f32.mrf.mxu0 }
 0x40b   : > { %6315 = vst.msk [vmem:[%s10351_s10 + $0x28] sm:$0xff] %vm6029_vm3, %v6203_v5  ;;  %v6224_v4 = vadd.f32 %v7722_v19, %v10345_v27 }
 0x40c   : > { %v6215_v32 = vpop.f32.mrf.mxu0 }
 0x40d   : > { %6320 = vst.msk [vmem:[%s10351_s10 + $0x50] sm:$0xff] %vm6029_vm3, %v6224_v4  ;;  %v6216_v11 = vadd.f32 %v10345_v27, %v6215_v32 }
 0x40e   : > { %v7723_v28 = vpop.f32.mrf.mxu0 }
 0x40f   : > { %6318 = vst.msk [vmem:[%s10351_s10 + $0x40] sm:$0xff] %vm6029_vm3, %v6216_v11  ;;  %v6227_v38 = vadd.f32 %v7723_v28, %v10345_v27 }
 0x410   : > { %v6218_v47 = vpop.f32.mrf.mxu0 }
 0x411   : > { %6321 = vst.msk [vmem:[%s10351_s10 + $0x58] sm:$0xff] %vm6029_vm3, %v6227_v38  ;;  %v6219_v23 = vadd.f32 %v10345_v27, %v6218_v47 }
 0x412   : > { %v7726_v6 = vpop.f32.mrf.mxu0 }
 0x413   : > { %6319 = vst.msk [vmem:[%s10351_s10 + $0x48] sm:$0xff] %vm6029_vm3, %v6219_v23  ;;  %v6240_v8 = vadd.f32 %v7726_v6, %v10345_v27 }
 0x414   : > { %v6231_v9 = vpop.f32.mrf.mxu0 }
 0x415   : > { %6324 = vst.msk [vmem:[%s10351_s10 + $0x70] sm:$0xff] %vm6029_vm3, %v6240_v8  ;;  %v6232_v20 = vadd.f32 %v10345_v27, %v6231_v9 }
 0x416   : > { %v7727_v63 = vpop.f32.mrf.mxu0 }
 0x417   : > { %6322 = vst.msk [vmem:[%s10351_s10 + $0x60] sm:$0xff] %vm6029_vm3, %v6232_v20  ;;  %v6243_v41 = vadd.f32 %v7727_v63, %v10345_v27 }
 0x418   : > { %v6234_v48 = vpop.f32.mrf.mxu0 }
 0x419   : > { %6325 = vst.msk [vmem:[%s10351_s10 + $0x78] sm:$0xff] %vm6029_vm3, %v6243_v41  ;;  %v6235_v31 = vadd.f32 %v10345_v27, %v6234_v48 }
 0x41a   : > { %v7730_v52 = vpop.f32.mrf.mxu0 }
 0x41b   : > { %6323 = vst.msk [vmem:[%s10351_s10 + $0x68] sm:$0xff] %vm6029_vm3, %v6235_v31  ;;  %v6256_v59 = vadd.f32 %v7730_v52, %v10345_v27 }
 0x41c   : > { %v6247_v24 = vpop.f32.mrf.mxu0 }
 0x41d   : > { %6328 = vst.msk [vmem:[%s10351_s10 + $0x90] sm:$0xff] %vm6029_vm3, %v6256_v59  ;;  %v6248_v60 = vadd.f32 %v10345_v27, %v6247_v24 }
 0x41e   : > { %v7731_v2 = vpop.f32.mrf.mxu0 }
 0x41f   : > { %6326 = vst.msk [vmem:[%s10351_s10 + $0x80] sm:$0xff] %vm6029_vm3, %v6248_v60  ;;  %v6259_v17 = vadd.f32 %v7731_v2, %v10345_v27 }
 0x420   : > { %v6250_v42 = vpop.f32.mrf.mxu0 }
 0x421   : > { %6329 = vst.msk [vmem:[%s10351_s10 + $0x98] sm:$0xff] %vm6029_vm3, %v6259_v17  ;;  %v6251_v49 = vadd.f32 %v10345_v27, %v6250_v42 }
 0x422   : > { %v7734_v16 = vpop.f32.mrf.mxu0 }
 0x423   : > { %6327 = vst.msk [vmem:[%s10351_s10 + $0x88] sm:$0xff] %vm6029_vm3, %v6251_v49  ;;  %v6272_v21 = vadd.f32 %v7734_v16, %v10345_v27 }
 0x424   : > { %v6263_v1 = vpop.f32.mrf.mxu0 }
 0x425   : > { %6332 = vst.msk [vmem:[%s10351_s10 + $0xb0] sm:$0xff] %vm6029_vm3, %v6272_v21  ;;  %v6264_v55 = vadd.f32 %v10345_v27, %v6263_v1 }
 0x426   : > { %v7735_v26 = vpop.f32.mrf.mxu0 }
 0x427   : > { %6330 = vst.msk [vmem:[%s10351_s10 + $0xa0] sm:$0xff] %vm6029_vm3, %v6264_v55  ;;  %v6275_v12 = vadd.f32 %v7735_v26, %v10345_v27 }
 0x428   : > { %v6266_v46 = vpop.f32.mrf.mxu0 }
 0x429   : > { %6333 = vst.msk [vmem:[%s10351_s10 + $0xb8] sm:$0xff] %vm6029_vm3, %v6275_v12  ;;  %v6267_v15 = vadd.f32 %v10345_v27, %v6266_v46 }
 0x42a   : > { %v7738_v25 = vpop.f32.mrf.mxu0 }
 0x42b   : > { %6331 = vst.msk [vmem:[%s10351_s10 + $0xa8] sm:$0xff] %vm6029_vm3, %v6267_v15  ;;  %v6288_v56 = vadd.f32 %v7738_v25, %v10345_v27 }
 0x42c   : > { %v6279_v3 = vpop.f32.mrf.mxu0 }
 0x42d   : > { %6336 = vst.msk [vmem:[%s10351_s10 + $0xd0] sm:$0xff] %vm6029_vm3, %v6288_v56  ;;  %v6280_v58 = vadd.f32 %v10345_v27, %v6279_v3 }
 0x42e   : > { %v7739_v54 = vpop.f32.mrf.mxu0 }
 0x42f   : > { %6334 = vst.msk [vmem:[%s10351_s10 + $0xc0] sm:$0xff] %vm6029_vm3, %v6280_v58  ;;  %v6291_v34 = vadd.f32 %v7739_v54, %v10345_v27 }
 0x430   : > { %v6282_v57 = vpop.f32.mrf.mxu0 }
 0x431   : > { %6337 = vst.msk [vmem:[%s10351_s10 + $0xd8] sm:$0xff] %vm6029_vm3, %v6291_v34  ;;  %v6283_v37 = vadd.f32 %v10345_v27, %v6282_v57 }
 0x432   : > { %v7742_v30 = vpop.f32.mrf.mxu0 }
 0x433   : > { %6335 = vst.msk [vmem:[%s10351_s10 + $0xc8] sm:$0xff] %vm6029_vm3, %v6283_v37  ;;  %v6304_v14 = vadd.f32 %v7742_v30, %v10345_v27 }
 0x434   : > { %v6295_v18 = vpop.f32.mrf.mxu0 }
 0x435   : > { %6340 = vst.msk [vmem:[%s10351_s10 + $0xf0] sm:$0xff] %vm6029_vm3, %v6304_v14  ;;  %v6296_v62 = vadd.f32 %v10345_v27, %v6295_v18 }
 0x436   : > { %v7743_v0 = vpop.f32.mrf.mxu0 }
 0x437   : > { %6338 = vst.msk [vmem:[%s10351_s10 + $0xe0] sm:$0xff] %vm6029_vm3, %v6296_v62  ;;  %v6307_v22 = vadd.f32 %v7743_v0, %v10345_v27 }
 0x438   : > { %v6298_v7 = vpop.f32.mrf.mxu0 }
 0x439   : > { %6341 = vst.msk [vmem:[%s10351_s10 + $0xf8] sm:$0xff] %vm6029_vm3, %v6307_v22  ;;  %v6299_v33 = vadd.f32 %v10345_v27, %v6298_v7 }
 0x43b   : > { %6339 = vst.msk [vmem:[%s10351_s10 + $0xe8] sm:$0xff] %vm6029_vm3, %v6299_v33 }
 0x43c PF: > { %s20_s30 = sadd.s32 1, %s7782_s30  }
 0x43d   : > { %p17_p4 = scmp.ge.s32.totalorder %s20_s30, 4  }
 0x43f   :  { %19 = sbr.rel (!%p17_p4) target bundleno = 1 (0x1), region = 114 }

// kernel: _lambda_.5
= control target key start
LH: loop header
LB: loop body
LE: loop exit
PB: predicated region body
PF: predicated region fallthrough
CT: control target
= control target key end

     0   :  { %s8425_s21 = smov 0   ;;  %s11046_s0 = inlined_call_operand.vmem [shape: f32[2,16,16,32], index: 0, kind: input, shape index: {}, may-alias: {0,11}]   ;;  %s11047_s1 = inlined_call_operand.vmem [shape: f32[2,16,16,32], index: 1, kind: input, shape index: {}, may-alias: {1,12}]   ;;  %s11048_s2 = inlined_call_operand.vmem [shape: f32[1,32], index: 2, kind: input, shape index: {}]   ;;  %s11049_s3 = inlined_call_operand.vmem [shape: f32[1,32], index: 3, kind: input, shape index: {}]   ;;  %s11050_s4 = inlined_call_operand.vmem [shape: bf16[9,32,32], index: 4, kind: input, shape index: {}]   ;;  %s11051_s5 = inlined_call_operand.vmem [shape: f32[1,32], index: 5, kind: input, shape index: {}]   ;;  %s11052_s6 = inlined_call_operand.vmem [shape: f32[1,32], index: 6, kind: input, shape index: {}]   ;;  %s11053_s7 = inlined_call_operand.vmem [shape: bf16[9,32,32], index: 7, kind: input, shape index: {}]   ;;  %s11054_s8 = inlined_call_operand.vmem [shape: f32[1,32], index: 8, kind: input, shape index: {}]   ;;  %s11055_s9 = inlined_call_operand.vmem [shape: bf16[32,32], index: 9, kind: input, shape index: {}]   ;;  %s11056_s10 = inlined_call_operand.vmem [shape: f32[1,32], index: 10, kind: input, shape index: {}]   ;;  %s11057_s11 = inlined_call_operand.vmem [shape: f32[2,16,16,32], index: 11, kind: output, shape index: {0}, may-alias: {0,11}]   ;;  %s11058_s12 = inlined_call_operand.vmem [shape: f32[2,16,16,32], index: 12, kind: output, shape index: {1}, may-alias: {1,12}]  }
   0x1 LB: > { %s6811_s22 = sadd.s32 4294967295, %s8357_s21   ;;  %p6815_p0 = scmp.ge.s32.totalorder %s8357_s21, 1  ;;  %s8357_s21 = sphi %s8425_s21, %s23_s21  }
   0x2   : > { %p375_p1 = scmp.lt.s32.totalorder %s8357_s21, 3 }
   0x4   : > { %p376_p2 = pnand %p6815_p0, %p375_p1 }
   0x6   : > { %379 = sbr.rel (%p376_p2) target bundleno = 1213 (0x4bd), region = 64 }
   0xb   : > { %v8281_v0 = vld [vmem:[%s11050_s4 + $0x18] sm:$0xff]   ;;  %vm480_vm0 = vcmask 261120   ;;  %v8439_v1 = vld [vmem:[%s11050_s4 + $0x10] sm:$0xff]   ;;  %v8359_v2 = vmov 0.0   ;;  %vm483_vm1 = vcmask 254976   ;;  %p8479_p3 = scmp.lt.s32.totalorder %s6811_s22, 1 }
   0xc   : > { %7584 = vmatprep.subr.bf16.mxu0 %v8281_v0  ;;  %8268 = vmatprep.subr.bf16.mxu1 %v8281_v0  ;;  %481 = vst.msk [vmem:[#allocation2] sm:$0xff] %vm480_vm0, %v8359_v2  ;;  %482 = vst.msk [vmem:[#allocation2 + $0x8] sm:$0xff] %vm480_vm0, %v8359_v2  ;;  %v8504_v3 = vld [vmem:[%s11050_s4 + $0x8] sm:$0xff]   ;;  %v8520_v5 = vld [vmem:[%s11048_s2] ss:$0 sm:$0xff] }
   0xd   : > { %485 = vst.msk [vmem:[#allocation2 + $0x18] sm:$0xff] %vm480_vm0, %v8359_v2  ;;  %486 = vst.msk [vmem:[#allocation2 + $0x20] sm:$0xff] %vm480_vm0, %v8359_v2  ;;  %7585 = vmatpush3.bf16.msra.mxu0 %v8281_v0  ;;  %8270 = vmatpush3.bf16.msra.mxu1 %v8281_v0  ;;  %s11299_s22 = smov (!%p8479_p3, %s6811_s22), 1  ;;  %v8515_v4 = vld [vmem:[%s11050_s4 + $0x28] sm:$0xff]   ;;  %v8535_v6 = vld [vmem:[%s11049_s3] ss:$0 sm:$0xff] }
   0xe   : > { %488 = vst.msk [vmem:[#allocation2 + $0x30] sm:$0xff] %vm480_vm0, %v8359_v2  ;;  %489 = vst.msk [vmem:[#allocation2 + $0x38] sm:$0xff] %vm480_vm0, %v8359_v2  ;;  %7586 = vmatprep.subr.bf16.mxu0 %v8439_v1  ;;  %8269 = vmatprep.subr.bf16.mxu1 %v8439_v1  ;;  %s8522_s16 = sshll.u32 %s11299_s22, 8 }
   0xf   : > { %491 = vst.msk [vmem:[#allocation2 + $0x48] sm:$0xff] %vm480_vm0, %v8359_v2  ;;  %492 = vst.msk [vmem:[#allocation2 + $0x50] sm:$0xff] %vm480_vm0, %v8359_v2  ;;  %s8530_s19 = scalar_lea.vmem %s11046_s0, %s8522_s16  ;;  %s10636_s22 = scalar_lea.vmem %s11057_s11, %s8522_s16 }
  0x10   : > { %494 = vst.msk [vmem:[#allocation2 + $0x60] sm:$0xff] %vm480_vm0, %v8359_v2  ;;  %495 = vst.msk [vmem:[#allocation2 + $0x68] sm:$0xff] %vm480_vm0, %v8359_v2  ;;  %v448_v7 = vld [vmem:[%s8530_s19] sm:$0xff]  ;;  %v449_v8 = vld [vmem:[%s8530_s19 + $0x8] sm:$0xff]  ;;  %s10842_s26 = scalar_lea.vmem %s11047_s1, %s8522_s16  ;;  %s10918_s13 = scalar_lea.vmem %s11058_s12, %s8522_s16 }
  0x11   : > { %497 = vst.msk [vmem:[#allocation2 + $0x78] sm:$0xff] %vm480_vm0, %v8359_v2  ;;  %498 = vst.msk [vmem:[#allocation2 + $0x80] sm:$0xff] %vm480_vm0, %v8359_v2  ;;  %7587 = vmatpush3.bf16.msra.mxu0 %v8439_v1  ;;  %8271 = vmatpush3.bf16.msra.mxu1 %v8439_v1  ;;  %v462_v9 = vld [vmem:[%s8530_s19 + $0x70] sm:$0xff]  ;;  %v543_v11 = vmul.f32 %v8520_v5, %v448_v7  ;;  %v544_v12 = vmul.f32 %v8520_v5, %v449_v8  ;;  %v463_v13 = vld [vmem:[%s8530_s19 + $0x78] sm:$0xff] }
  0x12   : > { %500 = vst.msk [vmem:[#allocation2 + $0x90] sm:$0xff] %vm480_vm0, %v8359_v2  ;;  %501 = vst.msk [vmem:[#allocation2 + $0x98] sm:$0xff] %vm480_vm0, %v8359_v2  ;;  %7620 = vmatprep.subr.bf16.mxu1 %v8504_v3  ;;  %7656 = vmatprep.subr.bf16.mxu0 %v8515_v4  ;;  %v557_v14 = vmul.f32 %v8520_v5, %v462_v9  ;;  %v464_v15 = vld [vmem:[%s8530_s19 + $0x80] sm:$0xff]  ;;  %v558_v17 = vmul.f32 %v8520_v5, %v463_v13  ;;  %v465_v18 = vld [vmem:[%s8530_s19 + $0x88] sm:$0xff] }
  0x13   : > { %503 = vst.msk [vmem:[#allocation2 + $0xa8] sm:$0xff] %vm480_vm0, %v8359_v2  ;;  %504 = vst.msk [vmem:[#allocation2 + $0xb0] sm:$0xff] %vm480_vm0, %v8359_v2  ;;  %v731_v10 = vld [vmem:[#allocation2 + $0x1] sm:$0xff]  ;;  %v559_v19 = vmul.f32 %v8520_v5, %v464_v15  ;;  %v450_v20 = vld [vmem:[%s8530_s19 + $0x10] sm:$0xff]  ;;  %v582_v22 = vadd.f32 %v8535_v6, %v543_v11  ;;  %v583_v23 = vadd.f32 %v8535_v6, %v544_v12 }
  0x14   : > { %506 = vst.msk [vmem:[#allocation2 + $0xc0] sm:$0xff] %vm480_vm0, %v8359_v2  ;;  %507 = vst.msk [vmem:[#allocation2 + $0xc8] sm:$0xff] %vm480_vm0, %v8359_v2  ;;  %v596_v24 = vadd.f32 %v8535_v6, %v557_v14  ;;  %v451_v25 = vld [vmem:[%s8530_s19 + $0x18] sm:$0xff]  ;;  %v597_v26 = vadd.f32 %v8535_v6, %v558_v17  ;;  %v560_v27 = vmul.f32 %v8520_v5, %v465_v18  ;;  %v452_v30 = vld [vmem:[%s8530_s19 + $0x20] sm:$0xff] }
  0x15   : > { %509 = vst.msk [vmem:[#allocation2 + $0xd8] sm:$0xff] %vm480_vm0, %v8359_v2  ;;  %510 = vst.msk [vmem:[#allocation2 + $0xe0] sm:$0xff] %vm480_vm0, %v8359_v2  ;;  %v598_v28 = vadd.f32 %v8535_v6, %v559_v19  ;;  %v545_v29 = vmul.f32 %v8520_v5, %v450_v20  ;;  %v453_v31 = vld [vmem:[%s8530_s19 + $0x28] sm:$0xff]  ;;  %v466_v32 = vld [vmem:[%s8530_s19 + $0x90] sm:$0xff]  ;;  %v614_v33 = vmax.f32 %v582_v22, 0.0  ;;  %v615_v34 = vmax.f32 %v583_v23, 0.0 }
  0x16   : > { %512 = vst.msk [vmem:[#allocation2 + $0xf0] sm:$0xff] %vm480_vm0, %v8359_v2  ;;  %513 = vst.msk [vmem:[#allocation2 + $0xf8] sm:$0xff] %vm480_vm0, %v8359_v2  ;;  %v628_v35 = vmax.f32 %v596_v24, 0.0  ;;  %v546_v36 = vmul.f32 %v8520_v5, %v451_v25  ;;  %v467_v37 = vld [vmem:[%s8530_s19 + $0x98] sm:$0xff]  ;;  %v468_v38 = vld [vmem:[%s8530_s19 + $0xa0] sm:$0xff]  ;;  %v629_v39 = vmax.f32 %v597_v26, 0.0  ;;  %v599_v40 = vadd.f32 %v8535_v6, %v560_v27 }
  0x17   : > { %515 = vst.msk [vmem:[#allocation2 + $0x108] sm:$0xff] %vm480_vm0, %v8359_v2  ;;  %516 = vst.msk [vmem:[#allocation2 + $0x110] sm:$0xff] %vm480_vm0, %v8359_v2  ;;  %v630_v41 = vmax.f32 %v598_v28, 0.0  ;;  %v584_v42 = vadd.f32 %v8535_v6, %v545_v29  ;;  %v547_v44 = vmul.f32 %v8520_v5, %v452_v30  ;;  %v548_v45 = vmul.f32 %v8520_v5, %v453_v31  ;;  %v469_v47 = vld [vmem:[%s8530_s19 + $0xa8] sm:$0xff]  ;;  %v454_v48 = vld [vmem:[%s8530_s19 + $0x30] sm:$0xff] }
  0x18   : > { %518 = vst.msk [vmem:[#allocation2 + $0x120] sm:$0xff] %vm480_vm0, %v8359_v2  ;;  %519 = vst.msk [vmem:[#allocation2 + $0x128] sm:$0xff] %vm480_vm0, %v8359_v2  ;;  %v585_v43 = vadd.f32 %v8535_v6, %v546_v36  ;;  %v561_v46 = vmul.f32 %v8520_v5, %v466_v32  ;;  %v631_v49 = vmax.f32 %v599_v40, 0.0  ;;  %v562_v51 = vmul.f32 %v8520_v5, %v467_v37  ;;  %v455_v53 = vld [vmem:[%s8530_s19 + $0x38] sm:$0xff]  ;;  %v456_v62 = vld [vmem:[%s8530_s19 + $0x40] sm:$0xff] }
  0x19   : > { %521 = vst.msk [vmem:[#allocation2 + $0x138] sm:$0xff] %vm480_vm0, %v8359_v2  ;;  %522 = vst.msk [vmem:[#allocation2 + $0x140] sm:$0xff] %vm480_vm0, %v8359_v2  ;;  %v616_v50 = vmax.f32 %v584_v42, 0.0  ;;  %v563_v52 = vmul.f32 %v8520_v5, %v468_v38  ;;  %v586_v55 = vadd.f32 %v8535_v6, %v547_v44  ;;  %v587_v56 = vadd.f32 %v8535_v6, %v548_v45  ;;  %v457_v63 = vld [vmem:[%s8530_s19 + $0x48] sm:$0xff]  ;;  %v470_v0 = vld [vmem:[%s8530_s19 + $0xb0] sm:$0xff] }
  0x1a   : > { %524 = vst.msk [vmem:[#allocation2 + $0x150] sm:$0xff] %vm480_vm0, %v8359_v2  ;;  %525 = vst.msk [vmem:[#allocation2 + $0x158] sm:$0xff] %vm480_vm0, %v8359_v2  ;;  %v617_v54 = vmax.f32 %v585_v43, 0.0  ;;  %v600_v57 = vadd.f32 %v8535_v6, %v561_v46  ;;  %v601_v58 = vadd.f32 %v8535_v6, %v562_v51  ;;  %v564_v59 = vmul.f32 %v8520_v5, %v469_v47  ;;  %v471_v9 = vld [vmem:[%s8530_s19 + $0xb8] sm:$0xff]  ;;  %v473_v11 = vld [vmem:[%s8530_s19 + $0xc8] sm:$0xff] }
  0x1b   : > { %527 = vst.msk [vmem:[#allocation2 + $0x168] sm:$0xff] %vm480_vm0, %v8359_v2  ;;  %528 = vst.msk [vmem:[#allocation2 + $0x170] sm:$0xff] %vm480_vm0, %v8359_v2  ;;  %v602_v60 = vadd.f32 %v8535_v6, %v563_v52  ;;  %v549_v61 = vmul.f32 %v8520_v5, %v454_v48  ;;  %v618_v1 = vmax.f32 %v586_v55, 0.0  ;;  %v550_v8 = vmul.f32 %v8520_v5, %v455_v53  ;;  %v458_v20 = vld [vmem:[%s8530_s19 + $0x50] sm:$0xff]  ;;  %v460_v40 = vld [vmem:[%s8530_s19 + $0x60] sm:$0xff] }
  0x1c   : > { %530 = vst.msk [vmem:[#allocation2 + $0x180] sm:$0xff] %vm480_vm0, %v8359_v2  ;;  %531 = vst.msk [vmem:[#allocation2 + $0x188] sm:$0xff] %vm480_vm0, %v8359_v2  ;;  %v632_v7 = vmax.f32 %v600_v57, 0.0  ;;  %v633_v12 = vmax.f32 %v601_v58, 0.0  ;;  %v603_v13 = vadd.f32 %v8535_v6, %v564_v59  ;;  %v551_v17 = vmul.f32 %v8520_v5, %v456_v62  ;;  %v474_v48 = vld [vmem:[%s8530_s19 + $0xd0] sm:$0xff]  ;;  %v8285_v53 = vld [vmem:[%s11050_s4] sm:$0xff]  }
  0x1d   : > { %533 = vst.msk [vmem:[#allocation2 + $0x198] sm:$0xff] %vm480_vm0, %v8359_v2  ;;  %534 = vst.msk [vmem:[#allocation2 + $0x1a0] sm:$0xff] %vm480_vm0, %v8359_v2  ;;  %v634_v14 = vmax.f32 %v602_v60, 0.0  ;;  %v588_v15 = vadd.f32 %v8535_v6, %v549_v61  ;;  %v552_v18 = vmul.f32 %v8520_v5, %v457_v63  ;;  %v565_v19 = vmul.f32 %v8520_v5, %v470_v0  ;;  %v475_v55 = vld [vmem:[%s8530_s19 + $0xd8] sm:$0xff]  ;;  %v476_v59 = vld [vmem:[%s8530_s19 + $0xe0] sm:$0xff] }
  0x1e   : > { %484 = vst.msk [vmem:[#allocation2 + $0x10] sm:$0x3] %vm483_vm1, %v8359_v2  ;;  %487 = vst.msk [vmem:[#allocation2 + $0x28] sm:$0x3] %vm483_vm1, %v8359_v2  ;;  %v635_v24 = vmax.f32 %v603_v13, 0.0  ;;  %v566_v26 = vmul.f32 %v8520_v5, %v471_v9  ;;  %v590_v32 = vadd.f32 %v8535_v6, %v551_v17  ;;  %v568_v38 = vmul.f32 %v8520_v5, %v473_v11  ;;  %v8656_v60 = vld [vmem:[%s11050_s4 + $0x48] sm:$0xff]  }
  0x1f   : > { %490 = vst.msk [vmem:[#allocation2 + $0x40] sm:$0x3] %vm483_vm1, %v8359_v2  ;;  %493 = vst.msk [vmem:[#allocation2 + $0x58] sm:$0x3] %vm483_vm1, %v8359_v2  ;;  %v620_v25 = vmax.f32 %v588_v15, 0.0  ;;  %v604_v36 = vadd.f32 %v8535_v6, %v565_v19  ;;  %v553_v47 = vmul.f32 %v8520_v5, %v458_v20  ;;  %v570_v13 = vmul.f32 %v8520_v5, %v475_v55  ;;  %v8682_v17 = vld [vmem:[%s11050_s4 + $0x38] sm:$0xff]  }
  0x20   : > { %496 = vst.msk [vmem:[#allocation2 + $0x70] sm:$0x3] %vm483_vm1, %v8359_v2  ;;  %499 = vst.msk [vmem:[#allocation2 + $0x88] sm:$0x3] %vm483_vm1, %v8359_v2  ;;  %v605_v37 = vadd.f32 %v8535_v6, %v566_v26  ;;  %v622_v44 = vmax.f32 %v590_v32, 0.0 }
  0x21   : > { %502 = vst.msk [vmem:[#allocation2 + $0xa0] sm:$0x3] %vm483_vm1, %v8359_v2  ;;  %505 = vst.msk [vmem:[#allocation2 + $0xb8] sm:$0x3] %vm483_vm1, %v8359_v2  ;;  %v636_v51 = vmax.f32 %v604_v36, 0.0  ;;  %v592_v58 = vadd.f32 %v8535_v6, %v553_v47 }
  0x22   : > { %508 = vst.msk [vmem:[#allocation2 + $0xd0] sm:$0x3] %vm483_vm1, %v8359_v2  ;;  %511 = vst.msk [vmem:[#allocation2 + $0xe8] sm:$0x3] %vm483_vm1, %v8359_v2  ;;  %v637_v52 = vmax.f32 %v605_v37, 0.0 }
  0x23   : > { %514 = vst.msk [vmem:[#allocation2 + $0x100] sm:$0x3] %vm483_vm1, %v8359_v2  ;;  %517 = vst.msk [vmem:[#allocation2 + $0x118] sm:$0x3] %vm483_vm1, %v8359_v2 }
  0x24   : > { %520 = vst.msk [vmem:[#allocation2 + $0x130] sm:$0x3] %vm483_vm1, %v8359_v2  ;;  %523 = vst.msk [vmem:[#allocation2 + $0x148] sm:$0x3] %vm483_vm1, %v8359_v2 }
  0x25   : > { %526 = vst.msk [vmem:[#allocation2 + $0x160] sm:$0x3] %vm483_vm1, %v8359_v2  ;;  %529 = vst.msk [vmem:[#allocation2 + $0x178] sm:$0x3] %vm483_vm1, %v8359_v2  ;;  %v732_v16 = vld [vmem:[#allocation2 + $0x9] sm:$0xff] }
  0x26   : > { %532 = vst.msk [vmem:[#allocation2 + $0x190] sm:$0x3] %vm483_vm1, %v8359_v2  ;;  %535 = vst.msk [vmem:[#allocation2 + $0x1a8] sm:$0x3] %vm483_vm1, %v8359_v2  ;;  %v763_v21 = vpack.c.bf16 %v732_v16, %v731_v10  ;;  %v619_v2 = vmax.f32 %v587_v56, 0.0  ;;  %v472_v10 = vld [vmem:[%s8530_s19 + $0xc0] sm:$0xff]  ;;  %v589_v16 = vadd.f32 %v8535_v6, %v550_v8 }
  0x27   : > { %647 = vst.msk [vmem:[#allocation2 + $0x19] sm:$0xff] %vm480_vm0, %v614_v33  ;;  %648 = vst.msk [vmem:[#allocation2 + $0x21] sm:$0xff] %vm480_vm0, %v615_v34  ;;  %v567_v27 = vmul.f32 %v8520_v5, %v472_v10  ;;  %v591_v33 = vadd.f32 %v8535_v6, %v552_v18  ;;  %v8286_v34 = vld [vmem:[%s11050_s4 + $0x20] sm:$0xff]  }
  0x28   : > { %7588 = vmatprep.mubr.msk.bf16.mxu0 %vm480_vm0, %v763_v21  ;;  %661 = vst.msk [vmem:[#allocation2 + $0xc1] sm:$0xff] %vm480_vm0, %v628_v35  ;;  %662 = vst.msk [vmem:[#allocation2 + $0xc9] sm:$0xff] %vm480_vm0, %v629_v39  ;;  %v621_v31 = vmax.f32 %v589_v16, 0.0  ;;  %v459_v39 = vld [vmem:[%s8530_s19 + $0x58] sm:$0xff] }
  0x29   : > { %663 = vst.msk [vmem:[#allocation2 + $0xd9] sm:$0xff] %vm480_vm0, %v630_v41  ;;  %664 = vst.msk [vmem:[#allocation2 + $0xe1] sm:$0xff] %vm480_vm0, %v631_v49  ;;  %v461_v41 = vld [vmem:[%s8530_s19 + $0x68] sm:$0xff]  ;;  %v623_v45 = vmax.f32 %v591_v33, 0.0  ;;  %v606_v46 = vadd.f32 %v8535_v6, %v567_v27 }
  0x2a   : > { %649 = vst.msk [vmem:[#allocation2 + $0x31] sm:$0xff] %vm480_vm0, %v616_v50  ;;  %650 = vst.msk [vmem:[#allocation2 + $0x39] sm:$0xff] %vm480_vm0, %v617_v54  ;;  %v607_v54 = vadd.f32 %v8535_v6, %v568_v38 }
  0x2b   : > { %651 = vst.msk [vmem:[#allocation2 + $0x49] sm:$0xff] %vm480_vm0, %v618_v1  ;;  %652 = vst.msk [vmem:[#allocation2 + $0x51] sm:$0xff] %vm480_vm0, %v619_v2  ;;  %v638_v57 = vmax.f32 %v606_v46, 0.0  ;;  %v555_v1 = vmul.f32 %v8520_v5, %v460_v40  ;;  %v556_v2 = vmul.f32 %v8520_v5, %v461_v41 }
  0x2c   : > { %665 = vst.msk [vmem:[#allocation2 + $0xf1] sm:$0xff] %vm480_vm0, %v632_v7  ;;  %666 = vst.msk [vmem:[#allocation2 + $0xf9] sm:$0xff] %vm480_vm0, %v633_v12  ;;  %v639_v0 = vmax.f32 %v607_v54, 0.0  ;;  %v569_v7 = vmul.f32 %v8520_v5, %v474_v48  ;;  %v624_v12 = vmax.f32 %v592_v58, 0.0 }
  0x2d   : > { %667 = vst.msk [vmem:[#allocation2 + $0x109] sm:$0xff] %vm480_vm0, %v634_v14  ;;  %668 = vst.msk [vmem:[#allocation2 + $0x111] sm:$0xff] %vm480_vm0, %v635_v24  ;;  %v477_v14 = vld [vmem:[%s8530_s19 + $0xe8] sm:$0xff]  ;;  %v595_v16 = vadd.f32 %v8535_v6, %v556_v2 }
  0x2e   : > { %v733_v21 = vld [vmem:[#allocation2 + $0x19] sm:$0xff]  ;;  %v734_v22 = vld [vmem:[#allocation2 + $0x21] sm:$0xff]  ;;  %653 = vst.msk [vmem:[#allocation2 + $0x61] sm:$0xff] %vm480_vm0, %v620_v25  ;;  %654 = vst.msk [vmem:[#allocation2 + $0x69] sm:$0xff] %vm480_vm0, %v621_v31 }
  0x2f   : > { %v747_v23 = vld [vmem:[#allocation2 + $0xc1] sm:$0xff]  ;;  %v8613_v28 = vpack.c.bf16 %v734_v22, %v733_v21  ;;  %v748_v29 = vld [vmem:[#allocation2 + $0xc9] sm:$0xff]  ;;  %655 = vst.msk [vmem:[#allocation2 + $0x79] sm:$0xff] %vm480_vm0, %v622_v44  ;;  %656 = vst.msk [vmem:[#allocation2 + $0x81] sm:$0xff] %vm480_vm0, %v623_v45  ;;  %v608_v21 = vadd.f32 %v8535_v6, %v569_v7  ;;  %v609_v22 = vadd.f32 %v8535_v6, %v570_v13  ;;  %v627_v27 = vmax.f32 %v595_v16, 0.0 }
  0x30   : > { %v749_v30 = vld [vmem:[#allocation2 + $0xd9] sm:$0xff]  ;;  %v8620_v35 = vpack.c.bf16 %v748_v29, %v747_v23  ;;  %v750_v42 = vld [vmem:[#allocation2 + $0xe1] sm:$0xff]  ;;  %669 = vst.msk [vmem:[#allocation2 + $0x121] sm:$0xff] %vm480_vm0, %v636_v51  ;;  %670 = vst.msk [vmem:[#allocation2 + $0x129] sm:$0xff] %vm480_vm0, %v637_v52  ;;  %v571_v23 = vmul.f32 %v8520_v5, %v476_v59  ;;  %v572_v29 = vmul.f32 %v8520_v5, %v477_v14 }
  0x31   : > { %7589 = vmatmul.mubr.msk.bf16.vlgmr.msra.gmra.mxu0 %vm480_vm0, %v8613_v28  ;;  %v735_v43 = vld [vmem:[#allocation2 + $0x31] sm:$0xff]  ;;  %v8638_v49 = vpack.c.bf16 %v750_v42, %v749_v30  ;;  %v736_v50 = vld [vmem:[#allocation2 + $0x39] sm:$0xff]  ;;  %671 = vst.msk [vmem:[#allocation2 + $0x139] sm:$0xff] %vm480_vm0, %v638_v57  ;;  %672 = vst.msk [vmem:[#allocation2 + $0x141] sm:$0xff] %vm480_vm0, %v639_v0  ;;  %v640_v31 = vmax.f32 %v608_v21, 0.0  ;;  %v641_v32 = vmax.f32 %v609_v22, 0.0 }
  0x32   : > { %7604 = vmatprep.mubr.msk.bf16.mxu1 %vm480_vm0, %v8620_v35  ;;  %7657 = vmatpush3.bf16.msra.mxu0 %v8515_v4  ;;  %v8646_v56 = vpack.c.bf16 %v736_v50, %v735_v43  ;;  %v554_v4 = vmul.f32 %v8520_v5, %v459_v39  ;;  %v737_v61 = vld [vmem:[#allocation2 + $0x49] sm:$0xff]  ;;  %v738_v62 = vld [vmem:[#allocation2 + $0x51] sm:$0xff]  ;;  %657 = vst.msk [vmem:[#allocation2 + $0x91] sm:$0xff] %vm480_vm0, %v624_v12  ;;  %660 = vst.msk [vmem:[#allocation2 + $0xb1] sm:$0xff] %vm480_vm0, %v627_v27 }
  0x33   : > { %7658 = vmatprep.subr.bf16.mxu0 %v8286_v34  ;;  %7605 = vmatmul.mubr.msk.bf16.vlgmr.msra.gmra.mxu1 %vm480_vm0, %v8638_v49  ;;  %v751_v63 = vld [vmem:[#allocation2 + $0xf1] sm:$0xff]  ;;  %v8668_v8 = vpack.c.bf16 %v738_v62, %v737_v61  ;;  %v752_v9 = vld [vmem:[#allocation2 + $0xf9] sm:$0xff]  ;;  %v610_v33 = vadd.f32 %v8535_v6, %v571_v23  ;;  %v611_v37 = vadd.f32 %v8535_v6, %v572_v29  ;;  %v1226_v57 = vld [vmem:[#allocation2 + $0x2] sm:$0xff] }
  0x34   : > { %7621 = vmatpush3.bf16.msra.mxu1 %v8504_v3  ;;  %7592 = vmatprep.mubr.msk.bf16.mxu0 %vm480_vm0, %v8646_v56  ;;  %v753_v10 = vld [vmem:[#allocation2 + $0x109] sm:$0xff]  ;;  %v593_v11 = vadd.f32 %v8535_v6, %v554_v4  ;;  %v8674_v15 = vpack.c.bf16 %v752_v9, %v751_v63  ;;  %v594_v3 = vadd.f32 %v8535_v6, %v555_v1  ;;  %v754_v18 = vld [vmem:[#allocation2 + $0x111] sm:$0xff]  ;;  %v679_v63 = vld [vmem:[#allocation2] sm:$0xff] }
  0x35   : > { %7622 = vmatprep.subr.bf16.mxu1 %v8285_v53  ;;  %v739_v19 = vld [vmem:[#allocation2 + $0x61] sm:$0xff]  ;;  %v8691_v24 = vpack.c.bf16 %v754_v18, %v753_v10  ;;  %v740_v25 = vld [vmem:[#allocation2 + $0x69] sm:$0xff]  ;;  %673 = vst.msk [vmem:[#allocation2 + $0x151] sm:$0xff] %vm480_vm0, %v640_v31  ;;  %674 = vst.msk [vmem:[#allocation2 + $0x159] sm:$0xff] %vm480_vm0, %v641_v32  ;;  %v642_v40 = vmax.f32 %v610_v33, 0.0  ;;  %v643_v42 = vmax.f32 %v611_v37, 0.0 }
  0x36   : > { %7659 = vmatpush3.bf16.msra.mxu0 %v8286_v34  ;;  %v625_v20 = vmax.f32 %v593_v11, 0.0  ;;  %7608 = vmatprep.mubr.msk.bf16.mxu1 %vm480_vm0, %v8674_v15  ;;  %v626_v26 = vmax.f32 %v594_v3, 0.0  ;;  %v8696_v30 = vpack.c.bf16 %v740_v25, %v739_v19  ;;  %v741_v34 = vld [vmem:[#allocation2 + $0x79] sm:$0xff]  ;;  %v742_v36 = vld [vmem:[#allocation2 + $0x81] sm:$0xff]  ;;  %v1227_v4 = vld [vmem:[#allocation2 + $0xa] sm:$0xff] }
  0x37   : > { %7728 = vmatprep.subr.bf16.mxu0 %v8656_v60  ;;  %v755_v38 = vld [vmem:[#allocation2 + $0x121] sm:$0xff]  ;;  %v756_v39 = vld [vmem:[#allocation2 + $0x129] sm:$0xff]  ;;  %v8712_v43 = vpack.c.bf16 %v742_v36, %v741_v34  ;;  %675 = vst.msk [vmem:[#allocation2 + $0x169] sm:$0xff] %vm480_vm0, %v642_v40  ;;  %676 = vst.msk [vmem:[#allocation2 + $0x171] sm:$0xff] %vm480_vm0, %v643_v42  ;;  %v1258_v62 = vpack.c.bf16 %v1227_v4, %v1226_v57 }
  0x38   : > { %7623 = vmatpush3.bf16.msra.mxu1 %v8285_v53  ;;  %658 = vst.msk [vmem:[#allocation2 + $0x99] sm:$0xff] %vm480_vm0, %v625_v20  ;;  %659 = vst.msk [vmem:[#allocation2 + $0xa9] sm:$0xff] %vm480_vm0, %v626_v26  ;;  %v8710_v41 = vpack.c.bf16 %v756_v39, %v755_v38  ;;  %v757_v44 = vld [vmem:[#allocation2 + $0x139] sm:$0xff]  ;;  %v758_v45 = vld [vmem:[#allocation2 + $0x141] sm:$0xff] }
  0x39   : > { %7593 = vmatmul.mubr.msk.bf16.gmra.mxu0 %vm480_vm0, %v8668_v8  ;;  %7692 = vmatprep.subr.bf16.mxu1 %v8682_v17  ;;  %v743_v46 = vld [vmem:[#allocation2 + $0x91] sm:$0xff]  ;;  %v8718_v47 = vpack.c.bf16 %v758_v45, %v757_v44  ;;  %v680_v0 = vld [vmem:[#allocation2 + $0x8] sm:$0xff]  ;;  %v1228_v7 = vld [vmem:[#allocation2 + $0x1a] sm:$0xff] }
  0x3a   : > { %7596 = vmatprep.mubr.msk.bf16.mxu0 %vm480_vm0, %v8696_v30  ;;  %v746_v52 = vld [vmem:[#allocation2 + $0xb1] sm:$0xff]  ;;  %v711_v2 = vpack.c.bf16 %v680_v0, %v679_v63  ;;  %v1229_v9 = vld [vmem:[#allocation2 + $0x22] sm:$0xff]  ;;  %v1231_v11 = vld [vmem:[#allocation2 + $0x3a] sm:$0xff] }
  0x3b   : > { %7609 = vmatmul.mubr.msk.bf16.gmra.mxu1 %vm480_vm0, %v8691_v24  ;;  %v1230_v10 = vld [vmem:[#allocation2 + $0x32] sm:$0xff]  ;;  %v682_v13 = vld [vmem:[#allocation2 + $0x20] sm:$0xff]  ;;  %v8742_v14 = vpack.c.bf16 %v1229_v9, %v1228_v7  ;;  %v1232_v21 = vld [vmem:[#allocation2 + $0x4a] sm:$0xff] }
  0x3c   : > { %7612 = vmatprep.mubr.msk.bf16.mxu1 %vm480_vm0, %v8710_v41  ;;  %v759_v53 = vld [vmem:[#allocation2 + $0x151] sm:$0xff]  ;;  %v760_v54 = vld [vmem:[#allocation2 + $0x159] sm:$0xff]  ;;  %v8744_v16 = vpack.c.bf16 %v1231_v11, %v1230_v10  ;;  %v1234_v25 = vld [vmem:[#allocation2 + $0x62] sm:$0xff] }
  0x3d   : > { %v8726_v55 = vpack.c.bf16 %v760_v54, %v759_v53  ;;  %v681_v12 = vld [vmem:[#allocation2 + $0x18] sm:$0xff]  ;;  %v683_v3 = vld [vmem:[#allocation2 + $0x30] sm:$0xff]  ;;  %v8290_v19 = vld [vmem:[%s11050_s4 + $0x40] sm:$0xff]  }
  0x3e   : > { %v761_v59 = vld [vmem:[#allocation2 + $0x169] sm:$0xff]  ;;  %v762_v61 = vld [vmem:[#allocation2 + $0x171] sm:$0xff]  ;;  %v8749_v20 = vpack.c.bf16 %v682_v13, %v681_v12  ;;  %v687_v38 = vld [vmem:[#allocation2 + $0x60] sm:$0xff] }
  0x3f   : > { %v744_v48 = vld [vmem:[#allocation2 + $0x99] sm:$0xff]  ;;  %v745_v51 = vld [vmem:[#allocation2 + $0xa9] sm:$0xff]  ;;  %v8734_v1 = vpack.c.bf16 %v762_v61, %v761_v59 }
  0x40   : > { %v8722_v50 = vpack.c.bf16 %v744_v48, %v743_v46  ;;  %v8730_v58 = vpack.c.bf16 %v746_v52, %v745_v51  ;;  %v684_v18 = vld [vmem:[#allocation2 + $0x38] sm:$0xff]  ;;  %v1235_v26 = vld [vmem:[#allocation2 + $0x6a] sm:$0xff]  ;;  %v1237_v48 = vld [vmem:[#allocation2 + $0x82] sm:$0xff] }
  0x41   : > { %7597 = vmatmul.mubr.msk.bf16.gmra.mxu0 %vm480_vm0, %v8712_v43  ;;  %v1233_v22 = vld [vmem:[#allocation2 + $0x52] sm:$0xff]  ;;  %v8753_v23 = vpack.c.bf16 %v684_v18, %v683_v3  ;;  %v8766_v32 = vld [vmem:[%s11050_s4 + $0x68] sm:$0xff]   ;;  %v8784_v44 = vpack.c.bf16 %v1235_v26, %v1234_v25  ;;  %v1239_v53 = vld [vmem:[#allocation2 + $0x9a] sm:$0xff] }
  0x42   : > { %7600 = vmatprep.mubr.msk.bf16.mxu0 %vm480_vm0, %v8722_v50  ;;  %v8289_v27 = vld [vmem:[%s11050_s4 + $0x30] sm:$0xff]   ;;  %v479_v31 = vld [vmem:[%s8530_s19 + $0xf8] sm:$0xff]  ;;  %v685_v36 = vld [vmem:[#allocation2 + $0x48] sm:$0xff]  ;;  %v8777_v42 = vpack.c.bf16 %v1233_v22, %v1232_v21 }
  0x43   : > { %7613 = vmatmul.mubr.msk.bf16.gmra.mxu1 %vm480_vm0, %v8718_v47  ;;  %v478_v29 = vld [vmem:[%s8530_s19 + $0xf0] sm:$0xff]  ;;  %v574_v34 = vmul.f32 %v8520_v5, %v479_v31  ;;  %v689_v54 = vld [vmem:[#allocation2 + $0x78] sm:$0xff]  ;;  %v690_v57 = vld [vmem:[#allocation2 + $0x80] sm:$0xff] }
  0x44   : > { %7616 = vmatprep.mubr.msk.bf16.mxu1 %vm480_vm0, %v8726_v55  ;;  %v573_v33 = vmul.f32 %v8520_v5, %v478_v29  ;;  %v686_v37 = vld [vmem:[#allocation2 + $0x50] sm:$0xff]  ;;  %v8782_v5 = vld [vmem:[%s11050_s4 + $0x58] sm:$0xff]   ;;  %v8806_v63 = vpack.c.bf16 %v690_v57, %v689_v54  ;;  %v1242_v9 = vld [vmem:[#allocation2 + $0xc2] sm:$0xff] }
  0x45   : > { %v613_v40 = vadd.f32 %v8535_v6, %v574_v34  ;;  %v1238_v52 = vld [vmem:[#allocation2 + $0x92] sm:$0xff]  ;;  %v1240_v0 = vld [vmem:[#allocation2 + $0xaa] sm:$0xff]  ;;  %v695_v18 = vld [vmem:[#allocation2 + $0xc0] sm:$0xff] }
  0x46   : > { %v612_v39 = vadd.f32 %v8535_v6, %v573_v33  ;;  %v8787_v6 = vpack.c.bf16 %v686_v37, %v685_v36  ;;  %v691_v4 = vld [vmem:[#allocation2 + $0x90] sm:$0xff]  ;;  %v692_v59 = vld [vmem:[#allocation2 + $0x98] sm:$0xff]  ;;  %v693_v12 = vld [vmem:[#allocation2 + $0xa8] sm:$0xff] }
  0x47   : > { %v645_v46 = vmax.f32 %v613_v40, 0.0  ;;  %v8810_v7 = vpack.c.bf16 %v692_v59, %v691_v4  ;;  %v1243_v10 = vld [vmem:[#allocation2 + $0xca] sm:$0xff]  ;;  %v1244_v25 = vld [vmem:[#allocation2 + $0xda] sm:$0xff]  ;;  %v1245_v26 = vld [vmem:[#allocation2 + $0xe2] sm:$0xff] }
  0x48   : > { %v644_v45 = vmax.f32 %v612_v39, 0.0  ;;  %v694_v13 = vld [vmem:[#allocation2 + $0xb0] sm:$0xff]  ;;  %v8820_v3 = vpack.c.bf16 %v1243_v10, %v1242_v9  ;;  %v1247_v29 = vld [vmem:[#allocation2 + $0xfa] sm:$0xff]  ;;  %v8834_v31 = vpack.c.bf16 %v1245_v26, %v1244_v25  ;;  %v704_v4 = vld [vmem:[#allocation2 + $0x128] sm:$0xff] }
  0x49   : > { %7601 = vmatmul.mubr.msk.bf16.gmra.mxu0 %vm480_vm0, %v8730_v58  ;;  %678 = vst.msk [vmem:[#allocation2 + $0x189] sm:$0xff] %vm480_vm0, %v645_v46  ;;  %v8822_v21 = vpack.c.bf16 %v694_v13, %v693_v12  ;;  %v697_v33 = vld [vmem:[#allocation2 + $0xd8] sm:$0xff]  ;;  %v698_v34 = vld [vmem:[#allocation2 + $0xe0] sm:$0xff]  ;;  %v699_v37 = vld [vmem:[#allocation2 + $0xf0] sm:$0xff] }
  0x4a   : > { %7660 = vmatprep.mubr.msk.bf16.mxu0 %vm480_vm0, %v1258_v62  ;;  %677 = vst.msk [vmem:[#allocation2 + $0x181] sm:$0xff] %vm480_vm0, %v644_v45  ;;  %v8804_v62 = vpack.c.bf16 %v1239_v53, %v1238_v52  ;;  %v1248_v40 = vld [vmem:[#allocation2 + $0x10a] sm:$0xff]  ;;  %v1249_v45 = vld [vmem:[#allocation2 + $0x112] sm:$0xff]  ;;  %v1250_v46 = vld [vmem:[#allocation2 + $0x122] sm:$0xff] }
  0x4b   : > { %7617 = vmatmul.mubr.msk.bf16.gmra.mxu1 %vm480_vm0, %v8734_v1  ;;  %v701_v52 = vld [vmem:[#allocation2 + $0x108] sm:$0xff]  ;;  %v702_v53 = vld [vmem:[#allocation2 + $0x110] sm:$0xff]  ;;  %v703_v57 = vld [vmem:[#allocation2 + $0x120] sm:$0xff] }
  0x4c   : > { %7624 = vmatprep.mubr.msk.bf16.mxu1 %vm480_vm0, %v711_v2  ;;  %v1241_v2 = vld [vmem:[#allocation2 + $0xb2] sm:$0xff]  ;;  %v8854_v59 = vpack.c.bf16 %v702_v53, %v701_v52  ;;  %v1253_v9 = vld [vmem:[#allocation2 + $0x142] sm:$0xff]  ;;  %v1255_v12 = vld [vmem:[#allocation2 + $0x15a] sm:$0xff] }
  0x4d   : > { %v8818_v11 = vpack.c.bf16 %v1241_v2, %v1240_v0  ;;  %v8858_v0 = vpack.c.bf16 %v704_v4, %v703_v57  ;;  %v1252_v2 = vld [vmem:[#allocation2 + $0x13a] sm:$0xff]  ;;  %v1254_v10 = vld [vmem:[#allocation2 + $0x152] sm:$0xff] }
  0x4e   : > { %v8866_v13 = vpack.c.bf16 %v1253_v9, %v1252_v2  ;;  %v8868_v25 = vpack.c.bf16 %v1255_v12, %v1254_v10  ;;  %v707_v26 = vld [vmem:[#allocation2 + $0x150] sm:$0xff]  ;;  %v2481_v52 = vld [vmem:[#allocation2 + $0x198] sm:$0xff]  ;;  %v2482_v53 = vld [vmem:[#allocation2 + $0x1a0] sm:$0xff] }
  0x4f   : > { %v2757_v12 = vld [vmem:[#allocation2 + $0x31] sm:$0xff] }
  0x50   : > { %v2175_v9 = vld [vmem:[#allocation2 + $0x18a] sm:$0xff] }
  0x51   : > { %7661 = vmatmul.mubr.msk.bf16.vlgmr.msra.gmra.mxu0 %vm480_vm0, %v8742_v14  ;;  %v2174_v2 = vld [vmem:[#allocation2 + $0x182] sm:$0xff] }
  0x52   : > { %7729 = vmatpush3.bf16.msra.mxu0 %v8656_v60  ;;  %7664 = vmatprep.mubr.msk.bf16.mxu0 %vm480_vm0, %v8744_v16  ;;  %v688_v60 = vld [vmem:[#allocation2 + $0x68] sm:$0xff] }
  0x53   : > { %7730 = vmatprep.subr.bf16.mxu0 %v8290_v19  ;;  %7625 = vmatmul.mubr.msk.bf16.vlgmr.msra.gmra.mxu1 %vm480_vm0, %v8749_v20  ;;  %v8793_v51 = vpack.c.bf16 %v688_v60, %v687_v38  ;;  %v700_v38 = vld [vmem:[#allocation2 + $0xf8] sm:$0xff]  ;;  %v8838_v60 = vpack.c.bf16 %v698_v34, %v697_v33  ;;  %v1256_v34 = vld [vmem:[#allocation2 + $0x16a] sm:$0xff] }
  0x54   : > { %7693 = vmatpush3.bf16.msra.mxu1 %v8682_v17  ;;  %7628 = vmatprep.mubr.msk.bf16.mxu1 %vm480_vm0, %v8753_v23  ;;  %v1236_v17 = vld [vmem:[#allocation2 + $0x7a] sm:$0xff]  ;;  %v8842_v39 = vpack.c.bf16 %v700_v38, %v699_v37  ;;  %v1257_v37 = vld [vmem:[#allocation2 + $0x172] sm:$0xff] }
  0x55   : > { %7694 = vmatprep.subr.bf16.mxu1 %v8289_v27  ;;  %v8802_v61 = vpack.c.bf16 %v1237_v48, %v1236_v17  ;;  %v1251_v17 = vld [vmem:[#allocation2 + $0x12a] sm:$0xff]  ;;  %v8850_v48 = vpack.c.bf16 %v1249_v45, %v1248_v40  ;;  %v8882_v38 = vpack.c.bf16 %v1257_v37, %v1256_v34 }
  0x56   : > { %7731 = vmatpush3.bf16.msra.mxu0 %v8290_v19  ;;  %v696_v19 = vld [vmem:[#allocation2 + $0xc8] sm:$0xff]  ;;  %v8852_v54 = vpack.c.bf16 %v1251_v17, %v1250_v46  ;;  %v710_v45 = vld [vmem:[#allocation2 + $0x170] sm:$0xff]  ;;  %v8294_v17 = vld [vmem:[%s11050_s4 + $0x60] sm:$0xff]  }
  0x57   : > { %7800 = vmatprep.subr.bf16.mxu0 %v8766_v32  ;;  %v8826_v22 = vpack.c.bf16 %v696_v19, %v695_v18  ;;  %v705_v18 = vld [vmem:[#allocation2 + $0x138] sm:$0xff]  ;;  %v706_v19 = vld [vmem:[#allocation2 + $0x140] sm:$0xff]  ;;  %v709_v40 = vld [vmem:[#allocation2 + $0x168] sm:$0xff] }
  0x58   : > { %7695 = vmatpush3.bf16.msra.mxu1 %v8289_v27  ;;  %v1246_v27 = vld [vmem:[#allocation2 + $0xf2] sm:$0xff]  ;;  %v8884_v46 = vpack.c.bf16 %v710_v45, %v709_v40  ;;  %v2759_v40 = vld [vmem:[#allocation2 + $0x49] sm:$0xff] }
  0x59   : > { %7665 = vmatmul.mubr.msk.bf16.gmra.mxu0 %vm480_vm0, %v8777_v42  ;;  %7764 = vmatprep.subr.bf16.mxu1 %v8782_v5  ;;  %v8836_v36 = vpack.c.bf16 %v1247_v29, %v1246_v27  ;;  %v708_v27 = vld [vmem:[#allocation2 + $0x158] sm:$0xff]  ;;  %v8870_v29 = vpack.c.bf16 %v706_v19, %v705_v18 }
  0x5a   : > { %7668 = vmatprep.mubr.msk.bf16.mxu0 %vm480_vm0, %v8784_v44  ;;  %v8874_v33 = vpack.c.bf16 %v708_v27, %v707_v26  ;;  %v2758_v18 = vld [vmem:[#allocation2 + $0x39] sm:$0xff]  ;;  %v9080_v27 = vpack.c.bf16 %v2175_v9, %v2174_v2  ;;  %v2760_v45 = vld [vmem:[#allocation2 + $0x51] sm:$0xff] }
  0x5b   : > { %7629 = vmatmul.mubr.msk.bf16.gmra.mxu1 %vm480_vm0, %v8787_v6  ;;  %v2765_v2 = vld [vmem:[#allocation2 + $0x91] sm:$0xff] }
  0x5c   : > { %7632 = vmatprep.mubr.msk.bf16.mxu1 %vm480_vm0, %v8793_v51 }
  0x61   : > { %7669 = vmatmul.mubr.msk.bf16.gmra.mxu0 %vm480_vm0, %v8802_v61 }
  0x62   : > { %7672 = vmatprep.mubr.msk.bf16.mxu0 %vm480_vm0, %v8804_v62 }
  0x63   : > { %7633 = vmatmul.mubr.msk.bf16.gmra.mxu1 %vm480_vm0, %v8806_v63 }
  0x64   : > { %7636 = vmatprep.mubr.msk.bf16.mxu1 %vm480_vm0, %v8810_v7 }
  0x69   : > { %7673 = vmatmul.mubr.msk.bf16.gmra.mxu0 %vm480_vm0, %v8818_v11 }
  0x6a   : > { %7676 = vmatprep.mubr.msk.bf16.mxu0 %vm480_vm0, %v8820_v3 }
  0x6b   : > { %7637 = vmatmul.mubr.msk.bf16.gmra.mxu1 %vm480_vm0, %v8822_v21 }
  0x6c   : > { %7640 = vmatprep.mubr.msk.bf16.mxu1 %vm480_vm0, %v8826_v22 }
  0x71   : > { %7677 = vmatmul.mubr.msk.bf16.gmra.mxu0 %vm480_vm0, %v8834_v31 }
  0x72   : > { %7680 = vmatprep.mubr.msk.bf16.mxu0 %vm480_vm0, %v8836_v36 }
  0x73   : > { %7641 = vmatmul.mubr.msk.bf16.gmra.mxu1 %vm480_vm0, %v8838_v60 }
  0x74   : > { %7644 = vmatprep.mubr.msk.bf16.mxu1 %vm480_vm0, %v8842_v39 }
  0x79   : > { %7681 = vmatmul.mubr.msk.bf16.gmra.mxu0 %vm480_vm0, %v8850_v48 }
  0x7a   : > { %7684 = vmatprep.mubr.msk.bf16.mxu0 %vm480_vm0, %v8852_v54 }
  0x7b   : > { %7645 = vmatmul.mubr.msk.bf16.gmra.mxu1 %vm480_vm0, %v8854_v59 }
  0x7c   : > { %7648 = vmatprep.mubr.msk.bf16.mxu1 %vm480_vm0, %v8858_v0 }
  0x81   : > { %7685 = vmatmul.mubr.msk.bf16.gmra.mxu0 %vm480_vm0, %v8866_v13 }
  0x82   : > { %7688 = vmatprep.mubr.msk.bf16.mxu0 %vm480_vm0, %v8868_v25 }
  0x83   : > { %7649 = vmatmul.mubr.msk.bf16.gmra.mxu1 %vm480_vm0, %v8870_v29 }
  0x84   : > { %7652 = vmatprep.mubr.msk.bf16.mxu1 %vm480_vm0, %v8874_v33 }
  0x89   : > { %7689 = vmatmul.mubr.msk.bf16.gmra.mxu0 %vm480_vm0, %v8882_v38 }
  0x8a   : > { %7732 = vmatprep.mubr.msk.bf16.mxu0 %vm480_vm0, %v8613_v28  ;;  %v8293_v28 = vld [vmem:[%s11050_s4 + $0x50] sm:$0xff]  }
  0x8b   : > { %7653 = vmatmul.mubr.msk.bf16.gmra.mxu1 %vm480_vm0, %v8884_v46 }
  0x8c   : > { %7696 = vmatprep.mubr.msk.bf16.mxu1 %vm480_vm0, %v8749_v20  ;;  %v8296_v20 = vld [vmem:[%s11050_s4 + $0x88] sm:$0xff]  }
  0x91   : > { %7733 = vmatmul.mubr.msk.bf16.vlgmr.msra.gmra.mxu0 %vm480_vm0, %v8646_v56  ;;  %v8295_v56 = vld [vmem:[%s11050_s4 + $0x78] sm:$0xff]  }
  0x92   : > { %7801 = vmatpush3.bf16.msra.mxu0 %v8766_v32  ;;  %7736 = vmatprep.mubr.msk.bf16.mxu0 %vm480_vm0, %v8668_v8 }
  0x93   : > { %7802 = vmatprep.subr.bf16.mxu0 %v8294_v17  ;;  %7697 = vmatmul.mubr.msk.bf16.vlgmr.msra.gmra.mxu1 %vm480_vm0, %v8753_v23 }
  0x94   : > { %7765 = vmatpush3.bf16.msra.mxu1 %v8782_v5  ;;  %7700 = vmatprep.mubr.msk.bf16.mxu1 %vm480_vm0, %v8787_v6 }
  0x95   : > { %7766 = vmatprep.subr.bf16.mxu1 %v8293_v28 }
  0x96   : > { %7803 = vmatpush3.bf16.msra.mxu0 %v8294_v17  ;;  %v2761_v17 = vld [vmem:[#allocation2 + $0x61] sm:$0xff] }
  0x97   : > { %7872 = vmatprep.subr.bf16.mxu0 %v8296_v20 }
  0x98   : > { %7767 = vmatpush3.bf16.msra.mxu1 %v8293_v28  ;;  %v2762_v28 = vld [vmem:[#allocation2 + $0x69] sm:$0xff] }
  0x99   : > { %7737 = vmatmul.mubr.msk.bf16.gmra.mxu0 %vm480_vm0, %v8696_v30  ;;  %7836 = vmatprep.subr.bf16.mxu1 %v8295_v56 }
  0x9a   : > { %7740 = vmatprep.mubr.msk.bf16.mxu0 %vm480_vm0, %v8712_v43  ;;  %v8297_v43 = vld [vmem:[%s11050_s4 + $0x70] sm:$0xff]  }
  0x9b   : > { %7701 = vmatmul.mubr.msk.bf16.gmra.mxu1 %vm480_vm0, %v8793_v51 }
  0x9c   : > { %7704 = vmatprep.mubr.msk.bf16.mxu1 %vm480_vm0, %v8806_v63 }
  0xa1   : > { %7741 = vmatmul.mubr.msk.bf16.gmra.mxu0 %vm480_vm0, %v8722_v50 }
  0xa2   : > { %7744 = vmatprep.mubr.msk.bf16.mxu0 %vm480_vm0, %v8730_v58 }
  0xa3   : > { %7705 = vmatmul.mubr.msk.bf16.gmra.mxu1 %vm480_vm0, %v8810_v7 }
  0xa4   : > { %7708 = vmatprep.mubr.msk.bf16.mxu1 %vm480_vm0, %v8822_v21 }
  0xa9   : > { %7745 = vmatmul.mubr.msk.bf16.gmra.mxu0 %vm480_vm0, %v8620_v35  ;;  %v1868_v35 = vld [vmem:[#allocation2 + $0x181] sm:$0xff] }
  0xaa   : > { %7748 = vmatprep.mubr.msk.bf16.mxu0 %vm480_vm0, %v8638_v49  ;;  %v1869_v49 = vld [vmem:[#allocation2 + $0x189] sm:$0xff] }
  0xab   : > { %7709 = vmatmul.mubr.msk.bf16.gmra.mxu1 %vm480_vm0, %v8826_v22  ;;  %v8964_v8 = vpack.c.bf16 %v1869_v49, %v1868_v35  ;;  %v2791_v49 = vpack.c.bf16 %v2762_v28, %v2761_v17 }
  0xac   : > { %7712 = vmatprep.mubr.msk.bf16.mxu1 %vm480_vm0, %v8838_v60 }
  0xb1   : > { %7749 = vmatmul.mubr.msk.bf16.gmra.mxu0 %vm480_vm0, %v8674_v15  ;;  %v1562_v15 = vld [vmem:[#allocation2 + $0x180] sm:$0xff] }
  0xb2   : > { %7752 = vmatprep.mubr.msk.bf16.mxu0 %vm480_vm0, %v8691_v24  ;;  %v1563_v24 = vld [vmem:[#allocation2 + $0x188] sm:$0xff] }
  0xb3   : > { %7713 = vmatmul.mubr.msk.bf16.gmra.mxu1 %vm480_vm0, %v8842_v39  ;;  %v1579_v30 = vpack.c.bf16 %v1563_v24, %v1562_v15 }
  0xb4   : > { %7716 = vmatprep.mubr.msk.bf16.mxu1 %vm480_vm0, %v8854_v59 }
  0xb9   : > { %7753 = vmatmul.mubr.msk.bf16.gmra.mxu0 %vm480_vm0, %v8710_v41  ;;  %v8298_v41 = vld [vmem:[%s11050_s4 + $0x80] sm:$0xff]  }
  0xba   : > { %7756 = vmatprep.mubr.msk.bf16.mxu0 %vm480_vm0, %v8718_v47 }
  0xbb   : > { %7717 = vmatmul.mubr.msk.bf16.gmra.mxu1 %vm480_vm0, %v8858_v0 }
  0xbc   : > { %7720 = vmatprep.mubr.msk.bf16.mxu1 %vm480_vm0, %v8870_v29 }
  0xc1   : > { %7757 = vmatmul.mubr.msk.bf16.gmra.mxu0 %vm480_vm0, %v8726_v55 }
  0xc2   : > { %7760 = vmatprep.mubr.msk.bf16.mxu0 %vm480_vm0, %v8734_v1 }
  0xc3   : > { %7721 = vmatmul.mubr.msk.bf16.gmra.mxu1 %vm480_vm0, %v8874_v33 }
  0xc4   : > { %7724 = vmatprep.mubr.msk.bf16.mxu1 %vm480_vm0, %v8884_v46 }
  0xc9   : > { %7761 = vmatmul.mubr.msk.bf16.gmra.mxu0 %vm480_vm0, %v8964_v8 }
  0xca   : > { %7804 = vmatprep.mubr.msk.bf16.mxu0 %vm480_vm0, %v8753_v23 }
  0xcb   : > { %7725 = vmatmul.mubr.msk.bf16.gmra.mxu1 %vm480_vm0, %v1579_v30 }
  0xcc   : > { %7768 = vmatprep.mubr.msk.bf16.mxu1 %vm480_vm0, %v8742_v14 }
  0xd1   : > { %7805 = vmatmul.mubr.msk.bf16.vlgmr.msra.gmra.mxu0 %vm480_vm0, %v8787_v6 }
  0xd2   : > { %7873 = vmatpush3.bf16.msra.mxu0 %v8296_v20  ;;  %7808 = vmatprep.mubr.msk.bf16.mxu0 %vm480_vm0, %v8793_v51 }
  0xd3   : > { %7874 = vmatprep.subr.bf16.mxu0 %v8298_v41  ;;  %7769 = vmatmul.mubr.msk.bf16.vlgmr.msra.gmra.mxu1 %vm480_vm0, %v8744_v16 }
  0xd4   : > { %7837 = vmatpush3.bf16.msra.mxu1 %v8295_v56  ;;  %7772 = vmatprep.mubr.msk.bf16.mxu1 %vm480_vm0, %v8777_v42  ;;  %v2790_v56 = vpack.c.bf16 %v2760_v45, %v2759_v40 }
  0xd5   : > { %7838 = vmatprep.subr.bf16.mxu1 %v8297_v43 }
  0xd6   : > { %7875 = vmatpush3.bf16.msra.mxu0 %v8298_v41 }
  0xd8   : > { %7839 = vmatpush3.bf16.msra.mxu1 %v8297_v43 }
  0xd9   : > { %7809 = vmatmul.mubr.msk.bf16.gmra.mxu0 %vm480_vm0, %v8806_v63 }
  0xda   : > { %7812 = vmatprep.mubr.msk.bf16.mxu0 %vm480_vm0, %v8810_v7 }
  0xdb   : > { %7773 = vmatmul.mubr.msk.bf16.gmra.mxu1 %vm480_vm0, %v8784_v44 }
  0xdc   : > { %7776 = vmatprep.mubr.msk.bf16.mxu1 %vm480_vm0, %v8802_v61 }
  0xe1   : > { %7813 = vmatmul.mubr.msk.bf16.gmra.mxu0 %vm480_vm0, %v8822_v21 }
  0xe2   : > { %7816 = vmatprep.mubr.msk.bf16.mxu0 %vm480_vm0, %v8826_v22 }
  0xe3   : > { %7777 = vmatmul.mubr.msk.bf16.gmra.mxu1 %vm480_vm0, %v8804_v62 }
  0xe4   : > { %7780 = vmatprep.mubr.msk.bf16.mxu1 %vm480_vm0, %v8818_v11 }
  0xe9   : > { %7817 = vmatmul.mubr.msk.bf16.gmra.mxu0 %vm480_vm0, %v8838_v60 }
  0xea   : > { %7820 = vmatprep.mubr.msk.bf16.mxu0 %vm480_vm0, %v8842_v39 }
  0xeb   : > { %7781 = vmatmul.mubr.msk.bf16.gmra.mxu1 %vm480_vm0, %v8820_v3 }
  0xec   : > { %7784 = vmatprep.mubr.msk.bf16.mxu1 %vm480_vm0, %v8834_v31 }
  0xf1   : > { %v9011_v47 = vpop.f32.mrf.mxu0  ;;  %7821 = vmatmul.mubr.msk.bf16.gmra.mxu0 %vm480_vm0, %v8854_v59 }
  0xf2   : > { %7824 = vmatprep.mubr.msk.bf16.mxu0 %vm480_vm0, %v8858_v0  ;;  %v2498_v0 = vpack.c.bf16 %v2482_v53, %v2481_v52  ;;  %v2763_v52 = vld [vmem:[#allocation2 + $0x79] sm:$0xff]  ;;  %v2764_v53 = vld [vmem:[#allocation2 + $0x81] sm:$0xff] }
  0xf3   : > { %v9017_v50 = vpop.f32.mrf.mxu0  ;;  %v9019_v55 = vpop.f32.mrf.mxu1  ;;  %7785 = vmatmul.mubr.msk.bf16.gmra.mxu1 %vm480_vm0, %v8836_v36 }
  0xf4   : > { %7788 = vmatprep.mubr.msk.bf16.mxu1 %vm480_vm0, %v8850_v48 }
  0xf5   : > { %v9023_v58 = vpop.f32.mrf.mxu0  ;;  %v9027_v1 = vpop.f32.mrf.mxu1 }
  0xf7   : > { %v9029_v14 = vpop.f32.mrf.mxu0  ;;  %v9031_v23 = vpop.f32.mrf.mxu1 }
  0xf9   : > { %v9033_v32 = vpop.f32.mrf.mxu0  ;;  %7825 = vmatmul.mubr.msk.bf16.gmra.mxu0 %vm480_vm0, %v8870_v29  ;;  %v9037_v5 = vpop.f32.mrf.mxu1 }
  0xfa   : > { %7828 = vmatprep.mubr.msk.bf16.mxu0 %vm480_vm0, %v8874_v33 }
  0xfb   : > { %v9041_v6 = vpop.f32.mrf.mxu0  ;;  %v9043_v51 = vpop.f32.mrf.mxu1  ;;  %7789 = vmatmul.mubr.msk.bf16.gmra.mxu1 %vm480_vm0, %v8852_v54 }
  0xfc   : > { %7792 = vmatprep.mubr.msk.bf16.mxu1 %vm480_vm0, %v8866_v13 }
  0xfd   : > { %v9047_v63 = vpop.f32.mrf.mxu0  ;;  %v9051_v7 = vpop.f32.mrf.mxu1 }
  0xff   : > { %v9053_v21 = vpop.f32.mrf.mxu0  ;;  %v9055_v22 = vpop.f32.mrf.mxu1 }
 0x101   : > { %v9057_v60 = vpop.f32.mrf.mxu0  ;;  %7829 = vmatmul.mubr.msk.bf16.gmra.mxu0 %vm480_vm0, %v8884_v46  ;;  %v9061_v39 = vpop.f32.mrf.mxu1 }
 0x102   : > { %7832 = vmatprep.mubr.msk.bf16.mxu0 %vm480_vm0, %v1579_v30 }
 0x103   : > { %v9064_v57 = vpop.f32.mrf.mxu0  ;;  %v9066_v4 = vpop.f32.mrf.mxu1  ;;  %7793 = vmatmul.mubr.msk.bf16.gmra.mxu1 %vm480_vm0, %v8868_v25  ;;  %v2789_v25 = vpack.c.bf16 %v2758_v18, %v2757_v12 }
 0x104   : > { %7796 = vmatprep.mubr.msk.bf16.mxu1 %vm480_vm0, %v8882_v38 }
 0x105   : > { %v9070_v59 = vpop.f32.mrf.mxu0  ;;  %v9074_v10 = vpop.f32.mrf.mxu1 }
 0x107   : > { %v9076_v19 = vpop.f32.mrf.mxu0  ;;  %v9078_v26 = vpop.f32.mrf.mxu1 }
 0x109   : > { %v9082_v29 = vpop.f32.mrf.mxu0  ;;  %7833 = vmatmul.mubr.msk.bf16.gmra.mxu0 %vm480_vm0, %v2498_v0  ;;  %v9085_v33 = vpop.f32.mrf.mxu1 }
 0x10a   : > { %7876 = vmatprep.mubr.msk.bf16.mxu0 %vm480_vm0, %v8744_v16 }
 0x10b   : > { %v9089_v34 = vpop.f32.mrf.mxu0  ;;  %v9091_v37 = vpop.f32.mrf.mxu1  ;;  %7797 = vmatmul.mubr.msk.bf16.gmra.mxu1 %vm480_vm0, %v9080_v27 }
 0x10c   : > { %7840 = vmatprep.mubr.msk.bf16.mxu1 %vm480_vm0, %v2789_v25  ;;  %v2792_v25 = vpack.c.bf16 %v2764_v53, %v2763_v52  ;;  %v2769_v53 = vld [vmem:[#allocation2 + $0xc1] sm:$0xff] }
 0x10d   : > { %v9095_v38 = vpop.f32.mrf.mxu0  ;;  %v9098_v46 = vpop.f32.mrf.mxu1 }
 0x10f   : > { %v9100_v20 = vpop.f32.mrf.mxu0  ;;  %v9102_v16 = vpop.f32.mrf.mxu1 }
 0x111   : > { %v7662_v35 = vpop.f32.mrf.mxu0  ;;  %7877 = vmatmul.mubr.msk.bf16.vlgmr.msra.gmra.mxu0 %vm480_vm0, %v8777_v42  ;;  %v9106_v15 = vpop.f32.mrf.mxu1  ;;  %v2766_v42 = vld [vmem:[#allocation2 + $0x99] sm:$0xff] }
 0x112   : > { %7880 = vmatprep.mubr.msk.bf16.mxu0 %vm480_vm0, %v8784_v44 }
 0x113   : > { %v1373_v24 = vpop.f32.mrf.mxu0  ;;  %v7626_v30 = vpop.f32.mrf.mxu1  ;;  %7841 = vmatmul.mubr.msk.bf16.vlgmr.msra.gmra.mxu1 %vm480_vm0, %v2790_v56 }
 0x114   : > { %v1108_v41 = vadd.f32 %v7626_v30, %v9011_v47  ;;  %7844 = vmatprep.mubr.msk.bf16.mxu1 %vm480_vm0, %v2791_v49  ;;  %v2793_v47 = vpack.c.bf16 %v2766_v42, %v2765_v2 }
 0x115   : > { %v7663_v43 = vpop.f32.mrf.mxu0  ;;  %v1099_v0 = vpop.f32.mrf.mxu1 }
 0x116   : > { %v1100_v9 = vadd.f32 %v1099_v0, %v9017_v50  ;;  %v9114_v18 = vadd.f32 %v7662_v35, %v1108_v41 }
 0x117   : > { %v1376_v12 = vpop.f32.mrf.mxu0  ;;  %v7627_v44 = vpop.f32.mrf.mxu1 }
 0x118   : > { %v1111_v40 = vadd.f32 %v7627_v44, %v9023_v58  ;;  %v9119_v17 = vadd.f32 %v1373_v24, %v1100_v9  ;;  %v2768_v24 = vld [vmem:[#allocation2 + $0xb1] sm:$0xff] }
 0x119   : > { %v7666_v45 = vpop.f32.mrf.mxu0  ;;  %7881 = vmatmul.mubr.msk.bf16.gmra.mxu0 %vm480_vm0, %v8802_v61  ;;  %v1102_v28 = vpop.f32.mrf.mxu1  ;;  %v2767_v61 = vld [vmem:[#allocation2 + $0xa9] sm:$0xff] }
 0x11a   : > { %7884 = vmatprep.mubr.msk.bf16.mxu0 %vm480_vm0, %v8804_v62  ;;  %v1103_v50 = vadd.f32 %v1102_v28, %v9029_v14  ;;  %v9124_v35 = vadd.f32 %v7663_v43, %v1111_v40  ;;  %v2770_v62 = vld [vmem:[#allocation2 + $0xc9] sm:$0xff]  ;;  %v2794_v42 = vpack.c.bf16 %v2768_v24, %v2767_v61 }
 0x11b   : > { %v1389_v56 = vpop.f32.mrf.mxu0  ;;  %v7630_v49 = vpop.f32.mrf.mxu1  ;;  %7845 = vmatmul.mubr.msk.bf16.gmra.mxu1 %vm480_vm0, %v2792_v25  ;;  %v2795_v44 = vpack.c.bf16 %v2770_v62, %v2769_v53 }
 0x11c   : > { %v1124_v58 = vadd.f32 %v7630_v49, %v9033_v32  ;;  %7848 = vmatprep.mubr.msk.bf16.mxu1 %vm480_vm0, %v2793_v47  ;;  %v9129_v41 = vadd.f32 %v1376_v12, %v1103_v50  ;;  %v2772_v50 = vld [vmem:[#allocation2 + $0xe1] sm:$0xff] }
 0x11d   : > { %v7667_v30 = vpop.f32.mrf.mxu0  ;;  %v1115_v52 = vpop.f32.mrf.mxu1 }
 0x11e   : > { %v1116_v14 = vadd.f32 %v1115_v52, %v9041_v6  ;;  %v9132_v43 = vadd.f32 %v7666_v45, %v1124_v58  ;;  %v2773_v58 = vld [vmem:[#allocation2 + $0xf1] sm:$0xff] }
 0x11f   : > { %v1392_v0 = vpop.f32.mrf.mxu0  ;;  %v7631_v2 = vpop.f32.mrf.mxu1 }
 0x120   : > { %v1127_v9 = vadd.f32 %v7631_v2, %v9047_v63  ;;  %v9137_v25 = vadd.f32 %v1389_v56, %v1116_v14 }
 0x121   : > { %v7670_v32 = vpop.f32.mrf.mxu0  ;;  %7885 = vmatmul.mubr.msk.bf16.gmra.mxu0 %vm480_vm0, %v8818_v11  ;;  %v1118_v12 = vpop.f32.mrf.mxu1  ;;  %v2771_v11 = vld [vmem:[#allocation2 + $0xd9] sm:$0xff] }
 0x122   : > { %7888 = vmatprep.mubr.msk.bf16.mxu0 %vm480_vm0, %v8820_v3  ;;  %v1119_v6 = vadd.f32 %v1118_v12, %v9053_v21  ;;  %v9142_v45 = vadd.f32 %v7667_v30, %v1127_v9  ;;  %v2774_v3 = vld [vmem:[#allocation2 + $0xf9] sm:$0xff]  ;;  %v2796_v52 = vpack.c.bf16 %v2772_v50, %v2771_v11 }
 0x123   : > { %v1405_v40 = vpop.f32.mrf.mxu0  ;;  %v7634_v47 = vpop.f32.mrf.mxu1  ;;  %7849 = vmatmul.mubr.msk.bf16.gmra.mxu1 %vm480_vm0, %v2794_v42  ;;  %v2797_v62 = vpack.c.bf16 %v2774_v3, %v2773_v58 }
 0x124   : > { %v1140_v63 = vadd.f32 %v7634_v47, %v9057_v60  ;;  %7852 = vmatprep.mubr.msk.bf16.mxu1 %vm480_vm0, %v2795_v44  ;;  %v9147_v56 = vadd.f32 %v1392_v0, %v1119_v6  ;;  %v2776_v44 = vld [vmem:[#allocation2 + $0x111] sm:$0xff] }
 0x125   : > { %v7671_v28 = vpop.f32.mrf.mxu0  ;;  %v1131_v49 = vpop.f32.mrf.mxu1 }
 0x126   : > { %v1132_v21 = vadd.f32 %v1131_v49, %v9064_v57  ;;  %v9150_v30 = vadd.f32 %v7670_v32, %v1140_v63 }
 0x127   : > { %v1408_v61 = vpop.f32.mrf.mxu0  ;;  %v7635_v24 = vpop.f32.mrf.mxu1 }
 0x128   : > { %v1143_v53 = vadd.f32 %v7635_v24, %v9070_v59  ;;  %v9155_v14 = vadd.f32 %v1405_v40, %v1132_v21  ;;  %v2777_v40 = vld [vmem:[#allocation2 + $0x121] sm:$0xff]  ;;  %v3087_v24 = vld [vmem:[#allocation2 + $0x152] sm:$0xff] }
 0x129   : > { %v7674_v60 = vpop.f32.mrf.mxu0  ;;  %7889 = vmatmul.mubr.msk.bf16.gmra.mxu0 %vm480_vm0, %v8834_v31  ;;  %v1134_v0 = vpop.f32.mrf.mxu1  ;;  %v2775_v31 = vld [vmem:[#allocation2 + $0x109] sm:$0xff] }
 0x12a   : > { %7892 = vmatprep.mubr.msk.bf16.mxu0 %vm480_vm0, %v8836_v36  ;;  %v1135_v57 = vadd.f32 %v1134_v0, %v9076_v19  ;;  %v9160_v42 = vadd.f32 %v7671_v28, %v1143_v53  ;;  %v2778_v36 = vld [vmem:[#allocation2 + $0x129] sm:$0xff]  ;;  %v2798_v11 = vpack.c.bf16 %v2776_v44, %v2775_v31  ;;  %v2780_v0 = vld [vmem:[#allocation2 + $0x141] sm:$0xff] }
 0x12b   : > { %v1421_v2 = vpop.f32.mrf.mxu0  ;;  %v7638_v9 = vpop.f32.mrf.mxu1  ;;  %7853 = vmatmul.mubr.msk.bf16.gmra.mxu1 %vm480_vm0, %v2796_v52  ;;  %v8299_v28 = vld [vmem:[%s11053_s7 + $0x8] sm:$0xff]   ;;  %v2799_v58 = vpack.c.bf16 %v2778_v36, %v2777_v40  ;;  %v3088_v52 = vld [vmem:[#allocation2 + $0x15a] sm:$0xff] }
 0x12c   : > { %v1156_v59 = vadd.f32 %v7638_v9, %v9082_v29  ;;  %7856 = vmatprep.mubr.msk.bf16.mxu1 %vm480_vm0, %v2797_v62  ;;  %v9165_v12 = vadd.f32 %v1408_v61, %v1135_v57  ;;  %7908 = vmatprep.subr.bf16.mxu1 %v8299_v28  ;;  %v2779_v62 = vld [vmem:[#allocation2 + $0x139] sm:$0xff] }
 0x12d   : > { %v7675_v32 = vpop.f32.mrf.mxu0  ;;  %v1147_v6 = vpop.f32.mrf.mxu1  ;;  %7909 = vmatpush3.bf16.msra.mxu1 %v8299_v28  ;;  %v2782_v9 = vld [vmem:[#allocation2 + $0x159] sm:$0xff] }
 0x12e   : > { %v1148_v19 = vadd.f32 %v1147_v6, %v9089_v34  ;;  %v9168_v63 = vadd.f32 %v7674_v60, %v1156_v59  ;;  %v2800_v6 = vpack.c.bf16 %v2780_v0, %v2779_v62  ;;  %v3090_v28 = vld [vmem:[#allocation2 + $0x172] sm:$0xff] }
 0x12f   : > { %v1424_v47 = vpop.f32.mrf.mxu0  ;;  %v7639_v29 = vpop.f32.mrf.mxu1 }
 0x130   : > { %v1159_v50 = vadd.f32 %v7639_v29, %v9095_v38  ;;  %v9176_v3 = vadd.f32 %v1421_v2, %v1148_v19  ;;  %v3107_v2 = vpack.c.bf16 %v3088_v52, %v3087_v24 }
 0x131   : > { %v7678_v49 = vpop.f32.mrf.mxu0  ;;  %7893 = vmatmul.mubr.msk.bf16.gmra.mxu0 %vm480_vm0, %v8850_v48  ;;  %v1150_v34 = vpop.f32.mrf.mxu1 }
 0x132   : > { %7896 = vmatprep.mubr.msk.bf16.mxu0 %vm480_vm0, %v8852_v54  ;;  %v1151_v21 = vadd.f32 %v1150_v34, %v9100_v20  ;;  %v9181_v53 = vadd.f32 %v7675_v32, %v1159_v50  ;;  %v2781_v20 = vld [vmem:[#allocation2 + $0x151] sm:$0xff] }
 0x133   : > { %v1437_v61 = vpop.f32.mrf.mxu0  ;;  %v7642_v38 = vpop.f32.mrf.mxu1  ;;  %7857 = vmatmul.mubr.msk.bf16.gmra.mxu1 %vm480_vm0, %v2798_v11  ;;  %v2801_v36 = vpack.c.bf16 %v2782_v9, %v2781_v20  ;;  %v2784_v34 = vld [vmem:[#allocation2 + $0x171] sm:$0xff] }
 0x134   : > { %v1172_v48 = vadd.f32 %v7642_v38, %v9019_v55  ;;  %7860 = vmatprep.mubr.msk.bf16.mxu1 %vm480_vm0, %v2799_v58  ;;  %v9186_v57 = vadd.f32 %v1424_v47, %v1151_v21  ;;  %v2783_v58 = vld [vmem:[#allocation2 + $0x169] sm:$0xff] }
 0x135   : > { %v7679_v60 = vpop.f32.mrf.mxu0  ;;  %v1163_v54 = vpop.f32.mrf.mxu1 }
 0x136   : > { %v1164_v59 = vadd.f32 %v1163_v54, %v9027_v1  ;;  %v9191_v31 = vadd.f32 %v7678_v49, %v1172_v48  ;;  %v3089_v1 = vld [vmem:[#allocation2 + $0x16a] sm:$0xff]  ;;  %v2802_v48 = vpack.c.bf16 %v2784_v34, %v2783_v58  ;;  %v3093_v54 = vld [vmem:[#allocation2 + $0x19a] sm:$0xff] }
 0x137   : > { %v9189_v32 = vpop.f32.mrf.mxu0  ;;  %v7643_v44 = vpop.f32.mrf.mxu1 }
 0x138   : > { %v1175_v55 = vadd.f32 %v7643_v44, %v9031_v23  ;;  %v9196_v19 = vadd.f32 %v1437_v61, %v1164_v59 }
 0x139   : > { %v7682_v40 = vpop.f32.mrf.mxu0  ;;  %7897 = vmatmul.mubr.msk.bf16.gmra.mxu0 %vm480_vm0, %v8866_v13  ;;  %v9198_v47 = vpop.f32.mrf.mxu1  ;;  %v3108_v13 = vpack.c.bf16 %v3090_v28, %v3089_v1 }
 0x13a   : > { %7900 = vmatprep.mubr.msk.bf16.mxu0 %vm480_vm0, %v3107_v2  ;;  %v9201_v11 = vadd.f32 %v7679_v60, %v1175_v55  ;;  %v2788_v55 = vld [vmem:[#allocation2 + $0x1a1] sm:$0xff] }
 0x13b   : > { %v1453_v29 = vpop.f32.mrf.mxu0  ;;  %v7646_v50 = vpop.f32.mrf.mxu1  ;;  %7861 = vmatmul.mubr.msk.bf16.gmra.mxu1 %vm480_vm0, %v2800_v6  ;;  %v2787_v6 = vld [vmem:[#allocation2 + $0x199] sm:$0xff] }
 0x13c   : > { %v1188_v23 = vadd.f32 %v7646_v50, %v9043_v51  ;;  %7864 = vmatprep.mubr.msk.bf16.mxu1 %vm480_vm0, %v2801_v36 }
 0x13d   : > { %v7683_v49 = vpop.f32.mrf.mxu0  ;;  %v1179_v21 = vpop.f32.mrf.mxu1 }
 0x13e   : > { %v1180_v61 = vadd.f32 %v1179_v21, %v9051_v7  ;;  %v9209_v52 = vadd.f32 %v7682_v40, %v1188_v23  ;;  %v3094_v7 = vld [vmem:[#allocation2 + $0x1a2] sm:$0xff] }
 0x13f   : > { %v9207_v24 = vpop.f32.mrf.mxu0  ;;  %v7647_v38 = vpop.f32.mrf.mxu1  ;;  %v3110_v44 = vpack.c.bf16 %v3094_v7, %v3093_v54 }
 0x140   : > { %v1191_v60 = vadd.f32 %v7647_v38, %v9055_v22  ;;  %v9213_v51 = vadd.f32 %v1453_v29, %v1180_v61  ;;  %v2804_v29 = vpack.c.bf16 %v2788_v55, %v2787_v6 }
 0x141   : > { %v7686_v62 = vpop.f32.mrf.mxu0  ;;  %7901 = vmatmul.mubr.msk.bf16.gmra.mxu0 %vm480_vm0, %v3108_v13  ;;  %v9215_v0 = vpop.f32.mrf.mxu1 }
 0x142   : > { %7904 = vmatprep.mubr.msk.bf16.mxu0 %vm480_vm0, %v9080_v27  ;;  %v9219_v20 = vadd.f32 %v7683_v49, %v1191_v60 }
 0x143   : > { %v1469_v2 = vpop.f32.mrf.mxu0  ;;  %v7650_v9 = vpop.f32.mrf.mxu1  ;;  %7865 = vmatmul.mubr.msk.bf16.gmra.mxu1 %vm480_vm0, %v2802_v48  ;;  %v8300_v48 = vld [vmem:[%s11053_s7] sm:$0xff]  }
 0x144   : > { %v1204_v22 = vadd.f32 %v7650_v9, %v9066_v4  ;;  %7868 = vmatprep.mubr.msk.bf16.mxu1 %vm480_vm0, %v8964_v8  ;;  %7910 = vmatprep.subr.bf16.mxu1 %v8300_v48 }
 0x145   : > { %v7687_v59 = vpop.f32.mrf.mxu0  ;;  %v1195_v40 = vpop.f32.mrf.mxu1  ;;  %7911 = vmatpush3.bf16.msra.mxu1 %v8300_v48 }
 0x146   : > { %v1196_v27 = vadd.f32 %v1195_v40, %v9074_v10  ;;  %v9228_v1 = vadd.f32 %v7686_v62, %v1204_v22 }
 0x147   : > { %v9226_v36 = vpop.f32.mrf.mxu0  ;;  %v7651_v28 = vpop.f32.mrf.mxu1 }
 0x148   : > { %v1207_v50 = vadd.f32 %v7651_v28, %v9078_v26  ;;  %v9232_v4 = vadd.f32 %v1469_v2, %v1196_v27 }
 0x149   : > { %v7690_v23 = vpop.f32.mrf.mxu0  ;;  %7905 = vmatmul.mubr.msk.bf16.gmra.mxu0 %vm480_vm0, %v3110_v44  ;;  %v9234_v8 = vpop.f32.mrf.mxu1 }
 0x14a   : > { %v9236_v13 = vadd.f32 %v7687_v59, %v1207_v50 }
 0x14b   : > { %v1485_v49 = vpop.f32.mrf.mxu0  ;;  %v7654_v58 = vpop.f32.mrf.mxu1  ;;  %7869 = vmatmul.mubr.msk.bf16.gmra.mxu1 %vm480_vm0, %v2804_v29 }
 0x14c   : > { %v1220_v10 = vadd.f32 %v7654_v58, %v9091_v37 }
 0x14d   : > { %v7691_v34 = vpop.f32.mrf.mxu0  ;;  %v1211_v21 = vpop.f32.mrf.mxu1 }
 0x14e   : > { %v1212_v61 = vadd.f32 %v1211_v21, %v9098_v46  ;;  %v9243_v38 = vadd.f32 %v7690_v23, %v1220_v10 }
 0x14f   : > { %v9241_v26 = vpop.f32.mrf.mxu0  ;;  %v7655_v60 = vpop.f32.mrf.mxu1 }
 0x150   : > { %v1223_v62 = vadd.f32 %v7655_v60, %v9102_v16  ;;  %v9249_v7 = vadd.f32 %v1485_v49, %v1212_v61 }
 0x151   : > { %v7734_v54 = vpop.f32.mrf.mxu0  ;;  %v9251_v37 = vpop.f32.mrf.mxu1 }
 0x152   : > { %v9253_v46 = vadd.f32 %v7691_v34, %v1223_v62 }
 0x153   : > { %v1985_v2 = vpop.f32.mrf.mxu0  ;;  %v7698_v9 = vpop.f32.mrf.mxu1 }
 0x154   : > { %v1808_v22 = vadd.f32 %v7698_v9, %v9114_v18 }
 0x155   : > { %v7735_v59 = vpop.f32.mrf.mxu0  ;;  %v1679_v44 = vpop.f32.mrf.mxu1 }
 0x156   : > { %v1806_v6 = vadd.f32 %v1679_v44, %v9119_v17  ;;  %v9259_v16 = vadd.f32 %v7734_v54, %v1808_v22  ;;  %v8301_v44 = vld [vmem:[%s11053_s7 + $0x18] sm:$0xff]  }
 0x157   : > { %v9257_v55 = vpop.f32.mrf.mxu0  ;;  %v7699_v40 = vpop.f32.mrf.mxu1  ;;  %7944 = vmatprep.subr.bf16.mxu0 %v8301_v44 }
 0x158   : > { %v1809_v27 = vadd.f32 %v7699_v40, %v9124_v35  ;;  %v9262_v29 = vadd.f32 %v1985_v2, %v1806_v6  ;;  %7945 = vmatpush3.bf16.msra.mxu0 %v8301_v44 }
 0x159   : > { %v7738_v28 = vpop.f32.mrf.mxu0  ;;  %v9264_v50 = vpop.f32.mrf.mxu1 }
 0x15a   : > { %v9266_v49 = vadd.f32 %v7735_v59, %v1809_v27 }
 0x15b   : > { %v2001_v23 = vpop.f32.mrf.mxu0  ;;  %v7702_v18 = vpop.f32.mrf.mxu1 }
 0x15c   : > { %v1812_v58 = vadd.f32 %v7702_v18, %v9132_v43 }
 0x15d   : > { %v7739_v10 = vpop.f32.mrf.mxu0  ;;  %v1695_v17 = vpop.f32.mrf.mxu1 }
 0x15e   : > { %v1810_v34 = vadd.f32 %v1695_v17, %v9137_v25  ;;  %v9272_v61 = vadd.f32 %v7738_v28, %v1812_v58  ;;  %v8302_v58 = vld [vmem:[%s11053_s7 + $0x10] sm:$0xff]  }
 0x15f   : > { %v9270_v21 = vpop.f32.mrf.mxu0  ;;  %v7703_v35 = vpop.f32.mrf.mxu1  ;;  %7946 = vmatprep.subr.bf16.mxu0 %v8302_v58 }
 0x160   : > { %v1813_v48 = vadd.f32 %v7703_v35, %v9142_v45  ;;  %v9275_v62 = vadd.f32 %v2001_v23, %v1810_v34  ;;  %v3550_v34 = vld [vmem:[#allocation2] sm:$0xff]  ;;  %v3551_v35 = vld [vmem:[#allocation2 + $0x8] sm:$0xff]  ;;  %7947 = vmatpush3.bf16.msra.mxu0 %v8302_v58 }
 0x161   : > { %v7742_v60 = vpop.f32.mrf.mxu0  ;;  %v9277_v54 = vpop.f32.mrf.mxu1 }
 0x162   : > { %v9279_v9 = vadd.f32 %v7739_v10, %v1813_v48  ;;  %v3855_v48 = vld [vmem:[#allocation2 + $0x1] sm:$0xff] }
 0x163   : > { %v2017_v2 = vpop.f32.mrf.mxu0  ;;  %v7706_v43 = vpop.f32.mrf.mxu1 }
 0x164   : > { %v1816_v22 = vadd.f32 %v7706_v43, %v9150_v30  ;;  %v3856_v43 = vld [vmem:[#allocation2 + $0x9] sm:$0xff] }
 0x165   : > { %v7743_v59 = vpop.f32.mrf.mxu0  ;;  %v1711_v25 = vpop.f32.mrf.mxu1 }
 0x166   : > { %v1814_v6 = vadd.f32 %v1711_v25, %v9155_v14  ;;  %v9288_v40 = vadd.f32 %v7742_v60, %v1816_v22  ;;  %v3887_v25 = vpack.c.bf16 %v3856_v43, %v3855_v48 }
 0x167   : > { %v9286_v45 = vpop.f32.mrf.mxu0  ;;  %v7707_v27 = vpop.f32.mrf.mxu1 }
 0x168   : > { %v1817_v28 = vadd.f32 %v7707_v27, %v9160_v42  ;;  %v9291_v18 = vadd.f32 %v2017_v2, %v1814_v6  ;;  %v3582_v2 = vpack.c.bf16 %v3551_v35, %v3550_v34  ;;  %7948 = vmatprep.mubr.msk.bf16.mxu0 %vm480_vm0, %v3887_v25 }
 0x169   : > { %v7746_v23 = vpop.f32.mrf.mxu0  ;;  %v9293_v30 = vpop.f32.mrf.mxu1 }
 0x16a   : > { %v9298_v14 = vadd.f32 %v7743_v59, %v1817_v28  ;;  %7912 = vmatprep.mubr.msk.bf16.mxu1 %vm480_vm0, %v3582_v2 }
 0x16b   : > { %v2033_v10 = vpop.f32.mrf.mxu0  ;;  %v7710_v17 = vpop.f32.mrf.mxu1 }
 0x16c   : > { %11062 = vst [vmem:[#allocation3_spill] sm:$0xff] %v9298_v14  ;;  %v1820_v42 = vadd.f32 %v7710_v17, %v9168_v63 }
 0x16d   : > { %v7747_v60 = vpop.f32.mrf.mxu0  ;;  %v1727_v22 = vpop.f32.mrf.mxu1 }
 0x16e   : > { %v1818_v44 = vadd.f32 %v1727_v22, %v9176_v3  ;;  %v9304_v27 = vadd.f32 %v7746_v23, %v1820_v42 }
 0x16f   : > { %v9302_v6 = vpop.f32.mrf.mxu0  ;;  %v7711_v59 = vpop.f32.mrf.mxu1 }
 0x170   : > { %11063 = vst [vmem:[#allocation4_spill] sm:$0xff] %v9304_v27  ;;  %v1821_v28 = vadd.f32 %v7711_v59, %v9181_v53  ;;  %v9309_v17 = vadd.f32 %v2033_v10, %v1818_v44 }
 0x171   : > { %v7750_v63 = vpop.f32.mrf.mxu0  ;;  %v9311_v58 = vpop.f32.mrf.mxu1 }
 0x172   : > { %11064 = vst [vmem:[#allocation5_spill] sm:$0xff] %v9309_v17  ;;  %v9313_v35 = vadd.f32 %v7747_v60, %v1821_v28  ;;  %v9327_v60 = vld [vmem:[%s11053_s7 + $0x28] sm:$0xff]   ;;  %v9418_v17 = vld [vmem:[%s11053_s7 + $0x38] sm:$0xff]  }
 0x173   : > { %v2049_v34 = vpop.f32.mrf.mxu0  ;;  %v7714_v3 = vpop.f32.mrf.mxu1  ;;  %11068 = vst [vmem:[#allocation9_spill] sm:$0xff] %v9327_v60  ;;  %7980 = vmatprep.subr.bf16.mxu1 %v9327_v60  ;;  %11088 = vst [vmem:[#allocation29_spill] sm:$0xff] %v9418_v17  ;;  %8016 = vmatprep.subr.bf16.mxu0 %v9418_v17 }
 0x174   : > { %11065 = vst [vmem:[#allocation6_spill] sm:$0xff] %v9313_v35  ;;  %v1824_v48 = vadd.f32 %v7714_v3, %v9191_v31 }
 0x175   : > { %v7751_v23 = vpop.f32.mrf.mxu0  ;;  %v1743_v42 = vpop.f32.mrf.mxu1 }
 0x176   : > { %v1822_v2 = vadd.f32 %v1743_v42, %v9196_v19  ;;  %v9319_v22 = vadd.f32 %v7750_v63, %v1824_v48 }
 0x177   : > { %v9317_v43 = vpop.f32.mrf.mxu0  ;;  %v7715_v53 = vpop.f32.mrf.mxu1 }
 0x178   : > { %11066 = vst [vmem:[#allocation7_spill] sm:$0xff] %v9319_v22  ;;  %v1825_v10 = vadd.f32 %v7715_v53, %v9201_v11  ;;  %v9322_v44 = vadd.f32 %v2049_v34, %v1822_v2 }
 0x179   : > { %v7754_v25 = vpop.f32.mrf.mxu0  ;;  %v9329_v31 = vpop.f32.mrf.mxu1 }
 0x17a   : > { %11067 = vst [vmem:[#allocation8_spill] sm:$0xff] %v9322_v44  ;;  %v9331_v28 = vadd.f32 %v7751_v23, %v1825_v10 }
 0x17b   : > { %v2065_v59 = vpop.f32.mrf.mxu0  ;;  %v7718_v19 = vpop.f32.mrf.mxu1 }
 0x17c   : > { %11069 = vst [vmem:[#allocation10_spill] sm:$0xff] %v9331_v28  ;;  %v1828_v63 = vadd.f32 %v7718_v19, %v9209_v52 }
 0x17d   : > { %v7755_v3 = vpop.f32.mrf.mxu0  ;;  %v1759_v11 = vpop.f32.mrf.mxu1 }
 0x17e   : > { %v1826_v34 = vadd.f32 %v1759_v11, %v9213_v51  ;;  %v9338_v42 = vadd.f32 %v7754_v25, %v1828_v63 }
 0x17f   : > { %v9336_v48 = vpop.f32.mrf.mxu0  ;;  %v7719_v2 = vpop.f32.mrf.mxu1 }
 0x180   : > { %11070 = vst [vmem:[#allocation11_spill] sm:$0xff] %v9338_v42  ;;  %v1829_v53 = vadd.f32 %v7719_v2, %v9219_v20  ;;  %v9341_v22 = vadd.f32 %v2065_v59, %v1826_v34 }
 0x181   : > { %v7758_v44 = vpop.f32.mrf.mxu0  ;;  %v9343_v23 = vpop.f32.mrf.mxu1 }
 0x182   : > { %11071 = vst [vmem:[#allocation12_spill] sm:$0xff] %v9341_v22  ;;  %v9345_v60 = vadd.f32 %v7755_v3, %v1829_v53 }
 0x183   : > { %v2081_v10 = vpop.f32.mrf.mxu0  ;;  %v7722_v52 = vpop.f32.mrf.mxu1 }
 0x184   : > { %11072 = vst [vmem:[#allocation13_spill] sm:$0xff] %v9345_v60  ;;  %v1832_v19 = vadd.f32 %v7722_v52, %v9228_v1 }
 0x185   : > { %v7759_v28 = vpop.f32.mrf.mxu0  ;;  %v1775_v51 = vpop.f32.mrf.mxu1 }
 0x186   : > { %v1830_v11 = vadd.f32 %v1775_v51, %v9232_v4  ;;  %v9351_v63 = vadd.f32 %v7758_v44, %v1832_v19 }
 0x187   : > { %v9349_v25 = vpop.f32.mrf.mxu0  ;;  %v7723_v20 = vpop.f32.mrf.mxu1 }
 0x188   : > { %11073 = vst [vmem:[#allocation14_spill] sm:$0xff] %v9351_v63  ;;  %v1833_v59 = vadd.f32 %v7723_v20, %v9236_v13  ;;  %v9354_v2 = vadd.f32 %v2081_v10, %v1830_v11 }
 0x189   : > { %v7762_v34 = vpop.f32.mrf.mxu0  ;;  %v9356_v22 = vpop.f32.mrf.mxu1 }
 0x18a   : > { %11074 = vst [vmem:[#allocation15_spill] sm:$0xff] %v9354_v2  ;;  %v9358_v53 = vadd.f32 %v7759_v28, %v1833_v59 }
 0x18b   : > { %v2097_v3 = vpop.f32.mrf.mxu0  ;;  %v7726_v1 = vpop.f32.mrf.mxu1 }
 0x18c   : > { %11075 = vst [vmem:[#allocation16_spill] sm:$0xff] %v9358_v53  ;;  %v1836_v52 = vadd.f32 %v7726_v1, %v9243_v38 }
 0x18d   : > { %v7763_v60 = vpop.f32.mrf.mxu0  ;;  %v1791_v4 = vpop.f32.mrf.mxu1 }
 0x18e   : > { %v1834_v51 = vadd.f32 %v1791_v4, %v9249_v7  ;;  %v9364_v19 = vadd.f32 %v7762_v34, %v1836_v52 }
 0x18f   : > { %v9362_v44 = vpop.f32.mrf.mxu0  ;;  %v7727_v13 = vpop.f32.mrf.mxu1 }
 0x190   : > { %11076 = vst [vmem:[#allocation17_spill] sm:$0xff] %v9362_v44  ;;  %11077 = vst [vmem:[#allocation18_spill] sm:$0xff] %v9364_v19  ;;  %v1837_v10 = vadd.f32 %v7727_v13, %v9253_v46  ;;  %v9369_v20 = vadd.f32 %v2097_v3, %v1834_v51 }
 0x191   : > { %v9367_v11 = vpop.f32.mrf.mxu0  ;;  %v9371_v28 = vpop.f32.mrf.mxu1 }
 0x192   : > { %11078 = vst [vmem:[#allocation19_spill] sm:$0xff] %v9369_v20  ;;  %11079 = vst [vmem:[#allocation20_spill] sm:$0xff] %v9371_v28  ;;  %v9375_v38 = vadd.f32 %v7763_v60, %v1837_v10 }
 0x193   : > { %v9373_v59 = vpop.f32.mrf.mxu0  ;;  %v7770_v1 = vpop.f32.mrf.mxu1 }
 0x194   : > { %11080 = vst [vmem:[#allocation21_spill] sm:$0xff] %v9375_v38 }
 0x195   : > { %v9377_v53 = vpop.f32.mrf.mxu0  ;;  %v9379_v7 = vpop.f32.mrf.mxu1 }
 0x197   : > { %v9381_v34 = vpop.f32.mrf.mxu0  ;;  %v9383_v52 = vpop.f32.mrf.mxu1 }
 0x199   : > { %v9385_v46 = vpop.f32.mrf.mxu0  ;;  %v9387_v4 = vpop.f32.mrf.mxu1 }
 0x19b   : > { %v9389_v3 = vpop.f32.mrf.mxu0  ;;  %v9391_v51 = vpop.f32.mrf.mxu1 }
 0x19d   : > { %v9393_v13 = vpop.f32.mrf.mxu0  ;;  %v9395_v60 = vpop.f32.mrf.mxu1 }
 0x19e   : > { %11081 = vst [vmem:[#allocation22_spill] sm:$0xff] %v9393_v13 }
 0x19f   : > { %v9397_v10 = vpop.f32.mrf.mxu0  ;;  %v9399_v44 = vpop.f32.mrf.mxu1 }
 0x1a0   : > { %11082 = vst [vmem:[#allocation23_spill] sm:$0xff] %v9397_v10 }
 0x1a1   : > { %v9401_v38 = vpop.f32.mrf.mxu0  ;;  %v9403_v20 = vpop.f32.mrf.mxu1 }
 0x1a2   : > { %11083 = vst [vmem:[#allocation24_spill] sm:$0xff] %v9401_v38 }
 0x1a3   : > { %v9405_v19 = vpop.f32.mrf.mxu0  ;;  %v9407_v2 = vpop.f32.mrf.mxu1 }
 0x1a4   : > { %11084 = vst [vmem:[#allocation25_spill] sm:$0xff] %v9405_v19 }
 0x1a5   : > { %v9409_v63 = vpop.f32.mrf.mxu0  ;;  %v9411_v42 = vpop.f32.mrf.mxu1 }
 0x1a6   : > { %11085 = vst [vmem:[#allocation26_spill] sm:$0xff] %v9409_v63  ;;  %11086 = vst [vmem:[#allocation27_spill] sm:$0xff] %v9411_v42 }
 0x1a7   : > { %v9413_v35 = vpop.f32.mrf.mxu0  ;;  %v9420_v27 = vpop.f32.mrf.mxu1 }
 0x1a8   : > { %11087 = vst [vmem:[#allocation28_spill] sm:$0xff] %v9413_v35  ;;  %11089 = vst [vmem:[#allocation30_spill] sm:$0xff] %v9420_v27 }
 0x1a9   : > { %v9422_v38 = vpop.f32.mrf.mxu0  ;;  %v9425_v19 = vpop.f32.mrf.mxu1 }
 0x1aa   : > { %11090 = vst [vmem:[#allocation31_spill] sm:$0xff] %v9422_v38  ;;  %11091 = vst [vmem:[#allocation32_spill] sm:$0xff] %v9425_v19 }
 0x1ab   : > { %v9427_v10 = vpop.f32.mrf.mxu0  ;;  %v9429_v63 = vpop.f32.mrf.mxu1 }
 0x1ac   : > { %11092 = vst [vmem:[#allocation33_spill] sm:$0xff] %v9427_v10  ;;  %11093 = vst [vmem:[#allocation34_spill] sm:$0xff] %v9429_v63 }
 0x1ad   : > { %v9431_v14 = vpop.f32.mrf.mxu0  ;;  %v9433_v35 = vpop.f32.mrf.mxu1 }
 0x1ae   : > { %11094 = vst [vmem:[#allocation35_spill] sm:$0xff] %v9431_v14  ;;  %11095 = vst [vmem:[#allocation36_spill] sm:$0xff] %v9433_v35 }
 0x1af   : > { %v9435_v28 = vpop.f32.mrf.mxu0  ;;  %v9437_v13 = vpop.f32.mrf.mxu1 }
 0x1b0   : > { %11096 = vst [vmem:[#allocation37_spill] sm:$0xff] %v9435_v28  ;;  %11097 = vst [vmem:[#allocation38_spill] sm:$0xff] %v9437_v13 }
 0x1b1   : > { %v9439_v42 = vpop.f32.mrf.mxu0  ;;  %v9441_v27 = vpop.f32.mrf.mxu1 }
 0x1b2   : > { %11098 = vst [vmem:[#allocation39_spill] sm:$0xff] %v9439_v42  ;;  %11099 = vst [vmem:[#allocation40_spill] sm:$0xff] %v9441_v27 }
 0x1b3   : > { %v9443_v38 = vpop.f32.mrf.mxu0  ;;  %v9445_v17 = vpop.f32.mrf.mxu1 }
 0x1b4   : > { %11100 = vst [vmem:[#allocation41_spill] sm:$0xff] %v9443_v38  ;;  %11101 = vst [vmem:[#allocation42_spill] sm:$0xff] %v9445_v17 }
 0x1b5   : > { %v9447_v19 = vpop.f32.mrf.mxu0  ;;  %v9449_v10 = vpop.f32.mrf.mxu1 }
 0x1b6   : > { %11102 = vst [vmem:[#allocation43_spill] sm:$0xff] %v9447_v19  ;;  %11103 = vst [vmem:[#allocation44_spill] sm:$0xff] %v9449_v10 }
 0x1b7   : > { %v9451_v63 = vpop.f32.mrf.mxu0  ;;  %v9453_v14 = vpop.f32.mrf.mxu1 }
 0x1b8   : > { %11104 = vst [vmem:[#allocation45_spill] sm:$0xff] %v9451_v63  ;;  %11105 = vst [vmem:[#allocation46_spill] sm:$0xff] %v9453_v14 }
 0x1b9   : > { %v9455_v35 = vpop.f32.mrf.mxu0  ;;  %v9457_v28 = vpop.f32.mrf.mxu1 }
 0x1ba   : > { %11106 = vst [vmem:[#allocation47_spill] sm:$0xff] %v9455_v35  ;;  %11107 = vst [vmem:[#allocation48_spill] sm:$0xff] %v9457_v28 }
 0x1bb   : > { %v9459_v13 = vpop.f32.mrf.mxu0  ;;  %v9461_v42 = vpop.f32.mrf.mxu1 }
 0x1bc   : > { %11108 = vst [vmem:[#allocation49_spill] sm:$0xff] %v9459_v13  ;;  %11109 = vst [vmem:[#allocation50_spill] sm:$0xff] %v9461_v42 }
 0x1bd   : > { %v9463_v27 = vpop.f32.mrf.mxu0  ;;  %v9465_v38 = vpop.f32.mrf.mxu1 }
 0x1be   : > { %11110 = vst [vmem:[#allocation51_spill] sm:$0xff] %v9463_v27  ;;  %11111 = vst [vmem:[#allocation52_spill] sm:$0xff] %v9465_v38 }
 0x1bf   : > { %v9467_v17 = vpop.f32.mrf.mxu0  ;;  %v9469_v19 = vpop.f32.mrf.mxu1 }
 0x1c0   : > { %11112 = vst [vmem:[#allocation53_spill] sm:$0xff] %v9467_v17  ;;  %11113 = vst [vmem:[#allocation54_spill] sm:$0xff] %v9469_v19 }
 0x1c1   : > { %v9471_v10 = vpop.f32.mrf.mxu0  ;;  %v9473_v63 = vpop.f32.mrf.mxu1 }
 0x1c2   : > { %11114 = vst [vmem:[#allocation55_spill] sm:$0xff] %v9471_v10  ;;  %11115 = vst [vmem:[#allocation56_spill] sm:$0xff] %v9473_v63 }
 0x1c3   : > { %v9475_v14 = vpop.f32.mrf.mxu0  ;;  %v9477_v35 = vpop.f32.mrf.mxu1 }
 0x1c4   : > { %11116 = vst [vmem:[#allocation57_spill] sm:$0xff] %v9475_v14 }
 0x1c5   : > { %v9479_v28 = vpop.f32.mrf.mxu0  ;;  %v9481_v13 = vpop.f32.mrf.mxu1 }
 0x1c6   : > { %11117 = vst [vmem:[#allocation58_spill] sm:$0xff] %v9479_v28  ;;  %11118 = vst [vmem:[#allocation59_spill] sm:$0xff] %v9481_v13  ;;  %v1807_v28 = vadd.f32 %v9264_v50, %v9129_v41  ;;  %v2420_v13 = vadd.f32 %v7770_v1, %v9259_v16  ;;  %v1215_v41 = vadd.f32 %v9251_v37, %v9106_v15 }
 0x1c7   : > { %v9483_v42 = vpop.f32.mrf.mxu0  ;;  %v9485_v27 = vpop.f32.mrf.mxu1 }
 0x1c8   : > { %11119 = vst [vmem:[#allocation60_spill] sm:$0xff] %v9483_v42 }
 0x1c9   : > { %v9487_v38 = vpop.f32.mrf.mxu0  ;;  %v9489_v17 = vpop.f32.mrf.mxu1 }
 0x1ca   : > { %11120 = vst [vmem:[#allocation61_spill] sm:$0xff] %v9487_v38  ;;  %11121 = vst [vmem:[#allocation62_spill] sm:$0xff] %v9489_v17  ;;  %v1167_v38 = vadd.f32 %v9198_v47, %v9037_v5  ;;  %v1183_v17 = vadd.f32 %v9215_v0, %v9061_v39  ;;  %v1811_v5 = vadd.f32 %v9277_v54, %v9147_v56 }
 0x1cb   : > { %v9491_v19 = vpop.f32.mrf.mxu0  ;;  %v9493_v10 = vpop.f32.mrf.mxu1  ;;  %v2421_v39 = vadd.f32 %v9383_v52, %v9266_v49  ;;  %v2113_v47 = vadd.f32 %v9257_v55, %v1807_v28  ;;  %v2727_v0 = vadd.f32 %v9367_v11, %v2420_v13  ;;  %v1819_v55 = vadd.f32 %v9311_v58, %v9186_v57 }
 0x1cc   : > { %11122 = vst [vmem:[#allocation63_spill] sm:$0xff] %v9491_v19  ;;  %11123 = vst [vmem:[#allocation64_spill] sm:$0xff] %v9493_v10  ;;  %v1521_v15 = vadd.f32 %v9207_v24, %v1183_v17  ;;  %v9539_v24 = vld [vmem:[%s11051_s5] ss:$0 sm:$0xff]  ;;  %v2424_v58 = vadd.f32 %v9391_v51, %v9272_v61  ;;  %v2425_v61 = vadd.f32 %v9399_v44, %v9279_v9 }
 0x1cd   : > { %v9495_v63 = vpop.f32.mrf.mxu0  ;;  %v9497_v14 = vpop.f32.mrf.mxu1  ;;  %v2419_v56 = vadd.f32 %v9387_v4, %v2113_v47 }
 0x1ce   : > { %11124 = vst [vmem:[#allocation65_spill] sm:$0xff] %v9495_v63  ;;  %11125 = vst [vmem:[#allocation66_spill] sm:$0xff] %v9497_v14  ;;  %v1199_v63 = vadd.f32 %v9234_v8, %v9085_v33  ;;  %v2418_v14 = vadd.f32 %v9379_v7, %v9262_v29  ;;  %v1815_v8 = vadd.f32 %v9293_v30, %v9165_v12 }
 0x1cf   : > { %v9502_v42 = vpop.f32.mrf.mxu0  ;;  %v9508_v19 = vpop.f32.mrf.mxu1  ;;  %v1517_v29 = vadd.f32 %v9189_v32, %v1167_v38  ;;  %v1827_v12 = vadd.f32 %v9343_v23, %v1521_v15  ;;  %v1529_v32 = vadd.f32 %v9241_v26, %v1215_v41  ;;  %v2117_v30 = vadd.f32 %v9270_v21, %v1811_v5  ;;  %v9552_v23 = vld [vmem:[%s11052_s6] ss:$0 sm:$0xff]  ;;  %v11127_v15 = vld [vmem:[#allocation22_spill] sm:$0xff] }
 0x1d0   : > { %v1525_v50 = vadd.f32 %v9226_v36, %v1199_v63  ;;  %v2725_v49 = vadd.f32 %v9373_v59, %v2418_v14  ;;  %v2728_v63 = vadd.f32 %v9377_v53, %v2421_v39  ;;  %v2422_v26 = vadd.f32 %v9395_v60, %v9275_v62 }
 0x1d1   : > { %v7878_v10 = vpop.f32.mrf.mxu0  ;;  %v9516_v16 = vpop.f32.mrf.mxu1  ;;  %v1823_v11 = vadd.f32 %v9329_v31, %v1517_v29  ;;  %v2121_v31 = vadd.f32 %v9286_v45, %v1815_v8  ;;  %v9559_v62 = vadd.f32 %v9302_v6, %v1819_v55  ;;  %v9565_v52 = vadd.f32 %v9336_v48, %v1827_v12  ;;  %v11131_v12 = vld [vmem:[#allocation23_spill] sm:$0xff] }
 0x1d2   : > { %v1831_v57 = vadd.f32 %v9356_v22, %v1525_v50  ;;  %v2726_v22 = vadd.f32 %v9381_v34, %v2419_v56  ;;  %v2423_v41 = vadd.f32 %v9403_v20, %v2117_v30  ;;  %v2731_v6 = vadd.f32 %v9385_v46, %v2424_v58  ;;  %v11126_v20 = vld [vmem:[#allocation27_spill] sm:$0xff] }
 0x1d3   : > { %v3210_v33 = vpop.f32.mrf.mxu0  ;;  %v7842_v37 = vpop.f32.mrf.mxu1  ;;  %v9562_v45 = vadd.f32 %v9317_v43, %v1823_v11  ;;  %v2729_v44 = vadd.f32 %v9389_v3, %v2422_v26  ;;  %v2426_v8 = vadd.f32 %v11126_v20, %v9291_v18  ;;  %v2732_v46 = vadd.f32 %v11127_v15, %v2425_v61  ;;  %v11140_v20 = vld [vmem:[#allocation6_spill] sm:$0xff] }
 0x1d4   : > { %v3033_v54 = vadd.f32 %v7842_v37, %v2727_v0  ;;  %v9571_v9 = vadd.f32 %v9349_v25, %v1831_v57  ;;  %v11132_v57 = vld [vmem:[#allocation32_spill] sm:$0xff] }
 0x1d5   : > { %v7879_v1 = vpop.f32.mrf.mxu0  ;;  %v2904_v36 = vpop.f32.mrf.mxu1  ;;  %v2427_v58 = vadd.f32 %v11132_v57, %v2121_v31  ;;  %v11138_v31 = vld [vmem:[#allocation36_spill] sm:$0xff] }
 0x1d6   : > { %v3339_v17 = vadd.f32 %v7878_v10, %v3033_v54  ;;  %v3031_v14 = vadd.f32 %v2904_v36, %v2725_v49  ;;  %v11128_v49 = vld [vmem:[#allocation20_spill] sm:$0xff]  ;;  %v2730_v36 = vadd.f32 %v11131_v12, %v2423_v41 }
 0x1d7   : > { %v3213_v28 = vpop.f32.mrf.mxu0  ;;  %v7843_v21 = vpop.f32.mrf.mxu1 }
 0x1d8   : > { %v3378_v59 = vmul.f32 %v9539_v24, %v3339_v17  ;;  %v3337_v53 = vadd.f32 %v3210_v33, %v3031_v14  ;;  %v3034_v38 = vadd.f32 %v7843_v21, %v2728_v63  ;;  %v2428_v33 = vadd.f32 %v9407_v2, %v9288_v40  ;;  %v11129_v40 = vld [vmem:[#allocation3_spill] sm:$0xff]  ;;  %v11130_v2 = vld [vmem:[#allocation30_spill] sm:$0xff]  ;;  %v11133_v21 = vld [vmem:[#allocation24_spill] sm:$0xff] }
 0x1d9   : > { %v7882_v7 = vpop.f32.mrf.mxu0  ;;  %v2907_v4 = vpop.f32.mrf.mxu1  ;;  %v2429_v55 = vadd.f32 %v11130_v2, %v11129_v40 }
 0x1da   : > { %v3417_v51 = vadd.f32 %v9552_v23, %v3378_v59  ;;  %v3376_v13 = vmul.f32 %v9539_v24, %v3337_v53  ;;  %v3340_v60 = vadd.f32 %v7879_v1, %v3034_v38  ;;  %v3032_v34 = vadd.f32 %v2907_v4, %v2726_v22  ;;  %v11134_v53 = vld [vmem:[#allocation25_spill] sm:$0xff] }
 0x1db   : > { %v3226_v10 = vpop.f32.mrf.mxu0  ;;  %v7846_v43 = vpop.f32.mrf.mxu1  ;;  %v9586_v1 = vadd.f32 %v11128_v49, %v1529_v32  ;;  %v2735_v59 = vadd.f32 %v11133_v21, %v2428_v33  ;;  %v2733_v38 = vadd.f32 %v11134_v53, %v2426_v8  ;;  %v11141_v8 = vld [vmem:[#allocation38_spill] sm:$0xff]  ;;  %v11149_v21 = vld [vmem:[#allocation44_spill] sm:$0xff] }
 0x1dc   : > { %v3449_v48 = vmax.f32 %v3417_v51, 0.0  ;;  %v3415_v5 = vadd.f32 %v9552_v23, %v3376_v13  ;;  %v3379_v39 = vmul.f32 %v9539_v24, %v3340_v60  ;;  %v3338_v47 = vadd.f32 %v3213_v28, %v3032_v34  ;;  %v11135_v13 = vld [vmem:[#allocation4_spill] sm:$0xff]  ;;  %v11136_v60 = vld [vmem:[#allocation34_spill] sm:$0xff] }
 0x1dd   : > { %v7883_v0 = vpop.f32.mrf.mxu0  ;;  %v3037_v25 = vadd.f32 %v7846_v43, %v2731_v6  ;;  %v2920_v29 = vpop.f32.mrf.mxu1  ;;  %v2432_v34 = vadd.f32 %v11136_v60, %v11135_v13 }
 0x1de   : > { %3481 = vst.msk [vmem:[#allocation2 + $0x31] sm:$0xff] %vm480_vm0, %v3449_v48  ;;  %v3447_v3 = vmax.f32 %v3415_v5, 0.0  ;;  %v3418_v37 = vadd.f32 %v9552_v23, %v3379_v39  ;;  %v3377_v50 = vmul.f32 %v9539_v24, %v3338_v47  ;;  %v3035_v56 = vadd.f32 %v2920_v29, %v2729_v44  ;;  %v11139_v44 = vld [vmem:[#allocation26_spill] sm:$0xff]  ;;  %v11142_v29 = vld [vmem:[#allocation40_spill] sm:$0xff] }
 0x1df   : > { %v3229_v54 = vpop.f32.mrf.mxu0  ;;  %v3343_v18 = vadd.f32 %v7882_v7, %v3037_v25  ;;  %v7847_v11 = vpop.f32.mrf.mxu1  ;;  %v2736_v48 = vadd.f32 %v11139_v44, %v2429_v55  ;;  %v2433_v25 = vadd.f32 %v11141_v8, %v11140_v20  ;;  %v2431_v15 = vadd.f32 %v11142_v29, %v9559_v62  ;;  %v11155_v8 = vld [vmem:[#allocation39_spill] sm:$0xff] }
 0x1e0   : > { %3479 = vst.msk [vmem:[#allocation2 + $0x19] sm:$0xff] %vm480_vm0, %v3447_v3  ;;  %v3450_v30 = vmax.f32 %v3418_v37, 0.0  ;;  %v3416_v17 = vadd.f32 %v9552_v23, %v3377_v50  ;;  %v3341_v14 = vadd.f32 %v3226_v10, %v3035_v56  ;;  %v3038_v63 = vadd.f32 %v7847_v11, %v2732_v46  ;;  %v11137_v10 = vld [vmem:[#allocation5_spill] sm:$0xff]  ;;  %v11143_v37 = vld [vmem:[#allocation28_spill] sm:$0xff] }
 0x1e1   : > { %v7886_v28 = vpop.f32.mrf.mxu0  ;;  %v3382_v32 = vmul.f32 %v9539_v24, %v3343_v18  ;;  %v2923_v26 = vpop.f32.mrf.mxu1  ;;  %v2430_v41 = vadd.f32 %v11138_v31, %v11137_v10  ;;  %v2734_v50 = vadd.f32 %v11143_v37, %v2427_v58  ;;  %v11145_v18 = vld [vmem:[#allocation42_spill] sm:$0xff] }
 0x1e2   : > { %3482 = vst.msk [vmem:[#allocation2 + $0x39] sm:$0xff] %vm480_vm0, %v3450_v30  ;;  %v3448_v22 = vmax.f32 %v3416_v17, 0.0  ;;  %v3380_v7 = vmul.f32 %v9539_v24, %v3341_v14  ;;  %v3344_v61 = vadd.f32 %v7883_v0, %v3038_v63  ;;  %v3036_v4 = vadd.f32 %v2923_v26, %v2730_v36  ;;  %v11146_v30 = vld [vmem:[#allocation31_spill] sm:$0xff]  ;;  %v11147_v17 = vld [vmem:[#allocation33_spill] sm:$0xff]  ;;  %v11148_v26 = vld [vmem:[#allocation8_spill] sm:$0xff] }
 0x1e3   : > { %v3242_v51 = vpop.f32.mrf.mxu0  ;;  %v3421_v6 = vadd.f32 %v9552_v23, %v3382_v32  ;;  %v7850_v43 = vpop.f32.mrf.mxu1  ;;  %v2739_v62 = vadd.f32 %v11146_v30, %v2432_v34  ;;  %v2737_v14 = vadd.f32 %v11147_v17, %v2430_v41  ;;  %v11156_v17 = vld [vmem:[#allocation11_spill] sm:$0xff] }
 0x1e4   : > { %3480 = vst.msk [vmem:[#allocation2 + $0x21] sm:$0xff] %vm480_vm0, %v3448_v22  ;;  %v3419_v5 = vadd.f32 %v9552_v23, %v3380_v7  ;;  %v3383_v39 = vmul.f32 %v9539_v24, %v3344_v61  ;;  %v3342_v47 = vadd.f32 %v3229_v54, %v3036_v4  ;;  %v3041_v0 = vadd.f32 %v7850_v43, %v2735_v59  ;;  %v11144_v54 = vld [vmem:[#allocation7_spill] sm:$0xff]  ;;  %v11151_v61 = vld [vmem:[#allocation37_spill] sm:$0xff]  ;;  %v11153_v43 = vld [vmem:[#allocation46_spill] sm:$0xff] }
 0x1e5   : > { %v7887_v33 = vpop.f32.mrf.mxu0  ;;  %v3453_v46 = vmax.f32 %v3421_v6, 0.0  ;;  %v2936_v3 = vpop.f32.mrf.mxu1  ;;  %v2436_v11 = vadd.f32 %v11145_v18, %v11144_v54  ;;  %v2434_v59 = vadd.f32 %v11149_v21, %v11148_v26  ;;  %v9627_v4 = vadd.f32 %v11151_v61, %v2431_v15  ;;  %v11152_v6 = vld [vmem:[#allocation10_spill] sm:$0xff]  ;;  %v3554_v20 = vld [vmem:[#allocation2 + $0x30] sm:$0xff]  ;;  %v8304_v18 = vld [vmem:[%s11053_s7 + $0x20] sm:$0xff]  }
 0x1e6   : > { %v3451_v56 = vmax.f32 %v3419_v5, 0.0  ;;  %v3422_v49 = vadd.f32 %v9552_v23, %v3383_v39  ;;  %v3381_v40 = vmul.f32 %v9539_v24, %v3342_v47  ;;  %v3347_v2 = vadd.f32 %v7886_v28, %v3041_v0  ;;  %v3859_v30 = vld [vmem:[#allocation2 + $0x31] sm:$0xff]  ;;  %v11158_v21 = vld [vmem:[#allocation41_spill] sm:$0xff] }
 0x1e7   : > { %v3245_v55 = vpop.f32.mrf.mxu0  ;;  %3485 = vst.msk [vmem:[#allocation2 + $0x61] sm:$0xff] %vm480_vm0, %v3453_v46  ;;  %v3039_v12 = vadd.f32 %v2936_v3, %v2733_v38  ;;  %v7851_v36 = vpop.f32.mrf.mxu1  ;;  %v11150_v38 = vld [vmem:[#allocation35_spill] sm:$0xff]  ;;  %v2437_v44 = vadd.f32 %v11153_v43, %v11152_v6  ;;  %v3552_v37 = vld [vmem:[#allocation2 + $0x18] sm:$0xff]  ;;  %v11161_v6 = vld [vmem:[#allocation45_spill] sm:$0xff] }
 0x1e8   : > { %3483 = vst.msk [vmem:[#allocation2 + $0x49] sm:$0xff] %vm480_vm0, %v3451_v56  ;;  %v3454_v63 = vmax.f32 %v3422_v49, 0.0  ;;  %v3420_v57 = vadd.f32 %v9552_v23, %v3381_v40  ;;  %v3386_v58 = vmul.f32 %v9539_v24, %v3347_v2  ;;  %v3042_v28 = vadd.f32 %v7851_v36, %v2736_v48 }
 0x1e9   : > { %v7890_v32 = vpop.f32.mrf.mxu0  ;;  %v3345_v53 = vadd.f32 %v3242_v51, %v3039_v12  ;;  %v2939_v22 = vpop.f32.mrf.mxu1  ;;  %v2740_v7 = vadd.f32 %v11150_v38, %v2433_v25  ;;  %v3555_v41 = vld [vmem:[#allocation2 + $0x38] sm:$0xff]  ;;  %v9637_v25 = vadd.f32 %v11155_v8, %v2436_v11 }
 0x1ea   : > { %3486 = vst.msk [vmem:[#allocation2 + $0x69] sm:$0xff] %vm480_vm0, %v3454_v63  ;;  %v3452_v13 = vmax.f32 %v3420_v57, 0.0  ;;  %v3425_v60 = vadd.f32 %v9552_v23, %v3386_v58  ;;  %v3348_v34 = vadd.f32 %v7887_v33, %v3042_v28  ;;  %v3040_v10 = vadd.f32 %v2939_v22, %v2734_v50  ;;  %v11154_v51 = vld [vmem:[#allocation48_spill] sm:$0xff]  ;;  %v11157_v63 = vld [vmem:[#allocation50_spill] sm:$0xff] }
 0x1eb   : > { %v3258_v31 = vpop.f32.mrf.mxu0  ;;  %v2435_v48 = vadd.f32 %v11154_v51, %v9562_v45  ;;  %v3384_v5 = vmul.f32 %v9539_v24, %v3345_v53  ;;  %v7854_v39 = vpop.f32.mrf.mxu1  ;;  %v3553_v47 = vld [vmem:[#allocation2 + $0x20] sm:$0xff]  ;;  %v9646_v54 = vpack.c.bf16 %v3555_v41, %v3554_v20  ;;  %v2440_v57 = vadd.f32 %v11157_v63, %v11156_v17  ;;  %v11164_v20 = vld [vmem:[#allocation52_spill] sm:$0xff] }
 0x1ec   : > { %v3858_v0 = vld [vmem:[#allocation2 + $0x21] sm:$0xff]  ;;  %3484 = vst.msk [vmem:[#allocation2 + $0x51] sm:$0xff] %vm480_vm0, %v3452_v13  ;;  %v3457_v33 = vmax.f32 %v3425_v60, 0.0  ;;  %v3387_v29 = vmul.f32 %v9539_v24, %v3348_v34  ;;  %v3346_v15 = vadd.f32 %v3245_v55, %v3040_v10  ;;  %v3045_v46 = vadd.f32 %v7854_v39, %v2739_v62  ;;  %v3857_v50 = vld [vmem:[#allocation2 + $0x19] sm:$0xff]  ;;  %v11160_v10 = vld [vmem:[#allocation43_spill] sm:$0xff] }
 0x1ed   : > { %v7891_v3 = vpop.f32.mrf.mxu0  ;;  %v3860_v45 = vld [vmem:[#allocation2 + $0x39] sm:$0xff]  ;;  %v3423_v56 = vadd.f32 %v9552_v23, %v3384_v5  ;;  %v2952_v49 = vpop.f32.mrf.mxu1  ;;  %v9642_v40 = vpack.c.bf16 %v3553_v47, %v3552_v37  ;;  %v9644_v2 = vpack.c.bf16 %v3858_v0, %v3857_v50  ;;  %v2741_v53 = vadd.f32 %v11158_v21, %v2434_v59 }
 0x1ee   : > { %3489 = vst.msk [vmem:[#allocation2 + $0x91] sm:$0xff] %vm480_vm0, %v3457_v33  ;;  %v3426_v55 = vadd.f32 %v9552_v23, %v3387_v29  ;;  %v3385_v11 = vmul.f32 %v9539_v24, %v3346_v15  ;;  %v3351_v12 = vadd.f32 %v7890_v32, %v3045_v46  ;;  %v3043_v36 = vadd.f32 %v2952_v49, %v2737_v14  ;;  %v8306_v14 = vld [vmem:[%s11053_s7 + $0x30] sm:$0xff]   ;;  %v11159_v13 = vld [vmem:[#allocation9_spill] sm:$0xff]  ;;  %v11166_v29 = vld [vmem:[#allocation54_spill] sm:$0xff] }
 0x1ef   : > { %v3261_v62 = vpop.f32.mrf.mxu0  ;;  %v3455_v58 = vmax.f32 %v3423_v56, 0.0  ;;  %7913 = vmatmul.mubr.msk.bf16.vlgmr.msra.gmra.mxu1 %vm480_vm0, %v9642_v40  ;;  %7949 = vmatmul.mubr.msk.bf16.vlgmr.msra.gmra.mxu0 %vm480_vm0, %v9644_v2  ;;  %v7855_v28 = vpop.f32.mrf.mxu1  ;;  %v9660_v26 = vpack.c.bf16 %v3860_v45, %v3859_v30  ;;  %v2744_v41 = vadd.f32 %v11160_v10, %v2437_v44  ;;  %v9676_v43 = vadd.f32 %v11161_v6, %v2435_v48  ;;  %v11162_v0 = vld [vmem:[#allocation29_spill] sm:$0xff]  ;;  %v11163_v48 = vld [vmem:[#allocation12_spill] sm:$0xff]  ;;  %v11167_v49 = vld [vmem:[#allocation47_spill] sm:$0xff] }
 0x1f0   : > { %v3458_v32 = vmax.f32 %v3426_v55, 0.0  ;;  %v3424_v22 = vadd.f32 %v9552_v23, %v3385_v11  ;;  %v3390_v38 = vmul.f32 %v9539_v24, %v3351_v12  ;;  %v3349_v61 = vadd.f32 %v3258_v31, %v3043_v36  ;;  %7981 = vmatpush3.bf16.msra.mxu1 %v11159_v13  ;;  %7916 = vmatprep.mubr.msk.bf16.mxu1 %vm480_vm0, %v9646_v54  ;;  %v9681_v31 = vld [vmem:[%s11053_s7 + $0x48] sm:$0xff]   ;;  %v11165_v33 = vld [vmem:[#allocation13_spill] sm:$0xff] }
 0x1f1   : > { %v7894_v60 = vpop.f32.mrf.mxu0  ;;  %3487 = vst.msk [vmem:[#allocation2 + $0x79] sm:$0xff] %vm480_vm0, %v3455_v58  ;;  %v3046_v34 = vadd.f32 %v7855_v28, %v2740_v7  ;;  %7952 = vmatprep.mubr.msk.bf16.mxu0 %vm480_vm0, %v9660_v26  ;;  %v2955_v59 = vpop.f32.mrf.mxu1  ;;  %7982 = vmatprep.subr.bf16.mxu1 %v8304_v18  ;;  %v3559_v44 = vld [vmem:[#allocation2 + $0x68] sm:$0xff]  ;;  %v2438_v8 = vadd.f32 %v11164_v20, %v11163_v48  ;;  %v3558_v56 = vld [vmem:[#allocation2 + $0x60] sm:$0xff] }
 0x1f2   : > { %3490 = vst.msk [vmem:[#allocation2 + $0x99] sm:$0xff] %vm480_vm0, %v3458_v32  ;;  %v3456_v51 = vmax.f32 %v3424_v22, 0.0  ;;  %v3429_v7 = vadd.f32 %v9552_v23, %v3390_v38  ;;  %v3388_v5 = vmul.f32 %v9539_v24, %v3349_v61  ;;  %v3044_v39 = vadd.f32 %v2955_v59, %v9627_v4  ;;  %8017 = vmatpush3.bf16.msra.mxu0 %v11162_v0  ;;  %v3556_v17 = vld [vmem:[#allocation2 + $0x48] sm:$0xff]  ;;  %v11168_v6 = vld [vmem:[#allocation49_spill] sm:$0xff] }
 0x1f3   : > { %v3274_v47 = vpop.f32.mrf.mxu0  ;;  %v2441_v15 = vadd.f32 %v11166_v29, %v11165_v33  ;;  %v3352_v46 = vadd.f32 %v7891_v3, %v3046_v34  ;;  %v7858_v37 = vpop.f32.mrf.mxu1  ;;  %v3557_v50 = vld [vmem:[#allocation2 + $0x50] sm:$0xff]  ;;  %v9693_v55 = vadd.f32 %v11167_v49, %v2440_v57  ;;  %8018 = vmatprep.subr.bf16.mxu0 %v8306_v14  ;;  %v9703_v32 = vpack.c.bf16 %v3559_v44, %v3558_v56  ;;  %v3863_v61 = vld [vmem:[#allocation2 + $0x61] sm:$0xff] }
 0x1f4   : > { %v3862_v45 = vld [vmem:[#allocation2 + $0x51] sm:$0xff]  ;;  %3488 = vst.msk [vmem:[#allocation2 + $0x81] sm:$0xff] %vm480_vm0, %v3456_v51  ;;  %v3461_v4 = vmax.f32 %v3429_v7, 0.0  ;;  %v3427_v11 = vadd.f32 %v9552_v23, %v3388_v5  ;;  %v3350_v12 = vadd.f32 %v3261_v62, %v3044_v39  ;;  %v3049_v36 = vadd.f32 %v7858_v37, %v9637_v25  ;;  %v3861_v63 = vld [vmem:[#allocation2 + $0x49] sm:$0xff]  ;;  %7983 = vmatpush3.bf16.msra.mxu1 %v8304_v18 }
 0x1f5   : > { %v7895_v30 = vpop.f32.mrf.mxu0  ;;  %v3864_v3 = vld [vmem:[#allocation2 + $0x69] sm:$0xff]  ;;  %v3391_v58 = vmul.f32 %v9539_v24, %v3352_v46  ;;  %v2968_v28 = vpop.f32.mrf.mxu1  ;;  %v9699_v21 = vpack.c.bf16 %v3557_v50, %v3556_v17  ;;  %v9701_v57 = vpack.c.bf16 %v3862_v45, %v3861_v63  ;;  %8052 = vmatprep.subr.bf16.mxu1 %v9681_v31  ;;  %v9709_v25 = vld [vmem:[%s11053_s7 + $0x58] sm:$0xff]   ;;  %v2745_v51 = vadd.f32 %v11168_v6, %v2438_v8 }
 0x1f6   : > { %3493 = vst.msk [vmem:[#allocation2 + $0xc1] sm:$0xff] %vm480_vm0, %v3461_v4  ;;  %v3459_v62 = vmax.f32 %v3427_v11, 0.0  ;;  %v3389_v18 = vmul.f32 %v9539_v24, %v3350_v12  ;;  %v3355_v22 = vadd.f32 %v7894_v60, %v3049_v36  ;;  %v3047_v38 = vadd.f32 %v2968_v28, %v2741_v53  ;;  %8019 = vmatpush3.bf16.msra.mxu0 %v8306_v14  ;;  %v11169_v39 = vld [vmem:[#allocation56_spill] sm:$0xff]  ;;  %v11170_v0 = vld [vmem:[#allocation14_spill] sm:$0xff]  ;;  %v11171_v33 = vld [vmem:[#allocation51_spill] sm:$0xff] }
 0x1f7   : > { %v3277_v13 = vpop.f32.mrf.mxu0  ;;  %v3430_v34 = vadd.f32 %v9552_v23, %v3391_v58  ;;  %7917 = vmatmul.mubr.msk.bf16.gmra.mxu1 %vm480_vm0, %v9699_v21  ;;  %7953 = vmatmul.mubr.msk.bf16.gmra.mxu0 %vm480_vm0, %v9701_v57  ;;  %v7859_v59 = vpop.f32.mrf.mxu1  ;;  %v9718_v10 = vpack.c.bf16 %v3864_v3, %v3863_v61  ;;  %v2439_v44 = vadd.f32 %v11169_v39, %v9565_v52  ;;  %v3562_v45 = vld [vmem:[#allocation2 + $0x90] sm:$0xff]  ;;  %v11174_v11 = vld [vmem:[#allocation16_spill] sm:$0xff] }
 0x1f8   : > { %3491 = vst.msk [vmem:[#allocation2 + $0xa9] sm:$0xff] %vm480_vm0, %v3459_v62  ;;  %v3428_v53 = vadd.f32 %v9552_v23, %v3389_v18  ;;  %v3394_v60 = vmul.f32 %v9539_v24, %v3355_v22  ;;  %v3353_v14 = vadd.f32 %v3274_v47, %v3047_v38  ;;  %v3050_v7 = vadd.f32 %v7859_v59, %v2744_v41  ;;  %v11173_v49 = vld [vmem:[#allocation59_spill] sm:$0xff]  ;;  %v3865_v22 = vld [vmem:[#allocation2 + $0x79] sm:$0xff] }
 0x1f9   : > { %7920 = vmatprep.mubr.msk.bf16.mxu1 %vm480_vm0, %v9703_v32  ;;  %v7898_v5 = vpop.f32.mrf.mxu0  ;;  %v2444_v48 = vadd.f32 %v9477_v35, %v11170_v0  ;;  %v3462_v20 = vmax.f32 %v3430_v34, 0.0  ;;  %7956 = vmatprep.mubr.msk.bf16.mxu0 %vm480_vm0, %v9718_v10  ;;  %v2971_v8 = vpop.f32.mrf.mxu1  ;;  %v2748_v29 = vadd.f32 %v11171_v33, %v2441_v15  ;;  %v3563_v46 = vld [vmem:[#allocation2 + $0x98] sm:$0xff]  ;;  %v11172_v35 = vld [vmem:[#allocation15_spill] sm:$0xff]  ;;  %v2445_v12 = vadd.f32 %v9485_v27, %v11174_v11  ;;  %v11175_v0 = vld [vmem:[#allocation53_spill] sm:$0xff] }
 0x1fa   : > { %8088 = vmatprep.subr.bf16.mxu0 %v9709_v25  ;;  %v3460_v41 = vmax.f32 %v3428_v53, 0.0  ;;  %v3433_v47 = vadd.f32 %v9552_v23, %v3394_v60  ;;  %v3392_v37 = vmul.f32 %v9539_v24, %v3353_v14  ;;  %v3356_v50 = vadd.f32 %v7895_v30, %v3050_v7  ;;  %v3868_v56 = vld [vmem:[#allocation2 + $0x99] sm:$0xff]  ;;  %v3867_v38 = vld [vmem:[#allocation2 + $0x91] sm:$0xff] }
 0x1fb   : > { %v3290_v52 = vpop.f32.mrf.mxu0  ;;  %v2442_v4 = vadd.f32 %v11173_v49, %v11172_v35  ;;  %3494 = vst.msk [vmem:[#allocation2 + $0xc9] sm:$0xff] %vm480_vm0, %v3462_v20  ;;  %v3048_v15 = vadd.f32 %v2971_v8, %v9676_v43  ;;  %v7862_v36 = vpop.f32.mrf.mxu1  ;;  %v3561_v17 = vld [vmem:[#allocation2 + $0x80] sm:$0xff]  ;;  %v9742_v3 = vpack.c.bf16 %v3563_v46, %v3562_v45  ;;  %v3560_v27 = vld [vmem:[#allocation2 + $0x78] sm:$0xff]  ;;  %v9752_v6 = vpack.c.bf16 %v3868_v56, %v3867_v38  ;;  %v11176_v8 = vld [vmem:[#allocation55_spill] sm:$0xff] }
 0x1fc   : > { %v3866_v63 = vld [vmem:[#allocation2 + $0x81] sm:$0xff]  ;;  %3492 = vst.msk [vmem:[#allocation2 + $0xb1] sm:$0xff] %vm480_vm0, %v3460_v41  ;;  %v3465_v30 = vmax.f32 %v3433_v47, 0.0  ;;  %v3431_v58 = vadd.f32 %v9552_v23, %v3392_v37  ;;  %v3395_v28 = vmul.f32 %v9539_v24, %v3356_v50  ;;  %v3053_v62 = vadd.f32 %v7862_v36, %v9693_v55 }
 0x1fd   : > { %v7899_v18 = vpop.f32.mrf.mxu0  ;;  %v3354_v61 = vadd.f32 %v3277_v13, %v3048_v15  ;;  %v2984_v43 = vpop.f32.mrf.mxu1  ;;  %v9748_v34 = vpack.c.bf16 %v3561_v17, %v3560_v27  ;;  %v9750_v59 = vpack.c.bf16 %v3866_v63, %v3865_v22  ;;  %v2746_v20 = vadd.f32 %v11175_v0, %v2439_v44  ;;  %v11177_v37 = vld [vmem:[#allocation62_spill] sm:$0xff]  ;;  %v11178_v45 = vld [vmem:[#allocation57_spill] sm:$0xff] }
 0x1fe   : > { %3497 = vst.msk [vmem:[#allocation2 + $0xf1] sm:$0xff] %vm480_vm0, %v3465_v30  ;;  %v3463_v53 = vmax.f32 %v3431_v58, 0.0  ;;  %v3434_v60 = vadd.f32 %v9552_v23, %v3395_v28  ;;  %v3359_v14 = vadd.f32 %v7898_v5, %v3053_v62  ;;  %v3051_v7 = vadd.f32 %v2984_v43, %v2745_v51  ;;  %v11179_v35 = vld [vmem:[#allocation58_spill] sm:$0xff]  ;;  %v3566_v17 = vld [vmem:[#allocation2 + $0xc0] sm:$0xff]  ;;  %v11181_v58 = vld [vmem:[#allocation64_spill] sm:$0xff] }
 0x1ff   : > { %v3293_v55 = vpop.f32.mrf.mxu0  ;;  %v3393_v39 = vmul.f32 %v9539_v24, %v3354_v61  ;;  %7921 = vmatmul.mubr.msk.bf16.gmra.mxu1 %vm480_vm0, %v9748_v34  ;;  %7957 = vmatmul.mubr.msk.bf16.gmra.mxu0 %vm480_vm0, %v9750_v59  ;;  %v7863_v13 = vpop.f32.mrf.mxu1  ;;  %v2751_v33 = vadd.f32 %v11176_v8, %v2444_v48  ;;  %v2443_v50 = vadd.f32 %v11177_v37, %v9571_v9  ;;  %v11180_v9 = vld [vmem:[#allocation18_spill] sm:$0xff]  ;;  %v11182_v62 = vld [vmem:[#allocation19_spill] sm:$0xff] }
 0x200   : > { %3495 = vst.msk [vmem:[#allocation2 + $0xd9] sm:$0xff] %vm480_vm0, %v3463_v53  ;;  %v3466_v46 = vmax.f32 %v3434_v60, 0.0  ;;  %v3398_v5 = vmul.f32 %v9539_v24, %v3359_v14  ;;  %v3357_v51 = vadd.f32 %v3290_v52, %v3051_v7  ;;  %v3054_v41 = vadd.f32 %v7863_v13, %v2748_v29  ;;  %7924 = vmatprep.mubr.msk.bf16.mxu1 %vm480_vm0, %v9742_v3  ;;  %v11183_v27 = vld [vmem:[#allocation66_spill] sm:$0xff] }
 0x201   : > { %7960 = vmatprep.mubr.msk.bf16.mxu0 %vm480_vm0, %v9752_v6  ;;  %v7902_v47 = vpop.f32.mrf.mxu0  ;;  %v3432_v44 = vadd.f32 %v9552_v23, %v3393_v39  ;;  %v2987_v48 = vpop.f32.mrf.mxu1  ;;  %v2749_v56 = vadd.f32 %v11178_v45, %v2442_v4  ;;  %v2752_v49 = vadd.f32 %v11179_v35, %v2445_v12  ;;  %v2448_v28 = vadd.f32 %v11181_v58, %v11180_v9  ;;  %v3564_v39 = vld [vmem:[#allocation2 + $0xa8] sm:$0xff]  ;;  %v11184_v45 = vld [vmem:[#allocation21_spill] sm:$0xff] }
 0x202   : > { %3498 = vst.msk [vmem:[#allocation2 + $0xf9] sm:$0xff] %vm480_vm0, %v3466_v46  ;;  %v3437_v29 = vadd.f32 %v9552_v23, %v3398_v5  ;;  %v3396_v52 = vmul.f32 %v9539_v24, %v3357_v51  ;;  %v3360_v11 = vadd.f32 %v7899_v18, %v3054_v41  ;;  %v3052_v15 = vadd.f32 %v2987_v48, %v2746_v20  ;;  %v3567_v63 = vld [vmem:[#allocation2 + $0xc8] sm:$0xff]  ;;  %v11187_v58 = vld [vmem:[#allocation61_spill] sm:$0xff] }
 0x203   : > { %v3306_v36 = vpop.f32.mrf.mxu0  ;;  %v3872_v30 = vld [vmem:[#allocation2 + $0xc9] sm:$0xff]  ;;  %v2446_v4 = vadd.f32 %v11183_v27, %v11182_v62  ;;  %v3464_v22 = vmax.f32 %v3432_v44, 0.0  ;;  %v7866_v12 = vpop.f32.mrf.mxu1  ;;  %v3870_v61 = vld [vmem:[#allocation2 + $0xb1] sm:$0xff]  ;;  %v9781_v43 = vpack.c.bf16 %v3567_v63, %v3566_v17  ;;  %v3871_v0 = vld [vmem:[#allocation2 + $0xc1] sm:$0xff]  ;;  %v2449_v35 = vadd.f32 %v9508_v19, %v11184_v45 }
 0x204   : > { %v3565_v38 = vld [vmem:[#allocation2 + $0xb0] sm:$0xff]  ;;  %v3469_v53 = vmax.f32 %v3437_v29, 0.0  ;;  %v3435_v18 = vadd.f32 %v9552_v23, %v3396_v52  ;;  %v3399_v60 = vmul.f32 %v9539_v24, %v3360_v11  ;;  %v3358_v14 = vadd.f32 %v3293_v55, %v3052_v15  ;;  %v11185_v52 = vld [vmem:[#allocation60_spill] sm:$0xff] }
 0x205   : > { %v7903_v7 = vpop.f32.mrf.mxu0  ;;  %v3869_v13 = vld [vmem:[#allocation2 + $0xa9] sm:$0xff]  ;;  %3496 = vst.msk [vmem:[#allocation2 + $0xe1] sm:$0xff] %vm480_vm0, %v3464_v22  ;;  %v3057_v20 = vadd.f32 %v7866_v12, %v2751_v33  ;;  %v3000_v8 = vpop.f32.mrf.mxu1  ;;  %v9786_v46 = vpack.c.bf16 %v3565_v38, %v3564_v39  ;;  %v9790_v51 = vpack.c.bf16 %v3872_v30, %v3871_v0  ;;  %v2750_v11 = vadd.f32 %v11185_v52, %v2443_v50 }
 0x206   : > { %v9788_v5 = vpack.c.bf16 %v3870_v61, %v3869_v13  ;;  %3501 = vst.msk [vmem:[#allocation2 + $0x121] sm:$0xff] %vm480_vm0, %v3469_v53  ;;  %v3467_v41 = vmax.f32 %v3435_v18, 0.0  ;;  %v3438_v37 = vadd.f32 %v9552_v23, %v3399_v60  ;;  %v3397_v55 = vmul.f32 %v9539_v24, %v3358_v14  ;;  %v11188_v27 = vld [vmem:[#allocation63_spill] sm:$0xff] }
 0x207   : > { %v3055_v44 = vadd.f32 %v3000_v8, %v2749_v56  ;;  %v3309_v48 = vpop.f32.mrf.mxu0  ;;  %v3363_v33 = vadd.f32 %v7902_v47, %v3057_v20  ;;  %7925 = vmatmul.mubr.msk.bf16.gmra.mxu1 %vm480_vm0, %v9786_v46  ;;  %v7867_v29 = vpop.f32.mrf.mxu1  ;;  %v11186_v47 = vld [vmem:[#allocation17_spill] sm:$0xff]  ;;  %v2755_v62 = vadd.f32 %v11187_v58, %v2448_v28  ;;  %v2753_v22 = vadd.f32 %v11188_v27, %v2446_v4  ;;  %v3570_v53 = vld [vmem:[#allocation2 + $0xf0] sm:$0xff]  ;;  %v3568_v13 = vld [vmem:[#allocation2 + $0xd8] sm:$0xff] }
 0x208   : > { %7961 = vmatmul.mubr.msk.bf16.gmra.mxu0 %vm480_vm0, %v9788_v5  ;;  %3499 = vst.msk [vmem:[#allocation2 + $0x109] sm:$0xff] %vm480_vm0, %v3467_v41  ;;  %v3470_v15 = vmax.f32 %v3438_v37, 0.0  ;;  %v3436_v17 = vadd.f32 %v9552_v23, %v3397_v55  ;;  %v3058_v63 = vadd.f32 %v7867_v29, %v2752_v49  ;;  %7928 = vmatprep.mubr.msk.bf16.mxu1 %vm480_vm0, %v9781_v43  ;;  %v11189_v28 = vld [vmem:[#allocation65_spill] sm:$0xff]  ;;  %v3875_v20 = vld [vmem:[#allocation2 + $0xf1] sm:$0xff] }
 0x209   : > { %v3361_v56 = vadd.f32 %v3306_v36, %v3055_v44  ;;  %7964 = vmatprep.mubr.msk.bf16.mxu0 %vm480_vm0, %v9790_v51  ;;  %v7906_v19 = vpop.f32.mrf.mxu0  ;;  %v2141_v30 = vadd.f32 %v11186_v47, %v9586_v1  ;;  %v3402_v9 = vmul.f32 %v9539_v24, %v3363_v33  ;;  %v3003_v50 = vpop.f32.mrf.mxu1  ;;  %v3571_v12 = vld [vmem:[#allocation2 + $0xf8] sm:$0xff]  ;;  %v2756_v0 = vadd.f32 %v11189_v28, %v2449_v35 }
 0x20a   : > { %3502 = vst.msk [vmem:[#allocation2 + $0x129] sm:$0xff] %vm480_vm0, %v3470_v15  ;;  %v3468_v49 = vmax.f32 %v3436_v17, 0.0  ;;  %v3364_v38 = vadd.f32 %v7903_v7, %v3058_v63  ;;  %v3056_v61 = vadd.f32 %v3003_v50, %v2750_v11  ;;  %v3876_v18 = vld [vmem:[#allocation2 + $0xf9] sm:$0xff]  ;;  %v9818_v4 = vpack.c.bf16 %v3571_v12, %v3570_v53 }
 0x20b   : > { %v3400_v36 = vmul.f32 %v9539_v24, %v3361_v56  ;;  %v2447_v60 = vadd.f32 %v9516_v16, %v2141_v30  ;;  %v3441_v1 = vadd.f32 %v9552_v23, %v3402_v9  ;;  %v7870_v14 = vpop.f32.mrf.mxu1  ;;  %v3322_v39 = vpop.f32.mrf.mxu0  ;;  %v3873_v16 = vld [vmem:[#allocation2 + $0xd9] sm:$0xff]  ;;  %v9827_v35 = vpack.c.bf16 %v3876_v18, %v3875_v20 }
 0x20c   : > { %3500 = vst.msk [vmem:[#allocation2 + $0x111] sm:$0xff] %vm480_vm0, %v3468_v49  ;;  %v3403_v7 = vmul.f32 %v9539_v24, %v3364_v38  ;;  %v3362_v41 = vadd.f32 %v3309_v48, %v3056_v61  ;;  %v3061_v37 = vadd.f32 %v7870_v14, %v2755_v62  ;;  %v3569_v55 = vld [vmem:[#allocation2 + $0xe0] sm:$0xff] }
 0x20d   : > { %v3439_v8 = vadd.f32 %v9552_v23, %v3400_v36  ;;  %v3874_v44 = vld [vmem:[#allocation2 + $0xe1] sm:$0xff]  ;;  %v3473_v45 = vmax.f32 %v3441_v1, 0.0  ;;  %v3016_v33 = vpop.f32.mrf.mxu1  ;;  %v9823_v29 = vpack.c.bf16 %v3569_v55, %v3568_v13  ;;  %v7907_v63 = vpop.f32.mrf.mxu0  ;;  %v2754_v30 = vadd.f32 %v9502_v42, %v2447_v60 }
 0x20e   : > { %v9825_v52 = vpack.c.bf16 %v3874_v44, %v3873_v16  ;;  %v3442_v15 = vadd.f32 %v9552_v23, %v3403_v7  ;;  %v3401_v17 = vmul.f32 %v9539_v24, %v3362_v41  ;;  %v3367_v56 = vadd.f32 %v7906_v19, %v3061_v37  ;;  %v3574_v7 = vld [vmem:[#allocation2 + $0x120] sm:$0xff] }
 0x20f   : > { %v3471_v11 = vmax.f32 %v3439_v8, 0.0  ;;  %3505 = vst.msk [vmem:[#allocation2 + $0x151] sm:$0xff] %vm480_vm0, %v3473_v45  ;;  %v3059_v48 = vadd.f32 %v3016_v33, %v2753_v22  ;;  %7929 = vmatmul.mubr.msk.bf16.gmra.mxu1 %vm480_vm0, %v9823_v29  ;;  %v7871_v47 = vpop.f32.mrf.mxu1  ;;  %v3572_v36 = vld [vmem:[#allocation2 + $0x108] sm:$0xff]  ;;  %v3325_v53 = vpop.f32.mrf.mxu0 }
 0x210   : > { %7965 = vmatmul.mubr.msk.bf16.gmra.mxu0 %vm480_vm0, %v9825_v52  ;;  %v3474_v9 = vmax.f32 %v3442_v15, 0.0  ;;  %v3440_v50 = vadd.f32 %v9552_v23, %v3401_v17  ;;  %v3406_v19 = vmul.f32 %v9539_v24, %v3367_v56  ;;  %v3062_v58 = vadd.f32 %v7871_v47, %v2756_v0  ;;  %7932 = vmatprep.mubr.msk.bf16.mxu1 %vm480_vm0, %v9818_v4  ;;  %v3877_v0 = vld [vmem:[#allocation2 + $0x109] sm:$0xff]  ;;  %v3879_v41 = vld [vmem:[#allocation2 + $0x121] sm:$0xff] }
 0x211   : > { %3503 = vst.msk [vmem:[#allocation2 + $0x139] sm:$0xff] %vm480_vm0, %v3471_v11  ;;  %7968 = vmatprep.mubr.msk.bf16.mxu0 %vm480_vm0, %v9827_v35  ;;  %v3365_v62 = vadd.f32 %v3322_v39, %v3059_v48  ;;  %v3019_v27 = vpop.f32.mrf.mxu1  ;;  %v3575_v38 = vld [vmem:[#allocation2 + $0x128] sm:$0xff] }
 0x212   : > { %3506 = vst.msk [vmem:[#allocation2 + $0x159] sm:$0xff] %vm480_vm0, %v3474_v9  ;;  %v3472_v22 = vmax.f32 %v3440_v50, 0.0  ;;  %v3445_v42 = vadd.f32 %v9552_v23, %v3406_v19  ;;  %v3368_v12 = vadd.f32 %v7907_v63, %v3062_v58  ;;  %v3060_v49 = vadd.f32 %v3019_v27, %v2754_v30  ;;  %v3880_v1 = vld [vmem:[#allocation2 + $0x129] sm:$0xff] }
 0x213   : > { %v3404_v61 = vmul.f32 %v9539_v24, %v3365_v62  ;;  %v3573_v18 = vld [vmem:[#allocation2 + $0x110] sm:$0xff]  ;;  %v9857_v16 = vpack.c.bf16 %v3575_v38, %v3574_v7  ;;  %v9859_v44 = vpack.c.bf16 %v3880_v1, %v3879_v41  ;;  %v4161_v62 = vld [vmem:[#allocation2 + $0x2] sm:$0xff]  ;;  %v4166_v1 = vld [vmem:[#allocation2 + $0x3a] sm:$0xff] }
 0x214   : > { %v3878_v60 = vld [vmem:[#allocation2 + $0x111] sm:$0xff]  ;;  %3504 = vst.msk [vmem:[#allocation2 + $0x141] sm:$0xff] %vm480_vm0, %v3472_v22  ;;  %v3477_v14 = vmax.f32 %v3445_v42, 0.0  ;;  %v3407_v39 = vmul.f32 %v9539_v24, %v3368_v12  ;;  %v3366_v13 = vadd.f32 %v3325_v53, %v3060_v49  ;;  %v9849_v28 = vpack.c.bf16 %v3573_v18, %v3572_v36  ;;  %v4163_v53 = vld [vmem:[#allocation2 + $0x1a] sm:$0xff]  ;;  %v4164_v18 = vld [vmem:[#allocation2 + $0x22] sm:$0xff] }
 0x215   : > { %v3443_v20 = vadd.f32 %v9552_v23, %v3404_v61  ;;  %v9852_v8 = vpack.c.bf16 %v3878_v60, %v3877_v0  ;;  %v4162_v27 = vld [vmem:[#allocation2 + $0xa] sm:$0xff]  ;;  %v4165_v60 = vld [vmem:[#allocation2 + $0x32] sm:$0xff]  ;;  %v4169_v7 = vld [vmem:[#allocation2 + $0x62] sm:$0xff] }
 0x216   : > { %3509 = vst.msk [vmem:[#allocation2 + $0x181] sm:$0xff] %vm480_vm0, %v3477_v14  ;;  %v3446_v37 = vadd.f32 %v9552_v23, %v3407_v39  ;;  %v3405_v55 = vmul.f32 %v9539_v24, %v3366_v13  ;;  %v3578_v9 = vld [vmem:[#allocation2 + $0x150] sm:$0xff]  ;;  %v4193_v61 = vpack.c.bf16 %v4162_v27, %v4161_v62  ;;  %v9900_v14 = vpack.c.bf16 %v4164_v18, %v4163_v53  ;;  %v8308_v39 = vld [vmem:[%s11053_s7 + $0x40] sm:$0xff]   ;;  %v9922_v0 = vld [vmem:[%s11053_s7 + $0x68] sm:$0xff]  }
 0x217   : > { %v3475_v45 = vmax.f32 %v3443_v20, 0.0  ;;  %7933 = vmatmul.mubr.msk.bf16.gmra.mxu1 %vm480_vm0, %v9849_v28  ;;  %v3883_v50 = vld [vmem:[#allocation2 + $0x151] sm:$0xff]  ;;  %v9905_v13 = vpack.c.bf16 %v4166_v1, %v4165_v60  ;;  %v4185_v27 = vld [vmem:[#allocation2 + $0x122] sm:$0xff] }
 0x218   : > { %7969 = vmatmul.mubr.msk.bf16.gmra.mxu0 %vm480_vm0, %v9852_v8  ;;  %v3478_v33 = vmax.f32 %v3446_v37, 0.0  ;;  %v3444_v11 = vadd.f32 %v9552_v23, %v3405_v55  ;;  %7936 = vmatprep.mubr.msk.bf16.mxu1 %vm480_vm0, %v9857_v16  ;;  %v3576_v15 = vld [vmem:[#allocation2 + $0x138] sm:$0xff]  ;;  %v4167_v20 = vld [vmem:[#allocation2 + $0x4a] sm:$0xff]  ;;  %v4172_v55 = vld [vmem:[#allocation2 + $0x82] sm:$0xff] }
 0x219   : > { %7972 = vmatprep.mubr.msk.bf16.mxu0 %vm480_vm0, %v9859_v44  ;;  %3507 = vst.msk [vmem:[#allocation2 + $0x169] sm:$0xff] %vm480_vm0, %v3475_v45  ;;  %v3881_v17 = vld [vmem:[#allocation2 + $0x139] sm:$0xff]  ;;  %v4170_v41 = vld [vmem:[#allocation2 + $0x6a] sm:$0xff] }
 0x21a   : > { %3510 = vst.msk [vmem:[#allocation2 + $0x189] sm:$0xff] %vm480_vm0, %v3478_v33  ;;  %v3476_v24 = vmax.f32 %v3444_v11, 0.0  ;;  %v3579_v56 = vld [vmem:[#allocation2 + $0x158] sm:$0xff]  ;;  %v9933_v37 = vpack.c.bf16 %v4170_v41, %v4169_v7  ;;  %v8319_v7 = vld [vmem:[%s8530_s19 + $0x10] sm:$0xff] }
 0x21b   : > { %v3577_v48 = vld [vmem:[#allocation2 + $0x140] sm:$0xff]  ;;  %v9877_v19 = vpack.c.bf16 %v3579_v56, %v3578_v9  ;;  %v4173_v45 = vld [vmem:[#allocation2 + $0x92] sm:$0xff] }
 0x21c   : > { %v3882_v63 = vld [vmem:[#allocation2 + $0x141] sm:$0xff]  ;;  %v3884_v47 = vld [vmem:[#allocation2 + $0x159] sm:$0xff]  ;;  %3508 = vst.msk [vmem:[#allocation2 + $0x171] sm:$0xff] %vm480_vm0, %v3476_v24  ;;  %v9873_v23 = vpack.c.bf16 %v3577_v48, %v3576_v15 }
 0x21d   : > { %v9875_v30 = vpack.c.bf16 %v3882_v63, %v3881_v17  ;;  %v9879_v58 = vpack.c.bf16 %v3884_v47, %v3883_v50  ;;  %v4174_v33 = vld [vmem:[#allocation2 + $0x9a] sm:$0xff]  ;;  %v4177_v15 = vld [vmem:[#allocation2 + $0xc2] sm:$0xff]  ;;  %v4178_v17 = vld [vmem:[#allocation2 + $0xca] sm:$0xff] }
 0x21e   : > { %v9946_v24 = vpack.c.bf16 %v4174_v33, %v4173_v45  ;;  %v9958_v48 = vpack.c.bf16 %v4178_v17, %v4177_v15  ;;  %v4181_v63 = vld [vmem:[#allocation2 + $0xf2] sm:$0xff]  ;;  %v4182_v47 = vld [vmem:[#allocation2 + $0xfa] sm:$0xff] }
 0x21f   : > { %7937 = vmatmul.mubr.msk.bf16.gmra.mxu1 %vm480_vm0, %v9873_v23  ;;  %v4203_v50 = vpack.c.bf16 %v4182_v47, %v4181_v63  ;;  %v4184_v62 = vld [vmem:[#allocation2 + $0x112] sm:$0xff]  ;;  %v5389_v45 = vld [vmem:[#allocation2 + $0x60] sm:$0xff] }
 0x220   : > { %7973 = vmatmul.mubr.msk.bf16.gmra.mxu0 %vm480_vm0, %v9875_v30  ;;  %7940 = vmatprep.mubr.msk.bf16.mxu1 %vm480_vm0, %v9877_v19  ;;  %v3580_v22 = vld [vmem:[#allocation2 + $0x168] sm:$0xff]  ;;  %v4189_v53 = vld [vmem:[#allocation2 + $0x152] sm:$0xff]  ;;  %v8316_v33 = vld [vmem:[%s11053_s7 + $0x80] sm:$0xff]  }
 0x221   : > { %7976 = vmatprep.mubr.msk.bf16.mxu0 %vm480_vm0, %v9879_v58  ;;  %v3885_v12 = vld [vmem:[#allocation2 + $0x169] sm:$0xff] }
 0x223   : > { %v3581_v42 = vld [vmem:[#allocation2 + $0x170] sm:$0xff] }
 0x224   : > { %v3886_v49 = vld [vmem:[#allocation2 + $0x171] sm:$0xff]  ;;  %v9889_v36 = vpack.c.bf16 %v3581_v42, %v3580_v22 }
 0x225   : > { %v9891_v38 = vpack.c.bf16 %v3886_v49, %v3885_v12  ;;  %v4186_v22 = vld [vmem:[#allocation2 + $0x12a] sm:$0xff]  ;;  %v4187_v49 = vld [vmem:[#allocation2 + $0x13a] sm:$0xff]  ;;  %v4192_v1 = vld [vmem:[#allocation2 + $0x172] sm:$0xff] }
 0x226   : > { %v4205_v12 = vpack.c.bf16 %v4186_v22, %v4185_v27  ;;  %v5392_v27 = vld [vmem:[#allocation2 + $0x80] sm:$0xff] }
 0x227   : > { %7941 = vmatmul.mubr.msk.bf16.gmra.mxu1 %vm480_vm0, %v9889_v36  ;;  %v5698_v22 = vld [vmem:[#allocation2 + $0x81] sm:$0xff] }
 0x228   : > { %7977 = vmatmul.mubr.msk.bf16.gmra.mxu0 %vm480_vm0, %v9891_v38  ;;  %7984 = vmatprep.mubr.msk.bf16.mxu1 %vm480_vm0, %v4193_v61  ;;  %v4188_v61 = vld [vmem:[#allocation2 + $0x142] sm:$0xff] }
 0x229   : > { %8020 = vmatprep.mubr.msk.bf16.mxu0 %vm480_vm0, %v9642_v40  ;;  %v8310_v40 = vld [vmem:[%s11053_s7 + $0x50] sm:$0xff]   ;;  %v4206_v18 = vpack.c.bf16 %v4188_v61, %v4187_v49  ;;  %v5700_v61 = vld [vmem:[#allocation2 + $0x99] sm:$0xff] }
 0x22f   : > { %7985 = vmatmul.mubr.msk.bf16.vlgmr.msra.gmra.mxu1 %vm480_vm0, %v9900_v14 }
 0x230   : > { %8021 = vmatmul.mubr.msk.bf16.vlgmr.msra.gmra.mxu0 %vm480_vm0, %v9646_v54  ;;  %8053 = vmatpush3.bf16.msra.mxu1 %v9681_v31  ;;  %v4168_v54 = vld [vmem:[#allocation2 + $0x52] sm:$0xff] }
 0x231   : > { %7988 = vmatprep.mubr.msk.bf16.mxu1 %vm480_vm0, %v9905_v13  ;;  %8024 = vmatprep.mubr.msk.bf16.mxu0 %vm480_vm0, %v9699_v21  ;;  %v9925_v31 = vpack.c.bf16 %v4168_v54, %v4167_v20  ;;  %v9931_v21 = vld [vmem:[%s11053_s7 + $0x78] sm:$0xff]   ;;  %v5390_v54 = vld [vmem:[#allocation2 + $0x68] sm:$0xff] }
 0x232   : > { %8054 = vmatprep.subr.bf16.mxu1 %v8308_v39  ;;  %8089 = vmatpush3.bf16.msra.mxu0 %v9709_v25  ;;  %v4171_v25 = vld [vmem:[#allocation2 + $0x7a] sm:$0xff] }
 0x233   : > { %8090 = vmatprep.subr.bf16.mxu0 %v8310_v40  ;;  %v9944_v11 = vpack.c.bf16 %v4172_v55, %v4171_v25 }
 0x234   : > { %8055 = vmatpush3.bf16.msra.mxu1 %v8308_v39  ;;  %v4498_v39 = vld [vmem:[#allocation2 + $0x188] sm:$0xff] }
 0x235   : > { %8124 = vmatprep.subr.bf16.mxu1 %v9922_v0 }
 0x236   : > { %8091 = vmatpush3.bf16.msra.mxu0 %v8310_v40 }
 0x237   : > { %7989 = vmatmul.mubr.msk.bf16.gmra.mxu1 %vm480_vm0, %v9925_v31  ;;  %8160 = vmatprep.subr.bf16.mxu0 %v9931_v21 }
 0x238   : > { %8025 = vmatmul.mubr.msk.bf16.gmra.mxu0 %vm480_vm0, %v9703_v32  ;;  %7992 = vmatprep.mubr.msk.bf16.mxu1 %vm480_vm0, %v9933_v37  ;;  %v4175_v32 = vld [vmem:[#allocation2 + $0xaa] sm:$0xff] }
 0x239   : > { %8028 = vmatprep.mubr.msk.bf16.mxu0 %vm480_vm0, %v9748_v34  ;;  %v4176_v34 = vld [vmem:[#allocation2 + $0xb2] sm:$0xff] }
 0x23a   : > { %v9956_v56 = vpack.c.bf16 %v4176_v34, %v4175_v32  ;;  %v8320_v32 = vld [vmem:[%s8530_s19] sm:$0xff] }
 0x23f   : > { %7993 = vmatmul.mubr.msk.bf16.gmra.mxu1 %vm480_vm0, %v9944_v11 }
 0x240   : > { %8029 = vmatmul.mubr.msk.bf16.gmra.mxu0 %vm480_vm0, %v9742_v3  ;;  %7996 = vmatprep.mubr.msk.bf16.mxu1 %vm480_vm0, %v9946_v24  ;;  %v4179_v3 = vld [vmem:[#allocation2 + $0xda] sm:$0xff] }
 0x241   : > { %8032 = vmatprep.mubr.msk.bf16.mxu0 %vm480_vm0, %v9786_v46  ;;  %v4180_v46 = vld [vmem:[#allocation2 + $0xe2] sm:$0xff] }
 0x242   : > { %v4202_v9 = vpack.c.bf16 %v4180_v46, %v4179_v3  ;;  %v8321_v3 = vld [vmem:[%s8530_s19 + $0x18] sm:$0xff] }
 0x247   : > { %7997 = vmatmul.mubr.msk.bf16.gmra.mxu1 %vm480_vm0, %v9956_v56 }
 0x248   : > { %8033 = vmatmul.mubr.msk.bf16.gmra.mxu0 %vm480_vm0, %v9781_v43  ;;  %8000 = vmatprep.mubr.msk.bf16.mxu1 %vm480_vm0, %v9958_v48  ;;  %v4183_v43 = vld [vmem:[#allocation2 + $0x10a] sm:$0xff] }
 0x249   : > { %8036 = vmatprep.mubr.msk.bf16.mxu0 %vm480_vm0, %v9823_v29  ;;  %v4204_v42 = vpack.c.bf16 %v4184_v62, %v4183_v43  ;;  %v8322_v43 = vld [vmem:[%s8530_s19 + $0x8] sm:$0xff] }
 0x24f   : > { %8001 = vmatmul.mubr.msk.bf16.gmra.mxu1 %vm480_vm0, %v4202_v9 }
 0x250   : > { %8037 = vmatmul.mubr.msk.bf16.gmra.mxu0 %vm480_vm0, %v9818_v4  ;;  %8004 = vmatprep.mubr.msk.bf16.mxu1 %vm480_vm0, %v4203_v50 }
 0x251   : > { %8040 = vmatprep.mubr.msk.bf16.mxu0 %vm480_vm0, %v9849_v28  ;;  %v4190_v28 = vld [vmem:[#allocation2 + $0x15a] sm:$0xff] }
 0x252   : > { %v4207_v60 = vpack.c.bf16 %v4190_v28, %v4189_v53 }
 0x257   : > { %8005 = vmatmul.mubr.msk.bf16.gmra.mxu1 %vm480_vm0, %v4204_v42 }
 0x258   : > { %8041 = vmatmul.mubr.msk.bf16.gmra.mxu0 %vm480_vm0, %v9857_v16  ;;  %8008 = vmatprep.mubr.msk.bf16.mxu1 %vm480_vm0, %v4205_v12  ;;  %v4191_v16 = vld [vmem:[#allocation2 + $0x16a] sm:$0xff] }
 0x259   : > { %8044 = vmatprep.mubr.msk.bf16.mxu0 %vm480_vm0, %v9873_v23  ;;  %v4497_v23 = vld [vmem:[#allocation2 + $0x180] sm:$0xff]  ;;  %v4208_v40 = vpack.c.bf16 %v4192_v1, %v4191_v16  ;;  %v5391_v16 = vld [vmem:[#allocation2 + $0x78] sm:$0xff] }
 0x25a   : > { %v9986_v20 = vpack.c.bf16 %v4498_v39, %v4497_v23  ;;  %v5697_v1 = vld [vmem:[#allocation2 + $0x79] sm:$0xff]  ;;  %v5393_v39 = vld [vmem:[#allocation2 + $0x90] sm:$0xff] }
 0x25f   : > { %8009 = vmatmul.mubr.msk.bf16.gmra.mxu1 %vm480_vm0, %v4206_v18 }
 0x260   : > { %8045 = vmatmul.mubr.msk.bf16.gmra.mxu0 %vm480_vm0, %v9877_v19  ;;  %8012 = vmatprep.mubr.msk.bf16.mxu1 %vm480_vm0, %v4207_v60  ;;  %v8312_v19 = vld [vmem:[%s11053_s7 + $0x60] sm:$0xff]  }
 0x261   : > { %8048 = vmatprep.mubr.msk.bf16.mxu0 %vm480_vm0, %v9889_v36  ;;  %v8314_v36 = vld [vmem:[%s11053_s7 + $0x70] sm:$0xff]  }
 0x267   : > { %8013 = vmatmul.mubr.msk.bf16.gmra.mxu1 %vm480_vm0, %v4208_v40 }
 0x268   : > { %8049 = vmatmul.mubr.msk.bf16.gmra.mxu0 %vm480_vm0, %v9986_v20  ;;  %8056 = vmatprep.mubr.msk.bf16.mxu1 %vm480_vm0, %v9644_v2  ;;  %v10013_v2 = vld [vmem:[%s11053_s7 + $0x88] sm:$0xff]  }
 0x269   : > { %8092 = vmatprep.mubr.msk.bf16.mxu0 %vm480_vm0, %v9900_v14 }
 0x26f   : > { %8057 = vmatmul.mubr.msk.bf16.vlgmr.msra.gmra.mxu1 %vm480_vm0, %v9660_v26  ;;  %v4804_v26 = vld [vmem:[#allocation2 + $0x189] sm:$0xff] }
 0x270   : > { %8093 = vmatmul.mubr.msk.bf16.vlgmr.msra.gmra.mxu0 %vm480_vm0, %v9905_v13  ;;  %8125 = vmatpush3.bf16.msra.mxu1 %v9922_v0  ;;  %v5388_v13 = vld [vmem:[#allocation2 + $0x50] sm:$0xff] }
 0x271   : > { %8060 = vmatprep.mubr.msk.bf16.mxu1 %vm480_vm0, %v9701_v57  ;;  %8096 = vmatprep.mubr.msk.bf16.mxu0 %vm480_vm0, %v9925_v31  ;;  %v5109_v57 = vld [vmem:[#allocation2 + $0x182] sm:$0xff]  ;;  %v5694_v0 = vld [vmem:[#allocation2 + $0x51] sm:$0xff] }
 0x272   : > { %8126 = vmatprep.subr.bf16.mxu1 %v8312_v19  ;;  %8161 = vmatpush3.bf16.msra.mxu0 %v9931_v21  ;;  %v5387_v31 = vld [vmem:[#allocation2 + $0x48] sm:$0xff] }
 0x273   : > { %8162 = vmatprep.subr.bf16.mxu0 %v8314_v36  ;;  %v5693_v21 = vld [vmem:[#allocation2 + $0x49] sm:$0xff]  ;;  %v5418_v25 = vpack.c.bf16 %v5388_v13, %v5387_v31  ;;  %v8325_v13 = vld [vmem:[%s8530_s19 + $0x38] sm:$0xff] }
 0x274   : > { %8127 = vmatpush3.bf16.msra.mxu1 %v8312_v19  ;;  %v5724_v55 = vpack.c.bf16 %v5694_v0, %v5693_v21  ;;  %v5420_v19 = vpack.c.bf16 %v5392_v27, %v5391_v16  ;;  %v8326_v21 = vld [vmem:[%s8530_s19 + $0x28] sm:$0xff]  ;;  %v8329_v16 = vld [vmem:[%s8530_s19 + $0x58] sm:$0xff] }
 0x275   : > { %8196 = vmatprep.subr.bf16.mxu1 %v10013_v2 }
 0x276   : > { %8163 = vmatpush3.bf16.msra.mxu0 %v8314_v36  ;;  %v5726_v36 = vpack.c.bf16 %v5698_v22, %v5697_v1 }
 0x277   : > { %8061 = vmatmul.mubr.msk.bf16.gmra.mxu1 %vm480_vm0, %v9718_v10  ;;  %v5110_v10 = vld [vmem:[#allocation2 + $0x18a] sm:$0xff] }
 0x278   : > { %8097 = vmatmul.mubr.msk.bf16.gmra.mxu0 %vm480_vm0, %v9933_v37  ;;  %8064 = vmatprep.mubr.msk.bf16.mxu1 %vm480_vm0, %v9750_v59  ;;  %v5386_v59 = vld [vmem:[#allocation2 + $0x38] sm:$0xff]  ;;  %v5696_v37 = vld [vmem:[#allocation2 + $0x69] sm:$0xff] }
 0x279   : > { %8100 = vmatprep.mubr.msk.bf16.mxu0 %vm480_vm0, %v9944_v11  ;;  %v5419_v11 = vpack.c.bf16 %v5390_v54, %v5389_v45  ;;  %v5398_v45 = vld [vmem:[#allocation2 + $0xc8] sm:$0xff] }
 0x27f   : > { %8065 = vmatmul.mubr.msk.bf16.gmra.mxu1 %vm480_vm0, %v9752_v6  ;;  %v5692_v6 = vld [vmem:[#allocation2 + $0x39] sm:$0xff] }
 0x280   : > { %8101 = vmatmul.mubr.msk.bf16.gmra.mxu0 %vm480_vm0, %v9946_v24  ;;  %8068 = vmatprep.mubr.msk.bf16.mxu1 %vm480_vm0, %v9788_v5  ;;  %v4803_v5 = vld [vmem:[#allocation2 + $0x181] sm:$0xff] }
 0x281   : > { %8104 = vmatprep.mubr.msk.bf16.mxu0 %vm480_vm0, %v9956_v56  ;;  %v5695_v24 = vld [vmem:[#allocation2 + $0x61] sm:$0xff] }
 0x282   : > { %v5725_v56 = vpack.c.bf16 %v5696_v37, %v5695_v24  ;;  %v5704_v24 = vld [vmem:[#allocation2 + $0xc9] sm:$0xff] }
 0x287   : > { %8069 = vmatmul.mubr.msk.bf16.gmra.mxu1 %vm480_vm0, %v9790_v51  ;;  %v10058_v51 = vpack.c.bf16 %v4804_v26, %v4803_v5  ;;  %v5699_v26 = vld [vmem:[#allocation2 + $0x91] sm:$0xff] }
 0x288   : > { %8105 = vmatmul.mubr.msk.bf16.gmra.mxu0 %vm480_vm0, %v9958_v48  ;;  %8072 = vmatprep.mubr.msk.bf16.mxu1 %vm480_vm0, %v9825_v52 }
 0x289   : > { %8108 = vmatprep.mubr.msk.bf16.mxu0 %vm480_vm0, %v4202_v9 }
 0x28f   : > { %8073 = vmatmul.mubr.msk.bf16.gmra.mxu1 %vm480_vm0, %v9827_v35 }
 0x290   : > { %8109 = vmatmul.mubr.msk.bf16.gmra.mxu0 %vm480_vm0, %v4203_v50  ;;  %8076 = vmatprep.mubr.msk.bf16.mxu1 %vm480_vm0, %v9852_v8  ;;  %v10060_v8 = vpack.c.bf16 %v5110_v10, %v5109_v57 }
 0x291   : > { %8112 = vmatprep.mubr.msk.bf16.mxu0 %vm480_vm0, %v4204_v42  ;;  %v5394_v42 = vld [vmem:[#allocation2 + $0x98] sm:$0xff] }
 0x297   : > { %8077 = vmatmul.mubr.msk.bf16.gmra.mxu1 %vm480_vm0, %v9859_v44  ;;  %v5385_v44 = vld [vmem:[#allocation2 + $0x30] sm:$0xff] }
 0x298   : > { %8113 = vmatmul.mubr.msk.bf16.gmra.mxu0 %vm480_vm0, %v4205_v12  ;;  %8080 = vmatprep.mubr.msk.bf16.mxu1 %vm480_vm0, %v9875_v30  ;;  %v5691_v30 = vld [vmem:[#allocation2 + $0x31] sm:$0xff] }
 0x299   : > { %8116 = vmatprep.mubr.msk.bf16.mxu0 %vm480_vm0, %v4206_v18  ;;  %v5723_v14 = vpack.c.bf16 %v5692_v6, %v5691_v30  ;;  %v8323_v18 = vld [vmem:[%s8530_s19 + $0x30] sm:$0xff]  ;;  %v8324_v6 = vld [vmem:[%s8530_s19 + $0x20] sm:$0xff] }
 0x29f   : > { %8081 = vmatmul.mubr.msk.bf16.gmra.mxu1 %vm480_vm0, %v9879_v58  ;;  %v5417_v58 = vpack.c.bf16 %v5386_v59, %v5385_v44  ;;  %v5727_v59 = vpack.c.bf16 %v5700_v61, %v5699_v26 }
 0x2a0   : > { %8117 = vmatmul.mubr.msk.bf16.gmra.mxu0 %vm480_vm0, %v4207_v60  ;;  %8084 = vmatprep.mubr.msk.bf16.mxu1 %vm480_vm0, %v9891_v38  ;;  %v10071_v38 = vld [vmem:[%s11054_s8] ss:$0 sm:$0xff] }
 0x2a1   : > { %8120 = vmatprep.mubr.msk.bf16.mxu0 %vm480_vm0, %v4208_v40  ;;  %v3520_v41 = vadd.f32 %v8319_v7, %v10071_v38  ;;  %v3518_v34 = vadd.f32 %v8320_v32, %v10071_v38  ;;  %v3521_v46 = vadd.f32 %v8321_v3, %v10071_v38  ;;  %v3519_v62 = vadd.f32 %v8322_v43, %v10071_v38  ;;  %v5397_v3 = vld [vmem:[#allocation2 + $0xc0] sm:$0xff] }
 0x2a2   : > { %v3524_v60 = vadd.f32 %v8323_v18, %v10071_v38  ;;  %v3522_v5 = vadd.f32 %v8324_v6, %v10071_v38  ;;  %v3525_v0 = vadd.f32 %v8325_v13, %v10071_v38  ;;  %v3523_v37 = vadd.f32 %v8326_v21, %v10071_v38 }
 0x2a3   : > { %v5423_v43 = vpack.c.bf16 %v5398_v45, %v5397_v3  ;;  %v3529_v1 = vadd.f32 %v8329_v16, %v10071_v38  ;;  %v5712_v3 = vld [vmem:[#allocation2 + $0x129] sm:$0xff] }
 0x2a7   : > { %8085 = vmatmul.mubr.msk.bf16.gmra.mxu1 %vm480_vm0, %v10058_v51 }
 0x2a8   : > { %8121 = vmatmul.mubr.msk.bf16.gmra.mxu0 %vm480_vm0, %v10060_v8  ;;  %8128 = vmatprep.mubr.msk.bf16.mxu1 %vm480_vm0, %v5417_v58 }
 0x2a9   : > { %8164 = vmatprep.mubr.msk.bf16.mxu0 %vm480_vm0, %v5723_v14 }
 0x2af   : > { %v7914_v15 = vpop.f32.mrf.mxu1  ;;  %v7950_v17 = vpop.f32.mrf.mxu0  ;;  %8129 = vmatmul.mubr.msk.bf16.vlgmr.msra.gmra.mxu1 %vm480_vm0, %v5418_v25  ;;  %v5396_v25 = vld [vmem:[#allocation2 + $0xb0] sm:$0xff] }
 0x2b0   : > { %8165 = vmatmul.mubr.msk.bf16.vlgmr.msra.gmra.mxu0 %vm480_vm0, %v5724_v55  ;;  %v3825_v48 = vadd.f32 %v7914_v15, %v3520_v41  ;;  %8197 = vmatpush3.bf16.msra.mxu1 %v10013_v2  ;;  %v5421_v2 = vpack.c.bf16 %v5394_v42, %v5393_v39  ;;  %v5702_v55 = vld [vmem:[#allocation2 + $0xb1] sm:$0xff] }
 0x2b1   : > { %8132 = vmatprep.mubr.msk.bf16.mxu1 %vm480_vm0, %v5419_v11  ;;  %8168 = vmatprep.mubr.msk.bf16.mxu0 %vm480_vm0, %v5725_v56  ;;  %v3696_v63 = vpop.f32.mrf.mxu1  ;;  %v4002_v47 = vpop.f32.mrf.mxu0  ;;  %v8327_v15 = vld [vmem:[%s8530_s19 + $0x50] sm:$0xff]  ;;  %v5395_v56 = vld [vmem:[#allocation2 + $0xa8] sm:$0xff] }
 0x2b2   : > { %8198 = vmatprep.subr.bf16.mxu1 %v8316_v33  ;;  %v10087_v9 = vadd.f32 %v7950_v17, %v3825_v48  ;;  %v3823_v50 = vadd.f32 %v3696_v63, %v3518_v34  ;;  %v3528_v17 = vadd.f32 %v8327_v15, %v10071_v38  ;;  %v5701_v48 = vld [vmem:[#allocation2 + $0xa9] sm:$0xff] }
 0x2b3   : > { %v7915_v12 = vpop.f32.mrf.mxu1  ;;  %v7951_v49 = vpop.f32.mrf.mxu0  ;;  %v5404_v15 = vld [vmem:[#allocation2 + $0x110] sm:$0xff] }
 0x2b4   : > { %v10091_v53 = vadd.f32 %v4002_v47, %v3823_v50  ;;  %v3826_v28 = vadd.f32 %v7915_v12, %v3521_v46  ;;  %8199 = vmatpush3.bf16.msra.mxu1 %v8316_v33  ;;  %v5422_v47 = vpack.c.bf16 %v5396_v25, %v5395_v56  ;;  %v5728_v50 = vpack.c.bf16 %v5702_v55, %v5701_v48  ;;  %v8328_v12 = vld [vmem:[%s8530_s19 + $0x40] sm:$0xff]  ;;  %v8333_v55 = vld [vmem:[%s8530_s19 + $0x78] sm:$0xff]  ;;  %v5406_v56 = vld [vmem:[#allocation2 + $0x128] sm:$0xff] }
 0x2b5   : > { %v3699_v23 = vpop.f32.mrf.mxu1  ;;  %v4005_v40 = vpop.f32.mrf.mxu0  ;;  %v3533_v45 = vadd.f32 %v8333_v55, %v10071_v38 }
 0x2b6   : > { %v10095_v57 = vadd.f32 %v7951_v49, %v3826_v28  ;;  %v3824_v10 = vadd.f32 %v3699_v23, %v3519_v62  ;;  %v5703_v62 = vld [vmem:[#allocation2 + $0xc1] sm:$0xff]  ;;  %v3526_v49 = vadd.f32 %v8328_v12, %v10071_v38 }
 0x2b7   : > { %v7918_v44 = vpop.f32.mrf.mxu1  ;;  %v7954_v30 = vpop.f32.mrf.mxu0  ;;  %8133 = vmatmul.mubr.msk.bf16.gmra.mxu1 %vm480_vm0, %v5420_v19  ;;  %v5729_v42 = vpack.c.bf16 %v5704_v24, %v5703_v62  ;;  %v5405_v62 = vld [vmem:[#allocation2 + $0x120] sm:$0xff] }
 0x2b8   : > { %8169 = vmatmul.mubr.msk.bf16.gmra.mxu0 %vm480_vm0, %v5726_v36  ;;  %v10101_v58 = vadd.f32 %v4005_v40, %v3824_v10  ;;  %v3829_v14 = vadd.f32 %v7918_v44, %v3524_v60  ;;  %8136 = vmatprep.mubr.msk.bf16.mxu1 %vm480_vm0, %v5421_v2  ;;  %v8330_v36 = vld [vmem:[%s8530_s19 + $0x48] sm:$0xff] }
 0x2b9   : > { %8172 = vmatprep.mubr.msk.bf16.mxu0 %vm480_vm0, %v5727_v59  ;;  %v3712_v54 = vpop.f32.mrf.mxu1  ;;  %v4018_v7 = vpop.f32.mrf.mxu0  ;;  %v3527_v2 = vadd.f32 %v8330_v36, %v10071_v38 }
 0x2ba   : > { %v10107_v41 = vadd.f32 %v7954_v30, %v3829_v14  ;;  %v3827_v31 = vadd.f32 %v3712_v54, %v3522_v5  ;;  %v8331_v5 = vld [vmem:[%s8530_s19 + $0x70] sm:$0xff]  ;;  %v8332_v54 = vld [vmem:[%s8530_s19 + $0x60] sm:$0xff] }
 0x2bb   : > { %v7919_v33 = vpop.f32.mrf.mxu1  ;;  %v7955_v11 = vpop.f32.mrf.mxu0  ;;  %v3532_v44 = vadd.f32 %v8331_v5, %v10071_v38 }
 0x2bc   : > { %v10111_v32 = vadd.f32 %v4018_v7, %v3827_v31  ;;  %v3830_v34 = vadd.f32 %v7919_v33, %v3525_v0  ;;  %v3530_v7 = vadd.f32 %v8332_v54, %v10071_v38  ;;  %v5714_v54 = vld [vmem:[#allocation2 + $0x141] sm:$0xff] }
 0x2bd   : > { %v3715_v46 = vpop.f32.mrf.mxu1  ;;  %v4021_v63 = vpop.f32.mrf.mxu0 }
 0x2be   : > { %v10115_v27 = vadd.f32 %v7955_v11, %v3830_v34  ;;  %v3828_v22 = vadd.f32 %v3715_v46, %v3523_v37  ;;  %v8334_v34 = vld [vmem:[%s8530_s19 + $0x68] sm:$0xff] }
 0x2bf   : > { %v7922_v61 = vpop.f32.mrf.mxu1  ;;  %v7958_v28 = vpop.f32.mrf.mxu0  ;;  %8137 = vmatmul.mubr.msk.bf16.gmra.mxu1 %vm480_vm0, %v5422_v47 }
 0x2c0   : > { %8173 = vmatmul.mubr.msk.bf16.gmra.mxu0 %vm480_vm0, %v5728_v50  ;;  %v10121_v18 = vadd.f32 %v4021_v63, %v3828_v22  ;;  %v3833_v60 = vadd.f32 %v7922_v61, %v3528_v17  ;;  %8140 = vmatprep.mubr.msk.bf16.mxu1 %vm480_vm0, %v5423_v43  ;;  %v5710_v17 = vld [vmem:[#allocation2 + $0x111] sm:$0xff]  ;;  %v5403_v50 = vld [vmem:[#allocation2 + $0x108] sm:$0xff]  ;;  %v5427_v61 = vpack.c.bf16 %v5406_v56, %v5405_v62 }
 0x2c1   : > { %8176 = vmatprep.mubr.msk.bf16.mxu0 %vm480_vm0, %v5729_v42  ;;  %v3728_v39 = vpop.f32.mrf.mxu1  ;;  %v4034_v23 = vpop.f32.mrf.mxu0  ;;  %v8335_v63 = vld [vmem:[%s8530_s19 + $0x90] sm:$0xff]  ;;  %v5426_v12 = vpack.c.bf16 %v5404_v15, %v5403_v50 }
 0x2c2   : > { %v10127_v40 = vadd.f32 %v7958_v28, %v3833_v60  ;;  %v3831_v19 = vadd.f32 %v3728_v39, %v3526_v49  ;;  %v3536_v47 = vadd.f32 %v8335_v63, %v10071_v38  ;;  %v5709_v43 = vld [vmem:[#allocation2 + $0x109] sm:$0xff]  ;;  %v5711_v28 = vld [vmem:[#allocation2 + $0x121] sm:$0xff] }
 0x2c3   : > { %v7923_v26 = vpop.f32.mrf.mxu1  ;;  %v7959_v10 = vpop.f32.mrf.mxu0  ;;  %v5732_v49 = vpack.c.bf16 %v5710_v17, %v5709_v43  ;;  %v8336_v39 = vld [vmem:[%s8530_s19 + $0x80] sm:$0xff] }
 0x2c4   : > { %v10131_v59 = vadd.f32 %v4034_v23, %v3831_v19  ;;  %v3834_v6 = vadd.f32 %v7923_v26, %v3529_v1  ;;  %v5733_v1 = vpack.c.bf16 %v5712_v3, %v5711_v28  ;;  %v3534_v23 = vadd.f32 %v8336_v39, %v10071_v38  ;;  %v5718_v39 = vld [vmem:[#allocation2 + $0x171] sm:$0xff] }
 0x2c5   : > { %v3731_v30 = vpop.f32.mrf.mxu1  ;;  %v4037_v14 = vpop.f32.mrf.mxu0 }
 0x2c6   : > { %v10135_v13 = vadd.f32 %v7959_v10, %v3834_v6  ;;  %v3832_v0 = vadd.f32 %v3731_v30, %v3527_v2  ;;  %v8337_v10 = vld [vmem:[%s8530_s19 + $0x98] sm:$0xff] }
 0x2c7   : > { %v7926_v31 = vpop.f32.mrf.mxu1  ;;  %8141 = vmatmul.mubr.msk.bf16.gmra.mxu1 %vm480_vm0, %v9823_v29  ;;  %v3537_v6 = vadd.f32 %v8337_v10, %v10071_v38  ;;  %v8341_v10 = vld [vmem:[%s8530_s19 + $0xd0] sm:$0xff] }
 0x2c8   : > { %v7962_v21 = vpop.f32.mrf.mxu0  ;;  %8177 = vmatmul.mubr.msk.bf16.gmra.mxu0 %vm480_vm0, %v9825_v52  ;;  %v10143_v37 = vadd.f32 %v4037_v14, %v3832_v0  ;;  %v3837_v25 = vadd.f32 %v7926_v31, %v3532_v44  ;;  %8144 = vmatprep.mubr.msk.bf16.mxu1 %vm480_vm0, %v9818_v4  ;;  %v3531_v52 = vadd.f32 %v8334_v34, %v10071_v38  ;;  %v5408_v0 = vld [vmem:[#allocation2 + $0x140] sm:$0xff] }
 0x2c9   : > { %8180 = vmatprep.mubr.msk.bf16.mxu0 %vm480_vm0, %v9827_v35  ;;  %v3744_v33 = vpop.f32.mrf.mxu1  ;;  %v5713_v34 = vld [vmem:[#allocation2 + $0x139] sm:$0xff] }
 0x2ca   : > { %v4050_v11 = vpop.f32.mrf.mxu0  ;;  %v10151_v24 = vadd.f32 %v7962_v21, %v3837_v25  ;;  %v3835_v29 = vadd.f32 %v3744_v33, %v3530_v7  ;;  %v5410_v21 = vld [vmem:[#allocation2 + $0x158] sm:$0xff]  ;;  %v8338_v33 = vld [vmem:[%s8530_s19 + $0xb0] sm:$0xff]  ;;  %v5734_v56 = vpack.c.bf16 %v5714_v54, %v5713_v34 }
 0x2cb   : > { %v7927_v48 = vpop.f32.mrf.mxu1  ;;  %v5716_v25 = vld [vmem:[#allocation2 + $0x159] sm:$0xff] }
 0x2cc   : > { %v7963_v4 = vpop.f32.mrf.mxu0  ;;  %v10155_v46 = vadd.f32 %v4050_v11, %v3835_v29  ;;  %v3838_v35 = vadd.f32 %v7927_v48, %v3533_v45  ;;  %v3540_v11 = vadd.f32 %v8338_v33, %v10071_v38  ;;  %v5407_v29 = vld [vmem:[#allocation2 + $0x138] sm:$0xff]  ;;  %v5409_v48 = vld [vmem:[#allocation2 + $0x150] sm:$0xff] }
 0x2cd   : > { %v3747_v22 = vpop.f32.mrf.mxu1  ;;  %v5428_v17 = vpack.c.bf16 %v5408_v0, %v5407_v29  ;;  %v8343_v34 = vld [vmem:[%s8530_s19 + $0xd8] sm:$0xff] }
 0x2ce   : > { %v4053_v42 = vpop.f32.mrf.mxu0  ;;  %v10159_v60 = vadd.f32 %v7963_v4, %v3838_v35  ;;  %v3836_v16 = vadd.f32 %v3747_v22, %v3531_v52  ;;  %v5715_v4 = vld [vmem:[#allocation2 + $0x151] sm:$0xff]  ;;  %v5429_v35 = vpack.c.bf16 %v5410_v21, %v5409_v48  ;;  %v8342_v21 = vld [vmem:[%s8530_s19 + $0xc0] sm:$0xff] }
 0x2cf   : > { %v7930_v19 = vpop.f32.mrf.mxu1  ;;  %8145 = vmatmul.mubr.msk.bf16.gmra.mxu1 %vm480_vm0, %v5426_v12  ;;  %v5735_v63 = vpack.c.bf16 %v5716_v25, %v5715_v4  ;;  %v3542_v25 = vadd.f32 %v8342_v21, %v10071_v38  ;;  %v5721_v48 = vld [vmem:[#allocation2 + $0x199] sm:$0xff]  ;;  %v5722_v4 = vld [vmem:[#allocation2 + $0x1a1] sm:$0xff] }
 0x2d0   : > { %v7966_v36 = vpop.f32.mrf.mxu0  ;;  %8181 = vmatmul.mubr.msk.bf16.gmra.mxu0 %vm480_vm0, %v5732_v49  ;;  %v10165_v2 = vadd.f32 %v4053_v42, %v3836_v16  ;;  %v3841_v26 = vadd.f32 %v7930_v19, %v3536_v47  ;;  %8148 = vmatprep.mubr.msk.bf16.mxu1 %vm480_vm0, %v5427_v61  ;;  %v8339_v47 = vld [vmem:[%s8530_s19 + $0xa0] sm:$0xff]  ;;  %v8340_v42 = vld [vmem:[%s8530_s19 + $0xb8] sm:$0xff] }
 0x2d1   : > { %8184 = vmatprep.mubr.msk.bf16.mxu0 %vm480_vm0, %v5733_v1  ;;  %v3760_v5 = vpop.f32.mrf.mxu1  ;;  %v3538_v50 = vadd.f32 %v8339_v47, %v10071_v38  ;;  %v3541_v12 = vadd.f32 %v8340_v42, %v10071_v38  ;;  %v5412_v1 = vld [vmem:[#allocation2 + $0x170] sm:$0xff]  ;;  %v5998_v42 = vld [vmem:[#allocation2 + $0x3a] sm:$0xff] }
 0x2d2   : > { %v4066_v44 = vpop.f32.mrf.mxu0  ;;  %v10171_v30 = vadd.f32 %v7966_v36, %v3841_v26  ;;  %v3839_v14 = vadd.f32 %v3760_v5, %v3534_v23  ;;  %v5411_v5 = vld [vmem:[#allocation2 + $0x168] sm:$0xff] }
 0x2d3   : > { %v7931_v7 = vpop.f32.mrf.mxu1  ;;  %v5430_v54 = vpack.c.bf16 %v5412_v1, %v5411_v5 }
 0x2d4   : > { %v7967_v31 = vpop.f32.mrf.mxu0  ;;  %v10173_v55 = vadd.f32 %v4066_v44, %v3839_v14  ;;  %v3842_v45 = vadd.f32 %v7931_v7, %v3537_v6  ;;  %v3544_v6 = vadd.f32 %v8341_v10, %v10071_v38  ;;  %v5717_v44 = vld [vmem:[#allocation2 + $0x169] sm:$0xff] }
 0x2d5   : > { %v10177_v52 = vpop.f32.mrf.mxu1  ;;  %v5736_v7 = vpack.c.bf16 %v5718_v39, %v5717_v44 }
 0x2d6   : > { %v10179_v15 = vpop.f32.mrf.mxu0  ;;  %v10181_v3 = vadd.f32 %v7967_v31, %v3842_v45 }
 0x2d7   : > { %v7934_v43 = vpop.f32.mrf.mxu1  ;;  %8149 = vmatmul.mubr.msk.bf16.gmra.mxu1 %vm480_vm0, %v5428_v17  ;;  %v3545_v17 = vadd.f32 %v8343_v34, %v10071_v38 }
 0x2d8   : > { %v7970_v62 = vpop.f32.mrf.mxu0  ;;  %8185 = vmatmul.mubr.msk.bf16.gmra.mxu0 %vm480_vm0, %v5734_v56  ;;  %v3845_v22 = vadd.f32 %v7934_v43, %v3540_v11  ;;  %8152 = vmatprep.mubr.msk.bf16.mxu1 %vm480_vm0, %v5429_v35  ;;  %v5415_v11 = vld [vmem:[#allocation2 + $0x198] sm:$0xff]  ;;  %v5416_v56 = vld [vmem:[#allocation2 + $0x1a0] sm:$0xff] }
 0x2d9   : > { %8188 = vmatprep.mubr.msk.bf16.mxu0 %vm480_vm0, %v5735_v63  ;;  %v3776_v49 = vpop.f32.mrf.mxu1 }
 0x2da   : > { %v4082_v61 = vpop.f32.mrf.mxu0  ;;  %v10191_v28 = vadd.f32 %v7970_v62, %v3845_v22  ;;  %v3843_v16 = vadd.f32 %v3776_v49, %v3538_v50  ;;  %v5432_v22 = vpack.c.bf16 %v5416_v56, %v5415_v11  ;;  %v5999_v11 = vld [vmem:[#allocation2 + $0x4a] sm:$0xff]  ;;  %v6001_v56 = vld [vmem:[#allocation2 + $0x62] sm:$0xff] }
 0x2db   : > { %v7935_v23 = vpop.f32.mrf.mxu1 }
 0x2dc   : > { %v7971_v19 = vpop.f32.mrf.mxu0  ;;  %v10193_v36 = vadd.f32 %v4082_v61, %v3843_v16  ;;  %v3846_v26 = vadd.f32 %v7935_v23, %v3541_v12  ;;  %v5738_v12 = vpack.c.bf16 %v5722_v4, %v5721_v48  ;;  %v8344_v61 = vld [vmem:[%s8530_s19 + $0xf0] sm:$0xff] }
 0x2dd   : > { %v10197_v14 = vpop.f32.mrf.mxu1  ;;  %v3548_v16 = vadd.f32 %v8344_v61, %v10071_v38  ;;  %v6002_v48 = vld [vmem:[#allocation2 + $0x6a] sm:$0xff] }
 0x2de   : > { %v10199_v0 = vpop.f32.mrf.mxu0  ;;  %v10201_v31 = vadd.f32 %v7971_v19, %v3846_v26  ;;  %v8345_v26 = vld [vmem:[%s8530_s19 + $0xe0] sm:$0xff] }
 0x2df   : > { %v7938_v45 = vpop.f32.mrf.mxu1  ;;  %8153 = vmatmul.mubr.msk.bf16.gmra.mxu1 %vm480_vm0, %v5430_v54  ;;  %v3546_v10 = vadd.f32 %v8345_v26, %v10071_v38  ;;  %v8346_v54 = vld [vmem:[%s8530_s19 + $0xf8] sm:$0xff] }
 0x2e0   : > { %v7974_v33 = vpop.f32.mrf.mxu0  ;;  %8189 = vmatmul.mubr.msk.bf16.gmra.mxu0 %vm480_vm0, %v5736_v7  ;;  %v3849_v29 = vadd.f32 %v7938_v45, %v3544_v6  ;;  %8156 = vmatprep.mubr.msk.bf16.mxu1 %vm480_vm0, %v9986_v20  ;;  %v5997_v20 = vld [vmem:[#allocation2 + $0x32] sm:$0xff]  ;;  %v3549_v7 = vadd.f32 %v8346_v54, %v10071_v38  ;;  %v6003_v26 = vld [vmem:[#allocation2 + $0x7a] sm:$0xff] }
 0x2e1   : > { %8192 = vmatprep.mubr.msk.bf16.mxu0 %vm480_vm0, %v10058_v51  ;;  %v3792_v35 = vpop.f32.mrf.mxu1  ;;  %v6029_v19 = vpack.c.bf16 %v5998_v42, %v5997_v20  ;;  %v6006_v54 = vld [vmem:[#allocation2 + $0x9a] sm:$0xff] }
 0x2e2   : > { %v4098_v63 = vpop.f32.mrf.mxu0  ;;  %v10213_v47 = vadd.f32 %v7974_v33, %v3849_v29  ;;  %v3847_v50 = vadd.f32 %v3792_v35, %v3542_v25  ;;  %v6000_v29 = vld [vmem:[#allocation2 + $0x52] sm:$0xff] }
 0x2e3   : > { %v7939_v43 = vpop.f32.mrf.mxu1 }
 0x2e4   : > { %v7975_v62 = vpop.f32.mrf.mxu0  ;;  %v10215_v51 = vadd.f32 %v4098_v63, %v3847_v50  ;;  %v3850_v49 = vadd.f32 %v7939_v43, %v3545_v17  ;;  %v6030_v43 = vpack.c.bf16 %v6000_v29, %v5999_v11 }
 0x2e5   : > { %v10219_v1 = vpop.f32.mrf.mxu1 }
 0x2e6   : > { %v10221_v39 = vpop.f32.mrf.mxu0  ;;  %v10223_v23 = vadd.f32 %v7975_v62, %v3850_v49 }
 0x2e7   : > { %v7942_v6 = vpop.f32.mrf.mxu1  ;;  %8157 = vmatmul.mubr.msk.bf16.gmra.mxu1 %vm480_vm0, %v5432_v22  ;;  %v6031_v22 = vpack.c.bf16 %v6002_v48, %v6001_v56 }
 0x2e8   : > { %v7978_v5 = vpop.f32.mrf.mxu0  ;;  %8193 = vmatmul.mubr.msk.bf16.gmra.mxu0 %vm480_vm0, %v5738_v12  ;;  %v3853_v44 = vadd.f32 %v7942_v6, %v3548_v16  ;;  %8200 = vmatprep.mubr.msk.bf16.mxu1 %vm480_vm0, %v6029_v19 }
 0x2e9   : > { %v3808_v21 = vpop.f32.mrf.mxu1 }
 0x2ea   : > { %v4114_v25 = vpop.f32.mrf.mxu0  ;;  %v10232_v45 = vadd.f32 %v7978_v5, %v3853_v44  ;;  %v3851_v33 = vadd.f32 %v3808_v21, %v3546_v10  ;;  %v6004_v10 = vld [vmem:[#allocation2 + $0x82] sm:$0xff]  ;;  %v6005_v44 = vld [vmem:[#allocation2 + $0x92] sm:$0xff] }
 0x2eb   : > { %v7943_v34 = vpop.f32.mrf.mxu1 }
 0x2ec   : > { %v7979_v17 = vpop.f32.mrf.mxu0  ;;  %v10234_v4 = vadd.f32 %v4114_v25, %v3851_v33  ;;  %v3854_v35 = vadd.f32 %v7943_v34, %v3549_v7  ;;  %v6032_v33 = vpack.c.bf16 %v6004_v10, %v6003_v26 }
 0x2ed   : > { %v10236_v63 = vpop.f32.mrf.mxu1 }
 0x2ee   : > { %v10238_v50 = vpop.f32.mrf.mxu0  ;;  %v10240_v62 = vadd.f32 %v7979_v17, %v3854_v35 }
 0x2ef   : > { %v7986_v20 = vpop.f32.mrf.mxu1  ;;  %8201 = vmatmul.mubr.msk.bf16.vlgmr.msra.gmra.mxu1 %vm480_vm0, %v6030_v43 }
 0x2f0   : > { %v8022_v42 = vpop.f32.mrf.mxu0  ;;  %v4437_v12 = vadd.f32 %v7986_v20, %v10087_v9  ;;  %8204 = vmatprep.mubr.msk.bf16.mxu1 %vm480_vm0, %v6031_v22  ;;  %v6007_v22 = vld [vmem:[#allocation2 + $0xaa] sm:$0xff]  ;;  %v6008_v20 = vld [vmem:[#allocation2 + $0xb2] sm:$0xff] }
 0x2f1   : > { %v4308_v49 = vpop.f32.mrf.mxu1 }
 0x2f2   : > { %v4614_v61 = vpop.f32.mrf.mxu0  ;;  %v10245_v16 = vadd.f32 %v8022_v42, %v4437_v12  ;;  %v4435_v19 = vadd.f32 %v4308_v49, %v10091_v53  ;;  %v6033_v53 = vpack.c.bf16 %v6006_v54, %v6005_v44  ;;  %v6009_v12 = vld [vmem:[#allocation2 + $0xc2] sm:$0xff]  ;;  %v6010_v49 = vld [vmem:[#allocation2 + $0xca] sm:$0xff] }
 0x2f3   : > { %v7987_v6 = vpop.f32.mrf.mxu1  ;;  %v6035_v44 = vpack.c.bf16 %v6010_v49, %v6009_v12 }
 0x2f4   : > { %v8023_v5 = vpop.f32.mrf.mxu0  ;;  %v10248_v7 = vadd.f32 %v4614_v61, %v4435_v19  ;;  %v4438_v21 = vadd.f32 %v7987_v6, %v10095_v57  ;;  %v6034_v6 = vpack.c.bf16 %v6008_v20, %v6007_v22 }
 0x2f5   : > { %v4311_v25 = vpop.f32.mrf.mxu1 }
 0x2f6   : > { %v10251_v9 = vpop.f32.mrf.mxu0  ;;  %v10253_v11 = vadd.f32 %v8023_v5, %v4438_v21  ;;  %v10256_v29 = vadd.f32 %v4311_v25, %v10101_v58 }
 0x2f7   : > { %v7990_v34 = vpop.f32.mrf.mxu1  ;;  %8205 = vmatmul.mubr.msk.bf16.gmra.mxu1 %vm480_vm0, %v6032_v33 }
 0x2f8   : > { %v8026_v17 = vpop.f32.mrf.mxu0  ;;  %v4441_v56 = vadd.f32 %v7990_v34, %v10107_v41  ;;  %8208 = vmatprep.mubr.msk.bf16.mxu1 %vm480_vm0, %v6033_v53  ;;  %v8317_v41 = vld [vmem:[%s11055_s9 + $0x8] sm:$0xff]  }
 0x2f9   : > { %v4324_v48 = vpop.f32.mrf.mxu1  ;;  %8232 = vmatprep.subr.bf16.mxu0 %v8317_v41 }
 0x2fa   : > { %v4630_v57 = vpop.f32.mrf.mxu0  ;;  %v10261_v35 = vadd.f32 %v8026_v17, %v4441_v56  ;;  %v4439_v43 = vadd.f32 %v4324_v48, %v10111_v32  ;;  %8233 = vmatpush3.bf16.msra.mxu0 %v8317_v41  ;;  %v6011_v17 = vld [vmem:[#allocation2 + $0xda] sm:$0xff] }
 0x2fb   : > { %v7991_v42 = vpop.f32.mrf.mxu1 }
 0x2fc   : > { %v8027_v58 = vpop.f32.mrf.mxu0  ;;  %v10264_v61 = vadd.f32 %v4630_v57, %v4439_v43  ;;  %v4442_v19 = vadd.f32 %v7991_v42, %v10115_v27  ;;  %v6013_v57 = vld [vmem:[#allocation2 + $0xf2] sm:$0xff]  ;;  %v6014_v43 = vld [vmem:[#allocation2 + $0xfa] sm:$0xff] }
 0x2fd   : > { %v4327_v26 = vpop.f32.mrf.mxu1 }
 0x2fe   : > { %v10270_v10 = vpop.f32.mrf.mxu0  ;;  %v10272_v5 = vadd.f32 %v8027_v58, %v4442_v19  ;;  %v10275_v32 = vadd.f32 %v4327_v26, %v10121_v18  ;;  %v6012_v18 = vld [vmem:[#allocation2 + $0xe2] sm:$0xff] }
 0x2ff   : > { %v7994_v54 = vpop.f32.mrf.mxu1  ;;  %8209 = vmatmul.mubr.msk.bf16.gmra.mxu1 %vm480_vm0, %v6034_v6  ;;  %v6036_v58 = vpack.c.bf16 %v6012_v18, %v6011_v17  ;;  %v8347_v17 = vld [vmem:[%s8530_s19 + $0x88] sm:$0xff] }
 0x300   : > { %v8030_v21 = vpop.f32.mrf.mxu0  ;;  %v4445_v27 = vadd.f32 %v7994_v54, %v10127_v40  ;;  %8212 = vmatprep.mubr.msk.bf16.mxu1 %vm480_vm0, %v6035_v44  ;;  %v3535_v18 = vadd.f32 %v8347_v17, %v10071_v38 }
 0x301   : > { %v4340_v25 = vpop.f32.mrf.mxu1 }
 0x302   : > { %v4646_v33 = vpop.f32.mrf.mxu0  ;;  %v10280_v53 = vadd.f32 %v8030_v21, %v4445_v27  ;;  %v4443_v34 = vadd.f32 %v4340_v25, %v10131_v59  ;;  %v6037_v59 = vpack.c.bf16 %v6014_v43, %v6013_v57  ;;  %v6015_v21 = vld [vmem:[#allocation2 + $0x10a] sm:$0xff]  ;;  %v6016_v27 = vld [vmem:[#allocation2 + $0x112] sm:$0xff] }
 0x303   : > { %v7995_v56 = vpop.f32.mrf.mxu1  ;;  %v6038_v43 = vpack.c.bf16 %v6016_v27, %v6015_v21 }
 0x304   : > { %v8031_v48 = vpop.f32.mrf.mxu0  ;;  %v10283_v22 = vadd.f32 %v4646_v33, %v4443_v34  ;;  %v4446_v20 = vadd.f32 %v7995_v56, %v10135_v13  ;;  %v6017_v33 = vld [vmem:[#allocation2 + $0x122] sm:$0xff]  ;;  %v6018_v34 = vld [vmem:[#allocation2 + $0x12a] sm:$0xff] }
 0x305   : > { %v4343_v42 = vpop.f32.mrf.mxu1 }
 0x306   : > { %v10286_v40 = vpop.f32.mrf.mxu0  ;;  %v10288_v12 = vadd.f32 %v8031_v48, %v4446_v20  ;;  %v10291_v49 = vadd.f32 %v4343_v42, %v10143_v37  ;;  %v6039_v42 = vpack.c.bf16 %v6018_v34, %v6017_v33  ;;  %v8348_v34 = vld [vmem:[%s8530_s19 + $0xa8] sm:$0xff] }
 0x307   : > { %v7998_v19 = vpop.f32.mrf.mxu1  ;;  %8213 = vmatmul.mubr.msk.bf16.gmra.mxu1 %vm480_vm0, %v6036_v58 }
 0x308   : > { %v8034_v41 = vpop.f32.mrf.mxu0  ;;  %v4449_v26 = vadd.f32 %v7998_v19, %v10151_v24  ;;  %8216 = vmatprep.mubr.msk.bf16.mxu1 %vm480_vm0, %v6037_v59  ;;  %v3840_v19 = vadd.f32 %v10177_v52, %v3535_v18  ;;  %v3539_v52 = vadd.f32 %v8348_v34, %v10071_v38  ;;  %v8318_v34 = vld [vmem:[%s11055_s9] sm:$0xff]  }
 0x309   : > { %v4356_v13 = vpop.f32.mrf.mxu1  ;;  %8234 = vmatprep.subr.bf16.mxu0 %v8318_v34 }
 0x30a   : > { %v4662_v6 = vpop.f32.mrf.mxu0  ;;  %v10296_v44 = vadd.f32 %v8034_v41, %v4449_v26  ;;  %v4447_v54 = vadd.f32 %v4356_v13, %v10155_v46  ;;  %v4146_v33 = vadd.f32 %v10179_v15, %v3840_v19  ;;  %v3844_v15 = vadd.f32 %v10197_v14, %v3539_v52  ;;  %8235 = vmatpush3.bf16.msra.mxu0 %v8318_v34 }
 0x30b   : > { %v7999_v37 = vpop.f32.mrf.mxu1 }
 0x30c   : > { %v8035_v25 = vpop.f32.mrf.mxu0  ;;  %v10301_v56 = vadd.f32 %v4662_v6, %v4447_v54  ;;  %v4450_v24 = vadd.f32 %v7999_v37, %v10159_v60  ;;  %v6020_v54 = vld [vmem:[#allocation2 + $0x142] sm:$0xff]  ;;  %v6021_v37 = vld [vmem:[#allocation2 + $0x152] sm:$0xff] }
 0x30d   : > { %v4359_v48 = vpop.f32.mrf.mxu1 }
 0x30e   : > { %v10304_v57 = vpop.f32.mrf.mxu0  ;;  %v10306_v20 = vadd.f32 %v8035_v25, %v4450_v24  ;;  %v10309_v46 = vadd.f32 %v4359_v48, %v10165_v2  ;;  %v6019_v2 = vld [vmem:[#allocation2 + $0x13a] sm:$0xff] }
 0x30f   : > { %v8002_v58 = vpop.f32.mrf.mxu1  ;;  %8217 = vmatmul.mubr.msk.bf16.gmra.mxu1 %vm480_vm0, %v6038_v43  ;;  %v6022_v25 = vld [vmem:[#allocation2 + $0x15a] sm:$0xff]  ;;  %v6040_v48 = vpack.c.bf16 %v6020_v54, %v6019_v2  ;;  %v6023_v2 = vld [vmem:[#allocation2 + $0x16a] sm:$0xff]  ;;  %v6024_v54 = vld [vmem:[#allocation2 + $0x172] sm:$0xff] }
 0x310   : > { %v8038_v59 = vpop.f32.mrf.mxu0  ;;  %v4453_v41 = vadd.f32 %v8002_v58, %v10171_v30  ;;  %8220 = vmatprep.mubr.msk.bf16.mxu1 %vm480_vm0, %v6039_v42  ;;  %v6041_v42 = vpack.c.bf16 %v6022_v25, %v6021_v37  ;;  %v4150_v37 = vadd.f32 %v10199_v0, %v3844_v15  ;;  %v8349_v25 = vld [vmem:[%s8530_s19 + $0xc8] sm:$0xff] }
 0x311   : > { %v4372_v60 = vpop.f32.mrf.mxu1  ;;  %v3543_v14 = vadd.f32 %v8349_v25, %v10071_v38 }
 0x312   : > { %v4678_v26 = vpop.f32.mrf.mxu0  ;;  %v10315_v13 = vadd.f32 %v8038_v59, %v4453_v41  ;;  %v4451_v6 = vadd.f32 %v4372_v60, %v10173_v55 }
 0x313   : > { %v8003_v21 = vpop.f32.mrf.mxu1 }
 0x314   : > { %v8039_v27 = vpop.f32.mrf.mxu0  ;;  %v10321_v30 = vadd.f32 %v4678_v26, %v4451_v6  ;;  %v4454_v17 = vadd.f32 %v8003_v21, %v10181_v3 }
 0x315   : > { %v4375_v18 = vpop.f32.mrf.mxu1 }
 0x316   : > { %v4681_v24 = vpop.f32.mrf.mxu0  ;;  %v10324_v43 = vadd.f32 %v8039_v27, %v4454_v17  ;;  %v4452_v55 = vadd.f32 %v4375_v18, %v4146_v33 }
 0x317   : > { %v8006_v58 = vpop.f32.mrf.mxu1  ;;  %8221 = vmatmul.mubr.msk.bf16.gmra.mxu1 %vm480_vm0, %v6040_v48 }
 0x318   : > { %v8042_v59 = vpop.f32.mrf.mxu0  ;;  %v10328_v19 = vadd.f32 %v4681_v24, %v4452_v55  ;;  %v4457_v41 = vadd.f32 %v8006_v58, %v10191_v28  ;;  %8224 = vmatprep.mubr.msk.bf16.mxu1 %vm480_vm0, %v6041_v42  ;;  %v3848_v55 = vadd.f32 %v10219_v1, %v3543_v14  ;;  %v6027_v58 = vld [vmem:[#allocation2 + $0x19a] sm:$0xff] }
 0x319   : > { %v4388_v3 = vpop.f32.mrf.mxu1 }
 0x31a   : > { %v4694_v60 = vpop.f32.mrf.mxu0  ;;  %v10332_v26 = vadd.f32 %v8042_v59, %v4457_v41  ;;  %v4455_v6 = vadd.f32 %v4388_v3, %v10193_v36  ;;  %v6042_v36 = vpack.c.bf16 %v6024_v54, %v6023_v2  ;;  %v6028_v59 = vld [vmem:[#allocation2 + $0x1a2] sm:$0xff]  ;;  %v4154_v1 = vadd.f32 %v10221_v39, %v3848_v55 }
 0x31b   : > { %v8007_v21 = vpop.f32.mrf.mxu1  ;;  %v6044_v54 = vpack.c.bf16 %v6028_v59, %v6027_v58 }
 0x31c   : > { %v8043_v27 = vpop.f32.mrf.mxu0  ;;  %v10338_v33 = vadd.f32 %v4694_v60, %v4455_v6  ;;  %v4458_v28 = vadd.f32 %v8007_v21, %v10201_v31  ;;  %v8350_v21 = vld [vmem:[%s8530_s19 + $0xe8] sm:$0xff] }
 0x31d   : > { %v4391_v52 = vpop.f32.mrf.mxu1 }
 0x31e   : > { %v4697_v17 = vpop.f32.mrf.mxu0  ;;  %v10344_v18 = vadd.f32 %v8043_v27, %v4458_v28  ;;  %v4456_v24 = vadd.f32 %v4391_v52, %v4150_v37  ;;  %v3547_v27 = vadd.f32 %v8350_v21, %v10071_v38  ;;  %v4742_v21 = vadd.f32 %v10251_v9, %v10256_v29 }
 0x31f   : > { %v8010_v48 = vpop.f32.mrf.mxu1  ;;  %8225 = vmatmul.mubr.msk.bf16.gmra.mxu1 %vm480_vm0, %v6042_v36  ;;  %v4746_v29 = vadd.f32 %v10270_v10, %v10275_v32  ;;  %v4750_v32 = vadd.f32 %v10286_v40, %v10291_v49  ;;  %v4754_v49 = vadd.f32 %v10304_v57, %v10309_v46 }
 0x320   : > { %v8046_v0 = vpop.f32.mrf.mxu0  ;;  %v10348_v31 = vadd.f32 %v4697_v17, %v4456_v24  ;;  %v4461_v42 = vadd.f32 %v8010_v48, %v10213_v47  ;;  %8228 = vmatprep.mubr.msk.bf16.mxu1 %vm480_vm0, %v10060_v8 }
 0x321   : > { %v4404_v15 = vpop.f32.mrf.mxu1 }
 0x322   : > { %v4710_v41 = vpop.f32.mrf.mxu0  ;;  %v10353_v3 = vadd.f32 %v8046_v0, %v4461_v42  ;;  %v4459_v60 = vadd.f32 %v4404_v15, %v10215_v51  ;;  %v3852_v51 = vadd.f32 %v10236_v63, %v3547_v27 }
 0x323   : > { %v8011_v6 = vpop.f32.mrf.mxu1 }
 0x324   : > { %v8047_v2 = vpop.f32.mrf.mxu0  ;;  %v10359_v47 = vadd.f32 %v4710_v41, %v4459_v60  ;;  %v4462_v8 = vadd.f32 %v8011_v6, %v10223_v23  ;;  %v4158_v55 = vadd.f32 %v10238_v50, %v3852_v51 }
 0x325   : > { %v4407_v37 = vpop.f32.mrf.mxu1 }
 0x326   : > { %v4713_v25 = vpop.f32.mrf.mxu0  ;;  %v10362_v14 = vadd.f32 %v8047_v2, %v4462_v8  ;;  %v4460_v28 = vadd.f32 %v4407_v37, %v4154_v1 }
 0x327   : > { %v8014_v34 = vpop.f32.mrf.mxu1  ;;  %8229 = vmatmul.mubr.msk.bf16.gmra.mxu1 %vm480_vm0, %v6044_v54 }
 0x328   : > { %v8050_v52 = vpop.f32.mrf.mxu0  ;;  %v10366_v17 = vadd.f32 %v4713_v25, %v4460_v28  ;;  %v4465_v39 = vadd.f32 %v8014_v34, %v10232_v45 }
 0x329   : > { %v4420_v38 = vpop.f32.mrf.mxu1 }
 0x32a   : > { %v4726_v36 = vpop.f32.mrf.mxu0  ;;  %v10369_v24 = vadd.f32 %v8050_v52, %v4465_v39  ;;  %v4463_v23 = vadd.f32 %v4420_v38, %v10234_v4 }
 0x32b   : > { %v8015_v48 = vpop.f32.mrf.mxu1 }
 0x32c   : > { %v8051_v0 = vpop.f32.mrf.mxu0  ;;  %v10373_v42 = vadd.f32 %v4726_v36, %v4463_v23  ;;  %v4466_v58 = vadd.f32 %v8015_v48, %v10240_v62 }
 0x32d   : > { %v4423_v59 = vpop.f32.mrf.mxu1 }
 0x32e   : > { %v4729_v63 = vpop.f32.mrf.mxu0  ;;  %v10376_v15 = vadd.f32 %v8051_v0, %v4466_v58  ;;  %v4464_v41 = vadd.f32 %v4423_v59, %v4158_v55 }
 0x32f   : > { %v8058_v45 = vpop.f32.mrf.mxu1 }
 0x330   : > { %v10378_v60 = vpop.f32.mrf.mxu0  ;;  %v10380_v6 = vadd.f32 %v4729_v63, %v4464_v41  ;;  %v10383_v4 = vadd.f32 %v8058_v45, %v10245_v16 }
 0x331   : > { %v4920_v2 = vpop.f32.mrf.mxu1 }
 0x332   : > { %v10385_v54 = vpop.f32.mrf.mxu0  ;;  %v10388_v50 = vadd.f32 %v4920_v2, %v10248_v7 }
 0x333   : > { %v8059_v62 = vpop.f32.mrf.mxu1 }
 0x334   : > { %v10390_v1 = vpop.f32.mrf.mxu0  ;;  %v10395_v27 = vadd.f32 %v8059_v62, %v10253_v11 }
 0x335   : > { %v4923_v8 = vpop.f32.mrf.mxu1 }
 0x336   : > { %v10397_v37 = vpop.f32.mrf.mxu0  ;;  %v10399_v16 = vadd.f32 %v4923_v8, %v4742_v21 }
 0x337   : > { %v8062_v25 = vpop.f32.mrf.mxu1 }
 0x338   : > { %v10401_v28 = vpop.f32.mrf.mxu0  ;;  %v10404_v7 = vadd.f32 %v8062_v25, %v10261_v35 }
 0x339   : > { %v4936_v34 = vpop.f32.mrf.mxu1 }
 0x33a   : > { %v10406_v52 = vpop.f32.mrf.mxu0  ;;  %v10409_v51 = vadd.f32 %v4936_v34, %v10264_v61 }
 0x33b   : > { %v8063_v9 = vpop.f32.mrf.mxu1 }
 0x33c   : > { %v10411_v11 = vpop.f32.mrf.mxu0  ;;  %v10416_v39 = vadd.f32 %v8063_v9, %v10272_v5 }
 0x33d   : > { %v4939_v38 = vpop.f32.mrf.mxu1 }
 0x33e   : > { %v10418_v36 = vpop.f32.mrf.mxu0  ;;  %v10420_v35 = vadd.f32 %v4939_v38, %v4746_v29 }
 0x33f   : > { %v8066_v23 = vpop.f32.mrf.mxu1 }
 0x340   : > { %v10422_v48 = vpop.f32.mrf.mxu0  ;;  %v10425_v61 = vadd.f32 %v8066_v23, %v10280_v53 }
 0x341   : > { %v4952_v0 = vpop.f32.mrf.mxu1 }
 0x342   : > { %v10427_v55 = vpop.f32.mrf.mxu0  ;;  %v10430_v58 = vadd.f32 %v4952_v0, %v10283_v22 }
 0x343   : > { %v8067_v10 = vpop.f32.mrf.mxu1 }
 0x344   : > { %v10432_v5 = vpop.f32.mrf.mxu0  ;;  %v10437_v59 = vadd.f32 %v8067_v10, %v10288_v12 }
 0x345   : > { %v4955_v63 = vpop.f32.mrf.mxu1 }
 0x346   : > { %v10439_v41 = vpop.f32.mrf.mxu0  ;;  %v10441_v53 = vadd.f32 %v4955_v63, %v4750_v32 }
 0x347   : > { %v8070_v45 = vpop.f32.mrf.mxu1 }
 0x348   : > { %v10443_v2 = vpop.f32.mrf.mxu0  ;;  %v10446_v22 = vadd.f32 %v8070_v45, %v10296_v44 }
 0x349   : > { %v4968_v62 = vpop.f32.mrf.mxu1 }
 0x34a   : > { %v10448_v21 = vpop.f32.mrf.mxu0  ;;  %v10451_v8 = vadd.f32 %v4968_v62, %v10301_v56 }
 0x34b   : > { %v8071_v40 = vpop.f32.mrf.mxu1 }
 0x34c   : > { %v10453_v12 = vpop.f32.mrf.mxu0  ;;  %v10458_v25 = vadd.f32 %v8071_v40, %v10306_v20 }
 0x34d   : > { %v4971_v34 = vpop.f32.mrf.mxu1 }
 0x34e   : > { %v10460_v9 = vpop.f32.mrf.mxu0  ;;  %v10462_v44 = vadd.f32 %v4971_v34, %v4754_v49 }
 0x34f   : > { %11190 = vst [vmem:[#allocation27_spill] sm:$0xff] %v10460_v9  ;;  %v8074_v29 = vpop.f32.mrf.mxu1 }
 0x350   : > { %11191 = vst [vmem:[#allocation22_spill] sm:$0xff] %v10462_v44  ;;  %v10464_v38 = vpop.f32.mrf.mxu0  ;;  %v10467_v56 = vadd.f32 %v8074_v29, %v10315_v13 }
 0x351   : > { %11192 = vst [vmem:[#allocation20_spill] sm:$0xff] %v10464_v38  ;;  %v4984_v23 = vpop.f32.mrf.mxu1 }
 0x352   : > { %11193 = vst [vmem:[#allocation3_spill] sm:$0xff] %v10467_v56  ;;  %v10469_v0 = vpop.f32.mrf.mxu0  ;;  %v10472_v10 = vadd.f32 %v4984_v23, %v10321_v30 }
 0x353   : > { %11194 = vst [vmem:[#allocation30_spill] sm:$0xff] %v10469_v0  ;;  %v8075_v57 = vpop.f32.mrf.mxu1 }
 0x354   : > { %11195 = vst [vmem:[#allocation23_spill] sm:$0xff] %v10472_v10  ;;  %v10474_v20 = vpop.f32.mrf.mxu0  ;;  %v10477_v46 = vadd.f32 %v8075_v57, %v10324_v43 }
 0x355   : > { %11196 = vst [vmem:[#allocation32_spill] sm:$0xff] %v10474_v20  ;;  %v4987_v32 = vpop.f32.mrf.mxu1 }
 0x356   : > { %11197 = vst [vmem:[#allocation24_spill] sm:$0xff] %v10477_v46  ;;  %v10479_v63 = vpop.f32.mrf.mxu0  ;;  %v10482_v45 = vadd.f32 %v4987_v32, %v10328_v19 }
 0x357   : > { %11198 = vst [vmem:[#allocation25_spill] sm:$0xff] %v10479_v63  ;;  %v8078_v13 = vpop.f32.mrf.mxu1 }
 0x358   : > { %11199 = vst [vmem:[#allocation4_spill] sm:$0xff] %v10482_v45  ;;  %v10484_v62 = vpop.f32.mrf.mxu0  ;;  %v10487_v40 = vadd.f32 %v8078_v13, %v10332_v26 }
 0x359   : > { %11200 = vst [vmem:[#allocation34_spill] sm:$0xff] %v10484_v62  ;;  %v5000_v30 = vpop.f32.mrf.mxu1 }
 0x35a   : > { %11201 = vst [vmem:[#allocation5_spill] sm:$0xff] %v10487_v40  ;;  %v10489_v49 = vpop.f32.mrf.mxu0  ;;  %v10492_v34 = vadd.f32 %v5000_v30, %v10338_v33 }
 0x35b   : > { %11202 = vst [vmem:[#allocation36_spill] sm:$0xff] %v10489_v49  ;;  %v8079_v43 = vpop.f32.mrf.mxu1 }
 0x35c   : > { %11203 = vst [vmem:[#allocation26_spill] sm:$0xff] %v10492_v34  ;;  %v10494_v29 = vpop.f32.mrf.mxu0  ;;  %v10497_v23 = vadd.f32 %v8079_v43, %v10344_v18 }
 0x35d   : > { %11204 = vst [vmem:[#allocation6_spill] sm:$0xff] %v10494_v29  ;;  %v5003_v19 = vpop.f32.mrf.mxu1 }
 0x35e   : > { %11205 = vst [vmem:[#allocation38_spill] sm:$0xff] %v10497_v23  ;;  %v10499_v57 = vpop.f32.mrf.mxu0  ;;  %v10502_v32 = vadd.f32 %v5003_v19, %v10348_v31 }
 0x35f   : > { %11206 = vst [vmem:[#allocation40_spill] sm:$0xff] %v10499_v57  ;;  %v8082_v26 = vpop.f32.mrf.mxu1 }
 0x360   : > { %11207 = vst [vmem:[#allocation28_spill] sm:$0xff] %v10502_v32  ;;  %v10504_v13 = vpop.f32.mrf.mxu0  ;;  %v10507_v49 = vadd.f32 %v8082_v26, %v10353_v3 }
 0x361   : > { %11208 = vst [vmem:[#allocation7_spill] sm:$0xff] %v10504_v13  ;;  %v5016_v33 = vpop.f32.mrf.mxu1 }
 0x362   : > { %11209 = vst [vmem:[#allocation42_spill] sm:$0xff] %v10507_v49  ;;  %v10509_v30 = vpop.f32.mrf.mxu0  ;;  %v10512_v29 = vadd.f32 %v5016_v33, %v10359_v47 }
 0x363   : > { %11210 = vst [vmem:[#allocation31_spill] sm:$0xff] %v10509_v30  ;;  %v8083_v18 = vpop.f32.mrf.mxu1 }
 0x364   : > { %11211 = vst [vmem:[#allocation33_spill] sm:$0xff] %v10512_v29  ;;  %v10514_v43 = vpop.f32.mrf.mxu0  ;;  %v10517_v57 = vadd.f32 %v8083_v18, %v10362_v14 }
 0x365   : > { %11212 = vst [vmem:[#allocation8_spill] sm:$0xff] %v10514_v43  ;;  %v5019_v31 = vpop.f32.mrf.mxu1 }
 0x366   : > { %11213 = vst [vmem:[#allocation44_spill] sm:$0xff] %v10517_v57  ;;  %v10519_v19 = vpop.f32.mrf.mxu0  ;;  %v10522_v13 = vadd.f32 %v5019_v31, %v10366_v17 }
 0x367   : > { %11214 = vst [vmem:[#allocation35_spill] sm:$0xff] %v10519_v19  ;;  %v8086_v3 = vpop.f32.mrf.mxu1 }
 0x368   : > { %11215 = vst [vmem:[#allocation37_spill] sm:$0xff] %v10522_v13  ;;  %v10524_v26 = vpop.f32.mrf.mxu0  ;;  %v10527_v30 = vadd.f32 %v8086_v3, %v10369_v24 }
 0x369   : > { %11216 = vst [vmem:[#allocation10_spill] sm:$0xff] %v10524_v26  ;;  %v5032_v47 = vpop.f32.mrf.mxu1 }
 0x36a   : > { %11217 = vst [vmem:[#allocation46_spill] sm:$0xff] %v10527_v30  ;;  %v10529_v33 = vpop.f32.mrf.mxu0  ;;  %v10532_v43 = vadd.f32 %v5032_v47, %v10373_v42 }
 0x36b   : > { %11218 = vst [vmem:[#allocation48_spill] sm:$0xff] %v10529_v33  ;;  %v8087_v14 = vpop.f32.mrf.mxu1 }
 0x36c   : > { %11219 = vst [vmem:[#allocation39_spill] sm:$0xff] %v10532_v43  ;;  %v10534_v18 = vpop.f32.mrf.mxu0  ;;  %v10537_v19 = vadd.f32 %v8087_v14, %v10376_v15 }
 0x36d   : > { %11220 = vst [vmem:[#allocation11_spill] sm:$0xff] %v10534_v18  ;;  %v5035_v17 = vpop.f32.mrf.mxu1 }
 0x36e   : > { %11221 = vst [vmem:[#allocation50_spill] sm:$0xff] %v10537_v19  ;;  %v10539_v31 = vpop.f32.mrf.mxu0  ;;  %v10542_v26 = vadd.f32 %v5035_v17, %v10380_v6 }
 0x36f   : > { %11222 = vst [vmem:[#allocation41_spill] sm:$0xff] %v10539_v31  ;;  %v8130_v24 = vpop.f32.mrf.mxu1 }
 0x370   : > { %11223 = vst [vmem:[#allocation9_spill] sm:$0xff] %v10542_v26  ;;  %v8166_v3 = vpop.f32.mrf.mxu0 }
 0x371   : > { %v5532_v30 = vpop.f32.mrf.mxu1 }
 0x372   : > { %v5838_v13 = vpop.f32.mrf.mxu0 }
 0x373   : > { %v8131_v33 = vpop.f32.mrf.mxu1 }
 0x374   : > { %v8167_v42 = vpop.f32.mrf.mxu0 }
 0x375   : > { %v5535_v57 = vpop.f32.mrf.mxu1 }
 0x376   : > { %v10546_v18 = vpop.f32.mrf.mxu0 }
 0x377   : > { %v8134_v47 = vpop.f32.mrf.mxu1 }
 0x378   : > { %v10552_v31 = vpop.f32.mrf.mxu0 }
 0x379   : > { %v10544_v43 = vpop.f32.mrf.mxu1 }
 0x37a   : > { %v10558_v26 = vpop.f32.mrf.mxu0 }
 0x37b   : > { %v10548_v15 = vpop.f32.mrf.mxu1 }
 0x37c   : > { %v10564_v49 = vpop.f32.mrf.mxu0 }
 0x37d   : > { %v10550_v14 = vpop.f32.mrf.mxu1 }
 0x37e   : > { %v10570_v34 = vpop.f32.mrf.mxu0 }
 0x37f   : > { %v10554_v6 = vpop.f32.mrf.mxu1 }
 0x380   : > { %v10576_v63 = vpop.f32.mrf.mxu0 }
 0x381   : > { %v10556_v17 = vpop.f32.mrf.mxu1 }
 0x382   : > { %v10582_v46 = vpop.f32.mrf.mxu0 }
 0x383   : > { %v10560_v19 = vpop.f32.mrf.mxu1 }
 0x384   : > { %v10588_v38 = vpop.f32.mrf.mxu0 }
 0x385   : > { %v10562_v29 = vpop.f32.mrf.mxu1 }
 0x387   : > { %v10566_v32 = vpop.f32.mrf.mxu1 }
 0x389   : > { %v10568_v23 = vpop.f32.mrf.mxu1 }
 0x38a   : > { %11224 = vst [vmem:[#allocation43_spill] sm:$0xff] %v10568_v23 }
 0x38b   : > { %v10572_v62 = vpop.f32.mrf.mxu1 }
 0x38c   : > { %11225 = vst [vmem:[#allocation45_spill] sm:$0xff] %v10572_v62  ;;  %v10594_v62 = vpop.f32.mrf.mxu0 }
 0x38d   : > { %v10574_v40 = vpop.f32.mrf.mxu1  ;;  %11233 = vst [vmem:[#allocation56_spill] sm:$0xff] %v10594_v62 }
 0x38e   : > { %11226 = vst [vmem:[#allocation29_spill] sm:$0xff] %v10574_v40 }
 0x38f   : > { %v10578_v45 = vpop.f32.mrf.mxu1 }
 0x390   : > { %11227 = vst [vmem:[#allocation12_spill] sm:$0xff] %v10578_v45  ;;  %v10600_v45 = vpop.f32.mrf.mxu0 }
 0x391   : > { %v10580_v20 = vpop.f32.mrf.mxu1  ;;  %11236 = vst [vmem:[#allocation15_spill] sm:$0xff] %v10600_v45 }
 0x392   : > { %11228 = vst [vmem:[#allocation52_spill] sm:$0xff] %v10580_v20 }
 0x393   : > { %v10584_v0 = vpop.f32.mrf.mxu1 }
 0x394   : > { %11229 = vst [vmem:[#allocation13_spill] sm:$0xff] %v10584_v0  ;;  %v10606_v0 = vpop.f32.mrf.mxu0 }
 0x395   : > { %v10586_v10 = vpop.f32.mrf.mxu1  ;;  %11239 = vst [vmem:[#allocation53_spill] sm:$0xff] %v10606_v0 }
 0x396   : > { %11230 = vst [vmem:[#allocation54_spill] sm:$0xff] %v10586_v10 }
 0x397   : > { %v10590_v56 = vpop.f32.mrf.mxu1 }
 0x398   : > { %11231 = vst [vmem:[#allocation47_spill] sm:$0xff] %v10590_v56 }
 0x399   : > { %v10592_v9 = vpop.f32.mrf.mxu1 }
 0x39a   : > { %11232 = vst [vmem:[#allocation49_spill] sm:$0xff] %v10592_v9  ;;  %v10612_v9 = vpop.f32.mrf.mxu0 }
 0x39b   : > { %v10596_v40 = vpop.f32.mrf.mxu1  ;;  %11242 = vst [vmem:[#allocation57_spill] sm:$0xff] %v10612_v9 }
 0x39c   : > { %11234 = vst [vmem:[#allocation14_spill] sm:$0xff] %v10596_v40  ;;  %v10622_v45 = vpop.f32.mrf.mxu0 }
 0x39d   : > { %v10598_v44 = vpop.f32.mrf.mxu1 }
 0x39e   : > { %11235 = vst [vmem:[#allocation51_spill] sm:$0xff] %v10598_v44  ;;  %v5355_v44 = vadd.f32 %v10378_v60, %v10383_v4 }
 0x39f   : > { %v10602_v20 = vpop.f32.mrf.mxu1 }
 0x3a0   : > { %11237 = vst [vmem:[#allocation59_spill] sm:$0xff] %v10602_v20  ;;  %v5353_v20 = vadd.f32 %v10385_v54, %v10388_v50  ;;  %v10638_v54 = vpop.f32.mrf.mxu0 }
 0x3a1   : > { %v10604_v23 = vpop.f32.mrf.mxu1 }
 0x3a2   : > { %11238 = vst [vmem:[#allocation16_spill] sm:$0xff] %v10604_v23  ;;  %v5661_v23 = vadd.f32 %v8130_v24, %v5355_v44 }
 0x3a3   : > { %v10608_v10 = vpop.f32.mrf.mxu1 }
 0x3a4   : > { %11240 = vst [vmem:[#allocation55_spill] sm:$0xff] %v10608_v10  ;;  %v5659_v10 = vadd.f32 %v5532_v30, %v5353_v20  ;;  %v5967_v60 = vadd.f32 %v8166_v3, %v5661_v23  ;;  %v5360_v3 = vadd.f32 %v10411_v11, %v10416_v39 }
 0x3a5   : > { %v10610_v56 = vpop.f32.mrf.mxu1 }
 0x3a6   : > { %11241 = vst [vmem:[#allocation62_spill] sm:$0xff] %v10610_v56  ;;  %v5356_v56 = vadd.f32 %v10390_v1, %v10395_v27  ;;  %v5359_v1 = vadd.f32 %v10401_v28, %v10404_v7  ;;  %v5965_v27 = vadd.f32 %v5838_v13, %v5659_v10  ;;  %v5363_v13 = vadd.f32 %v10422_v48, %v10425_v61 }
 0x3a7   : > { %v10614_v62 = vpop.f32.mrf.mxu1 }
 0x3a8   : > { %11243 = vst [vmem:[#allocation58_spill] sm:$0xff] %v10614_v62  ;;  %v5354_v62 = vadd.f32 %v10397_v37, %v10399_v16  ;;  %v5662_v4 = vadd.f32 %v8131_v33, %v5356_v56  ;;  %v5357_v37 = vadd.f32 %v10406_v52, %v10409_v51  ;;  %v5665_v56 = vadd.f32 %v8134_v47, %v5359_v1  ;;  %v10646_v33 = vpop.f32.mrf.mxu0 }
 0x3a9   : > { %v10618_v40 = vpop.f32.mrf.mxu1  ;;  %v5358_v51 = vadd.f32 %v10418_v36, %v10420_v35  ;;  %v5669_v48 = vadd.f32 %v10554_v6, %v5363_v13  ;;  %v5362_v6 = vadd.f32 %v10439_v41, %v10441_v53 }
 0x3aa   : > { %v5660_v44 = vadd.f32 %v5535_v57, %v5354_v62  ;;  %v5968_v16 = vadd.f32 %v8167_v42, %v5662_v4  ;;  %v5663_v7 = vadd.f32 %v10544_v43, %v5357_v37  ;;  %v5971_v62 = vadd.f32 %v10552_v31, %v5665_v56  ;;  %v10662_v43 = vpop.f32.mrf.mxu0  ;;  %v11244_v56 = vld [vmem:[#allocation56_spill] sm:$0xff] }
 0x3ab   : > { %v10624_v0 = vpop.f32.mrf.mxu1  ;;  %v5666_v57 = vadd.f32 %v10548_v15, %v5360_v3  ;;  %v5664_v36 = vadd.f32 %v10550_v14, %v5358_v51  ;;  %v5361_v15 = vadd.f32 %v10427_v55, %v10430_v58  ;;  %v5364_v4 = vadd.f32 %v10432_v5, %v10437_v59  ;;  %v11249_v51 = vld [vmem:[#allocation45_spill] sm:$0xff] }
 0x3ac   : > { %v5966_v28 = vadd.f32 %v10546_v18, %v5660_v44  ;;  %v5969_v42 = vadd.f32 %v10558_v26, %v5663_v7  ;;  %v10675_v26 = vpop.f32.mrf.mxu0  ;;  %v5975_v1 = vadd.f32 %v10576_v63, %v5669_v48  ;;  %v5668_v41 = vadd.f32 %v10562_v29, %v5362_v6  ;;  %v11248_v7 = vld [vmem:[#allocation15_spill] sm:$0xff]  ;;  %v11255_v48 = vld [vmem:[#allocation30_spill] sm:$0xff] }
 0x3ad   : > { %v10628_v9 = vpop.f32.mrf.mxu1  ;;  %v5970_v55 = vadd.f32 %v10570_v34, %v5664_v36  ;;  %v5667_v58 = vadd.f32 %v10556_v17, %v5361_v15  ;;  %v5367_v34 = vadd.f32 %v10443_v2, %v10446_v22  ;;  %v11253_v36 = vld [vmem:[#allocation29_spill] sm:$0xff] }
 0x3ae   : > { %v10692_v17 = vpop.f32.mrf.mxu0 }
 0x3af   : > { %v8202_v50 = vpop.f32.mrf.mxu1  ;;  %v5673_v2 = vadd.f32 %v10566_v32, %v5367_v34  ;;  %v11260_v34 = vld [vmem:[#allocation52_spill] sm:$0xff] }
 0x3b0   : > { %v6273_v20 = vadd.f32 %v8202_v50, %v5967_v60  ;;  %v5972_v60 = vadd.f32 %v10564_v49, %v5666_v57  ;;  %v11251_v57 = vld [vmem:[#allocation20_spill] sm:$0xff] }
 0x3b1   : > { %v6144_v30 = vpop.f32.mrf.mxu1 }
 0x3b2   : > { %6305 = vst.msk [vmem:[%s10636_s22 + $0x10] sm:$0xff] %vm480_vm0, %v6273_v20  ;;  %v6271_v23 = vadd.f32 %v6144_v30, %v5965_v27  ;;  %v5670_v27 = vadd.f32 %v10560_v19, %v5364_v4  ;;  %v5365_v30 = vadd.f32 %v10448_v21, %v10451_v8  ;;  %v5974_v21 = vadd.f32 %v11244_v56, %v5668_v41  ;;  %v11245_v8 = vld [vmem:[#allocation43_spill] sm:$0xff]  ;;  %v11261_v41 = vld [vmem:[#allocation4_spill] sm:$0xff] }
 0x3b3   : > { %v8203_v24 = vpop.f32.mrf.mxu1 }
 0x3b4   : > { %6303 = vst.msk [vmem:[%s10636_s22] sm:$0xff] %vm480_vm0, %v6271_v23  ;;  %v6274_v52 = vadd.f32 %v8203_v24, %v5968_v16  ;;  %v5976_v37 = vadd.f32 %v10588_v38, %v5670_v27  ;;  %v5368_v16 = vadd.f32 %v10453_v12, %v10458_v25  ;;  %v5671_v38 = vadd.f32 %v11245_v8, %v5365_v30  ;;  %v11247_v24 = vld [vmem:[#allocation27_spill] sm:$0xff]  ;;  %v11259_v27 = vld [vmem:[#allocation32_spill] sm:$0xff] }
 0x3b5   : > { %v6147_v10 = vpop.f32.mrf.mxu1 }
 0x3b6   : > { %6306 = vst.msk [vmem:[%s10636_s22 + $0x18] sm:$0xff] %vm480_vm0, %v6274_v52  ;;  %v6407_v11 = vpack.c.bf16 %v6274_v52, %v6273_v20  ;;  %v6272_v39 = vadd.f32 %v6147_v10, %v5966_v28  ;;  %v5973_v20 = vadd.f32 %v10582_v46, %v5667_v58  ;;  %v10705_v46 = vpop.f32.mrf.mxu0  ;;  %v5979_v52 = vadd.f32 %v11248_v7, %v5673_v2  ;;  %v11268_v7 = vld [vmem:[#allocation36_spill] sm:$0xff] }
 0x3b7   : > { %v8206_v18 = vpop.f32.mrf.mxu1  ;;  %v5674_v10 = vadd.f32 %v11249_v51, %v5368_v16  ;;  %v11265_v16 = vld [vmem:[#allocation34_spill] sm:$0xff] }
 0x3b8   : > { %6304 = vst.msk [vmem:[%s10636_s22 + $0x8] sm:$0xff] %vm480_vm0, %v6272_v39  ;;  %v6406_v35 = vpack.c.bf16 %v6272_v39, %v6271_v23  ;;  %v6277_v31 = vadd.f32 %v8206_v18, %v5971_v62  ;;  %v11246_v23 = vld [vmem:[#allocation22_spill] sm:$0xff]  ;;  %v11250_v62 = vld [vmem:[#allocation3_spill] sm:$0xff]  ;;  %v10722_v39 = vpop.f32.mrf.mxu0  ;;  %v11252_v18 = vld [vmem:[#allocation53_spill] sm:$0xff] }
 0x3b9   : > { %v6160_v47 = vpop.f32.mrf.mxu1  ;;  %v5366_v3 = vadd.f32 %v11247_v24, %v11246_v23 }
 0x3ba   : > { %6309 = vst.msk [vmem:[%s10636_s22 + $0x30] sm:$0xff] %vm480_vm0, %v6277_v31  ;;  %v6275_v61 = vadd.f32 %v6160_v47, %v5969_v42  ;;  %8236 = vmatprep.mubr.msk.bf16.mxu0 %vm480_vm0, %v6406_v35  ;;  %v5977_v42 = vadd.f32 %v11252_v18, %v5671_v38  ;;  %v10735_v6 = vpop.f32.mrf.mxu0 }
 0x3bb   : > { %v8207_v14 = vpop.f32.mrf.mxu1  ;;  %8237 = vmatmul.mubr.msk.bf16.vlgmr.msra.gmra.mxu0 %vm480_vm0, %v6407_v11  ;;  %v5371_v11 = vadd.f32 %v11251_v57, %v11250_v62  ;;  %v5672_v35 = vadd.f32 %v11253_v36, %v5366_v3  ;;  %v11270_v57 = vld [vmem:[#allocation38_spill] sm:$0xff] }
 0x3bc   : > { %6307 = vst.msk [vmem:[%s10636_s22 + $0x20] sm:$0xff] %vm480_vm0, %v6275_v61  ;;  %v6278_v49 = vadd.f32 %v8207_v14, %v5972_v60  ;;  %v11254_v60 = vld [vmem:[#allocation23_spill] sm:$0xff]  ;;  %v11256_v14 = vld [vmem:[#allocation57_spill] sm:$0xff] }
 0x3bd   : > { %v6163_v50 = vpop.f32.mrf.mxu1  ;;  %v5980_v4 = vadd.f32 %v11256_v14, %v5674_v10  ;;  %v11269_v10 = vld [vmem:[#allocation47_spill] sm:$0xff] }
 0x3be   : > { %6310 = vst.msk [vmem:[%s10636_s22 + $0x38] sm:$0xff] %vm480_vm0, %v6278_v49  ;;  %v6409_v5 = vpack.c.bf16 %v6278_v49, %v6277_v31  ;;  %v6276_v59 = vadd.f32 %v6163_v50, %v5970_v55  ;;  %v11257_v55 = vld [vmem:[#allocation12_spill] sm:$0xff] }
 0x3bf   : > { %v8210_v44 = vpop.f32.mrf.mxu1  ;;  %v5677_v58 = vadd.f32 %v11257_v55, %v5371_v11  ;;  %v11271_v11 = vld [vmem:[#allocation6_spill] sm:$0xff]  ;;  %v11277_v55 = vld [vmem:[#allocation7_spill] sm:$0xff] }
 0x3c0   : > { %6308 = vst.msk [vmem:[%s10636_s22 + $0x28] sm:$0xff] %vm480_vm0, %v6276_v59  ;;  %v6408_v53 = vpack.c.bf16 %v6276_v59, %v6275_v61  ;;  %v6281_v63 = vadd.f32 %v8210_v44, %v5975_v1  ;;  %v5369_v61 = vadd.f32 %v11255_v48, %v11254_v60  ;;  %v11258_v1 = vld [vmem:[#allocation24_spill] sm:$0xff]  ;;  %v5978_v59 = vadd.f32 %v10622_v45, %v5672_v35  ;;  %v11264_v45 = vld [vmem:[#allocation5_spill] sm:$0xff]  ;;  %v11275_v48 = vld [vmem:[#allocation14_spill] sm:$0xff] }
 0x3c1   : > { %v6176_v19 = vpop.f32.mrf.mxu1  ;;  %v5983_v30 = vadd.f32 %v10638_v54, %v5677_v58  ;;  %v5375_v56 = vadd.f32 %v11265_v16, %v11264_v45  ;;  %v11273_v35 = vld [vmem:[#allocation28_spill] sm:$0xff] }
 0x3c2   : > { %6313 = vst.msk [vmem:[%s10636_s22 + $0x50] sm:$0xff] %vm480_vm0, %v6281_v63  ;;  %v6279_v22 = vadd.f32 %v6176_v19, %v5973_v20  ;;  %8240 = vmatprep.mubr.msk.bf16.mxu0 %vm480_vm0, %v6408_v53  ;;  %v5675_v44 = vadd.f32 %v11260_v34, %v5369_v61  ;;  %v11262_v53 = vld [vmem:[#allocation25_spill] sm:$0xff]  ;;  %v11284_v16 = vld [vmem:[#allocation16_spill] sm:$0xff] }
 0x3c3   : > { %v8211_v29 = vpop.f32.mrf.mxu1  ;;  %8241 = vmatmul.mubr.msk.bf16.gmra.mxu0 %vm480_vm0, %v6409_v5  ;;  %v5372_v5 = vadd.f32 %v11259_v27, %v11258_v1  ;;  %v11278_v27 = vld [vmem:[#allocation51_spill] sm:$0xff] }
 0x3c4   : > { %6311 = vst.msk [vmem:[%s10636_s22 + $0x40] sm:$0xff] %vm480_vm0, %v6279_v22  ;;  %v6282_v32 = vadd.f32 %v8211_v29, %v5976_v37  ;;  %v11263_v37 = vld [vmem:[#allocation13_spill] sm:$0xff]  ;;  %v5981_v38 = vadd.f32 %v10646_v33, %v5675_v44 }
 0x3c5   : > { %v6179_v28 = vpop.f32.mrf.mxu1  ;;  %v5678_v2 = vadd.f32 %v11263_v37, %v5372_v5  ;;  %v11279_v44 = vld [vmem:[#allocation33_spill] sm:$0xff] }
 0x3c6   : > { %6314 = vst.msk [vmem:[%s10636_s22 + $0x58] sm:$0xff] %vm480_vm0, %v6282_v32  ;;  %v6411_v12 = vpack.c.bf16 %v6282_v32, %v6281_v63  ;;  %v6280_v25 = vadd.f32 %v6179_v28, %v5974_v21  ;;  %v5370_v63 = vadd.f32 %v11262_v53, %v11261_v41  ;;  %v8190_v21 = vpop.f32.mrf.mxu0  ;;  %v11266_v32 = vld [vmem:[#allocation54_spill] sm:$0xff] }
 0x3c7   : > { %v8214_v13 = vpop.f32.mrf.mxu1  ;;  %v11267_v28 = vld [vmem:[#allocation26_spill] sm:$0xff]  ;;  %v5984_v51 = vadd.f32 %v10662_v43, %v5678_v2  ;;  %v11282_v2 = vld [vmem:[#allocation44_spill] sm:$0xff] }
 0x3c8   : > { %6312 = vst.msk [vmem:[%s10636_s22 + $0x48] sm:$0xff] %vm480_vm0, %v6280_v25  ;;  %v6410_v31 = vpack.c.bf16 %v6280_v25, %v6279_v22  ;;  %v6285_v47 = vadd.f32 %v8214_v13, %v5979_v52  ;;  %v5676_v23 = vadd.f32 %v11266_v32, %v5370_v63  ;;  %v5373_v52 = vadd.f32 %v11268_v7, %v11267_v28  ;;  %v5934_v33 = vpop.f32.mrf.mxu0  ;;  %v11281_v63 = vld [vmem:[#allocation59_spill] sm:$0xff] }
 0x3c9   : > { %v6192_v15 = vpop.f32.mrf.mxu1  ;;  %v5376_v13 = vadd.f32 %v11271_v11, %v11270_v57 }
 0x3ca   : > { %6317 = vst.msk [vmem:[%s10636_s22 + $0x70] sm:$0xff] %vm480_vm0, %v6285_v47  ;;  %v6283_v49 = vadd.f32 %v6192_v15, %v5977_v42  ;;  %8244 = vmatprep.mubr.msk.bf16.mxu0 %vm480_vm0, %v6410_v31  ;;  %v5982_v18 = vadd.f32 %v10675_v26, %v5676_v23  ;;  %v11272_v42 = vld [vmem:[#allocation49_spill] sm:$0xff]  ;;  %v11274_v31 = vld [vmem:[#allocation40_spill] sm:$0xff]  ;;  %v11276_v26 = vld [vmem:[#allocation42_spill] sm:$0xff] }
 0x3cb   : > { %v8215_v50 = vpop.f32.mrf.mxu1  ;;  %8245 = vmatmul.mubr.msk.bf16.gmra.mxu0 %vm480_vm0, %v6411_v12  ;;  %v5681_v12 = vadd.f32 %v11269_v10, %v5375_v56  ;;  %v5679_v43 = vadd.f32 %v11272_v42, %v5373_v52  ;;  %v5682_v61 = vadd.f32 %v11275_v48, %v5376_v13  ;;  %v5379_v58 = vadd.f32 %v11277_v55, %v11276_v26  ;;  %v11291_v42 = vld [vmem:[#allocation39_spill] sm:$0xff]  ;;  %v11296_v55 = vld [vmem:[#allocation9_spill] sm:$0xff] }
 0x3cc   : > { %6315 = vst.msk [vmem:[%s10636_s22 + $0x60] sm:$0xff] %vm480_vm0, %v6283_v49  ;;  %v6286_v20 = vadd.f32 %v8215_v50, %v5980_v4  ;;  %v11295_v48 = vld [vmem:[#allocation11_spill] sm:$0xff] }
 0x3cd   : > { %v6195_v19 = vpop.f32.mrf.mxu1  ;;  %v5987_v60 = vadd.f32 %v10692_v17, %v5681_v12  ;;  %v5985_v1 = vadd.f32 %v10705_v46, %v5679_v43  ;;  %v5988_v53 = vadd.f32 %v10722_v39, %v5682_v61  ;;  %v11292_v43 = vld [vmem:[#allocation48_spill] sm:$0xff] }
 0x3ce   : > { %6318 = vst.msk [vmem:[%s10636_s22 + $0x78] sm:$0xff] %vm480_vm0, %v6286_v20  ;;  %v6413_v22 = vpack.c.bf16 %v6286_v20, %v6285_v47  ;;  %v6284_v29 = vadd.f32 %v6195_v19, %v5978_v59  ;;  %v5374_v47 = vadd.f32 %v11274_v31, %v11273_v35  ;;  %v11280_v20 = vld [vmem:[#allocation31_spill] sm:$0xff]  ;;  %v5685_v19 = vadd.f32 %v11281_v63, %v5379_v58  ;;  %v11293_v31 = vld [vmem:[#allocation58_spill] sm:$0xff]  ;;  %v11297_v58 = vld [vmem:[#allocation41_spill] sm:$0xff] }
 0x3cf   : > { %v8218_v8 = vpop.f32.mrf.mxu1  ;;  %v5377_v41 = vadd.f32 %v11280_v20, %v11279_v44 }
 0x3d0   : > { %6316 = vst.msk [vmem:[%s10636_s22 + $0x68] sm:$0xff] %vm480_vm0, %v6284_v29  ;;  %v6412_v54 = vpack.c.bf16 %v6284_v29, %v6283_v49  ;;  %v6289_v24 = vadd.f32 %v8218_v8, %v5983_v30  ;;  %v8191_v49 = vpop.f32.mrf.mxu0  ;;  %v5680_v5 = vadd.f32 %v11278_v27, %v5374_v47  ;;  %v11285_v8 = vld [vmem:[#allocation37_spill] sm:$0xff] }
 0x3d1   : > { %v6208_v3 = vpop.f32.mrf.mxu1  ;;  %v5683_v39 = vadd.f32 %v11284_v16, %v5377_v41  ;;  %v10848_v16 = vld [vmem:[%s11056_s10] ss:$0 sm:$0xff] }
 0x3d2   : > { %6321 = vst.msk [vmem:[%s10636_s22 + $0x90] sm:$0xff] %vm480_vm0, %v6289_v24  ;;  %v6287_v25 = vadd.f32 %v6208_v3, %v5981_v38  ;;  %8248 = vmatprep.mubr.msk.bf16.mxu0 %vm480_vm0, %v6412_v54  ;;  %v5937_v46 = vpop.f32.mrf.mxu0  ;;  %v5986_v45 = vadd.f32 %v10735_v6, %v5680_v5  ;;  %v11286_v38 = vld [vmem:[#allocation35_spill] sm:$0xff]  ;;  %v11288_v6 = vld [vmem:[#allocation46_spill] sm:$0xff] }
 0x3d3   : > { %v8219_v62 = vpop.f32.mrf.mxu1  ;;  %8249 = vmatmul.mubr.msk.bf16.gmra.mxu0 %vm480_vm0, %v6413_v22  ;;  %v11283_v22 = vld [vmem:[#allocation8_spill] sm:$0xff]  ;;  %v5378_v32 = vadd.f32 %v11286_v38, %v11285_v8  ;;  %v11287_v3 = vld [vmem:[#allocation55_spill] sm:$0xff]  ;;  %v6336_v38 = vld [vmem:[%s10842_s26 + $0x8] sm:$0xff] }
 0x3d4   : > { %6319 = vst.msk [vmem:[%s10636_s22 + $0x80] sm:$0xff] %vm480_vm0, %v6287_v25  ;;  %v6290_v36 = vadd.f32 %v8219_v62, %v5984_v51  ;;  %v5380_v29 = vadd.f32 %v11283_v22, %v11282_v2  ;;  %v8194_v23 = vpop.f32.mrf.mxu0  ;;  %v11289_v51 = vld [vmem:[#allocation10_spill] sm:$0xff]  ;;  %v6338_v8 = vld [vmem:[%s10842_s26 + $0x18] sm:$0xff] }
 0x3d5   : > { %v6211_v15 = vpop.f32.mrf.mxu1  ;;  %v5383_v10 = vadd.f32 %v11289_v51, %v11288_v6  ;;  %v11290_v62 = vld [vmem:[#allocation62_spill] sm:$0xff]  ;;  %v10863_v6 = vld [vmem:[%s10842_s26 + $0x70] sm:$0xff]  ;;  %v10866_v51 = vld [vmem:[%s10842_s26 + $0x60] sm:$0xff] }
 0x3d6   : > { %6322 = vst.msk [vmem:[%s10636_s22 + $0x98] sm:$0xff] %vm480_vm0, %v6290_v36  ;;  %v6415_v14 = vpack.c.bf16 %v6290_v36, %v6289_v24  ;;  %v6288_v4 = vadd.f32 %v6211_v15, %v5982_v18  ;;  %v5991_v24 = vadd.f32 %v8190_v21, %v5685_v19  ;;  %v5686_v28 = vadd.f32 %v11287_v3, %v5380_v29  ;;  %v5950_v21 = vpop.f32.mrf.mxu0  ;;  %v6345_v3 = vld [vmem:[%s10842_s26 + $0x50] sm:$0xff] }
 0x3d7   : > { %v8222_v50 = vpop.f32.mrf.mxu1  ;;  %v5684_v57 = vadd.f32 %v11290_v62, %v5378_v32  ;;  %v5381_v36 = vadd.f32 %v11292_v43, %v11291_v42  ;;  %v5689_v47 = vadd.f32 %v11293_v31, %v5383_v10  ;;  %v6341_v32 = vld [vmem:[%s10842_s26 + $0x30] sm:$0xff]  ;;  %v10869_v10 = vld [vmem:[%s10842_s26 + $0x78] sm:$0xff]  ;;  %v10878_v62 = vld [vmem:[%s10842_s26 + $0x80] sm:$0xff] }
 0x3d8   : > { %6320 = vst.msk [vmem:[%s10636_s22 + $0x88] sm:$0xff] %vm480_vm0, %v6288_v4  ;;  %v6414_v17 = vpack.c.bf16 %v6288_v4, %v6287_v25  ;;  %v6293_v59 = vadd.f32 %v8222_v50, %v5987_v60  ;;  %v5989_v25 = vadd.f32 %v5934_v33, %v5683_v39  ;;  %v5992_v35 = vadd.f32 %v8191_v49, %v5686_v28  ;;  %v11294_v60 = vld [vmem:[#allocation50_spill] sm:$0xff]  ;;  %v8195_v50 = vpop.f32.mrf.mxu0  ;;  %v6335_v39 = vld [vmem:[%s10842_s26] sm:$0xff]  ;;  %v10899_v43 = vld [vmem:[%s10842_s26 + $0xd0] sm:$0xff] }
 0x3d9   : > { %v6224_v34 = vpop.f32.mrf.mxu1  ;;  %v5384_v61 = vadd.f32 %v11295_v48, %v11294_v60  ;;  %v5687_v4 = vadd.f32 %v10618_v40, %v5381_v36  ;;  %v5382_v49 = vadd.f32 %v11297_v58, %v11296_v55  ;;  %v5995_v27 = vadd.f32 %v8194_v23, %v5689_v47  ;;  %v6339_v23 = vld [vmem:[%s10842_s26 + $0x20] sm:$0xff]  ;;  %v10896_v42 = vld [vmem:[%s10842_s26 + $0xa8] sm:$0xff]  ;;  %v10906_v31 = vld [vmem:[%s10842_s26 + $0xd8] sm:$0xff] }
 0x3da   : > { %6325 = vst.msk [vmem:[%s10636_s22 + $0xb0] sm:$0xff] %vm480_vm0, %v6293_v59  ;;  %v6291_v30 = vadd.f32 %v6224_v34, %v5985_v1  ;;  %8252 = vmatprep.mubr.msk.bf16.mxu0 %vm480_vm0, %v6414_v17  ;;  %v6343_v28 = vld [vmem:[%s10842_s26 + $0x40] sm:$0xff]  ;;  %v10909_v47 = vld [vmem:[%s10842_s26 + $0xc8] sm:$0xff]  ;;  %v10924_v48 = vld [vmem:[%s10842_s26 + $0xf8] sm:$0xff]  ;;  %v6375_v58 = vadd.f32 %v10848_v16, %v6336_v38 }
 0x3db   : > { %v8223_v37 = vpop.f32.mrf.mxu1  ;;  %8253 = vmatmul.mubr.msk.bf16.gmra.mxu0 %vm480_vm0, %v6415_v14  ;;  %v5990_v14 = vadd.f32 %v5937_v46, %v5684_v57  ;;  %v5690_v5 = vadd.f32 %v10624_v0, %v5384_v61  ;;  %v5993_v44 = vadd.f32 %v5950_v21, %v5687_v4  ;;  %v5688_v40 = vadd.f32 %v10628_v9, %v5382_v49  ;;  %v10881_v57 = vld [vmem:[%s10842_s26 + $0x98] sm:$0xff]  ;;  %v10890_v21 = vld [vmem:[%s10842_s26 + $0xa0] sm:$0xff]  ;;  %v10927_v61 = vld [vmem:[%s10842_s26 + $0xe8] sm:$0xff] }
 0x3dc   : > { %6323 = vst.msk [vmem:[%s10636_s22 + $0xa0] sm:$0xff] %vm480_vm0, %v6291_v30  ;;  %v6294_v56 = vadd.f32 %v8223_v37, %v5988_v53  ;;  %v5953_v53 = vpop.f32.mrf.mxu0  ;;  %v10902_v36 = vld [vmem:[%s10842_s26 + $0xc0] sm:$0xff]  ;;  %v6377_v4 = vadd.f32 %v10848_v16, %v6338_v8  ;;  %v6388_v8 = vadd.f32 %v10848_v16, %v10863_v6 }
 0x3dd   : > { %v6227_v54 = vpop.f32.mrf.mxu1  ;;  %v5996_v19 = vadd.f32 %v8195_v50, %v5690_v5  ;;  %v5994_v46 = vadd.f32 %v5953_v53, %v5688_v40  ;;  %v10921_v60 = vld [vmem:[%s10842_s26 + $0xe0] sm:$0xff] }
 0x3de   : > { %6326 = vst.msk [vmem:[%s10636_s22 + $0xb8] sm:$0xff] %vm480_vm0, %v6294_v56  ;;  %v6417_v7 = vpack.c.bf16 %v6294_v56, %v6293_v59  ;;  %v6292_v52 = vadd.f32 %v6227_v54, %v5986_v45  ;;  %v6337_v45 = vld [vmem:[%s10842_s26 + $0x10] sm:$0xff]  ;;  %v6342_v54 = vld [vmem:[%s10842_s26 + $0x38] sm:$0xff] }
 0x3df   : > { %v8226_v12 = vpop.f32.mrf.mxu1  ;;  %v6376_v56 = vadd.f32 %v10848_v16, %v6337_v45 }
 0x3e0   : > { %6324 = vst.msk [vmem:[%s10636_s22 + $0xa8] sm:$0xff] %vm480_vm0, %v6292_v52  ;;  %v6416_v11 = vpack.c.bf16 %v6292_v52, %v6291_v30  ;;  %v6297_v13 = vadd.f32 %v8226_v12, %v5991_v24  ;;  %v6340_v24 = vld [vmem:[%s10842_s26 + $0x28] sm:$0xff] }
 0x3e1   : > { %v6240_v18 = vpop.f32.mrf.mxu1  ;;  %v6344_v52 = vld [vmem:[%s10842_s26 + $0x48] sm:$0xff] }
 0x3e2   : > { %6329 = vst.msk [vmem:[%s10636_s22 + $0xd0] sm:$0xff] %vm480_vm0, %v6297_v13  ;;  %v6295_v15 = vadd.f32 %v6240_v18, %v5989_v25  ;;  %8256 = vmatprep.mubr.msk.bf16.mxu0 %vm480_vm0, %v6416_v11  ;;  %v10872_v12 = vld [vmem:[%s10842_s26 + $0x68] sm:$0xff]  ;;  %v10875_v25 = vld [vmem:[%s10842_s26 + $0x90] sm:$0xff]  ;;  %v10893_v18 = vld [vmem:[%s10842_s26 + $0xb8] sm:$0xff]  ;;  %v6383_v45 = vadd.f32 %v10848_v16, %v6344_v52 }
 0x3e3   : > { %v8227_v33 = vpop.f32.mrf.mxu1  ;;  %8257 = vmatmul.mubr.msk.bf16.gmra.mxu0 %vm480_vm0, %v6417_v7  ;;  %v6346_v7 = vld [vmem:[%s10842_s26 + $0x58] sm:$0xff]  ;;  %v10884_v11 = vld [vmem:[%s10842_s26 + $0x88] sm:$0xff]  ;;  %v6387_v52 = vadd.f32 %v10848_v16, %v10872_v12 }
 0x3e4   : > { %6327 = vst.msk [vmem:[%s10636_s22 + $0xc0] sm:$0xff] %vm480_vm0, %v6295_v15  ;;  %v6298_v26 = vadd.f32 %v8227_v33, %v5992_v35  ;;  %v6374_v35 = vadd.f32 %v10848_v16, %v6335_v39 }
 0x3e5   : > { %v6243_v1 = vpop.f32.mrf.mxu1 }
 0x3e6   : > { %6330 = vst.msk [vmem:[%s10636_s22 + $0xd8] sm:$0xff] %vm480_vm0, %v6298_v26  ;;  %v6419_v17 = vpack.c.bf16 %v6298_v26, %v6297_v13  ;;  %v6296_v59 = vadd.f32 %v6243_v1, %v5990_v14  ;;  %v10887_v13 = vld [vmem:[%s10842_s26 + $0xb0] sm:$0xff]  ;;  %v6380_v1 = vadd.f32 %v10848_v16, %v6341_v32 }
 0x3e7   : > { %v8230_v34 = vpop.f32.mrf.mxu1 }
 0x3e8   : > { %6328 = vst.msk [vmem:[%s10636_s22 + $0xc8] sm:$0xff] %vm480_vm0, %v6296_v59  ;;  %v6418_v20 = vpack.c.bf16 %v6296_v59, %v6295_v15  ;;  %v6301_v41 = vadd.f32 %v8230_v34, %v5995_v27  ;;  %v10912_v15 = vld [vmem:[%s10842_s26 + $0xf0] sm:$0xff] }
 0x3e9   : > { %v6256_v63 = vpop.f32.mrf.mxu1 }
 0x3ea   : > { %6333 = vst.msk [vmem:[%s10636_s22 + $0xf0] sm:$0xff] %vm480_vm0, %v6301_v41  ;;  %v6299_v0 = vadd.f32 %v6256_v63, %v5993_v44  ;;  %8260 = vmatprep.mubr.msk.bf16.mxu0 %vm480_vm0, %v6418_v20  ;;  %v6381_v44 = vadd.f32 %v10848_v16, %v6342_v54 }
 0x3eb   : > { %v8231_v30 = vpop.f32.mrf.mxu1  ;;  %8261 = vmatmul.mubr.msk.bf16.gmra.mxu0 %vm480_vm0, %v6419_v17  ;;  %v6378_v17 = vadd.f32 %v10848_v16, %v6339_v23  ;;  %v6386_v23 = vadd.f32 %v10848_v16, %v10866_v51 }
 0x3ec   : > { %6331 = vst.msk [vmem:[%s10636_s22 + $0xe0] sm:$0xff] %vm480_vm0, %v6299_v0  ;;  %v6302_v9 = vadd.f32 %v8231_v30, %v5996_v19  ;;  %v6384_v19 = vadd.f32 %v10848_v16, %v6345_v3  ;;  %v6389_v3 = vadd.f32 %v10848_v16, %v10869_v10 }
 0x3ed   : > { %v6259_v37 = vpop.f32.mrf.mxu1 }
 0x3ee   : > { %6334 = vst.msk [vmem:[%s10636_s22 + $0xf8] sm:$0xff] %vm480_vm0, %v6302_v9  ;;  %v6421_v2 = vpack.c.bf16 %v6302_v9, %v6301_v41  ;;  %v6300_v22 = vadd.f32 %v6259_v37, %v5994_v46  ;;  %v6379_v41 = vadd.f32 %v10848_v16, %v6340_v24  ;;  %v6382_v46 = vadd.f32 %v10848_v16, %v6343_v28 }
 0x3f0   : > { %6332 = vst.msk [vmem:[%s10636_s22 + $0xe8] sm:$0xff] %vm480_vm0, %v6300_v22  ;;  %v6420_v29 = vpack.c.bf16 %v6300_v22, %v6299_v0 }
 0x3f2   : > { %8264 = vmatprep.mubr.msk.bf16.mxu0 %vm480_vm0, %v6420_v29 }
 0x3f3   : > { %8265 = vmatmul.mubr.msk.bf16.gmra.mxu0 %vm480_vm0, %v6421_v2  ;;  %v6385_v2 = vadd.f32 %v10848_v16, %v6346_v7 }
 0x47b   : > { %v8238_v33 = vpop.f32.mrf.mxu0 }
 0x47c   : > { %v6649_v14 = vadd.f32 %v8238_v33, %v6376_v56 }
 0x47d   : > { %v6520_v26 = vpop.f32.mrf.mxu0 }
 0x47e   : > { %v6647_v55 = vadd.f32 %v6520_v26, %v6374_v35  ;;  %6681 = vst.msk [vmem:[%s10918_s13 + $0x10] sm:$0xff] %vm480_vm0, %v6649_v14  ;;  %v6392_v35 = vadd.f32 %v10848_v16, %v10875_v25  ;;  %v6390_v14 = vadd.f32 %v10848_v16, %v10878_v62  ;;  %v6393_v26 = vadd.f32 %v10848_v16, %v10881_v57 }
 0x47f   : > { %v8239_v49 = vpop.f32.mrf.mxu0 }
 0x480   : > { %v6650_v50 = vadd.f32 %v8239_v49, %v6377_v4  ;;  %6679 = vst.msk [vmem:[%s10918_s13] sm:$0xff] %vm480_vm0, %v6647_v55 }
 0x481   : > { %v6523_v27 = vpop.f32.mrf.mxu0 }
 0x482   : > { %v6648_v5 = vadd.f32 %v6523_v27, %v6375_v58  ;;  %6682 = vst.msk [vmem:[%s10918_s13 + $0x18] sm:$0xff] %vm480_vm0, %v6650_v50  ;;  %v6391_v58 = vadd.f32 %v10848_v16, %v10884_v11  ;;  %v6396_v50 = vadd.f32 %v10848_v16, %v10887_v13  ;;  %v6394_v27 = vadd.f32 %v10848_v16, %v10890_v21 }
 0x483   : > { %v8242_v59 = vpop.f32.mrf.mxu0 }
 0x484   : > { %v6653_v34 = vadd.f32 %v8242_v59, %v6380_v1  ;;  %6680 = vst.msk [vmem:[%s10918_s13 + $0x8] sm:$0xff] %vm480_vm0, %v6648_v5 }
 0x485   : > { %v6536_v40 = vpop.f32.mrf.mxu0 }
 0x486   : > { %v6651_v20 = vadd.f32 %v6536_v40, %v6378_v17  ;;  %6685 = vst.msk [vmem:[%s10918_s13 + $0x30] sm:$0xff] %vm480_vm0, %v6653_v34  ;;  %v6397_v17 = vadd.f32 %v10848_v16, %v10893_v18  ;;  %v6395_v34 = vadd.f32 %v10848_v16, %v10896_v42  ;;  %v6400_v40 = vadd.f32 %v10848_v16, %v10899_v43 }
 0x487   : > { %v8243_v53 = vpop.f32.mrf.mxu0 }
 0x488   : > { %v6654_v63 = vadd.f32 %v8243_v53, %v6381_v44  ;;  %6683 = vst.msk [vmem:[%s10918_s13 + $0x20] sm:$0xff] %vm480_vm0, %v6651_v20 }
 0x489   : > { %v6539_v0 = vpop.f32.mrf.mxu0 }
 0x48a   : > { %v6652_v30 = vadd.f32 %v6539_v0, %v6379_v41  ;;  %6686 = vst.msk [vmem:[%s10918_s13 + $0x38] sm:$0xff] %vm480_vm0, %v6654_v63  ;;  %v6398_v41 = vadd.f32 %v10848_v16, %v10902_v36  ;;  %v6401_v63 = vadd.f32 %v10848_v16, %v10906_v31  ;;  %v6399_v0 = vadd.f32 %v10848_v16, %v10909_v47 }
 0x48b   : > { %v8246_v9 = vpop.f32.mrf.mxu0 }
 0x48c   : > { %v6657_v37 = vadd.f32 %v8246_v9, %v6384_v19  ;;  %6684 = vst.msk [vmem:[%s10918_s13 + $0x28] sm:$0xff] %vm480_vm0, %v6652_v30 }
 0x48d   : > { %v6552_v22 = vpop.f32.mrf.mxu0 }
 0x48e   : > { %v6655_v29 = vadd.f32 %v6552_v22, %v6382_v46  ;;  %6689 = vst.msk [vmem:[%s10918_s13 + $0x50] sm:$0xff] %vm480_vm0, %v6657_v37  ;;  %v6404_v46 = vadd.f32 %v10848_v16, %v10912_v15  ;;  %v6402_v37 = vadd.f32 %v10848_v16, %v10921_v60  ;;  %v6405_v22 = vadd.f32 %v10848_v16, %v10924_v48 }
 0x48f   : > { %v8247_v39 = vpop.f32.mrf.mxu0 }
 0x490   : > { %v6658_v56 = vadd.f32 %v8247_v39, %v6385_v2  ;;  %6687 = vst.msk [vmem:[%s10918_s13 + $0x40] sm:$0xff] %vm480_vm0, %v6655_v29 }
 0x491   : > { %v6555_v38 = vpop.f32.mrf.mxu0 }
 0x492   : > { %v6656_v32 = vadd.f32 %v6555_v38, %v6383_v45  ;;  %6690 = vst.msk [vmem:[%s10918_s13 + $0x58] sm:$0xff] %vm480_vm0, %v6658_v56  ;;  %v6403_v45 = vadd.f32 %v10848_v16, %v10927_v61 }
 0x493   : > { %v8250_v54 = vpop.f32.mrf.mxu0 }
 0x494   : > { %v6661_v24 = vadd.f32 %v8250_v54, %v6388_v8  ;;  %6688 = vst.msk [vmem:[%s10918_s13 + $0x48] sm:$0xff] %vm480_vm0, %v6656_v32 }
 0x495   : > { %v6568_v28 = vpop.f32.mrf.mxu0 }
 0x496   : > { %v6659_v7 = vadd.f32 %v6568_v28, %v6386_v23  ;;  %6693 = vst.msk [vmem:[%s10918_s13 + $0x70] sm:$0xff] %vm480_vm0, %v6661_v24 }
 0x497   : > { %v8251_v6 = vpop.f32.mrf.mxu0 }
 0x498   : > { %v6662_v51 = vadd.f32 %v8251_v6, %v6389_v3  ;;  %6691 = vst.msk [vmem:[%s10918_s13 + $0x60] sm:$0xff] %vm480_vm0, %v6659_v7 }
 0x499   : > { %v6571_v10 = vpop.f32.mrf.mxu0 }
 0x49a   : > { %v6660_v33 = vadd.f32 %v6571_v10, %v6387_v52  ;;  %6694 = vst.msk [vmem:[%s10918_s13 + $0x78] sm:$0xff] %vm480_vm0, %v6662_v51 }
 0x49b   : > { %v8254_v12 = vpop.f32.mrf.mxu0 }
 0x49c   : > { %v6665_v4 = vadd.f32 %v8254_v12, %v6392_v35  ;;  %6692 = vst.msk [vmem:[%s10918_s13 + $0x68] sm:$0xff] %vm480_vm0, %v6660_v33 }
 0x49d   : > { %v6584_v25 = vpop.f32.mrf.mxu0 }
 0x49e   : > { %v6663_v55 = vadd.f32 %v6584_v25, %v6390_v14  ;;  %6697 = vst.msk [vmem:[%s10918_s13 + $0x90] sm:$0xff] %vm480_vm0, %v6665_v4 }
 0x49f   : > { %v8255_v62 = vpop.f32.mrf.mxu0 }
 0x4a0   : > { %v6666_v49 = vadd.f32 %v8255_v62, %v6393_v26  ;;  %6695 = vst.msk [vmem:[%s10918_s13 + $0x80] sm:$0xff] %vm480_vm0, %v6663_v55 }
 0x4a1   : > { %v6587_v57 = vpop.f32.mrf.mxu0 }
 0x4a2   : > { %v6664_v1 = vadd.f32 %v6587_v57, %v6391_v58  ;;  %6698 = vst.msk [vmem:[%s10918_s13 + $0x98] sm:$0xff] %vm480_vm0, %v6666_v49 }
 0x4a3   : > { %v8258_v11 = vpop.f32.mrf.mxu0 }
 0x4a4   : > { %v6669_v5 = vadd.f32 %v8258_v11, %v6396_v50  ;;  %6696 = vst.msk [vmem:[%s10918_s13 + $0x88] sm:$0xff] %vm480_vm0, %v6664_v1 }
 0x4a5   : > { %v6600_v13 = vpop.f32.mrf.mxu0 }
 0x4a6   : > { %v6667_v59 = vadd.f32 %v6600_v13, %v6394_v27  ;;  %6701 = vst.msk [vmem:[%s10918_s13 + $0xb0] sm:$0xff] %vm480_vm0, %v6669_v5 }
 0x4a7   : > { %v8259_v21 = vpop.f32.mrf.mxu0 }
 0x4a8   : > { %v6670_v44 = vadd.f32 %v8259_v21, %v6397_v17  ;;  %6699 = vst.msk [vmem:[%s10918_s13 + $0xa0] sm:$0xff] %vm480_vm0, %v6667_v59 }
 0x4a9   : > { %v6603_v18 = vpop.f32.mrf.mxu0 }
 0x4aa   : > { %v6668_v20 = vadd.f32 %v6603_v18, %v6395_v34  ;;  %6702 = vst.msk [vmem:[%s10918_s13 + $0xb8] sm:$0xff] %vm480_vm0, %v6670_v44 }
 0x4ab   : > { %v8262_v42 = vpop.f32.mrf.mxu0 }
 0x4ac   : > { %v6673_v53 = vadd.f32 %v8262_v42, %v6400_v40  ;;  %6700 = vst.msk [vmem:[%s10918_s13 + $0xa8] sm:$0xff] %vm480_vm0, %v6668_v20 }
 0x4ad   : > { %v6616_v43 = vpop.f32.mrf.mxu0 }
 0x4ae   : > { %v6671_v19 = vadd.f32 %v6616_v43, %v6398_v41  ;;  %6705 = vst.msk [vmem:[%s10918_s13 + $0xd0] sm:$0xff] %vm480_vm0, %v6673_v53 }
 0x4af   : > { %v8263_v36 = vpop.f32.mrf.mxu0 }
 0x4b0   : > { %v6674_v30 = vadd.f32 %v8263_v36, %v6401_v63  ;;  %6703 = vst.msk [vmem:[%s10918_s13 + $0xc0] sm:$0xff] %vm480_vm0, %v6671_v19 }
 0x4b1   : > { %v6619_v31 = vpop.f32.mrf.mxu0 }
 0x4b2   : > { %v6672_v9 = vadd.f32 %v6619_v31, %v6399_v0  ;;  %6706 = vst.msk [vmem:[%s10918_s13 + $0xd8] sm:$0xff] %vm480_vm0, %v6674_v30 }
 0x4b3   : > { %v8266_v47 = vpop.f32.mrf.mxu0 }
 0x4b4   : > { %v6677_v2 = vadd.f32 %v8266_v47, %v6404_v46  ;;  %6704 = vst.msk [vmem:[%s10918_s13 + $0xc8] sm:$0xff] %vm480_vm0, %v6672_v9 }
 0x4b5   : > { %v6632_v15 = vpop.f32.mrf.mxu0 }
 0x4b6   : > { %v6675_v29 = vadd.f32 %v6632_v15, %v6402_v37  ;;  %6709 = vst.msk [vmem:[%s10918_s13 + $0xf0] sm:$0xff] %vm480_vm0, %v6677_v2 }
 0x4b7   : > { %v8267_v39 = vpop.f32.mrf.mxu0 }
 0x4b8   : > { %v6678_v56 = vadd.f32 %v8267_v39, %v6405_v22  ;;  %6707 = vst.msk [vmem:[%s10918_s13 + $0xe0] sm:$0xff] %vm480_vm0, %v6675_v29 }
 0x4b9   : > { %v6635_v60 = vpop.f32.mrf.mxu0 }
 0x4ba   : > { %v6676_v8 = vadd.f32 %v6635_v60, %v6403_v45  ;;  %6710 = vst.msk [vmem:[%s10918_s13 + $0xf8] sm:$0xff] %vm480_vm0, %v6678_v56 }
 0x4bc   : > { %6708 = vst.msk [vmem:[%s10918_s13 + $0xe8] sm:$0xff] %vm480_vm0, %v6676_v8 }
 0x4bd PF: > { %s23_s21 = sadd.s32 1, %s8357_s21  }
 0x4be   : > { %p20_p4 = scmp.ge.s32.totalorder %s23_s21, 4  }
 0x4c0   :  { %22 = sbr.rel (!%p20_p4) target bundleno = 1 (0x1), region = 127 }

</bundles_post_ra>
